<compile_context>
chip_gen: v7x
topology: tpu7x:2x2x1
jax: 0.10.0
libtpu: 0.0.40
codegen_flags: <defaults>
</compile_context>

<pallas_src>
import functools

import jax
import jax.numpy as jnp
from jax.experimental import pallas as pl
from jax.experimental.pallas import tpu as pltpu


# Compatibility shim: newer JAX exposes pltpu.CompilerParams.
_CompilerParams = getattr(pltpu, "CompilerParams", None) or getattr(
    pltpu, "TPUCompilerParams", None)


def _mosaic_params(dimension_semantics):
    if _CompilerParams is None:
        return None
    return _CompilerParams(dimension_semantics=dimension_semantics)


def _round_up(a, m):
    return (a + m - 1) // m * m


def _largest_tile(dim, cap, quantum):
    """Largest multiple of `quantum` that divides `dim` and is <= cap."""
    best = quantum
    t = quantum
    while t <= min(cap, dim):
        if dim % t == 0:
            best = t
        t += quantum
    return best


def _tn_cap():
    # v5e's MXU is 4x128x128; 256-wide output tiles only pay off on v6e/v7x
    # (2x256x256 MXU).  Query is best-effort; default to 256.
    try:
        kind = jax.devices()[0].device_kind.lower()
    except Exception:
        return 256
    if "v5 lite" in kind or "v5e" in kind or "v5litepod" in kind:
        return 128
    return 256


def _pick_conv_tiles(kp, np_, hwp, out_itemsize):
    """Shape-aware tile collapse under a conservative VMEM budget."""
    tn = _largest_tile(np_, _tn_cap(), 128)
    budget = 10 * 1024 * 1024  # safe under v5e's ~16 MiB default scoped VMEM

    def vmem_bytes(tk):
        x_t = hwp * tk * 2 * 2            # bf16 LHS tile, double-buffered
        w_t = tk * tn * 2 * 2             # bf16 RHS tile, double-buffered
        b_t = tn * 4 * 2                  # f32 bias row
        acc = hwp * tn * 4                # f32 accumulator scratch
        o_t = hwp * tn * out_itemsize * 2 # output tile, double-buffered
        return x_t + w_t + b_t + acc + o_t

    tk = 0
    cand = 128
    while cand <= min(kp, 8192):
        if kp % cand == 0 and vmem_bytes(cand) <= budget:
            tk = cand
        cand += 128
    if tk == 0:
        # TODO(synk): M-tiled fallback for very large resolutions.
        tk = 128
    return tk, tn


# ----------------------------- Pallas kernel ------------------------------- #

def _conv_kernel(x_ref, w_ref, b_ref, o_ref, acc_ref, *, hw, norm, lrelu, eps):
    """Fused conv-as-matmul: bias folded into init, InstanceNorm+LeakyReLU in
    the finalize.  x: [1, HWp, tk] bf16; w: [tk, tn] bf16; b: [1, tn] f32;
    o: [1, HWp, tn]; acc: [HWp, tn] f32."""
    k = pl.program_id(2)

    @pl.when(k == 0)
    def _init():
        # Bias folded into the accumulator init (no epilogue add).
        acc_ref[...] = jnp.broadcast_to(b_ref[...], acc_ref.shape)

    acc_ref[...] += jnp.dot(x_ref[0], w_ref[...],
                            preferred_element_type=jnp.float32)

    @pl.when(k == pl.num_programs(2) - 1)
    def _finalize():
        out = acc_ref[...]
        if norm:
            hwp, tnb = out.shape
            inv_hw = 1.0 / hw
            if hw < hwp:
                rows = jax.lax.broadcasted_iota(jnp.int32, (hwp, tnb), 0)
                valid = rows < hw
                out_v = jnp.where(valid, out, 0.0)
            else:
                valid = None
                out_v = out
            mean = jnp.sum(out_v, axis=0, keepdims=True) * inv_hw
            xc = out - mean
            xc_v = jnp.where(valid, xc, 0.0) if valid is not None else xc
            var = jnp.sum(xc_v * xc_v, axis=0, keepdims=True) * inv_hw
            out = xc * jax.lax.rsqrt(var + eps)
        if lrelu:
            out = jnp.where(out >= 0.0, out, 0.2 * out)   # LeakyReLU(0.2)
        o_ref[0] = out.astype(o_ref.dtype)


def conv_matmul(patches, w_p, b_p, *, hw, norm, lrelu, out_dtype, eps=1e-5):
    """patches: [B, HWp, Kp] bf16; w_p: [Kp, Np] bf16; b_p: [1, Np] f32."""
    b_sz, hwp, kp = patches.shape
    _, np_ = w_p.shape
    tk, tn = _pick_conv_tiles(kp, np_, hwp, jnp.dtype(out_dtype).itemsize)

    grid = (b_sz, np_ // tn, kp // tk)
    return pl.pallas_call(
        functools.partial(_conv_kernel, hw=hw, norm=norm, lrelu=lrelu, eps=eps),
        out_shape=jax.ShapeDtypeStruct((b_sz, hwp, np_), out_dtype),
        grid_spec=pltpu.PrefetchScalarGridSpec(
            num_scalar_prefetch=0,
            grid=grid,
            in_specs=[
                pl.BlockSpec((1, hwp, tk), lambda b, j, k: (b, 0, k)),
                pl.BlockSpec((tk, tn), lambda b, j, k: (k, j)),
                pl.BlockSpec((1, tn), lambda b, j, k: (0, j)),
            ],
            out_specs=pl.BlockSpec((1, hwp, tn), lambda b, j, k: (b, 0, j)),
            scratch_shapes=[pltpu.VMEM((hwp, tn), jnp.float32)],
        ),
        compiler_params=_mosaic_params(("parallel", "parallel", "arbitrary")),
    )(patches, w_p, b_p)


# ------------------------------- Glue (JAX) -------------------------------- #

def im2col_nhwc(x, ksize, stride, pad_h, pad_w, k_pad_to):
    """x: [B, H, W, C] -> patches [B, HWp, Kp], feature order (kh, kw, c)."""
    xp = jnp.pad(x, ((0, 0), pad_h, pad_w, (0, 0)))
    b_sz, hp, wp, c = xp.shape
    ho = (hp - ksize) // stride + 1
    wo = (wp - ksize) // stride + 1
    cols = []
    for di in range(ksize):
        for dj in range(ksize):
            cols.append(
                xp[:, di:di + stride * ho:stride, dj:dj + stride * wo:stride, :])
    p = jnp.stack(cols, axis=3)                    # [B, Ho, Wo, k*k, C]
    p = p.reshape(b_sz, ho * wo, ksize * ksize * c)
    hw = ho * wo
    hwp = _round_up(hw, 16)                        # bf16 sublane packing
    kp = _round_up(ksize * ksize * c, 128)
    assert kp == k_pad_to, (kp, k_pad_to)
    p = jnp.pad(p, ((0, 0), (0, hwp - hw), (0, kp - ksize * ksize * c)))
    return p, ho, wo


def conv2d_block(x, w_p, b_p, m, out_dtype):
    patches, ho, wo = im2col_nhwc(
        x, m["ksize"], m["stride"], m["pad_h"], m["pad_w"], w_p.shape[0])
    out = conv_matmul(patches, w_p, b_p, hw=ho * wo, norm=m["norm"],
                      lrelu=m["lrelu"], out_dtype=out_dtype)
    b_sz = x.shape[0]
    return out[:, :ho * wo, :m["cout"]].reshape(b_sz, ho, wo, m["cout"])


def layer_meta(in_channels=3):
    blk = dict(ksize=4, stride=2, pad_h=(1, 1), pad_w=(1, 1), lrelu=True)
    return (
        dict(blk, cin=in_channels, cout=64, norm=False),
        dict(blk, cin=64, cout=128, norm=True),
        dict(blk, cin=128, cout=256, norm=True),
        dict(blk, cin=256, cout=512, norm=True),
        # ZeroPad2d((1,0,1,0)) + Conv2d(512,1,4,padding=1) == asym pad (2,1)/(2,1)
        dict(ksize=4, stride=1, pad_h=(2, 1), pad_w=(2, 1),
             cin=512, cout=1, norm=False, lrelu=False),
    )


def prepare_params(params, meta):
    """One-time weight prep (transpose/reshape/pad/bf16-cast), hoisted out of
    the per-forward path."""
    prepped = []
    for i, _m in enumerate(meta, start=1):
        w = params[f"w{i}"]                       # [Cout, Cin, k, k] (OIHW)
        b = params[f"b{i}"]
        co, ci, ks, _ = w.shape
        kdim = ks * ks * ci
        kp = _round_up(kdim, 128)
        np_ = _round_up(co, 128)
        # OIHW -> (kh, kw, Cin, Cout) -> [k*k*Cin, Cout]: matches patch order.
        w2 = jnp.transpose(w, (2, 3, 1, 0)).reshape(kdim, co).astype(jnp.float32)
        w2 = jnp.pad(w2, ((0, kp - kdim), (0, np_ - co))).astype(jnp.bfloat16)
        b2 = jnp.pad(b.astype(jnp.float32).reshape(1, co), ((0, 0), (0, np_ - co)))
        prepped.append((w2, b2))
    return tuple(prepped)


def discriminator_forward(img, weights, meta):
    # img: NCHW f32 (PyTorch convention). Single transpose + bf16 cast.
    x = jnp.transpose(img, (0, 2, 3, 1)).astype(jnp.bfloat16)
    n = len(meta)
    for li, (m, (w_p, b_p)) in enumerate(zip(meta, weights)):
        out_dtype = jnp.float32 if li == n - 1 else jnp.bfloat16
        x = conv2d_block(x, w_p, b_p, m, out_dtype)
    return jnp.transpose(x.astype(jnp.float32), (0, 3, 1, 2))   # back to NCHW


def init_params(key, in_channels=3):
    chans = [(in_channels, 64), (64, 128), (128, 256), (256, 512), (512, 1)]
    params = {}
    for i, (ci, co) in enumerate(chans, start=1):
        key, k1, k2 = jax.random.split(key, 3)
        scale = 1.0 / jnp.sqrt(ci * 16.0)
        params[f"w{i}"] = jax.random.uniform(
            k1, (co, ci, 4, 4), jnp.float32, -1.0, 1.0) * scale
        params[f"b{i}"] = jax.random.uniform(
            k2, (co,), jnp.float32, -1.0, 1.0) * scale
    return params


# ------------------------- Pure-JAX reference check ------------------------ #

def reference_forward(img, params, *, mxu_dtype=jnp.float32):
    # mxu_dtype=float32  -> exact PyTorch semantics (f32 convs).
    # mxu_dtype=bfloat16 -> matches the kernels' bf16-in / f32-accumulate MXU
    #                       and bf16 inter-layer activations.
    def conv(x, w, b, stride, pad):
        y = jax.lax.conv_general_dilated(
            x.astype(mxu_dtype), w.astype(mxu_dtype), (stride, stride), pad,
            dimension_numbers=("NCHW", "OIHW", "NCHW"),
            preferred_element_type=jnp.float32)
        return y + b.reshape(1, -1, 1, 1)

    def inorm_lrelu(x):
        mean = x.mean(axis=(2, 3), keepdims=True)
        var = ((x - mean) ** 2).mean(axis=(2, 3), keepdims=True)
        y = (x - mean) / jnp.sqrt(var + 1e-5)
        return jnp.where(y >= 0, y, 0.2 * y)

    x = conv(img, params["w1"], params["b1"], 2, ((1, 1), (1, 1)))
    x = jnp.where(x >= 0, x, 0.2 * x)
    for i in (2, 3, 4):
        x = conv(x, params[f"w{i}"], params[f"b{i}"], 2, ((1, 1), (1, 1)))
        x = inorm_lrelu(x)
    return conv(x, params["w5"], params["b5"], 1, ((2, 1), (2, 1)))


# ----------------------------------- Main ----------------------------------- #

if __name__ == "__main__":
    key = jax.random.PRNGKey(0)
    kp, kx = jax.random.split(key)
    params = init_params(kp, in_channels=3)
    img = jax.random.normal(kx, (2, 3, 32, 32), dtype=jnp.float32)   # NCHW

    meta = layer_meta(in_channels=3)
    weights = jax.block_until_ready(prepare_params(params, meta))    # one-time

    fwd = jax.jit(functools.partial(discriminator_forward, meta=meta))
    out = jax.block_until_ready(fwd(img, weights))
    assert out.shape == (2, 1, 2, 2), out.shape

    # Strict check against an XLA reference with the same bf16-MXU / f32-acc /
    # bf16 inter-layer activation semantics.
    ref_bf16 = jax.block_until_ready(
        reference_forward(img, params, mxu_dtype=jnp.bfloat16))
    assert jnp.allclose(out, ref_bf16, rtol=5e-3, atol=5e-3), (
        float(jnp.max(jnp.abs(out - ref_bf16))))

    # Looser sanity check against the pure-f32 (PyTorch-semantics) reference.
    ref_f32 = jax.block_until_ready(reference_forward(img, params))
    assert jnp.allclose(out, ref_f32, rtol=3e-2, atol=3e-2), (
        float(jnp.max(jnp.abs(out - ref_f32))))

    print("KERNEL_OK")
</pallas_src>

<mosaic_0001>
module attributes {stable_mosaic.version = 11 : i64} {
  func.func @_conv_kernel(%arg0: i32, %arg1: i32, %arg2: i32, %arg3: memref<1x256x128xbf16, #tpu.memory_space<vmem>>, %arg4: memref<128x128xbf16, #tpu.memory_space<vmem>>, %arg5: memref<1x128xf32, #tpu.memory_space<vmem>>, %arg6: memref<1x256x128xbf16, #tpu.memory_space<vmem>>, %arg7: memref<256x128xf32, #tpu.memory_space<vmem>>) attributes {dimension_semantics = [#tpu.dimension_semantics<parallel>, #tpu.dimension_semantics<parallel>, #tpu.dimension_semantics<arbitrary>], iteration_bounds = array<i64: 2, 1, 1>, scalar_prefetch = 0 : i64, scratch_operands = 1 : i64, tpu.core_type = #tpu.core_type<tc>, window_params = [{transform_indices = @transform_0, window_bounds = array<i64: 1, 256, 128>}, {transform_indices = @transform_1, window_bounds = array<i64: 128, 128>}, {transform_indices = @transform_2, window_bounds = array<i64: 1, 128>}, {transform_indices = @transform_3, window_bounds = array<i64: 1, 256, 128>}]} {
    %c0_i32 = arith.constant 0 : i32
    %0 = arith.cmpi eq, %arg2, %c0_i32 : i32
    %1 = arith.extui %0 : i1 to i32
    %c0_i32_0 = arith.constant 0 : i32
    %2 = arith.cmpi ne, %1, %c0_i32_0 : i32
    scf.if %2 {
      %c0_11 = arith.constant 0 : index
      %c0_12 = arith.constant 0 : index
      %13 = vector.load %arg5[%c0_11, %c0_12] : memref<1x128xf32, #tpu.memory_space<vmem>>, vector<1x128xf32>
      %14 = vector.shape_cast %13 : vector<1x128xf32> to vector<1x128xf32>
      %15 = vector.broadcast %14 : vector<1x128xf32> to vector<256x128xf32>
      %c0_13 = arith.constant 0 : index
      %c0_14 = arith.constant 0 : index
      %16 = vector.load %arg7[%c0_13, %c0_14] : memref<256x128xf32, #tpu.memory_space<vmem>>, vector<256x128xf32>
      tpu.vector_store %arg7[%c0_13, %c0_14], %15 {strides = array<i32>} : memref<256x128xf32, #tpu.memory_space<vmem>>, vector<256x128xf32>,
    } else {
    }
    %c0 = arith.constant 0 : index
    %c0_1 = arith.constant 0 : index
    %3 = vector.load %arg7[%c0, %c0_1] : memref<256x128xf32, #tpu.memory_space<vmem>>, vector<256x128xf32>
    %c0_2 = arith.constant 0 : index
    %c0_3 = arith.constant 0 : index
    %c0_4 = arith.constant 0 : index
    %4 = vector.load %arg3[%c0_2, %c0_3, %c0_4] : memref<1x256x128xbf16, #tpu.memory_space<vmem>>, vector<1x256x128xbf16>
    %5 = vector.shape_cast %4 : vector<1x256x128xbf16> to vector<256x128xbf16>
    %c0_5 = arith.constant 0 : index
    %c0_6 = arith.constant 0 : index
    %6 = vector.load %arg4[%c0_5, %c0_6] : memref<128x128xbf16, #tpu.memory_space<vmem>>, vector<128x128xbf16>
    %cst = arith.constant dense<0.000000e+00> : vector<256x128xf32>
    %7 = tpu.matmul %5, %6, %cst {dimension_numbers = #tpu.dot_dimension_numbers<[1], [0], [0], [1], [0, 0, 1, 1], [], []>} : vector<256x128xbf16>, vector<128x128xbf16>, vector<256x128xf32> -> vector<256x128xf32>
    %8 = arith.addf %3, %7 : vector<256x128xf32>
    %c0_7 = arith.constant 0 : index
    %c0_8 = arith.constant 0 : index
    %9 = vector.load %arg7[%c0_7, %c0_8] : memref<256x128xf32, #tpu.memory_space<vmem>>, vector<256x128xf32>
    tpu.vector_store %arg7[%c0_7, %c0_8], %8 {strides = array<i32>} : memref<256x128xf32, #tpu.memory_space<vmem>>, vector<256x128xf32>,
    %c0_i32_9 = arith.constant 0 : i32
    %10 = arith.cmpi eq, %arg2, %c0_i32_9 : i32
    %11 = arith.extui %10 : i1 to i32
    %c0_i32_10 = arith.constant 0 : i32
    %12 = arith.cmpi ne, %11, %c0_i32_10 : i32
    scf.if %12 {
      %c0_11 = arith.constant 0 : index
      %c0_12 = arith.constant 0 : index
      %13 = vector.load %arg7[%c0_11, %c0_12] : memref<256x128xf32, #tpu.memory_space<vmem>>, vector<256x128xf32>
      %cst_13 = arith.constant 0.000000e+00 : f32
      %14 = vector.broadcast %cst_13 : f32 to vector<256x128xf32>
      %15 = arith.cmpf oge, %13, %14 : vector<256x128xf32>
      %cst_14 = arith.constant 2.000000e-01 : f32
      %16 = vector.broadcast %cst_14 : f32 to vector<256x128xf32>
      %17 = arith.mulf %16, %13 : vector<256x128xf32>
      %18 = arith.select %15, %13, %17 : vector<256x128xi1>, vector<256x128xf32>
      %19 = arith.truncf %18 : vector<256x128xf32> to vector<256x128xbf16>
      %c0_15 = arith.constant 0 : index
      %c0_16 = arith.constant 0 : index
      %c0_17 = arith.constant 0 : index
      %20 = vector.load %arg6[%c0_15, %c0_16, %c0_17] : memref<1x256x128xbf16, #tpu.memory_space<vmem>>, vector<1x256x128xbf16>
      %21 = vector.shape_cast %20 : vector<1x256x128xbf16> to vector<256x128xbf16>
      %22 = vector.shape_cast %19 : vector<256x128xbf16> to vector<1x256x128xbf16>
      tpu.vector_store %arg6[%c0_15, %c0_16, %c0_17], %22 {strides = array<i32>} : memref<1x256x128xbf16, #tpu.memory_space<vmem>>, vector<1x256x128xbf16>,
    } else {
    }
    return
  }
  func.func @transform_0(%arg0: i32, %arg1: i32, %arg2: i32) -> (i32, i32, i32) {
    %c0_i32 = arith.constant 0 : i32
    %c0_i32_0 = arith.constant 0 : i32
    return %arg0, %c0_i32, %arg2 : i32, i32, i32
  }
  func.func @transform_1(%arg0: i32, %arg1: i32, %arg2: i32) -> (i32, i32) {
    %c0_i32 = arith.constant 0 : i32
    return %arg2, %arg1 : i32, i32
  }
  func.func @transform_2(%arg0: i32, %arg1: i32, %arg2: i32) -> (i32, i32) {
    %c0_i32 = arith.constant 0 : i32
    %c0_i32_0 = arith.constant 0 : i32
    return %c0_i32, %arg1 : i32, i32
  }
  func.func @transform_3(%arg0: i32, %arg1: i32, %arg2: i32) -> (i32, i32, i32) {
    %c0_i32 = arith.constant 0 : i32
    %c0_i32_0 = arith.constant 0 : i32
    return %arg0, %c0_i32, %arg1 : i32, i32, i32
  }
}

module attributes {stable_mosaic.version = 11 : i64} {
  func.func @_conv_kernel(%arg0: i32, %arg1: i32, %arg2: i32, %arg3: memref<1x64x1024xbf16, #tpu.memory_space<vmem>>, %arg4: memref<1024x128xbf16, #tpu.memory_space<vmem>>, %arg5: memref<1x128xf32, #tpu.memory_space<vmem>>, %arg6: memref<1x64x128xbf16, #tpu.memory_space<vmem>>, %arg7: memref<64x128xf32, #tpu.memory_space<vmem>>) attributes {dimension_semantics = [#tpu.dimension_semantics<parallel>, #tpu.dimension_semantics<parallel>, #tpu.dimension_semantics<arbitrary>], iteration_bounds = array<i64: 2, 1, 1>, scalar_prefetch = 0 : i64, scratch_operands = 1 : i64, tpu.core_type = #tpu.core_type<tc>, window_params = [{transform_indices = @transform_0, window_bounds = array<i64: 1, 64, 1024>}, {transform_indices = @transform_1, window_bounds = array<i64: 1024, 128>}, {transform_indices = @transform_2, window_bounds = array<i64: 1, 128>}, {transform_indices = @transform_3, window_bounds = array<i64: 1, 64, 128>}]} {
    %c0_i32 = arith.constant 0 : i32
    %0 = arith.cmpi eq, %arg2, %c0_i32 : i32
    %1 = arith.extui %0 : i1 to i32
    %c0_i32_0 = arith.constant 0 : i32
    %2 = arith.cmpi ne, %1, %c0_i32_0 : i32
    scf.if %2 {
      %c0_11 = arith.constant 0 : index
      %c0_12 = arith.constant 0 : index
      %13 = vector.load %arg5[%c0_11, %c0_12] : memref<1x128xf32, #tpu.memory_space<vmem>>, vector<1x128xf32>
      %14 = vector.shape_cast %13 : vector<1x128xf32> to vector<1x128xf32>
      %15 = vector.broadcast %14 : vector<1x128xf32> to vector<64x128xf32>
      %c0_13 = arith.constant 0 : index
      %c0_14 = arith.constant 0 : index
      %16 = vector.load %arg7[%c0_13, %c0_14] : memref<64x128xf32, #tpu.memory_space<vmem>>, vector<64x128xf32>
      tpu.vector_store %arg7[%c0_13, %c0_14], %15 {strides = array<i32>} : memref<64x128xf32, #tpu.memory_space<vmem>>, vector<64x128xf32>,
    } else {
    }
    %c0 = arith.constant 0 : index
    %c0_1 = arith.constant 0 : index
    %3 = vector.load %arg7[%c0, %c0_1] : memref<64x128xf32, #tpu.memory_space<vmem>>, vector<64x128xf32>
    %c0_2 = arith.constant 0 : index
    %c0_3 = arith.constant 0 : index
    %c0_4 = arith.constant 0 : index
    %4 = vector.load %arg3[%c0_2, %c0_3, %c0_4] : memref<1x64x1024xbf16, #tpu.memory_space<vmem>>, vector<1x64x1024xbf16>
    %5 = vector.shape_cast %4 : vector<1x64x1024xbf16> to vector<64x1024xbf16>
    %c0_5 = arith.constant 0 : index
    %c0_6 = arith.constant 0 : index
    %6 = vector.load %arg4[%c0_5, %c0_6] : memref<1024x128xbf16, #tpu.memory_space<vmem>>, vector<1024x128xbf16>
    %cst = arith.constant dense<0.000000e+00> : vector<64x128xf32>
    %7 = tpu.matmul %5, %6, %cst {dimension_numbers = #tpu.dot_dimension_numbers<[1], [0], [0], [1], [0, 0, 1, 1], [], []>} : vector<64x1024xbf16>, vector<1024x128xbf16>, vector<64x128xf32> -> vector<64x128xf32>
    %8 = arith.addf %3, %7 : vector<64x128xf32>
    %c0_7 = arith.constant 0 : index
    %c0_8 = arith.constant 0 : index
    %9 = vector.load %arg7[%c0_7, %c0_8] : memref<64x128xf32, #tpu.memory_space<vmem>>, vector<64x128xf32>
    tpu.vector_store %arg7[%c0_7, %c0_8], %8 {strides = array<i32>} : memref<64x128xf32, #tpu.memory_space<vmem>>, vector<64x128xf32>,
    %c0_i32_9 = arith.constant 0 : i32
    %10 = arith.cmpi eq, %arg2, %c0_i32_9 : i32
    %11 = arith.extui %10 : i1 to i32
    %c0_i32_10 = arith.constant 0 : i32
    %12 = arith.cmpi ne, %11, %c0_i32_10 : i32
    scf.if %12 {
      %c0_11 = arith.constant 0 : index
      %c0_12 = arith.constant 0 : index
      %13 = vector.load %arg7[%c0_11, %c0_12] : memref<64x128xf32, #tpu.memory_space<vmem>>, vector<64x128xf32>
      %cst_13 = arith.constant dense<0.000000e+00> : vector<128xf32>
      %14 = vector.multi_reduction <add>, %13, %cst_13 [0] : vector<64x128xf32> to vector<128xf32>
      %15 = vector.shape_cast %14 : vector<128xf32> to vector<1x128xf32>
      %cst_14 = arith.constant 1.562500e-02 : f32
      %16 = vector.broadcast %cst_14 : f32 to vector<1x128xf32>
      %17 = arith.mulf %15, %16 : vector<1x128xf32>
      %18 = vector.broadcast %17 : vector<1x128xf32> to vector<64x128xf32>
      %19 = arith.subf %13, %18 : vector<64x128xf32>
      %20 = arith.mulf %19, %19 : vector<64x128xf32>
      %cst_15 = arith.constant dense<0.000000e+00> : vector<128xf32>
      %21 = vector.multi_reduction <add>, %20, %cst_15 [0] : vector<64x128xf32> to vector<128xf32>
      %22 = vector.shape_cast %21 : vector<128xf32> to vector<1x128xf32>
      %cst_16 = arith.constant 1.562500e-02 : f32
      %23 = vector.broadcast %cst_16 : f32 to vector<1x128xf32>
      %24 = arith.mulf %22, %23 : vector<1x128xf32>
      %cst_17 = arith.constant 9.99999974E-6 : f32
      %25 = vector.broadcast %cst_17 : f32 to vector<1x128xf32>
      %26 = arith.addf %24, %25 : vector<1x128xf32>
      %27 = math.rsqrt %26 : vector<1x128xf32>
      %28 = vector.broadcast %27 : vector<1x128xf32> to vector<64x128xf32>
      %29 = arith.mulf %19, %28 : vector<64x128xf32>
      %cst_18 = arith.constant 0.000000e+00 : f32
      %30 = vector.broadcast %cst_18 : f32 to vector<64x128xf32>
      %31 = arith.cmpf oge, %29, %30 : vector<64x128xf32>
      %cst_19 = arith.constant 2.000000e-01 : f32
      %32 = vector.broadcast %cst_19 : f32 to vector<64x128xf32>
      %33 = arith.mulf %32, %29 : vector<64x128xf32>
      %34 = arith.select %31, %29, %33 : vector<64x128xi1>, vector<64x128xf32>
      %35 = arith.truncf %34 : vector<64x128xf32> to vector<64x128xbf16>
      %c0_20 = arith.constant 0 : index
      %c0_21 = arith.constant 0 : index
      %c0_22 = arith.constant 0 : index
      %36 = vector.load %arg6[%c0_20, %c0_21, %c0_22] : memref<1x64x128xbf16, #tpu.memory_space<vmem>>, vector<1x64x128xbf16>
      %37 = vector.shape_cast %36 : vector<1x64x128xbf16> to vector<64x128xbf16>
      %38 = vector.shape_cast %35 : vector<64x128xbf16> to vector<1x64x128xbf16>
      tpu.vector_store %arg6[%c0_20, %c0_21, %c0_22], %38 {strides = array<i32>} : memref<1x64x128xbf16, #tpu.memory_space<vmem>>, vector<1x64x128xbf16>,
    } else {
    }
    return
  }
  func.func @transform_0(%arg0: i32, %arg1: i32, %arg2: i32) -> (i32, i32, i32) {
    %c0_i32 = arith.constant 0 : i32
    %c0_i32_0 = arith.constant 0 : i32
    return %arg0, %c0_i32, %arg2 : i32, i32, i32
  }
  func.func @transform_1(%arg0: i32, %arg1: i32, %arg2: i32) -> (i32, i32) {
    %c0_i32 = arith.constant 0 : i32
    return %arg2, %arg1 : i32, i32
  }
  func.func @transform_2(%arg0: i32, %arg1: i32, %arg2: i32) -> (i32, i32) {
    %c0_i32 = arith.constant 0 : i32
    %c0_i32_0 = arith.constant 0 : i32
    return %c0_i32, %arg1 : i32, i32
  }
  func.func @transform_3(%arg0: i32, %arg1: i32, %arg2: i32) -> (i32, i32, i32) {
    %c0_i32 = arith.constant 0 : i32
    %c0_i32_0 = arith.constant 0 : i32
    return %arg0, %c0_i32, %arg1 : i32, i32, i32
  }
}

module attributes {stable_mosaic.version = 11 : i64} {
  func.func @_conv_kernel(%arg0: i32, %arg1: i32, %arg2: i32, %arg3: memref<1x16x2048xbf16, #tpu.memory_space<vmem>>, %arg4: memref<2048x256xbf16, #tpu.memory_space<vmem>>, %arg5: memref<1x256xf32, #tpu.memory_space<vmem>>, %arg6: memref<1x16x256xbf16, #tpu.memory_space<vmem>>, %arg7: memref<16x256xf32, #tpu.memory_space<vmem>>) attributes {dimension_semantics = [#tpu.dimension_semantics<parallel>, #tpu.dimension_semantics<parallel>, #tpu.dimension_semantics<arbitrary>], iteration_bounds = array<i64: 2, 1, 1>, scalar_prefetch = 0 : i64, scratch_operands = 1 : i64, tpu.core_type = #tpu.core_type<tc>, window_params = [{transform_indices = @transform_0, window_bounds = array<i64: 1, 16, 2048>}, {transform_indices = @transform_1, window_bounds = array<i64: 2048, 256>}, {transform_indices = @transform_2, window_bounds = array<i64: 1, 256>}, {transform_indices = @transform_3, window_bounds = array<i64: 1, 16, 256>}]} {
    %c0_i32 = arith.constant 0 : i32
    %0 = arith.cmpi eq, %arg2, %c0_i32 : i32
    %1 = arith.extui %0 : i1 to i32
    %c0_i32_0 = arith.constant 0 : i32
    %2 = arith.cmpi ne, %1, %c0_i32_0 : i32
    scf.if %2 {
      %c0_11 = arith.constant 0 : index
      %c0_12 = arith.constant 0 : index
      %13 = vector.load %arg5[%c0_11, %c0_12] : memref<1x256xf32, #tpu.memory_space<vmem>>, vector<1x256xf32>
      %14 = vector.shape_cast %13 : vector<1x256xf32> to vector<1x256xf32>
      %15 = vector.broadcast %14 : vector<1x256xf32> to vector<16x256xf32>
      %c0_13 = arith.constant 0 : index
      %c0_14 = arith.constant 0 : index
      %16 = vector.load %arg7[%c0_13, %c0_14] : memref<16x256xf32, #tpu.memory_space<vmem>>, vector<16x256xf32>
      tpu.vector_store %arg7[%c0_13, %c0_14], %15 {strides = array<i32>} : memref<16x256xf32, #tpu.memory_space<vmem>>, vector<16x256xf32>,
    } else {
    }
    %c0 = arith.constant 0 : index
    %c0_1 = arith.constant 0 : index
    %3 = vector.load %arg7[%c0, %c0_1] : memref<16x256xf32, #tpu.memory_space<vmem>>, vector<16x256xf32>
    %c0_2 = arith.constant 0 : index
    %c0_3 = arith.constant 0 : index
    %c0_4 = arith.constant 0 : index
    %4 = vector.load %arg3[%c0_2, %c0_3, %c0_4] : memref<1x16x2048xbf16, #tpu.memory_space<vmem>>, vector<1x16x2048xbf16>
    %5 = vector.shape_cast %4 : vector<1x16x2048xbf16> to vector<16x2048xbf16>
    %c0_5 = arith.constant 0 : index
    %c0_6 = arith.constant 0 : index
    %6 = vector.load %arg4[%c0_5, %c0_6] : memref<2048x256xbf16, #tpu.memory_space<vmem>>, vector<2048x256xbf16>
    %cst = arith.constant dense<0.000000e+00> : vector<16x256xf32>
    %7 = tpu.matmul %5, %6, %cst {dimension_numbers = #tpu.dot_dimension_numbers<[1], [0], [0], [1], [0, 0, 1, 1], [], []>} : vector<16x2048xbf16>, vector<2048x256xbf16>, vector<16x256xf32> -> vector<16x256xf32>
    %8 = arith.addf %3, %7 : vector<16x256xf32>
    %c0_7 = arith.constant 0 : index
    %c0_8 = arith.constant 0 : index
    %9 = vector.load %arg7[%c0_7, %c0_8] : memref<16x256xf32, #tpu.memory_space<vmem>>, vector<16x256xf32>
    tpu.vector_store %arg7[%c0_7, %c0_8], %8 {strides = array<i32>} : memref<16x256xf32, #tpu.memory_space<vmem>>, vector<16x256xf32>,
    %c0_i32_9 = arith.constant 0 : i32
    %10 = arith.cmpi eq, %arg2, %c0_i32_9 : i32
    %11 = arith.extui %10 : i1 to i32
    %c0_i32_10 = arith.constant 0 : i32
    %12 = arith.cmpi ne, %11, %c0_i32_10 : i32
    scf.if %12 {
      %c0_11 = arith.constant 0 : index
      %c0_12 = arith.constant 0 : index
      %13 = vector.load %arg7[%c0_11, %c0_12] : memref<16x256xf32, #tpu.memory_space<vmem>>, vector<16x256xf32>
      %cst_13 = arith.constant dense<0.000000e+00> : vector<256xf32>
      %14 = vector.multi_reduction <add>, %13, %cst_13 [0] : vector<16x256xf32> to vector<256xf32>
      %15 = vector.shape_cast %14 : vector<256xf32> to vector<1x256xf32>
      %cst_14 = arith.constant 6.250000e-02 : f32
      %16 = vector.broadcast %cst_14 : f32 to vector<1x256xf32>
      %17 = arith.mulf %15, %16 : vector<1x256xf32>
      %18 = vector.broadcast %17 : vector<1x256xf32> to vector<16x256xf32>
      %19 = arith.subf %13, %18 : vector<16x256xf32>
      %20 = arith.mulf %19, %19 : vector<16x256xf32>
      %cst_15 = arith.constant dense<0.000000e+00> : vector<256xf32>
      %21 = vector.multi_reduction <add>, %20, %cst_15 [0] : vector<16x256xf32> to vector<256xf32>
      %22 = vector.shape_cast %21 : vector<256xf32> to vector<1x256xf32>
      %cst_16 = arith.constant 6.250000e-02 : f32
      %23 = vector.broadcast %cst_16 : f32 to vector<1x256xf32>
      %24 = arith.mulf %22, %23 : vector<1x256xf32>
      %cst_17 = arith.constant 9.99999974E-6 : f32
      %25 = vector.broadcast %cst_17 : f32 to vector<1x256xf32>
      %26 = arith.addf %24, %25 : vector<1x256xf32>
      %27 = math.rsqrt %26 : vector<1x256xf32>
      %28 = vector.broadcast %27 : vector<1x256xf32> to vector<16x256xf32>
      %29 = arith.mulf %19, %28 : vector<16x256xf32>
      %cst_18 = arith.constant 0.000000e+00 : f32
      %30 = vector.broadcast %cst_18 : f32 to vector<16x256xf32>
      %31 = arith.cmpf oge, %29, %30 : vector<16x256xf32>
      %cst_19 = arith.constant 2.000000e-01 : f32
      %32 = vector.broadcast %cst_19 : f32 to vector<16x256xf32>
      %33 = arith.mulf %32, %29 : vector<16x256xf32>
      %34 = arith.select %31, %29, %33 : vector<16x256xi1>, vector<16x256xf32>
      %35 = arith.truncf %34 : vector<16x256xf32> to vector<16x256xbf16>
      %c0_20 = arith.constant 0 : index
      %c0_21 = arith.constant 0 : index
      %c0_22 = arith.constant 0 : index
      %36 = vector.load %arg6[%c0_20, %c0_21, %c0_22] : memref<1x16x256xbf16, #tpu.memory_space<vmem>>, vector<1x16x256xbf16>
      %37 = vector.shape_cast %36 : vector<1x16x256xbf16> to vector<16x256xbf16>
      %38 = vector.shape_cast %35 : vector<16x256xbf16> to vector<1x16x256xbf16>
      tpu.vector_store %arg6[%c0_20, %c0_21, %c0_22], %38 {strides = array<i32>} : memref<1x16x256xbf16, #tpu.memory_space<vmem>>, vector<1x16x256xbf16>,
    } else {
    }
    return
  }
  func.func @transform_0(%arg0: i32, %arg1: i32, %arg2: i32) -> (i32, i32, i32) {
    %c0_i32 = arith.constant 0 : i32
    %c0_i32_0 = arith.constant 0 : i32
    return %arg0, %c0_i32, %arg2 : i32, i32, i32
  }
  func.func @transform_1(%arg0: i32, %arg1: i32, %arg2: i32) -> (i32, i32) {
    %c0_i32 = arith.constant 0 : i32
    return %arg2, %arg1 : i32, i32
  }
  func.func @transform_2(%arg0: i32, %arg1: i32, %arg2: i32) -> (i32, i32) {
    %c0_i32 = arith.constant 0 : i32
    %c0_i32_0 = arith.constant 0 : i32
    return %c0_i32, %arg1 : i32, i32
  }
  func.func @transform_3(%arg0: i32, %arg1: i32, %arg2: i32) -> (i32, i32, i32) {
    %c0_i32 = arith.constant 0 : i32
    %c0_i32_0 = arith.constant 0 : i32
    return %arg0, %c0_i32, %arg1 : i32, i32, i32
  }
}

module attributes {stable_mosaic.version = 11 : i64} {
  func.func @_conv_kernel(%arg0: i32, %arg1: i32, %arg2: i32, %arg3: memref<1x16x4096xbf16, #tpu.memory_space<vmem>>, %arg4: memref<4096x256xbf16, #tpu.memory_space<vmem>>, %arg5: memref<1x256xf32, #tpu.memory_space<vmem>>, %arg6: memref<1x16x256xbf16, #tpu.memory_space<vmem>>, %arg7: memref<16x256xf32, #tpu.memory_space<vmem>>) attributes {dimension_semantics = [#tpu.dimension_semantics<parallel>, #tpu.dimension_semantics<parallel>, #tpu.dimension_semantics<arbitrary>], iteration_bounds = array<i64: 2, 2, 1>, scalar_prefetch = 0 : i64, scratch_operands = 1 : i64, tpu.core_type = #tpu.core_type<tc>, window_params = [{transform_indices = @transform_0, window_bounds = array<i64: 1, 16, 4096>}, {transform_indices = @transform_1, window_bounds = array<i64: 4096, 256>}, {transform_indices = @transform_2, window_bounds = array<i64: 1, 256>}, {transform_indices = @transform_3, window_bounds = array<i64: 1, 16, 256>}]} {
    %c0_i32 = arith.constant 0 : i32
    %0 = arith.cmpi eq, %arg2, %c0_i32 : i32
    %1 = arith.extui %0 : i1 to i32
    %c0_i32_0 = arith.constant 0 : i32
    %2 = arith.cmpi ne, %1, %c0_i32_0 : i32
    scf.if %2 {
      %c0_11 = arith.constant 0 : index
      %c0_12 = arith.constant 0 : index
      %13 = vector.load %arg5[%c0_11, %c0_12] : memref<1x256xf32, #tpu.memory_space<vmem>>, vector<1x256xf32>
      %14 = vector.shape_cast %13 : vector<1x256xf32> to vector<1x256xf32>
      %15 = vector.broadcast %14 : vector<1x256xf32> to vector<16x256xf32>
      %c0_13 = arith.constant 0 : index
      %c0_14 = arith.constant 0 : index
      %16 = vector.load %arg7[%c0_13, %c0_14] : memref<16x256xf32, #tpu.memory_space<vmem>>, vector<16x256xf32>
      tpu.vector_store %arg7[%c0_13, %c0_14], %15 {strides = array<i32>} : memref<16x256xf32, #tpu.memory_space<vmem>>, vector<16x256xf32>,
    } else {
    }
    %c0 = arith.constant 0 : index
    %c0_1 = arith.constant 0 : index
    %3 = vector.load %arg7[%c0, %c0_1] : memref<16x256xf32, #tpu.memory_space<vmem>>, vector<16x256xf32>
    %c0_2 = arith.constant 0 : index
    %c0_3 = arith.constant 0 : index
    %c0_4 = arith.constant 0 : index
    %4 = vector.load %arg3[%c0_2, %c0_3, %c0_4] : memref<1x16x4096xbf16, #tpu.memory_space<vmem>>, vector<1x16x4096xbf16>
    %5 = vector.shape_cast %4 : vector<1x16x4096xbf16> to vector<16x4096xbf16>
    %c0_5 = arith.constant 0 : index
    %c0_6 = arith.constant 0 : index
    %6 = vector.load %arg4[%c0_5, %c0_6] : memref<4096x256xbf16, #tpu.memory_space<vmem>>, vector<4096x256xbf16>
    %cst = arith.constant dense<0.000000e+00> : vector<16x256xf32>
    %7 = tpu.matmul %5, %6, %cst {dimension_numbers = #tpu.dot_dimension_numbers<[1], [0], [0], [1], [0, 0, 1, 1], [], []>} : vector<16x4096xbf16>, vector<4096x256xbf16>, vector<16x256xf32> -> vector<16x256xf32>
    %8 = arith.addf %3, %7 : vector<16x256xf32>
    %c0_7 = arith.constant 0 : index
    %c0_8 = arith.constant 0 : index
    %9 = vector.load %arg7[%c0_7, %c0_8] : memref<16x256xf32, #tpu.memory_space<vmem>>, vector<16x256xf32>
    tpu.vector_store %arg7[%c0_7, %c0_8], %8 {strides = array<i32>} : memref<16x256xf32, #tpu.memory_space<vmem>>, vector<16x256xf32>,
    %c0_i32_9 = arith.constant 0 : i32
    %10 = arith.cmpi eq, %arg2, %c0_i32_9 : i32
    %11 = arith.extui %10 : i1 to i32
    %c0_i32_10 = arith.constant 0 : i32
    %12 = arith.cmpi ne, %11, %c0_i32_10 : i32
    scf.if %12 {
      %c0_11 = arith.constant 0 : index
      %c0_12 = arith.constant 0 : index
      %13 = vector.load %arg7[%c0_11, %c0_12] : memref<16x256xf32, #tpu.memory_space<vmem>>, vector<16x256xf32>
      %14 = tpu.iota {dimensions = array<i32: 0>} : vector<16x256xi32>
      %c4_i32 = arith.constant 4 : i32
      %15 = vector.broadcast %c4_i32 : i32 to vector<16x256xi32>
      %16 = arith.cmpi slt, %14, %15 : vector<16x256xi32>
      %cst_13 = arith.constant 0.000000e+00 : f32
      %17 = vector.broadcast %cst_13 : f32 to vector<16x256xf32>
      %18 = arith.select %16, %13, %17 : vector<16x256xi1>, vector<16x256xf32>
      %cst_14 = arith.constant dense<0.000000e+00> : vector<256xf32>
      %19 = vector.multi_reduction <add>, %18, %cst_14 [0] : vector<16x256xf32> to vector<256xf32>
      %20 = vector.shape_cast %19 : vector<256xf32> to vector<1x256xf32>
      %cst_15 = arith.constant 2.500000e-01 : f32
      %21 = vector.broadcast %cst_15 : f32 to vector<1x256xf32>
      %22 = arith.mulf %20, %21 : vector<1x256xf32>
      %23 = vector.broadcast %22 : vector<1x256xf32> to vector<16x256xf32>
      %24 = arith.subf %13, %23 : vector<16x256xf32>
      %cst_16 = arith.constant 0.000000e+00 : f32
      %25 = vector.broadcast %cst_16 : f32 to vector<16x256xf32>
      %26 = arith.select %16, %24, %25 : vector<16x256xi1>, vector<16x256xf32>
      %27 = arith.mulf %26, %26 : vector<16x256xf32>
      %cst_17 = arith.constant dense<0.000000e+00> : vector<256xf32>
      %28 = vector.multi_reduction <add>, %27, %cst_17 [0] : vector<16x256xf32> to vector<256xf32>
      %29 = vector.shape_cast %28 : vector<256xf32> to vector<1x256xf32>
      %cst_18 = arith.constant 2.500000e-01 : f32
      %30 = vector.broadcast %cst_18 : f32 to vector<1x256xf32>
      %31 = arith.mulf %29, %30 : vector<1x256xf32>
      %cst_19 = arith.constant 9.99999974E-6 : f32
      %32 = vector.broadcast %cst_19 : f32 to vector<1x256xf32>
      %33 = arith.addf %31, %32 : vector<1x256xf32>
      %34 = math.rsqrt %33 : vector<1x256xf32>
      %35 = vector.broadcast %34 : vector<1x256xf32> to vector<16x256xf32>
      %36 = arith.mulf %24, %35 : vector<16x256xf32>
      %cst_20 = arith.constant 0.000000e+00 : f32
      %37 = vector.broadcast %cst_20 : f32 to vector<16x256xf32>
      %38 = arith.cmpf oge, %36, %37 : vector<16x256xf32>
      %cst_21 = arith.constant 2.000000e-01 : f32
      %39 = vector.broadcast %cst_21 : f32 to vector<16x256xf32>
      %40 = arith.mulf %39, %36 : vector<16x256xf32>
      %41 = arith.select %38, %36, %40 : vector<16x256xi1>, vector<16x256xf32>
      %42 = arith.truncf %41 : vector<16x256xf32> to vector<16x256xbf16>
      %c0_22 = arith.constant 0 : index
      %c0_23 = arith.constant 0 : index
      %c0_24 = arith.constant 0 : index
      %43 = vector.load %arg6[%c0_22, %c0_23, %c0_24] : memref<1x16x256xbf16, #tpu.memory_space<vmem>>, vector<1x16x256xbf16>
      %44 = vector.shape_cast %43 : vector<1x16x256xbf16> to vector<16x256xbf16>
      %45 = vector.shape_cast %42 : vector<16x256xbf16> to vector<1x16x256xbf16>
      tpu.vector_store %arg6[%c0_22, %c0_23, %c0_24], %45 {strides = array<i32>} : memref<1x16x256xbf16, #tpu.memory_space<vmem>>, vector<1x16x256xbf16>,
    } else {
    }
    return
  }
  func.func @transform_0(%arg0: i32, %arg1: i32, %arg2: i32) -> (i32, i32, i32) {
    %c0_i32 = arith.constant 0 : i32
    %c0_i32_0 = arith.constant 0 : i32
    return %arg0, %c0_i32, %arg2 : i32, i32, i32
  }
  func.func @transform_1(%arg0: i32, %arg1: i32, %arg2: i32) -> (i32, i32) {
    %c0_i32 = arith.constant 0 : i32
    return %arg2, %arg1 : i32, i32
  }
  func.func @transform_2(%arg0: i32, %arg1: i32, %arg2: i32) -> (i32, i32) {
    %c0_i32 = arith.constant 0 : i32
    %c0_i32_0 = arith.constant 0 : i32
    return %c0_i32, %arg1 : i32, i32
  }
  func.func @transform_3(%arg0: i32, %arg1: i32, %arg2: i32) -> (i32, i32, i32) {
    %c0_i32 = arith.constant 0 : i32
    %c0_i32_0 = arith.constant 0 : i32
    return %arg0, %c0_i32, %arg1 : i32, i32, i32
  }
}

module attributes {stable_mosaic.version = 11 : i64} {
  func.func @_conv_kernel(%arg0: i32, %arg1: i32, %arg2: i32, %arg3: memref<1x16x8192xbf16, #tpu.memory_space<vmem>>, %arg4: memref<8192x128xbf16, #tpu.memory_space<vmem>>, %arg5: memref<1x128xf32, #tpu.memory_space<vmem>>, %arg6: memref<1x16x128xf32, #tpu.memory_space<vmem>>, %arg7: memref<16x128xf32, #tpu.memory_space<vmem>>) attributes {dimension_semantics = [#tpu.dimension_semantics<parallel>, #tpu.dimension_semantics<parallel>, #tpu.dimension_semantics<arbitrary>], iteration_bounds = array<i64: 2, 1, 1>, scalar_prefetch = 0 : i64, scratch_operands = 1 : i64, tpu.core_type = #tpu.core_type<tc>, window_params = [{transform_indices = @transform_0, window_bounds = array<i64: 1, 16, 8192>}, {transform_indices = @transform_1, window_bounds = array<i64: 8192, 128>}, {transform_indices = @transform_2, window_bounds = array<i64: 1, 128>}, {transform_indices = @transform_3, window_bounds = array<i64: 1, 16, 128>}]} {
    %c0_i32 = arith.constant 0 : i32
    %0 = arith.cmpi eq, %arg2, %c0_i32 : i32
    %1 = arith.extui %0 : i1 to i32
    %c0_i32_0 = arith.constant 0 : i32
    %2 = arith.cmpi ne, %1, %c0_i32_0 : i32
    scf.if %2 {
      %c0_11 = arith.constant 0 : index
      %c0_12 = arith.constant 0 : index
      %13 = vector.load %arg5[%c0_11, %c0_12] : memref<1x128xf32, #tpu.memory_space<vmem>>, vector<1x128xf32>
      %14 = vector.shape_cast %13 : vector<1x128xf32> to vector<1x128xf32>
      %15 = vector.broadcast %14 : vector<1x128xf32> to vector<16x128xf32>
      %c0_13 = arith.constant 0 : index
      %c0_14 = arith.constant 0 : index
      %16 = vector.load %arg7[%c0_13, %c0_14] : memref<16x128xf32, #tpu.memory_space<vmem>>, vector<16x128xf32>
      tpu.vector_store %arg7[%c0_13, %c0_14], %15 {strides = array<i32>} : memref<16x128xf32, #tpu.memory_space<vmem>>, vector<16x128xf32>,
    } else {
    }
    %c0 = arith.constant 0 : index
    %c0_1 = arith.constant 0 : index
    %3 = vector.load %arg7[%c0, %c0_1] : memref<16x128xf32, #tpu.memory_space<vmem>>, vector<16x128xf32>
    %c0_2 = arith.constant 0 : index
    %c0_3 = arith.constant 0 : index
    %c0_4 = arith.constant 0 : index
    %4 = vector.load %arg3[%c0_2, %c0_3, %c0_4] : memref<1x16x8192xbf16, #tpu.memory_space<vmem>>, vector<1x16x8192xbf16>
    %5 = vector.shape_cast %4 : vector<1x16x8192xbf16> to vector<16x8192xbf16>
    %c0_5 = arith.constant 0 : index
    %c0_6 = arith.constant 0 : index
    %6 = vector.load %arg4[%c0_5, %c0_6] : memref<8192x128xbf16, #tpu.memory_space<vmem>>, vector<8192x128xbf16>
    %cst = arith.constant dense<0.000000e+00> : vector<16x128xf32>
    %7 = tpu.matmul %5, %6, %cst {dimension_numbers = #tpu.dot_dimension_numbers<[1], [0], [0], [1], [0, 0, 1, 1], [], []>} : vector<16x8192xbf16>, vector<8192x128xbf16>, vector<16x128xf32> -> vector<16x128xf32>
    %8 = arith.addf %3, %7 : vector<16x128xf32>
    %c0_7 = arith.constant 0 : index
    %c0_8 = arith.constant 0 : index
    %9 = vector.load %arg7[%c0_7, %c0_8] : memref<16x128xf32, #tpu.memory_space<vmem>>, vector<16x128xf32>
    tpu.vector_store %arg7[%c0_7, %c0_8], %8 {strides = array<i32>} : memref<16x128xf32, #tpu.memory_space<vmem>>, vector<16x128xf32>,
    %c0_i32_9 = arith.constant 0 : i32
    %10 = arith.cmpi eq, %arg2, %c0_i32_9 : i32
    %11 = arith.extui %10 : i1 to i32
    %c0_i32_10 = arith.constant 0 : i32
    %12 = arith.cmpi ne, %11, %c0_i32_10 : i32
    scf.if %12 {
      %c0_11 = arith.constant 0 : index
      %c0_12 = arith.constant 0 : index
      %13 = vector.load %arg7[%c0_11, %c0_12] : memref<16x128xf32, #tpu.memory_space<vmem>>, vector<16x128xf32>
      %c0_13 = arith.constant 0 : index
      %c0_14 = arith.constant 0 : index
      %c0_15 = arith.constant 0 : index
      %14 = vector.load %arg6[%c0_13, %c0_14, %c0_15] : memref<1x16x128xf32, #tpu.memory_space<vmem>>, vector<1x16x128xf32>
      %15 = vector.shape_cast %14 : vector<1x16x128xf32> to vector<16x128xf32>
      %16 = vector.shape_cast %13 : vector<16x128xf32> to vector<1x16x128xf32>
      tpu.vector_store %arg6[%c0_13, %c0_14, %c0_15], %16 {strides = array<i32>} : memref<1x16x128xf32, #tpu.memory_space<vmem>>, vector<1x16x128xf32>,
    } else {
    }
    return
  }
  func.func @transform_0(%arg0: i32, %arg1: i32, %arg2: i32) -> (i32, i32, i32) {
    %c0_i32 = arith.constant 0 : i32
    %c0_i32_0 = arith.constant 0 : i32
    return %arg0, %c0_i32, %arg2 : i32, i32, i32
  }
  func.func @transform_1(%arg0: i32, %arg1: i32, %arg2: i32) -> (i32, i32) {
    %c0_i32 = arith.constant 0 : i32
    return %arg2, %arg1 : i32, i32
  }
  func.func @transform_2(%arg0: i32, %arg1: i32, %arg2: i32) -> (i32, i32) {
    %c0_i32 = arith.constant 0 : i32
    %c0_i32_0 = arith.constant 0 : i32
    return %c0_i32, %arg1 : i32, i32
  }
  func.func @transform_3(%arg0: i32, %arg1: i32, %arg2: i32) -> (i32, i32, i32) {
    %c0_i32 = arith.constant 0 : i32
    %c0_i32_0 = arith.constant 0 : i32
    return %arg0, %c0_i32, %arg1 : i32, i32, i32
  }
}

</mosaic_0001>

<bundles_post_ra>
// kernel: discriminator_forward.5
= control target key start
LH: loop header
LB: loop body
LE: loop exit
PB: predicated region body
PF: predicated region fallthrough
CT: control target
= control target key end

     0   :  { %8 = vsyncpa [#allocation4], 0  ;;  %s1824_s0 = inlined_call_operand.vmem [shape: bf16[2,256,128], index: 0, kind: input, shape index: {}]   ;;  %s1825_s1 = inlined_call_operand.hbm [shape: bf16[128,128], index: 1, kind: input, shape index: {}]   ;;  %s1826_s2 = inlined_call_operand.hbm [shape: f32[1,128], index: 2, kind: input, shape index: {}]   ;;  %s1827_s3 = inlined_call_operand.vmem [shape: bf16[2,256,128], index: 3, kind: output, shape index: {}]  }
   0x1   :  { %9 = vsyncpa [#allocation6], 0  ;;  %s1627_s12 = smov 0   ;;  %s1629_s13 = smov 0  }
   0x2   :  { %s1631_s14 = smov 0  }
   0x3 LB: > { %s1155_s15 = sadd.s32 4294967295, %s1601_s14   ;;  %s34_s16 = sadd.s32 1, %s1597_s13  ;;  %s1601_s14 = sphi %s1631_s14, %s15_s14   ;;  %s1597_s13 = sphi %s1629_s13, %s1837_s13   ;;  %s1593_s12 = sphi %s1627_s12, %s1836_s12  }
   0x4   : > { %p36_p0 = scmp.ge.s32.totalorder %s34_s16, 2  ;;  %p1157_p1 = scmp.ge.s32.totalorder %s1601_s14, 1 }
   0x5   : > { %p149_p2 = scmp.lt.s32.totalorder %s1601_s14, 3  ;;  %p1652_p4 = scmp.eq.s32.totalorder %s1155_s15, 0 }
   0x6   : > { %s1839_s16 = smov (%p36_p0, %s34_s16), 0  ;;  %s1603_s19 = smov [#allocation3]  }
   0x7   : > { %p1648_p3 = pnand %p1157_p1, %p149_p2  ;;  %s165_s20 = sshll.u32 %s1603_s19, 4  ;;  %s166_s20 = int_to_ptr.vmem [resolvable:$true] %s165_s20 }
   0x8   : > { %s1832_s18 = scalar_select %p1652_p4, 1, 0 }
   0x9   : > { %s1831_s17 = scalar_select %p1648_p3, 1, 0 }
   0xa   : > { %p1452_p5 = pneg %p1648_p3  ;;  %s1604_s22 = smov [#allocation5]  }
   0xb   : > { %s181_s23 = sshll.u32 %s1604_s22, 4  ;;  %s1515_s26 = scalar_lea.hbm %s1825_s1, 1024  ;;  %s1664_s23 = int_to_ptr.vmem [resolvable:$true] %s181_s23 }
   0xc   : > { %p1660_p6 = pnand %p1652_p4, %p1452_p5  ;;  %p1516_p7 = scmp.ne.s32.totalorder %s1825_s1, %s1515_s26 }
   0xd   : > { %p1522_p11 = scmp.lt.u32.totalorder %s1515_s26, %s1825_s1 }
   0xe   : > { %p1517_p8 = pneg %p1660_p6 }
  0x10   : > { %p1518_p9 = pnand %p1517_p8, %p1516_p7 }
  0x12   : > { %p1519_p10 = pneg %p1518_p9 }
  0x14   : > { %p1524_p12 = pnand %p1522_p11, %p1519_p10 }
  0x16   : > { %1527 = shalt.err (!%p1524_p12)
}
  0x17   : > { %s1528_s4 = scalar_lea.vmem %s166_s20, 1024  ;;  %p1536_p2 = scmp.lt.s32.totalorder %s166_s20, %s166_s20 }
  0x18   : > { %p1529_p13 = scmp.ne.s32.totalorder %s166_s20, %s1528_s4  ;;  %p1537_p5 = scmp.lt.s32.totalorder %s1528_s4, %s1528_s4 }
  0x1a   : > { %p1531_p0 = pnand %p1529_p13, %p1517_p8  ;;  %p1538_p4 = por %p1537_p5, %p1536_p2 }
  0x1c   : > { %p1532_p1 = pneg %p1531_p0 }
  0x1e   : > { %p1539_p3 = pnand %p1538_p4, %p1532_p1 }
  0x20   : > { %1542 = shalt.err (!%p1539_p3)
}
  0x21   : > { %s1605_s5 = smov 64   ;;  %s1606_s6 = smov 4  }
  0x22   : > { %1455 = dma.hbm_to_vmem [thread:$0]  (!%p1660_p6), %s1825_s1, 1024, %s166_s20, [#allocation4], %s1605_s5, %s1605_s5, %s1606_s6  }
  0x23   : > { %s1543_s11 = scalar_lea.hbm %s1826_s2, 16 }
  0x24   : > { %p1544_p7 = scmp.ne.s32.totalorder %s1826_s2, %s1543_s11  ;;  %p1550_p9 = scmp.lt.u32.totalorder %s1543_s11, %s1826_s2 }
  0x26   : > { %p1546_p3 = pnand %p1544_p7, %p1517_p8 }
  0x28   : > { %p1547_p4 = pneg %p1546_p3 }
  0x2a   : > { %p1552_p10 = pnand %p1550_p9, %p1547_p4 }
  0x2c   : > { %1555 = shalt.err (!%p1552_p10)
}
  0x2d   : > { %s1556_s20 = scalar_lea.vmem %s1664_s23, 16  ;;  %s1563_s25 = scalar_lea.vmem %s1664_s23, 32 }
  0x2e   : > { %p1557_p11 = scmp.ne.s32.totalorder %s1664_s23, %s1556_s20  ;;  %p1564_p0 = scmp.lt.s32.totalorder %s1664_s23, %s1664_s23 }
  0x2f   : > { %p1565_p1 = scmp.lt.s32.totalorder %s1563_s25, %s1556_s20 }
  0x30   : > { %p1559_p12 = pnand %p1557_p11, %p1517_p8 }
  0x31   : > { %p1566_p2 = por %p1565_p1, %p1564_p0 }
  0x32   : > { %p1560_p13 = pneg %p1559_p12 }
  0x34   : > { %p1567_p5 = pnand %p1566_p2, %p1560_p13 }
  0x36   : > { %1570 = shalt.err (!%p1567_p5)
}
  0x37   : > { %1458 = dma.hbm_to_vmem [thread:$0]  (!%p1660_p6), %s1826_s2, 16, %s1664_s23, [#allocation6]  }
  0x38   : > { %p1834_p7 = scmp.ne.s32.totalorder %s1831_s17, 0 }
  0x39   : > { %p1835_p8 = scmp.ne.s32.totalorder (!%p1834_p7), %s1832_s18, 0 }
  0x3a   : > { %205 = sbr.rel (%p1834_p7) target bundleno = 356 (0x164), region = 32 }
  0x41   : > { %1584 = dma.done.wait (%p1835_p8), [#allocation4], 1024  }
  0x42   : > { %1586 = vsyncadd (%p1835_p8), [#allocation4], 4294966272 }
  0x43   : > { %1588 = dma.done.wait (%p1835_p8), [#allocation6], 16  }
  0x44   : > { %1590 = vsyncadd (%p1835_p8), [#allocation6], 4294967280  ;;  %p239_p3 = scmp.lt.s32.totalorder %s1593_s12, 1  ;;  %v1491_v0 = vld [vmem:[#allocation3] sm:$0xff]   ;;  %v1492_v1 = vld [vmem:[#allocation3 + $0x8] sm:$0xff]  }
  0x45   : > { %1380 = vmatprep.subr.bf16.mxu0 %v1491_v0  ;;  %1428 = vmatprep.subr.bf16.mxu1 %v1491_v0  ;;  %v1493_v2 = vld [vmem:[#allocation3 + $0x10] sm:$0xff]   ;;  %v1494_v3 = vld [vmem:[#allocation3 + $0x18] sm:$0xff]   ;;  %v1495_v6 = vld [vmem:[#allocation3 + $0x20] sm:$0xff]  }
  0x46   : > { %s1841_s12 = smov (!%p239_p3, %s1593_s12), 1  ;;  %1381 = vmatpush3.bf16.msra.mxu0 %v1491_v0  ;;  %1436 = vmatpush3.bf16.msra.mxu1 %v1491_v0  ;;  %v1496_v7 = vld [vmem:[#allocation3 + $0x28] sm:$0xff]   ;;  %v1497_v8 = vld [vmem:[#allocation3 + $0x30] sm:$0xff]   ;;  %v1498_v9 = vld [vmem:[#allocation3 + $0x38] sm:$0xff]  }
  0x47   : > { %s1227_s17 = sshll.u32 %s1841_s12, 7  ;;  %1382 = vmatprep.subr.bf16.mxu0 %v1492_v1  ;;  %1429 = vmatprep.subr.bf16.mxu1 %v1492_v1  ;;  %v1752_v24 = vld [vmem:[#allocation5] ss:$0 sm:$0xff] }
  0x48   : > { %s1734_s23 = scalar_lea.vmem %s1824_s0, %s1227_s17  ;;  %s1769_s30 = scalar_lea.vmem %s1827_s3, %s1227_s17 }
  0x49   : > { %v1499_v4 = vld [vmem:[%s1734_s23] sm:$0xff]   ;;  %v1501_v10 = vld [vmem:[%s1734_s23 + $0x8] sm:$0xff]   ;;  %v1503_v12 = vld [vmem:[%s1734_s23 + $0x10] sm:$0xff]  }
  0x4a   : > { %1383 = vmatpush3.bf16.msra.mxu0 %v1492_v1  ;;  %1437 = vmatpush3.bf16.msra.mxu1 %v1492_v1  ;;  %v1500_v5 = vld [vmem:[%s1734_s23 + $0x40] sm:$0xff]   ;;  %v1502_v11 = vld [vmem:[%s1734_s23 + $0x48] sm:$0xff]   ;;  %v1504_v13 = vld [vmem:[%s1734_s23 + $0x50] sm:$0xff]  }
  0x4b   : > { %1384 = vmatprep.subr.bf16.mxu0 %v1493_v2  ;;  %1430 = vmatprep.subr.bf16.mxu1 %v1493_v2  ;;  %v1505_v14 = vld [vmem:[%s1734_s23 + $0x18] sm:$0xff]   ;;  %v1507_v16 = vld [vmem:[%s1734_s23 + $0x20] sm:$0xff]   ;;  %v1509_v18 = vld [vmem:[%s1734_s23 + $0x28] sm:$0xff]  }
  0x4c   : > { %1396 = vmatprep.mubr.bf16.mxu0 %v1499_v4  ;;  %1412 = vmatprep.mubr.bf16.mxu1 %v1500_v5  ;;  %v1506_v15 = vld [vmem:[%s1734_s23 + $0x58] sm:$0xff]   ;;  %v1508_v17 = vld [vmem:[%s1734_s23 + $0x60] sm:$0xff]   ;;  %v1510_v19 = vld [vmem:[%s1734_s23 + $0x68] sm:$0xff]  }
  0x4d   : > { %v1511_v20 = vld [vmem:[%s1734_s23 + $0x30] sm:$0xff]   ;;  %v1513_v22 = vld [vmem:[%s1734_s23 + $0x38] sm:$0xff]  }
  0x4e   : > { %1385 = vmatpush3.bf16.msra.mxu0 %v1493_v2  ;;  %1438 = vmatpush3.bf16.msra.mxu1 %v1493_v2  ;;  %v1512_v21 = vld [vmem:[%s1734_s23 + $0x70] sm:$0xff]   ;;  %v1514_v23 = vld [vmem:[%s1734_s23 + $0x78] sm:$0xff]  }
  0x4f   : > { %1386 = vmatprep.subr.bf16.mxu0 %v1494_v3  ;;  %1431 = vmatprep.subr.bf16.mxu1 %v1494_v3 }
  0x52   : > { %1387 = vmatpush3.bf16.msra.mxu0 %v1494_v3  ;;  %1439 = vmatpush3.bf16.msra.mxu1 %v1494_v3 }
  0x53   : > { %1388 = vmatprep.subr.bf16.mxu0 %v1495_v6  ;;  %1432 = vmatprep.subr.bf16.mxu1 %v1495_v6 }
  0x56   : > { %1389 = vmatpush3.bf16.msra.mxu0 %v1495_v6  ;;  %1440 = vmatpush3.bf16.msra.mxu1 %v1495_v6 }
  0x57   : > { %1390 = vmatprep.subr.bf16.mxu0 %v1496_v7  ;;  %1433 = vmatprep.subr.bf16.mxu1 %v1496_v7 }
  0x5a   : > { %1391 = vmatpush3.bf16.msra.mxu0 %v1496_v7  ;;  %1441 = vmatpush3.bf16.msra.mxu1 %v1496_v7 }
  0x5b   : > { %1392 = vmatprep.subr.bf16.mxu0 %v1497_v8  ;;  %1434 = vmatprep.subr.bf16.mxu1 %v1497_v8 }
  0x5e   : > { %1393 = vmatpush3.bf16.msra.mxu0 %v1497_v8  ;;  %1442 = vmatpush3.bf16.msra.mxu1 %v1497_v8 }
  0x5f   : > { %1394 = vmatprep.subr.bf16.mxu0 %v1498_v9  ;;  %1435 = vmatprep.subr.bf16.mxu1 %v1498_v9 }
  0x62   : > { %1395 = vmatpush3.bf16.msra.mxu0 %v1498_v9  ;;  %1443 = vmatpush3.bf16.msra.mxu1 %v1498_v9 }
  0x65   : > { %1397 = vmatmul.mubr.bf16.vlgmr.msra.gmra.mrb[0].mxu0 %v1501_v10  ;;  %1413 = vmatmul.mubr.bf16.vlgmr.msra.gmra.mrb[0].mxu1 %v1502_v11 }
  0x66   : > { %1400 = vmatprep.mubr.bf16.mxu0 %v1503_v12  ;;  %1416 = vmatprep.mubr.bf16.mxu1 %v1504_v13 }
  0x6d   : > { %1401 = vmatmul.mubr.bf16.gmra.mrb[4].mxu0 %v1505_v14  ;;  %1417 = vmatmul.mubr.bf16.gmra.mrb[4].mxu1 %v1506_v15 }
  0x6e   : > { %1404 = vmatprep.mubr.bf16.mxu0 %v1507_v16  ;;  %1420 = vmatprep.mubr.bf16.mxu1 %v1508_v17 }
  0x75   : > { %1405 = vmatmul.mubr.bf16.gmra.mrb[8].mxu0 %v1509_v18  ;;  %1421 = vmatmul.mubr.bf16.gmra.mrb[8].mxu1 %v1510_v19 }
  0x76   : > { %1408 = vmatprep.mubr.bf16.mxu0 %v1511_v20  ;;  %1424 = vmatprep.mubr.bf16.mxu1 %v1512_v21 }
  0x7d   : > { %1409 = vmatmul.mubr.bf16.gmra.mrb[12].mxu0 %v1513_v22  ;;  %1425 = vmatmul.mubr.bf16.gmra.mrb[12].mxu1 %v1514_v23 }
 0x138   : > { %v1398_v25 = vpop.f32.mrb[0].mxu0  ;;  %v1414_v26 = vpop.f32.mrb[0].mxu1 }
 0x139   : > { %v687_v27 = vadd.f32 %v1398_v25, %v1752_v24  ;;  %v703_v28 = vadd.f32 %v1414_v26, %v1752_v24  ;;  %v558_v29 = vpop.f32.mrb[1].mxu0  ;;  %v622_v30 = vpop.f32.mrb[1].mxu1 }
 0x13a   : > { %v685_v31 = vadd.f32 %v1752_v24, %v558_v29  ;;  %v701_v32 = vadd.f32 %v1752_v24, %v622_v30  ;;  %v1399_v33 = vpop.f32.mrb[2].mxu0  ;;  %v1415_v34 = vpop.f32.mrb[2].mxu1 }
 0x13b   : > { %vm786_vm0 = vcmp.ge.f32.partialorder %v687_v27, 0.0  ;;  %v818_v35 = vmul.f32 0.2, %v687_v27  ;;  %vm802_vm1 = vcmp.ge.f32.partialorder %v703_v28, 0.0  ;;  %v834_v36 = vmul.f32 0.2, %v703_v28 }
 0x13c   : > { %vm784_vm2 = vcmp.ge.f32.partialorder %v685_v31, 0.0  ;;  %v816_v37 = vmul.f32 0.2, %v685_v31  ;;  %vm800_vm3 = vcmp.ge.f32.partialorder %v701_v32, 0.0  ;;  %v832_v38 = vmul.f32 0.2, %v701_v32 }
 0x13d   : > { %v688_v39 = vadd.f32 %v1399_v33, %v1752_v24  ;;  %v704_v40 = vadd.f32 %v1415_v34, %v1752_v24  ;;  %v561_v41 = vpop.f32.mrb[3].mxu0  ;;  %v625_v42 = vpop.f32.mrb[3].mxu1  ;;  %v850_v43 = vsel %vm786_vm0, %v687_v27, %v818_v35  ;;  %v866_v44 = vsel %vm802_vm1, %v703_v28, %v834_v36 }
 0x13e   : > { %v686_v45 = vadd.f32 %v1752_v24, %v561_v41  ;;  %v702_v46 = vadd.f32 %v1752_v24, %v625_v42  ;;  %v848_v51 = vsel %vm784_vm2, %v685_v31, %v816_v37  ;;  %v864_v52 = vsel %vm800_vm3, %v701_v32, %v832_v38 }
 0x13f   : > { %vm787_vm4 = vcmp.ge.f32.partialorder %v688_v39, 0.0  ;;  %v819_v47 = vmul.f32 0.2, %v688_v39  ;;  %vm803_vm5 = vcmp.ge.f32.partialorder %v704_v40, 0.0  ;;  %v835_v48 = vmul.f32 0.2, %v704_v40 }
 0x140   : > { %vm785_vm6 = vcmp.ge.f32.partialorder %v686_v45, 0.0  ;;  %v817_v49 = vmul.f32 0.2, %v686_v45  ;;  %vm801_vm7 = vcmp.ge.f32.partialorder %v702_v46, 0.0  ;;  %v833_v50 = vmul.f32 0.2, %v702_v46 }
 0x141   : > { %v851_v53 = vsel %vm787_vm4, %v688_v39, %v819_v47  ;;  %v867_v54 = vsel %vm803_vm5, %v704_v40, %v835_v48  ;;  %v1402_v55 = vpop.f32.mrb[4].mxu0  ;;  %v1418_v56 = vpop.f32.mrb[4].mxu1 }
 0x142   : > { %v1269_v57 = vpack.c.bf16 %v851_v53, %v850_v43  ;;  %v1309_v58 = vpack.c.bf16 %v867_v54, %v866_v44  ;;  %v849_v59 = vsel %vm785_vm6, %v686_v45, %v817_v49  ;;  %v865_v60 = vsel %vm801_vm7, %v702_v46, %v833_v50  ;;  %v574_v61 = vpop.f32.mrb[5].mxu0  ;;  %v638_v62 = vpop.f32.mrb[5].mxu1 }
 0x143   : > { %v1264_v63 = vpack.c.bf16 %v849_v59, %v848_v51  ;;  %v1304_v0 = vpack.c.bf16 %v865_v60, %v864_v52  ;;  %v691_v1 = vadd.f32 %v1402_v55, %v1752_v24  ;;  %v707_v2 = vadd.f32 %v1418_v56, %v1752_v24  ;;  %v1403_v3 = vpop.f32.mrb[6].mxu0  ;;  %v1419_v4 = vpop.f32.mrb[6].mxu1 }
 0x144   : > { %1341 = vst [vmem:[%s1769_s30 + $0x8] sm:$0xff] %v1269_v57   ;;  %1349 = vst [vmem:[%s1769_s30 + $0x48] sm:$0xff] %v1309_v58   ;;  %v689_v5 = vadd.f32 %v1752_v24, %v574_v61  ;;  %v705_v6 = vadd.f32 %v1752_v24, %v638_v62  ;;  %v692_v7 = vadd.f32 %v1403_v3, %v1752_v24  ;;  %v577_v9 = vpop.f32.mrb[7].mxu0  ;;  %v641_v10 = vpop.f32.mrb[7].mxu1 }
 0x145   : > { %v708_v8 = vadd.f32 %v1419_v4, %v1752_v24  ;;  %1265 = vst [vmem:[%s1769_s30] sm:$0xff] %v1264_v63   ;;  %1348 = vst [vmem:[%s1769_s30 + $0x40] sm:$0xff] %v1304_v0   ;;  %vm790_vm8 = vcmp.ge.f32.partialorder %v691_v1, 0.0  ;;  %v822_v11 = vmul.f32 0.2, %v691_v1  ;;  %vm806_vm9 = vcmp.ge.f32.partialorder %v707_v2, 0.0 }
 0x146   : > { %v838_v12 = vmul.f32 0.2, %v707_v2  ;;  %vm788_vm10 = vcmp.ge.f32.partialorder %v689_v5, 0.0  ;;  %v820_v13 = vmul.f32 0.2, %v689_v5  ;;  %vm804_vm11 = vcmp.ge.f32.partialorder %v705_v6, 0.0 }
 0x147   : > { %v854_v14 = vsel %vm790_vm8, %v691_v1, %v822_v11  ;;  %v836_v15 = vmul.f32 0.2, %v705_v6  ;;  %vm791_vm12 = vcmp.ge.f32.partialorder %v692_v7, 0.0  ;;  %v823_v16 = vmul.f32 0.2, %v692_v7 }
 0x148   : > { %v870_v17 = vsel %vm806_vm9, %v707_v2, %v838_v12  ;;  %v852_v18 = vsel %vm788_vm10, %v689_v5, %v820_v13  ;;  %vm807_vm13 = vcmp.ge.f32.partialorder %v708_v8, 0.0  ;;  %v839_v19 = vmul.f32 0.2, %v708_v8  ;;  %v1406_v20 = vpop.f32.mrb[8].mxu0  ;;  %v1422_v21 = vpop.f32.mrb[8].mxu1 }
 0x149   : > { %v855_v22 = vsel %vm791_vm12, %v692_v7, %v823_v16  ;;  %v690_v23 = vadd.f32 %v1752_v24, %v577_v9  ;;  %v706_v25 = vadd.f32 %v1752_v24, %v641_v10  ;;  %v695_v26 = vadd.f32 %v1406_v20, %v1752_v24  ;;  %v590_v27 = vpop.f32.mrb[9].mxu0  ;;  %v654_v28 = vpop.f32.mrb[9].mxu1 }
 0x14a   : > { %v1279_v29 = vpack.c.bf16 %v855_v22, %v854_v14  ;;  %v871_v30 = vsel %vm807_vm13, %v708_v8, %v839_v19  ;;  %v711_v31 = vadd.f32 %v1422_v21, %v1752_v24  ;;  %v693_v32 = vadd.f32 %v1752_v24, %v590_v27  ;;  %v1407_v33 = vpop.f32.mrb[10].mxu0  ;;  %v1423_v34 = vpop.f32.mrb[10].mxu1 }
 0x14b   : > { %v1319_v35 = vpack.c.bf16 %v871_v30, %v870_v17  ;;  %vm789_vm14 = vcmp.ge.f32.partialorder %v690_v23, 0.0  ;;  %v821_v36 = vmul.f32 0.2, %v690_v23  ;;  %vm805_vm15 = vcmp.ge.f32.partialorder %v706_v25, 0.0  ;;  %v593_v37 = vpop.f32.mrb[11].mxu0  ;;  %v657_v38 = vpop.f32.mrb[11].mxu1 }
 0x14c   : > { %1343 = vst [vmem:[%s1769_s30 + $0x18] sm:$0xff] %v1279_v29   ;;  %v837_v39 = vmul.f32 0.2, %v706_v25  ;;  %vm794_vm0 = vcmp.ge.f32.partialorder %v695_v26, 0.0  ;;  %v826_v40 = vmul.f32 0.2, %v695_v26  ;;  %v868_v41 = vsel %vm804_vm11, %v705_v6, %v836_v15 }
 0x14d   : > { %vm810_vm1 = vcmp.ge.f32.partialorder %v711_v31, 0.0  ;;  %1351 = vst [vmem:[%s1769_s30 + $0x58] sm:$0xff] %v1319_v35   ;;  %v853_v42 = vsel %vm789_vm14, %v690_v23, %v821_v36  ;;  %v842_v43 = vmul.f32 0.2, %v711_v31  ;;  %vm792_vm2 = vcmp.ge.f32.partialorder %v693_v32, 0.0 }
 0x14e   : > { %v1274_v44 = vpack.c.bf16 %v853_v42, %v852_v18  ;;  %v869_v45 = vsel %vm805_vm15, %v706_v25, %v837_v39  ;;  %v824_v46 = vmul.f32 0.2, %v693_v32  ;;  %v709_v47 = vadd.f32 %v1752_v24, %v654_v28 }
 0x14f   : > { %v1314_v48 = vpack.c.bf16 %v869_v45, %v868_v41  ;;  %v858_v49 = vsel %vm794_vm0, %v695_v26, %v826_v40  ;;  %v874_v50 = vsel %vm810_vm1, %v711_v31, %v842_v43  ;;  %v696_v51 = vadd.f32 %v1407_v33, %v1752_v24 }
 0x150   : > { %1342 = vst [vmem:[%s1769_s30 + $0x10] sm:$0xff] %v1274_v44   ;;  %vm808_vm3 = vcmp.ge.f32.partialorder %v709_v47, 0.0  ;;  %v840_v52 = vmul.f32 0.2, %v709_v47  ;;  %v712_v53 = vadd.f32 %v1423_v34, %v1752_v24  ;;  %v694_v54 = vadd.f32 %v1752_v24, %v593_v37  ;;  %v1410_v55 = vpop.f32.mrb[12].mxu0  ;;  %v1426_v56 = vpop.f32.mrb[12].mxu1 }
 0x151   : > { %1350 = vst [vmem:[%s1769_s30 + $0x50] sm:$0xff] %v1314_v48   ;;  %vm795_vm4 = vcmp.ge.f32.partialorder %v696_v51, 0.0  ;;  %v827_v57 = vmul.f32 0.2, %v696_v51  ;;  %v710_v58 = vadd.f32 %v1752_v24, %v657_v38  ;;  %v699_v59 = vadd.f32 %v1410_v55, %v1752_v24  ;;  %v606_v60 = vpop.f32.mrb[13].mxu0  ;;  %v670_v61 = vpop.f32.mrb[13].mxu1 }
 0x152   : > { %v856_v62 = vsel %vm792_vm2, %v693_v32, %v824_v46  ;;  %vm811_vm5 = vcmp.ge.f32.partialorder %v712_v53, 0.0  ;;  %v843_v63 = vmul.f32 0.2, %v712_v53  ;;  %vm793_vm6 = vcmp.ge.f32.partialorder %v694_v54, 0.0  ;;  %v1411_v0 = vpop.f32.mrb[14].mxu0  ;;  %v1427_v1 = vpop.f32.mrb[14].mxu1 }
 0x153   : > { %v859_v2 = vsel %vm795_vm4, %v696_v51, %v827_v57  ;;  %v825_v3 = vmul.f32 0.2, %v694_v54  ;;  %vm809_vm7 = vcmp.ge.f32.partialorder %v710_v58, 0.0  ;;  %v841_v4 = vmul.f32 0.2, %v710_v58  ;;  %v609_v5 = vpop.f32.mrb[15].mxu0 }
 0x154   : > { %v872_v6 = vsel %vm808_vm3, %v709_v47, %v840_v52  ;;  %v1289_v7 = vpack.c.bf16 %v859_v2, %v858_v49  ;;  %v875_v8 = vsel %vm811_vm5, %v712_v53, %v843_v63  ;;  %v830_v9 = vmul.f32 0.2, %v699_v59  ;;  %v673_v10 = vpop.f32.mrb[15].mxu1 }
 0x155   : > { %v1329_v11 = vpack.c.bf16 %v875_v8, %v874_v50  ;;  %v857_v12 = vsel %vm793_vm6, %v694_v54, %v825_v3  ;;  %v873_v13 = vsel %vm809_vm7, %v710_v58, %v841_v4  ;;  %v715_v14 = vadd.f32 %v1426_v56, %v1752_v24 }
 0x156   : > { %1345 = vst [vmem:[%s1769_s30 + $0x28] sm:$0xff] %v1289_v7   ;;  %v1284_v15 = vpack.c.bf16 %v857_v12, %v856_v62  ;;  %v1324_v16 = vpack.c.bf16 %v873_v13, %v872_v6  ;;  %vm798_vm8 = vcmp.ge.f32.partialorder %v699_v59, 0.0  ;;  %v697_v17 = vadd.f32 %v1752_v24, %v606_v60 }
 0x157   : > { %1353 = vst [vmem:[%s1769_s30 + $0x68] sm:$0xff] %v1329_v11   ;;  %vm814_vm9 = vcmp.ge.f32.partialorder %v715_v14, 0.0  ;;  %v846_v18 = vmul.f32 0.2, %v715_v14  ;;  %v713_v19 = vadd.f32 %v1752_v24, %v670_v61  ;;  %v700_v20 = vadd.f32 %v1411_v0, %v1752_v24 }
 0x158   : > { %1344 = vst [vmem:[%s1769_s30 + $0x20] sm:$0xff] %v1284_v15   ;;  %1352 = vst [vmem:[%s1769_s30 + $0x60] sm:$0xff] %v1324_v16   ;;  %v828_v21 = vmul.f32 0.2, %v697_v17  ;;  %v716_v22 = vadd.f32 %v1427_v1, %v1752_v24  ;;  %v698_v23 = vadd.f32 %v1752_v24, %v609_v5  ;;  %v862_v25 = vsel %vm798_vm8, %v699_v59, %v830_v9 }
 0x159   : > { %vm796_vm10 = vcmp.ge.f32.partialorder %v697_v17, 0.0  ;;  %vm799_vm11 = vcmp.ge.f32.partialorder %v700_v20, 0.0  ;;  %v878_v26 = vsel %vm814_vm9, %v715_v14, %v846_v18  ;;  %v831_v27 = vmul.f32 0.2, %v700_v20 }
 0x15a   : > { %vm815_vm12 = vcmp.ge.f32.partialorder %v716_v22, 0.0  ;;  %v847_v28 = vmul.f32 0.2, %v716_v22  ;;  %vm812_vm13 = vcmp.ge.f32.partialorder %v713_v19, 0.0  ;;  %vm797_vm14 = vcmp.ge.f32.partialorder %v698_v23, 0.0 }
 0x15b   : > { %v829_v29 = vmul.f32 0.2, %v698_v23  ;;  %v714_v30 = vadd.f32 %v1752_v24, %v673_v10  ;;  %v860_v31 = vsel %vm796_vm10, %v697_v17, %v828_v21  ;;  %v844_v32 = vmul.f32 0.2, %v713_v19 }
 0x15c   : > { %v863_v33 = vsel %vm799_vm11, %v700_v20, %v831_v27  ;;  %v879_v34 = vsel %vm815_vm12, %v716_v22, %v847_v28 }
 0x15d   : > { %v1299_v35 = vpack.c.bf16 %v863_v33, %v862_v25  ;;  %v1339_v36 = vpack.c.bf16 %v879_v34, %v878_v26  ;;  %v861_v37 = vsel %vm797_vm14, %v698_v23, %v829_v29  ;;  %vm813_vm15 = vcmp.ge.f32.partialorder %v714_v30, 0.0 }
 0x15e   : > { %v1294_v38 = vpack.c.bf16 %v861_v37, %v860_v31  ;;  %v845_v39 = vmul.f32 0.2, %v714_v30  ;;  %v876_v40 = vsel %vm812_vm13, %v713_v19, %v844_v32 }
 0x15f   : > { %1347 = vst [vmem:[%s1769_s30 + $0x38] sm:$0xff] %v1299_v35   ;;  %1355 = vst [vmem:[%s1769_s30 + $0x78] sm:$0xff] %v1339_v36  }
 0x160   : > { %1346 = vst [vmem:[%s1769_s30 + $0x30] sm:$0xff] %v1294_v38   ;;  %v877_v41 = vsel %vm813_vm15, %v714_v30, %v845_v39 }
 0x161   : > { %v1334_v42 = vpack.c.bf16 %v877_v41, %v876_v40 }
 0x163   : > { %1354 = vst [vmem:[%s1769_s30 + $0x70] sm:$0xff] %v1334_v42  }
 0x164 PF: > { %s15_s14 = sadd.s32 1, %s1601_s14   ;;  %s1836_s12 = smov %s1597_s13 }
 0x165   : > { %p12_p6 = scmp.ge.s32.totalorder %s15_s14, 4   ;;  %s1837_s13 = smov %s1839_s16 }
 0x167   :  { %14 = sbr.rel (!%p12_p6) target bundleno = 3 (0x3), region = 81 }
 0x16e   :  { %1067 = vsyncpa [#allocation4], 1 }
 0x16f   :  { %1069 = vsyncpa [#allocation4 + $0x1], 1 }
 0x170   :  { %1070 = vsyncpa [#allocation6], 1 }

// kernel: discriminator_forward.6
= control target key start
LH: loop header
LB: loop body
LE: loop exit
PB: predicated region body
PF: predicated region fallthrough
CT: control target
= control target key end

     0   :  { %s1960_s12 = smov 0   ;;  %s1962_s13 = smov 0   ;;  %s2271_s0 = inlined_call_operand.vmem [shape: bf16[2,64,1024], index: 0, kind: input, shape index: {}]   ;;  %s2272_s1 = inlined_call_operand.vmem [shape: bf16[1024,128], index: 1, kind: input, shape index: {}]   ;;  %s2273_s2 = inlined_call_operand.vmem [shape: f32[1,128], index: 2, kind: input, shape index: {}]   ;;  %s2274_s3 = inlined_call_operand.vmem [shape: bf16[2,64,128], index: 3, kind: output, shape index: {}]  }
   0x1   :  { %s1964_s14 = smov 0  }
   0x2 LB: > { %s32_s15 = sadd.s32 1, %s1934_s13  ;;  %p1521_p0 = scmp.ge.s32.totalorder %s1938_s14, 1  ;;  %s1938_s14 = sphi %s1964_s14, %s13_s14   ;;  %s1934_s13 = sphi %s1962_s13, %s2276_s13   ;;  %s1930_s12 = sphi %s1960_s12, %s2275_s12  }
   0x3   : > { %p34_p1 = scmp.ge.s32.totalorder %s32_s15, 2  ;;  %p189_p2 = scmp.lt.s32.totalorder %s1938_s14, 3 }
   0x5   : > { %s2278_s15 = smov (%p34_p1, %s32_s15), 0  ;;  %p190_p3 = pnand %p1521_p0, %p189_p2 }
   0x6   : > { %v1850_v0 = vld [vmem:[%s2272_s1 + $0x40] sm:$0xff] (!%p190_p3)   ;;  %v1854_v4 = vld [vmem:[%s2272_s1 + $0x48] sm:$0xff] (!%p190_p3)   ;;  %v1858_v8 = vld [vmem:[%s2272_s1 + $0x50] sm:$0xff] (!%p190_p3)   ;;  %p232_p4 = scmp.lt.s32.totalorder (!%p190_p3), %s1930_s12, 1 }
   0x7   : > { %193 = sbr.rel (%p190_p3) target bundleno = 392 (0x188), region = 32  ;;  %v1851_v1 = vld [vmem:[%s2272_s1 + $0xc0] sm:$0xff] (!%p190_p3)   ;;  %1666 = vmatprep.subr.bf16.mxu0 (!%p190_p3), %v1850_v0  ;;  %v1855_v5 = vld [vmem:[%s2272_s1 + $0xc8] sm:$0xff] (!%p190_p3)   ;;  %v1859_v9 = vld [vmem:[%s2272_s1 + $0xd0] sm:$0xff] (!%p190_p3)  }
   0x8   : > { %v1852_v2 = vld [vmem:[%s2272_s1] sm:$0xff] (!%p190_p3)   ;;  %1706 = vmatprep.subr.bf16.mxu1 (!%p190_p3), %v1851_v1  ;;  %v1856_v6 = vld [vmem:[%s2272_s1 + $0x8] sm:$0xff] (!%p190_p3)   ;;  %v1860_v10 = vld [vmem:[%s2272_s1 + $0x10] sm:$0xff] (!%p190_p3)  }
   0x9   : > { %v1853_v3 = vld [vmem:[%s2272_s1 + $0x80] sm:$0xff] (!%p190_p3)   ;;  %1667 = vmatpush3.bf16.msra.mxu0 (!%p190_p3), %v1852_v2  ;;  %v1857_v7 = vld [vmem:[%s2272_s1 + $0x88] sm:$0xff] (!%p190_p3)   ;;  %v1861_v11 = vld [vmem:[%s2272_s1 + $0x90] sm:$0xff] (!%p190_p3)  }
   0xa   : > { %1707 = vmatpush3.bf16.msra.mxu1 (!%p190_p3), %v1853_v3  ;;  %1668 = vmatprep.subr.bf16.mxu0 (!%p190_p3), %v1854_v4  ;;  %v1862_v12 = vld [vmem:[%s2272_s1 + $0x58] sm:$0xff] (!%p190_p3)   ;;  %v1866_v16 = vld [vmem:[%s2272_s1 + $0x60] sm:$0xff] (!%p190_p3)   ;;  %v1870_v20 = vld [vmem:[%s2272_s1 + $0x68] sm:$0xff] (!%p190_p3)  }
   0xb   : > { %1708 = vmatprep.subr.bf16.mxu1 (!%p190_p3), %v1855_v5  ;;  %v1863_v13 = vld [vmem:[%s2272_s1 + $0xd8] sm:$0xff] (!%p190_p3)   ;;  %v1867_v17 = vld [vmem:[%s2272_s1 + $0xe0] sm:$0xff] (!%p190_p3)   ;;  %v1871_v21 = vld [vmem:[%s2272_s1 + $0xe8] sm:$0xff] (!%p190_p3)  }
   0xc   : > { %v1864_v14 = vld [vmem:[%s2272_s1 + $0x18] sm:$0xff] (!%p190_p3)   ;;  %v1868_v18 = vld [vmem:[%s2272_s1 + $0x20] sm:$0xff] (!%p190_p3)   ;;  %v1872_v22 = vld [vmem:[%s2272_s1 + $0x28] sm:$0xff] (!%p190_p3)  }
   0xd   : > { %1669 = vmatpush3.bf16.msra.mxu0 (!%p190_p3), %v1856_v6  ;;  %v1865_v15 = vld [vmem:[%s2272_s1 + $0x98] sm:$0xff] (!%p190_p3)   ;;  %v1869_v19 = vld [vmem:[%s2272_s1 + $0xa0] sm:$0xff] (!%p190_p3)   ;;  %v1873_v23 = vld [vmem:[%s2272_s1 + $0xa8] sm:$0xff] (!%p190_p3)  }
   0xe   : > { %1709 = vmatpush3.bf16.msra.mxu1 %v1857_v7  ;;  %1670 = vmatprep.subr.bf16.mxu0 %v1858_v8  ;;  %s2280_s12 = smov (!%p232_p4, %s1930_s12), 1  ;;  %v1874_v24 = vld [vmem:[%s2272_s1 + $0x70] sm:$0xff]   ;;  %v1878_v28 = vld [vmem:[%s2272_s1 + $0x78] sm:$0xff]   ;;  %v1882_v40 = vld [vmem:[%s2272_s1 + $0x140] sm:$0xff]  }
   0xf   : > { %1710 = vmatprep.subr.bf16.mxu1 %v1859_v9  ;;  %v1875_v25 = vld [vmem:[%s2272_s1 + $0xf0] sm:$0xff]   ;;  %s1633_s24 = sshll.u32 %s2280_s12, 8  ;;  %v1879_v29 = vld [vmem:[%s2272_s1 + $0xf8] sm:$0xff]   ;;  %v1883_v41 = vld [vmem:[%s2272_s1 + $0x1c0] sm:$0xff]   ;;  %s1634_s10 = sshll.u32 %s2280_s12, 5 }
  0x10   : > { %v1876_v26 = vld [vmem:[%s2272_s1 + $0x30] sm:$0xff]   ;;  %s2078_s6 = scalar_lea.vmem %s2271_s0, %s1633_s24  ;;  %v1880_v30 = vld [vmem:[%s2272_s1 + $0x38] sm:$0xff]   ;;  %v1884_v42 = vld [vmem:[%s2272_s1 + $0x100] sm:$0xff]   ;;  %s260_s12 = scalar_lea.vmem %s2274_s3, %s1634_s10 }
  0x11   : > { %1671 = vmatpush3.bf16.msra.mxu0 %v1860_v10  ;;  %v1877_v27 = vld [vmem:[%s2272_s1 + $0xb0] sm:$0xff]   ;;  %v1881_v31 = vld [vmem:[%s2272_s1 + $0xb8] sm:$0xff]   ;;  %v289_v32 = vld [vmem:[%s2078_s6] sm:$0xff] }
  0x12   : > { %1711 = vmatpush3.bf16.msra.mxu1 %v1861_v11  ;;  %1672 = vmatprep.subr.bf16.mxu0 %v1862_v12  ;;  %v293_v33 = vld [vmem:[%s2078_s6 + $0x20] sm:$0xff]  ;;  %v290_v34 = vld [vmem:[%s2078_s6 + $0x8] sm:$0xff]  ;;  %v1890_v56 = vld [vmem:[%s2272_s1 + $0x150] sm:$0xff]  }
  0x13   : > { %1712 = vmatprep.subr.bf16.mxu1 %v1863_v13  ;;  %v1527_v35 = vcombine.low %v289_v32, %v293_v33  ;;  %v1528_v36 = vcombine.high %v289_v32, %v293_v33  ;;  %v294_v37 = vld [vmem:[%s2078_s6 + $0x28] sm:$0xff]  ;;  %v1885_v43 = vld [vmem:[%s2272_s1 + $0x180] sm:$0xff]   ;;  %v1891_v57 = vld [vmem:[%s2272_s1 + $0x1d0] sm:$0xff]  }
  0x14   : > { %v1529_v38 = vcombine.low %v290_v34, %v294_v37  ;;  %v1530_v39 = vcombine.high %v290_v34, %v294_v37  ;;  %v1886_v44 = vld [vmem:[%s2272_s1 + $0x148] sm:$0xff]   ;;  %v297_v48 = vld [vmem:[%s2078_s6 + $0x40] sm:$0xff]  ;;  %v1892_v58 = vld [vmem:[%s2272_s1 + $0x110] sm:$0xff]  }
  0x15   : > { %1673 = vmatpush3.bf16.msra.mxu0 %v1864_v14  ;;  %1025 = vmatprep.mubr.bf16.mxu0 %v1528_v36  ;;  %v1887_v45 = vld [vmem:[%s2272_s1 + $0x1c8] sm:$0xff]   ;;  %v301_v49 = vld [vmem:[%s2078_s6 + $0x60] sm:$0xff]  ;;  %v1893_v59 = vld [vmem:[%s2272_s1 + $0x190] sm:$0xff]  }
  0x16   : > { %1713 = vmatpush3.bf16.msra.mxu1 %v1865_v15  ;;  %1674 = vmatprep.subr.bf16.mxu0 %v1866_v16  ;;  %v1888_v46 = vld [vmem:[%s2272_s1 + $0x108] sm:$0xff]   ;;  %v1536_v50 = vcombine.high %v297_v48, %v301_v49  ;;  %v1535_v53 = vcombine.low %v297_v48, %v301_v49  ;;  %v1894_v60 = vld [vmem:[%s2272_s1 + $0x158] sm:$0xff]   ;;  %v305_v0 = vld [vmem:[%s2078_s6 + $0x80] sm:$0xff] }
  0x17   : > { %1714 = vmatprep.subr.bf16.mxu1 %v1867_v17  ;;  %1090 = vmatprep.mubr.bf16.mxu1 %v1530_v39  ;;  %v1889_v47 = vld [vmem:[%s2272_s1 + $0x188] sm:$0xff]   ;;  %v1895_v61 = vld [vmem:[%s2272_s1 + $0x1d8] sm:$0xff]   ;;  %v309_v1 = vld [vmem:[%s2078_s6 + $0xa0] sm:$0xff] }
  0x18   : > { %v298_v51 = vld [vmem:[%s2078_s6 + $0x48] sm:$0xff]  ;;  %v1896_v62 = vld [vmem:[%s2272_s1 + $0x118] sm:$0xff]   ;;  %v1544_v4 = vcombine.high %v305_v0, %v309_v1  ;;  %v1543_v6 = vcombine.low %v305_v0, %v309_v1  ;;  %v1898_v8 = vld [vmem:[%s2272_s1 + $0x160] sm:$0xff]  }
  0x19   : > { %1675 = vmatpush3.bf16.msra.mxu0 %v1868_v18  ;;  %v302_v52 = vld [vmem:[%s2078_s6 + $0x68] sm:$0xff]  ;;  %v1897_v63 = vld [vmem:[%s2272_s1 + $0x198] sm:$0xff]   ;;  %v1899_v9 = vld [vmem:[%s2272_s1 + $0x1e0] sm:$0xff]  }
  0x1a   : > { %1715 = vmatpush3.bf16.msra.mxu1 %v1869_v19  ;;  %1676 = vmatprep.subr.bf16.mxu0 %v1870_v20  ;;  %v1538_v54 = vcombine.high %v298_v51, %v302_v52  ;;  %v1537_v55 = vcombine.low %v298_v51, %v302_v52  ;;  %v306_v2 = vld [vmem:[%s2078_s6 + $0x88] sm:$0xff]  ;;  %v1900_v10 = vld [vmem:[%s2272_s1 + $0x120] sm:$0xff]   ;;  %v291_v32 = vld [vmem:[%s2078_s6 + $0x10] sm:$0xff] }
  0x1b   : > { %1716 = vmatprep.subr.bf16.mxu1 %v1871_v21  ;;  %v310_v3 = vld [vmem:[%s2078_s6 + $0xa8] sm:$0xff]  ;;  %v1901_v11 = vld [vmem:[%s2272_s1 + $0x1a0] sm:$0xff]   ;;  %v295_v33 = vld [vmem:[%s2078_s6 + $0x30] sm:$0xff] }
  0x1c   : > { %v1546_v5 = vcombine.high %v306_v2, %v310_v3  ;;  %v1545_v7 = vcombine.low %v306_v2, %v310_v3  ;;  %v1902_v12 = vld [vmem:[%s2272_s1 + $0x168] sm:$0xff]   ;;  %v313_v16 = vld [vmem:[%s2078_s6 + $0xc0] sm:$0xff]  ;;  %v1531_v34 = vcombine.low %v291_v32, %v295_v33  ;;  %v292_v36 = vld [vmem:[%s2078_s6 + $0x18] sm:$0xff] }
  0x1d   : > { %1677 = vmatpush3.bf16.msra.mxu0 %v1872_v22  ;;  %v1903_v13 = vld [vmem:[%s2272_s1 + $0x1e8] sm:$0xff]   ;;  %v317_v17 = vld [vmem:[%s2078_s6 + $0xe0] sm:$0xff]  ;;  %v296_v37 = vld [vmem:[%s2078_s6 + $0x38] sm:$0xff] }
  0x1e   : > { %1717 = vmatpush3.bf16.msra.mxu1 %v1873_v23  ;;  %1678 = vmatprep.subr.bf16.mxu0 %v1874_v24  ;;  %v1904_v14 = vld [vmem:[%s2272_s1 + $0x128] sm:$0xff]   ;;  %v1552_v19 = vcombine.high %v313_v16, %v317_v17  ;;  %v1551_v21 = vcombine.low %v313_v16, %v317_v17  ;;  %v1906_v24 = vld [vmem:[%s2272_s1 + $0x170] sm:$0xff]   ;;  %v1533_v39 = vcombine.low %v292_v36, %v296_v37  ;;  %v308_v48 = vld [vmem:[%s2078_s6 + $0x98] sm:$0xff] }
  0x1f   : > { %1718 = vmatprep.subr.bf16.mxu1 %v1875_v25  ;;  %v1905_v15 = vld [vmem:[%s2272_s1 + $0x1a8] sm:$0xff]   ;;  %v1907_v25 = vld [vmem:[%s2272_s1 + $0x1f0] sm:$0xff]   ;;  %v312_v49 = vld [vmem:[%s2078_s6 + $0xb8] sm:$0xff] }
  0x20   : > { %v314_v18 = vld [vmem:[%s2078_s6 + $0xc8] sm:$0xff] }
  0x21   : > { %1679 = vmatpush3.bf16.msra.mxu0 %v1876_v26  ;;  %v318_v20 = vld [vmem:[%s2078_s6 + $0xe8] sm:$0xff]  ;;  %v1908_v26 = vld [vmem:[%s2272_s1 + $0x130] sm:$0xff]  }
  0x22   : > { %1719 = vmatpush3.bf16.msra.mxu1 %v1877_v27  ;;  %1680 = vmatprep.subr.bf16.mxu0 %v1878_v28  ;;  %v1554_v22 = vcombine.high %v314_v18, %v318_v20  ;;  %v1553_v23 = vcombine.low %v314_v18, %v318_v20  ;;  %v1909_v27 = vld [vmem:[%s2272_s1 + $0x1b0] sm:$0xff]   ;;  %v1910_v28 = vld [vmem:[%s2272_s1 + $0x178] sm:$0xff]  }
  0x23   : > { %1720 = vmatprep.subr.bf16.mxu1 %v1879_v29  ;;  %v1911_v29 = vld [vmem:[%s2272_s1 + $0x1f8] sm:$0xff]  }
  0x25   : > { %1681 = vmatpush3.bf16.msra.mxu0 %v1880_v30  ;;  %v1912_v30 = vld [vmem:[%s2272_s1 + $0x138] sm:$0xff]  }
  0x26   : > { %1721 = vmatpush3.bf16.msra.mxu1 %v1881_v31  ;;  %1746 = vmatprep.subr.bf16.mxu0 %v1882_v40  ;;  %v1913_v31 = vld [vmem:[%s2272_s1 + $0x1b8] sm:$0xff]   ;;  %v1534_v40 = vcombine.high %v292_v36, %v296_v37 }
  0x27   : > { %1786 = vmatprep.subr.bf16.mxu1 %v1883_v41  ;;  %v303_v41 = vld [vmem:[%s2078_s6 + $0x70] sm:$0xff] }
  0x28   : > { %1026 = vmatmul.mubr.bf16.vlgmr.msra.gmra.mrb[0].mxu0 %v1527_v35  ;;  %v1532_v35 = vcombine.high %v291_v32, %v295_v33 }
  0x29   : > { %1091 = vmatmul.mubr.bf16.vlgmr.msra.gmra.mrb[0].mxu1 %v1529_v38  ;;  %1747 = vmatpush3.bf16.msra.mxu0 %v1884_v42  ;;  %v299_v38 = vld [vmem:[%s2078_s6 + $0x50] sm:$0xff]  ;;  %v300_v42 = vld [vmem:[%s2078_s6 + $0x58] sm:$0xff] }
  0x2a   : > { %1787 = vmatpush3.bf16.msra.mxu1 %v1885_v43  ;;  %1748 = vmatprep.subr.bf16.mxu0 %v1886_v44  ;;  %v304_v43 = vld [vmem:[%s2078_s6 + $0x78] sm:$0xff]  ;;  %v1540_v44 = vcombine.high %v299_v38, %v303_v41 }
  0x2b   : > { %1788 = vmatprep.subr.bf16.mxu1 %v1887_v45  ;;  %1033 = vmatprep.mubr.bf16.mxu0 %v1536_v50  ;;  %v1542_v45 = vcombine.high %v300_v42, %v304_v43  ;;  %v1539_v50 = vcombine.low %v299_v38, %v303_v41  ;;  %v1541_v51 = vcombine.low %v300_v42, %v304_v43 }
  0x2c   : > { %1098 = vmatprep.mubr.bf16.mxu1 %v1538_v54  ;;  %v315_v54 = vld [vmem:[%s2078_s6 + $0xd0] sm:$0xff] }
  0x2d   : > { %1749 = vmatpush3.bf16.msra.mxu0 %v1888_v46  ;;  %v307_v46 = vld [vmem:[%s2078_s6 + $0x90] sm:$0xff] }
  0x2e   : > { %1789 = vmatpush3.bf16.msra.mxu1 %v1889_v47  ;;  %1750 = vmatprep.subr.bf16.mxu0 %v1890_v56  ;;  %v311_v47 = vld [vmem:[%s2078_s6 + $0xb0] sm:$0xff]  ;;  %v316_v56 = vld [vmem:[%s2078_s6 + $0xd8] sm:$0xff] }
  0x2f   : > { %1790 = vmatprep.subr.bf16.mxu1 %v1891_v57  ;;  %v1548_v52 = vcombine.high %v307_v46, %v311_v47  ;;  %v320_v57 = vld [vmem:[%s2078_s6 + $0xf8] sm:$0xff] }
  0x30   : > { %1034 = vmatmul.mubr.bf16.gmra.mrb[4].mxu0 %v1535_v53  ;;  %v1550_v53 = vcombine.high %v308_v48, %v312_v49 }
  0x31   : > { %1099 = vmatmul.mubr.bf16.gmra.mrb[4].mxu1 %v1537_v55  ;;  %1751 = vmatpush3.bf16.msra.mxu0 %v1892_v58  ;;  %v319_v55 = vld [vmem:[%s2078_s6 + $0xf0] sm:$0xff]  ;;  %v1547_v58 = vcombine.low %v307_v46, %v311_v47 }
  0x32   : > { %1791 = vmatpush3.bf16.msra.mxu1 %v1893_v59  ;;  %1752 = vmatprep.subr.bf16.mxu0 %v1894_v60  ;;  %v1549_v59 = vcombine.low %v308_v48, %v312_v49  ;;  %v1556_v60 = vcombine.high %v315_v54, %v319_v55 }
  0x33   : > { %1792 = vmatprep.subr.bf16.mxu1 %v1895_v61  ;;  %1041 = vmatprep.mubr.bf16.mxu0 %v1544_v4  ;;  %v1558_v61 = vcombine.high %v316_v56, %v320_v57 }
  0x34   : > { %1106 = vmatprep.mubr.bf16.mxu1 %v1546_v5 }
  0x35   : > { %1753 = vmatpush3.bf16.msra.mxu0 %v1896_v62  ;;  %v1555_v62 = vcombine.low %v315_v54, %v319_v55 }
  0x36   : > { %1793 = vmatpush3.bf16.msra.mxu1 %v1897_v63  ;;  %1754 = vmatprep.subr.bf16.mxu0 %v1898_v8  ;;  %v1557_v63 = vcombine.low %v316_v56, %v320_v57 }
  0x37   : > { %1794 = vmatprep.subr.bf16.mxu1 %v1899_v9 }
  0x38   : > { %1042 = vmatmul.mubr.bf16.gmra.mrb[8].mxu0 %v1543_v6 }
  0x39   : > { %1107 = vmatmul.mubr.bf16.gmra.mrb[8].mxu1 %v1545_v7  ;;  %1755 = vmatpush3.bf16.msra.mxu0 %v1900_v10 }
  0x3a   : > { %1795 = vmatpush3.bf16.msra.mxu1 %v1901_v11  ;;  %1756 = vmatprep.subr.bf16.mxu0 %v1902_v12 }
  0x3b   : > { %1796 = vmatprep.subr.bf16.mxu1 %v1903_v13  ;;  %1049 = vmatprep.mubr.bf16.mxu0 %v1552_v19 }
  0x3c   : > { %1114 = vmatprep.mubr.bf16.mxu1 %v1554_v22 }
  0x3d   : > { %1757 = vmatpush3.bf16.msra.mxu0 %v1904_v14 }
  0x3e   : > { %1797 = vmatpush3.bf16.msra.mxu1 %v1905_v15  ;;  %1758 = vmatprep.subr.bf16.mxu0 %v1906_v24 }
  0x3f   : > { %1798 = vmatprep.subr.bf16.mxu1 %v1907_v25 }
  0x40   : > { %1050 = vmatmul.mubr.bf16.gmra.mrb[12].mxu0 %v1551_v21 }
  0x41   : > { %1115 = vmatmul.mubr.bf16.gmra.mrb[12].mxu1 %v1553_v23  ;;  %1759 = vmatpush3.bf16.msra.mxu0 %v1908_v26 }
  0x42   : > { %1799 = vmatpush3.bf16.msra.mxu1 %v1909_v27  ;;  %1760 = vmatprep.subr.bf16.mxu0 %v1910_v28 }
  0x43   : > { %1800 = vmatprep.subr.bf16.mxu1 %v1911_v29  ;;  %1155 = vmatprep.mubr.bf16.mxu0 %v1532_v35 }
  0x44   : > { %1220 = vmatprep.mubr.bf16.mxu1 %v1534_v40 }
  0x45   : > { %1761 = vmatpush3.bf16.msra.mxu0 %v1912_v30 }
  0x46   : > { %1801 = vmatpush3.bf16.msra.mxu1 %v1913_v31 }
  0x48   : > { %1156 = vmatmul.mubr.bf16.vlgmr.msra.gmra.mrb[16].mxu0 %v1531_v34 }
  0x49   : > { %1221 = vmatmul.mubr.bf16.vlgmr.msra.gmra.mrb[16].mxu1 %v1533_v39  ;;  %1163 = vmatprep.mubr.bf16.mxu0 %v1540_v44 }
  0x4a   : > { %1228 = vmatprep.mubr.bf16.mxu1 %v1542_v45 }
  0x50   : > { %1164 = vmatmul.mubr.bf16.gmra.mrb[20].mxu0 %v1539_v50 }
  0x51   : > { %1229 = vmatmul.mubr.bf16.gmra.mrb[20].mxu1 %v1541_v51  ;;  %1171 = vmatprep.mubr.bf16.mxu0 %v1548_v52 }
  0x52   : > { %1236 = vmatprep.mubr.bf16.mxu1 %v1550_v53 }
  0x58   : > { %1172 = vmatmul.mubr.bf16.gmra.mrb[24].mxu0 %v1547_v58 }
  0x59   : > { %1237 = vmatmul.mubr.bf16.gmra.mrb[24].mxu1 %v1549_v59  ;;  %1179 = vmatprep.mubr.bf16.mxu0 %v1556_v60 }
  0x5a   : > { %1244 = vmatprep.mubr.bf16.mxu1 %v1558_v61 }
  0x60   : > { %1180 = vmatmul.mubr.bf16.gmra.mrb[28].mxu0 %v1555_v62 }
  0x61   : > { %1245 = vmatmul.mubr.bf16.gmra.mrb[28].mxu1 %v1557_v63 }
  0xfb   : > { %v1682_v0 = vpop.f32.mrb[0].mxu0 }
  0xfc   : > { %v1722_v1 = vpop.f32.mrb[0].mxu1  ;;  %v1683_v2 = vpop.f32.mrb[1].mxu0 }
  0xfd   : > { %v1684_v3 = vadd.f32 %v1683_v2, %v1682_v0  ;;  %v1723_v4 = vpop.f32.mrb[1].mxu1  ;;  %v1685_v5 = vpop.f32.mrb[2].mxu0 }
  0xfe   : > { %v1724_v6 = vadd.f32 %v1723_v4, %v1722_v1  ;;  %v1725_v7 = vpop.f32.mrb[2].mxu1  ;;  %v1686_v8 = vpop.f32.mrb[3].mxu0 }
  0xff   : > { %v1687_v9 = vadd.f32 %v1686_v8, %v1685_v5  ;;  %v1726_v10 = vpop.f32.mrb[3].mxu1 }
 0x100   : > { %v1093_v11 = vadd.f32 %v1724_v6, %v1684_v3  ;;  %v1727_v12 = vadd.f32 %v1726_v10, %v1725_v7  ;;  %v2227_v7 = vld [vmem:[%s2273_s2] ss:$0 sm:$0xff] }
 0x102   : > { %v1096_v13 = vadd.f32 %v1727_v12, %v1687_v9 }
 0x103   : > { %v1688_v14 = vpop.f32.mrb[4].mxu0 }
 0x104   : > { %v1728_v15 = vpop.f32.mrb[4].mxu1  ;;  %v1689_v16 = vpop.f32.mrb[5].mxu0 }
 0x105   : > { %v1690_v17 = vadd.f32 %v1689_v16, %v1688_v14  ;;  %v1729_v18 = vpop.f32.mrb[5].mxu1  ;;  %v1691_v19 = vpop.f32.mrb[6].mxu0 }
 0x106   : > { %v1730_v20 = vadd.f32 %v1729_v18, %v1728_v15  ;;  %v1731_v21 = vpop.f32.mrb[6].mxu1  ;;  %v1692_v22 = vpop.f32.mrb[7].mxu0 }
 0x107   : > { %v1693_v23 = vadd.f32 %v1692_v22, %v1691_v19  ;;  %v1732_v24 = vpop.f32.mrb[7].mxu1 }
 0x108   : > { %v1101_v25 = vadd.f32 %v1730_v20, %v1690_v17  ;;  %v1733_v26 = vadd.f32 %v1732_v24, %v1731_v21 }
 0x10a   : > { %v2214_v27 = vadd.f32 %v1733_v26, %v1693_v23 }
 0x10b   : > { %v1694_v28 = vpop.f32.mrb[8].mxu0 }
 0x10c   : > { %v1734_v29 = vpop.f32.mrb[8].mxu1  ;;  %v1695_v30 = vpop.f32.mrb[9].mxu0 }
 0x10d   : > { %v1735_v31 = vpop.f32.mrb[9].mxu1  ;;  %v1696_v32 = vadd.f32 %v1695_v30, %v1694_v28  ;;  %v1697_v34 = vpop.f32.mrb[10].mxu0 }
 0x10e   : > { %v1736_v33 = vadd.f32 %v1735_v31, %v1734_v29  ;;  %v1737_v35 = vpop.f32.mrb[10].mxu1  ;;  %v1698_v36 = vpop.f32.mrb[11].mxu0 }
 0x10f   : > { %v1738_v37 = vpop.f32.mrb[11].mxu1  ;;  %v1699_v39 = vadd.f32 %v1698_v36, %v1697_v34 }
 0x110   : > { %v2216_v38 = vadd.f32 %v1736_v33, %v1696_v32  ;;  %v1739_v40 = vadd.f32 %v1738_v37, %v1737_v35 }
 0x112   : > { %v2218_v41 = vadd.f32 %v1739_v40, %v1699_v39 }
 0x113   : > { %v1700_v42 = vpop.f32.mrb[12].mxu0 }
 0x114   : > { %v1740_v43 = vpop.f32.mrb[12].mxu1  ;;  %v1701_v44 = vpop.f32.mrb[13].mxu0 }
 0x115   : > { %v1702_v45 = vadd.f32 %v1701_v44, %v1700_v42  ;;  %v1741_v46 = vpop.f32.mrb[13].mxu1  ;;  %v1703_v47 = vpop.f32.mrb[14].mxu0 }
 0x116   : > { %v1742_v48 = vadd.f32 %v1741_v46, %v1740_v43  ;;  %v1743_v49 = vpop.f32.mrb[14].mxu1  ;;  %v1704_v50 = vpop.f32.mrb[15].mxu0 }
 0x117   : > { %v1705_v51 = vadd.f32 %v1704_v50, %v1703_v47  ;;  %v1744_v52 = vpop.f32.mrb[15].mxu1 }
 0x118   : > { %v2220_v53 = vadd.f32 %v1742_v48, %v1702_v45  ;;  %v1745_v54 = vadd.f32 %v1744_v52, %v1743_v49 }
 0x11a   : > { %v2222_v55 = vadd.f32 %v1745_v54, %v1705_v51 }
 0x11b   : > { %v1762_v56 = vpop.f32.mrb[16].mxu0 }
 0x11c   : > { %v1802_v57 = vpop.f32.mrb[16].mxu1  ;;  %v1763_v58 = vpop.f32.mrb[17].mxu0 }
 0x11d   : > { %v1764_v59 = vadd.f32 %v1763_v58, %v1762_v56  ;;  %v1803_v60 = vpop.f32.mrb[17].mxu1  ;;  %v1765_v61 = vpop.f32.mrb[18].mxu0 }
 0x11e   : > { %v1804_v62 = vadd.f32 %v1803_v60, %v1802_v57  ;;  %v1805_v63 = vpop.f32.mrb[18].mxu1  ;;  %v1766_v0 = vpop.f32.mrb[19].mxu0 }
 0x11f   : > { %v1158_v1 = vadd.f32 %v1764_v59, %v1093_v11  ;;  %v1767_v2 = vadd.f32 %v1766_v0, %v1765_v61  ;;  %v1806_v3 = vpop.f32.mrb[19].mxu1 }
 0x120   : > { %v1807_v4 = vadd.f32 %v1806_v3, %v1805_v63 }
 0x121   : > { %v1223_v5 = vadd.f32 %v1804_v62, %v1158_v1  ;;  %v1161_v6 = vadd.f32 %v1767_v2, %v1096_v13 }
 0x123   : > { %v1226_v8 = vadd.f32 %v1807_v4, %v1161_v6  ;;  %v1768_v9 = vpop.f32.mrb[20].mxu0  ;;  %v2230_v14 = vadd.f32 %v2227_v7, %v1223_v5 }
 0x124   : > { %v1808_v10 = vpop.f32.mrb[20].mxu1  ;;  %v1769_v12 = vpop.f32.mrb[21].mxu0 }
 0x125   : > { %v2233_v15 = vadd.f32 %v2227_v7, %v1226_v8  ;;  %v1770_v11 = vadd.f32 %v1769_v12, %v1768_v9  ;;  %v1809_v16 = vpop.f32.mrb[21].mxu1  ;;  %v1771_v17 = vpop.f32.mrb[22].mxu0 }
 0x126   : > { %v1810_v18 = vadd.f32 %v1809_v16, %v1808_v10  ;;  %v1811_v13 = vpop.f32.mrb[22].mxu1  ;;  %v1772_v19 = vpop.f32.mrb[23].mxu0 }
 0x127   : > { %v1280_v20 = vadd.f32 %v2233_v15, %v2230_v14  ;;  %v1166_v21 = vadd.f32 %v1770_v11, %v1101_v25  ;;  %v1773_v22 = vadd.f32 %v1772_v19, %v1771_v17  ;;  %v1812_v23 = vpop.f32.mrb[23].mxu1 }
 0x128   : > { %v1813_v24 = vadd.f32 %v1812_v23, %v1811_v13 }
 0x129   : > { %v1231_v26 = vadd.f32 %v1810_v18, %v1166_v21  ;;  %v1169_v28 = vadd.f32 %v1773_v22, %v2214_v27 }
 0x12b   : > { %v1255_v29 = vadd.f32 %v2227_v7, %v1231_v26  ;;  %v1234_v30 = vadd.f32 %v1813_v24, %v1169_v28  ;;  %v1774_v31 = vpop.f32.mrb[24].mxu0 }
 0x12c   : > { %v1814_v32 = vpop.f32.mrb[24].mxu1  ;;  %v1775_v33 = vpop.f32.mrb[25].mxu0 }
 0x12d   : > { %v1281_v34 = vadd.f32 %v1280_v20, %v1255_v29  ;;  %v1256_v35 = vadd.f32 %v2227_v7, %v1234_v30  ;;  %v1776_v36 = vadd.f32 %v1775_v33, %v1774_v31  ;;  %v1815_v37 = vpop.f32.mrb[25].mxu1  ;;  %v1777_v39 = vpop.f32.mrb[26].mxu0 }
 0x12e   : > { %v1816_v40 = vadd.f32 %v1815_v37, %v1814_v32  ;;  %v1817_v25 = vpop.f32.mrb[26].mxu1  ;;  %v1778_v42 = vpop.f32.mrb[27].mxu0 }
 0x12f   : > { %v1282_v43 = vadd.f32 %v1281_v34, %v1256_v35  ;;  %v1174_v44 = vadd.f32 %v1776_v36, %v2216_v38  ;;  %v1779_v45 = vadd.f32 %v1778_v42, %v1777_v39  ;;  %v1818_v27 = vpop.f32.mrb[27].mxu1 }
 0x130   : > { %v1819_v46 = vadd.f32 %v1818_v27, %v1817_v25 }
 0x131   : > { %v1239_v47 = vadd.f32 %v1816_v40, %v1174_v44  ;;  %v1177_v48 = vadd.f32 %v1779_v45, %v2218_v41 }
 0x133   : > { %v1257_v49 = vadd.f32 %v2227_v7, %v1239_v47  ;;  %v1242_v50 = vadd.f32 %v1819_v46, %v1177_v48  ;;  %v1780_v51 = vpop.f32.mrb[28].mxu0 }
 0x134   : > { %v1820_v52 = vpop.f32.mrb[28].mxu1  ;;  %v1781_v54 = vpop.f32.mrb[29].mxu0 }
 0x135   : > { %v1283_v56 = vadd.f32 %v1282_v43, %v1257_v49  ;;  %v1258_v57 = vadd.f32 %v2227_v7, %v1242_v50  ;;  %v1782_v58 = vadd.f32 %v1781_v54, %v1780_v51  ;;  %v1821_v59 = vpop.f32.mrb[29].mxu1  ;;  %v1783_v60 = vpop.f32.mrb[30].mxu0 }
 0x136   : > { %v1822_v61 = vadd.f32 %v1821_v59, %v1820_v52  ;;  %v1823_v38 = vpop.f32.mrb[30].mxu1  ;;  %v1784_v62 = vpop.f32.mrb[31].mxu0 }
 0x137   : > { %v1284_v63 = vadd.f32 %v1283_v56, %v1258_v57  ;;  %v1182_v0 = vadd.f32 %v1782_v58, %v2220_v53  ;;  %v1785_v1 = vadd.f32 %v1784_v62, %v1783_v60  ;;  %v1824_v41 = vpop.f32.mrb[31].mxu1 }
 0x138   : > { %v1825_v2 = vadd.f32 %v1824_v41, %v1823_v38 }
 0x139   : > { %v1247_v3 = vadd.f32 %v1822_v61, %v1182_v0  ;;  %v1185_v4 = vadd.f32 %v1785_v1, %v2222_v55 }
 0x13b   : > { %v1259_v5 = vadd.f32 %v2227_v7, %v1247_v3  ;;  %v1250_v6 = vadd.f32 %v1825_v2, %v1185_v4 }
 0x13d   : > { %v1285_v8 = vadd.f32 %v1284_v63, %v1259_v5  ;;  %v1260_v9 = vadd.f32 %v2227_v7, %v1250_v6 }
 0x13f   : > { %v1286_v10 = vadd.f32 %v1285_v8, %v1260_v9 }
 0x141   : > { %v1287_v12 = vrot.slane %v1286_v10, 4 }
 0x143   : > { %v1288_v11 = vadd.f32 %v1287_v12, %v1286_v10 }
 0x145   : > { %v1289_v16 = vrot.slane %v1288_v11, 2 }
 0x147   : > { %v1290_v17 = vadd.f32 %v1289_v16, %v1288_v11 }
 0x149   : > { %v1291_v18 = vrot.slane %v1290_v17, 1 }
 0x14b   : > { %v1292_v13 = vadd.f32 %v1291_v18, %v1290_v17 }
 0x14d   : > { %v1293_v53 = vmul.f32 0.015625, %v1292_v13 }
 0x14f   : > { %v1294_v19 = vsub.f32 %v2230_v14, %v1293_v53  ;;  %v1295_v20 = vsub.f32 %v2233_v15, %v1293_v53  ;;  %v1296_v21 = vsub.f32 %v1255_v29, %v1293_v53  ;;  %v1297_v55 = vsub.f32 %v1256_v35, %v1293_v53 }
 0x150   : > { %v1298_v22 = vsub.f32 %v1257_v49, %v1293_v53  ;;  %v1299_v23 = vsub.f32 %v1258_v57, %v1293_v53  ;;  %v1300_v24 = vsub.f32 %v1259_v5, %v1293_v53  ;;  %v1301_v26 = vsub.f32 %v1260_v9, %v1293_v53 }
 0x151   : > { %v1302_v28 = vmul.f32 %v1294_v19, %v1294_v19  ;;  %v1303_v7 = vmul.f32 %v1295_v20, %v1295_v20  ;;  %v1304_v30 = vmul.f32 %v1296_v21, %v1296_v21  ;;  %v1305_v32 = vmul.f32 %v1297_v55, %v1297_v55 }
 0x152   : > { %v1306_v34 = vmul.f32 %v1298_v22, %v1298_v22  ;;  %v1307_v37 = vmul.f32 %v1299_v23, %v1299_v23  ;;  %v1308_v40 = vmul.f32 %v1300_v24, %v1300_v24  ;;  %v1309_v25 = vmul.f32 %v1301_v26, %v1301_v26 }
 0x153   : > { %v1310_v31 = vadd.f32 %v1303_v7, %v1302_v28 }
 0x155   : > { %v1311_v33 = vadd.f32 %v1310_v31, %v1304_v30 }
 0x157   : > { %v1312_v36 = vadd.f32 %v1311_v33, %v1305_v32 }
 0x159   : > { %v1313_v39 = vadd.f32 %v1312_v36, %v1306_v34 }
 0x15b   : > { %v1314_v14 = vadd.f32 %v1313_v39, %v1307_v37 }
 0x15d   : > { %v1315_v15 = vadd.f32 %v1314_v14, %v1308_v40 }
 0x15f   : > { %v1316_v29 = vadd.f32 %v1315_v15, %v1309_v25 }
 0x161   : > { %v1317_v35 = vrot.slane %v1316_v29, 4 }
 0x163   : > { %v1318_v42 = vadd.f32 %v1317_v35, %v1316_v29 }
 0x165   : > { %v1319_v43 = vrot.slane %v1318_v42, 2 }
 0x167   : > { %v1320_v44 = vadd.f32 %v1319_v43, %v1318_v42 }
 0x169   : > { %v1321_v45 = vrot.slane %v1320_v44, 1 }
 0x16b   : > { %v1322_v27 = vadd.f32 %v1321_v45, %v1320_v44 }
 0x16d   : > { %v1323_v46 = vmul.f32 0.015625, %v1322_v27 }
 0x16f   : > { %v1324_v47 = vadd.f32 1e-05, %v1323_v46 }
 0x171   : > { %1914 = vrsqrt.f32 %v1324_v47 }
 0x17b   : > { %v1915_v48 = vpop.eup %1914 }
 0x17c   : > { %v1326_v49 = vmul.f32 %v1915_v48, %v1294_v19  ;;  %v1327_v50 = vmul.f32 %v1915_v48, %v1295_v20  ;;  %v1328_v51 = vmul.f32 %v1915_v48, %v1296_v21  ;;  %v1329_v52 = vmul.f32 %v1915_v48, %v1297_v55 }
 0x17d   : > { %v1330_v54 = vmul.f32 %v1915_v48, %v1298_v22  ;;  %v1331_v56 = vmul.f32 %v1915_v48, %v1299_v23  ;;  %v1332_v57 = vmul.f32 %v1915_v48, %v1300_v24  ;;  %v1333_v58 = vmul.f32 %v1915_v48, %v1301_v26 }
 0x17e   : > { %vm1334_vm0 = vcmp.ge.f32.partialorder %v1326_v49, 0.0  ;;  %vm1335_vm1 = vcmp.ge.f32.partialorder %v1327_v50, 0.0  ;;  %vm1336_vm2 = vcmp.ge.f32.partialorder %v1328_v51, 0.0  ;;  %vm1337_vm3 = vcmp.ge.f32.partialorder %v1329_v52, 0.0 }
 0x17f   : > { %vm1338_vm4 = vcmp.ge.f32.partialorder %v1330_v54, 0.0  ;;  %vm1339_vm5 = vcmp.ge.f32.partialorder %v1331_v56, 0.0  ;;  %vm1340_vm6 = vcmp.ge.f32.partialorder %v1332_v57, 0.0  ;;  %vm1341_vm7 = vcmp.ge.f32.partialorder %v1333_v58, 0.0 }
 0x180   : > { %v1342_v59 = vmul.f32 0.2, %v1326_v49  ;;  %v1343_v60 = vmul.f32 0.2, %v1327_v50  ;;  %v1344_v61 = vmul.f32 0.2, %v1328_v51 }
 0x181   : > { %v1345_v38 = vmul.f32 0.2, %v1329_v52  ;;  %v1346_v62 = vmul.f32 0.2, %v1330_v54  ;;  %v1347_v63 = vmul.f32 0.2, %v1331_v56 }
 0x182   : > { %v1348_v0 = vmul.f32 0.2, %v1332_v57  ;;  %v1349_v1 = vmul.f32 0.2, %v1333_v58  ;;  %v1350_v41 = vsel %vm1334_vm0, %v1326_v49, %v1342_v59  ;;  %v1351_v2 = vsel %vm1335_vm1, %v1327_v50, %v1343_v60 }
 0x183   : > { %v1352_v3 = vsel %vm1336_vm2, %v1328_v51, %v1344_v61  ;;  %v1353_v4 = vsel %vm1337_vm3, %v1329_v52, %v1345_v38  ;;  %v1354_v5 = vsel %vm1338_vm4, %v1330_v54, %v1346_v62  ;;  %v1355_v6 = vsel %vm1339_vm5, %v1331_v56, %v1347_v63 }
 0x184   : > { %v1356_v8 = vsel %vm1340_vm6, %v1332_v57, %v1348_v0  ;;  %v1357_v9 = vsel %vm1341_vm7, %v1333_v58, %v1349_v1  ;;  %v1646_v10 = vpack.c.bf16 %v1351_v2, %v1350_v41  ;;  %v1651_v12 = vpack.c.bf16 %v1353_v4, %v1352_v3 }
 0x185   : > { %v1656_v11 = vpack.c.bf16 %v1355_v6, %v1354_v5  ;;  %v1661_v16 = vpack.c.bf16 %v1357_v9, %v1356_v8 }
 0x186   : > { %1647 = vst [vmem:[%s260_s12] sm:$0xff] %v1646_v10   ;;  %1663 = vst [vmem:[%s260_s12 + $0x8] sm:$0xff] %v1651_v12  }
 0x187   : > { %1664 = vst [vmem:[%s260_s12 + $0x10] sm:$0xff] %v1656_v11   ;;  %1665 = vst [vmem:[%s260_s12 + $0x18] sm:$0xff] %v1661_v16  }
 0x188 PF: > { %s13_s14 = sadd.s32 1, %s1938_s14   ;;  %s2275_s12 = smov %s1934_s13 }
 0x189   : > { %p10_p5 = scmp.ge.s32.totalorder %s13_s14, 4   ;;  %s2276_s13 = smov %s2278_s15 }
 0x18b   :  { %12 = sbr.rel (!%p10_p5) target bundleno = 2 (0x2), region = 76 }

// kernel: discriminator_forward.7
= control target key start
LH: loop header
LB: loop body
LE: loop exit
PB: predicated region body
PF: predicated region fallthrough
CT: control target
= control target key end

     0   :  { %s3264_s12 = smov 0   ;;  %s3266_s13 = smov 0   ;;  %s4142_s0 = inlined_call_operand.vmem [shape: bf16[2,16,2048], index: 0, kind: input, shape index: {}]   ;;  %s4143_s1 = inlined_call_operand.vmem [shape: bf16[2048,256], index: 1, kind: input, shape index: {}]   ;;  %s4144_s2 = inlined_call_operand.vmem [shape: f32[1,256], index: 2, kind: input, shape index: {}]   ;;  %s4145_s3 = inlined_call_operand.vmem [shape: bf16[2,16,256], index: 3, kind: output, shape index: {}]  }
   0x1   :  { %s3268_s14 = smov 0  }
   0x2 LB: > { %s32_s15 = sadd.s32 1, %s3238_s13  ;;  %p2495_p0 = scmp.ge.s32.totalorder %s3242_s14, 1  ;;  %s3242_s14 = sphi %s3268_s14, %s13_s14   ;;  %s3238_s13 = sphi %s3266_s13, %s4147_s13   ;;  %s3234_s12 = sphi %s3264_s12, %s4146_s12  }
   0x3   : > { %p34_p1 = scmp.ge.s32.totalorder %s32_s15, 2  ;;  %p194_p2 = scmp.lt.s32.totalorder %s3242_s14, 3 }
   0x5   : > { %s4149_s15 = smov (%p34_p1, %s32_s15), 0  ;;  %p195_p3 = pnand %p2495_p0, %p194_p2 }
   0x6   : > { %v2832_v0 = vld [vmem:[%s4143_s1 + $0x4] ss:$8 sps:$4 sm:$0xff] (!%p195_p3)   ;;  %v2836_v2 = vld [vmem:[%s4143_s1] ss:$8 sps:$4 sm:$0xff] (!%p195_p3)   ;;  %v2838_v4 = vld [vmem:[%s4143_s1 + $0x14] ss:$8 sps:$4 sm:$0xff] (!%p195_p3)  }
   0x7   : > { %198 = sbr.rel (%p195_p3) target bundleno = 540 (0x21c), region = 32  ;;  %v2834_v1 = vld [vmem:[%s4143_s1 + $0x404] ss:$8 sps:$4 sm:$0xff] (!%p195_p3)   ;;  %1933 = vmatprep.subr.bf16.mxu1 (!%p195_p3), %v2832_v0  ;;  %v2837_v3 = vld [vmem:[%s4143_s1 + $0x400] ss:$8 sps:$4 sm:$0xff] (!%p195_p3)   ;;  %p241_p4 = scmp.lt.s32.totalorder (!%p195_p3), %s3234_s12, 1 }
   0x8   : > { %2105 = vmatprep.subr.bf16.mxu0 (!%p195_p3), %v2834_v1  ;;  %1934 = vmatpush1.bf16.msra.mxu1 (!%p195_p3), %v2836_v2  ;;  %v2840_v5 = vld [vmem:[%s4143_s1 + $0x414] ss:$8 sps:$4 sm:$0xff] (!%p195_p3)   ;;  %v2842_v6 = vld [vmem:[%s4143_s1 + $0x10] ss:$8 sps:$4 sm:$0xff] (!%p195_p3)   ;;  %v2844_v8 = vld [vmem:[%s4143_s1 + $0x24] ss:$8 sps:$4 sm:$0xff] (!%p195_p3)  }
   0x9   : > { %2106 = vmatpush1.bf16.msra.mxu0 (!%p195_p3), %v2837_v3  ;;  %1935 = vmatprep.subr.bf16.mxu1 (!%p195_p3), %v2838_v4  ;;  %v2843_v7 = vld [vmem:[%s4143_s1 + $0x410] ss:$8 sps:$4 sm:$0xff] (!%p195_p3)   ;;  %v2846_v9 = vld [vmem:[%s4143_s1 + $0x424] ss:$8 sps:$4 sm:$0xff] (!%p195_p3)   ;;  %v2848_v10 = vld [vmem:[%s4143_s1 + $0x20] ss:$8 sps:$4 sm:$0xff] (!%p195_p3)  }
   0xa   : > { %2107 = vmatprep.subr.bf16.mxu0 (!%p195_p3), %v2840_v5  ;;  %v2849_v11 = vld [vmem:[%s4143_s1 + $0x420] ss:$8 sps:$4 sm:$0xff] (!%p195_p3)   ;;  %v2850_v12 = vld [vmem:[%s4143_s1 + $0x34] ss:$8 sps:$4 sm:$0xff] (!%p195_p3)   ;;  %v2854_v14 = vld [vmem:[%s4143_s1 + $0x30] ss:$8 sps:$4 sm:$0xff] (!%p195_p3)  }
   0xb   : > { %v2852_v13 = vld [vmem:[%s4143_s1 + $0x434] ss:$8 sps:$4 sm:$0xff] (!%p195_p3)   ;;  %v2855_v15 = vld [vmem:[%s4143_s1 + $0x430] ss:$8 sps:$4 sm:$0xff] (!%p195_p3)   ;;  %v2856_v16 = vld [vmem:[%s4143_s1 + $0x44] ss:$8 sps:$4 sm:$0xff] (!%p195_p3)  }
   0xc   : > { %1936 = vmatpush1.bf16.msra.mxu1 (!%p195_p3), %v2842_v6  ;;  %v2858_v17 = vld [vmem:[%s4143_s1 + $0x444] ss:$8 sps:$4 sm:$0xff] (!%p195_p3)   ;;  %v2860_v18 = vld [vmem:[%s4143_s1 + $0x40] ss:$8 sps:$4 sm:$0xff] (!%p195_p3)   ;;  %v2862_v20 = vld [vmem:[%s4143_s1 + $0x54] ss:$8 sps:$4 sm:$0xff] (!%p195_p3)  }
   0xd   : > { %2108 = vmatpush1.bf16.msra.mxu0 (!%p195_p3), %v2843_v7  ;;  %1937 = vmatprep.subr.bf16.mxu1 (!%p195_p3), %v2844_v8  ;;  %v2861_v19 = vld [vmem:[%s4143_s1 + $0x440] ss:$8 sps:$4 sm:$0xff] (!%p195_p3)   ;;  %v2864_v21 = vld [vmem:[%s4143_s1 + $0x454] ss:$8 sps:$4 sm:$0xff] (!%p195_p3)   ;;  %v2866_v22 = vld [vmem:[%s4143_s1 + $0x50] ss:$8 sps:$4 sm:$0xff] (!%p195_p3)  }
   0xe   : > { %2109 = vmatprep.subr.bf16.mxu0 %v2846_v9  ;;  %v2867_v23 = vld [vmem:[%s4143_s1 + $0x450] ss:$8 sps:$4 sm:$0xff]   ;;  %v2868_v24 = vld [vmem:[%s4143_s1 + $0x64] ss:$8 sps:$4 sm:$0xff]   ;;  %v2872_v26 = vld [vmem:[%s4143_s1 + $0x60] ss:$8 sps:$4 sm:$0xff]  }
   0xf   : > { %v2870_v25 = vld [vmem:[%s4143_s1 + $0x464] ss:$8 sps:$4 sm:$0xff]   ;;  %v2873_v27 = vld [vmem:[%s4143_s1 + $0x460] ss:$8 sps:$4 sm:$0xff]   ;;  %v2874_v28 = vld [vmem:[%s4143_s1 + $0x74] ss:$8 sps:$4 sm:$0xff]  }
  0x10   : > { %1938 = vmatpush1.bf16.msra.mxu1 %v2848_v10  ;;  %v2876_v29 = vld [vmem:[%s4143_s1 + $0x474] ss:$8 sps:$4 sm:$0xff]   ;;  %v2878_v30 = vld [vmem:[%s4143_s1 + $0x70] ss:$8 sps:$4 sm:$0xff]   ;;  %v2880_v32 = vld [vmem:[%s4143_s1 + $0x84] ss:$8 sps:$4 sm:$0xff]  }
  0x11   : > { %2110 = vmatpush1.bf16.msra.mxu0 %v2849_v11  ;;  %1939 = vmatprep.subr.bf16.mxu1 %v2850_v12  ;;  %v2879_v31 = vld [vmem:[%s4143_s1 + $0x470] ss:$8 sps:$4 sm:$0xff]   ;;  %v2882_v33 = vld [vmem:[%s4143_s1 + $0x484] ss:$8 sps:$4 sm:$0xff]   ;;  %v2884_v34 = vld [vmem:[%s4143_s1 + $0x80] ss:$8 sps:$4 sm:$0xff]  }
  0x12   : > { %2111 = vmatprep.subr.bf16.mxu0 %v2852_v13  ;;  %v2885_v35 = vld [vmem:[%s4143_s1 + $0x480] ss:$8 sps:$4 sm:$0xff]   ;;  %v2886_v36 = vld [vmem:[%s4143_s1 + $0x94] ss:$8 sps:$4 sm:$0xff]   ;;  %s4151_s12 = smov (!%p241_p4, %s3234_s12), 1 }
  0x13   : > { %v2888_v37 = vld [vmem:[%s4143_s1 + $0x494] ss:$8 sps:$4 sm:$0xff]   ;;  %v2890_v38 = vld [vmem:[%s4143_s1 + $0x90] ss:$8 sps:$4 sm:$0xff]   ;;  %v2892_v40 = vld [vmem:[%s4143_s1 + $0xa4] ss:$8 sps:$4 sm:$0xff]  }
  0x14   : > { %1940 = vmatpush1.bf16.msra.mxu1 %v2854_v14  ;;  %v2891_v39 = vld [vmem:[%s4143_s1 + $0x490] ss:$8 sps:$4 sm:$0xff]   ;;  %s2776_s29 = sshll.u32 %s4151_s12, 7  ;;  %v2894_v41 = vld [vmem:[%s4143_s1 + $0x4a4] ss:$8 sps:$4 sm:$0xff]   ;;  %s2777_s18 = sshll.u32 %s4151_s12, 4 }
  0x15   : > { %2112 = vmatpush1.bf16.msra.mxu0 %v2855_v15  ;;  %1941 = vmatprep.subr.bf16.mxu1 %v2856_v16  ;;  %v2896_v42 = vld [vmem:[%s4143_s1 + $0xa0] ss:$8 sps:$4 sm:$0xff]   ;;  %s3424_s11 = scalar_lea.vmem %s4142_s0, %s2776_s29  ;;  %v2898_v44 = vld [vmem:[%s4143_s1 + $0xb4] ss:$8 sps:$4 sm:$0xff]   ;;  %v2902_v46 = vld [vmem:[%s4143_s1 + $0xb0] ss:$8 sps:$4 sm:$0xff]   ;;  %s275_s21 = scalar_lea.vmem %s4145_s3, %s2777_s18 }
  0x16   : > { %2113 = vmatprep.subr.bf16.mxu0 %v2858_v17  ;;  %v2897_v43 = vld [vmem:[%s4143_s1 + $0x4a0] ss:$8 sps:$4 sm:$0xff]   ;;  %v2900_v45 = vld [vmem:[%s4143_s1 + $0x4b4] ss:$8 sps:$4 sm:$0xff]   ;;  %v2903_v47 = vld [vmem:[%s4143_s1 + $0x4b0] ss:$8 sps:$4 sm:$0xff]  }
  0x17   : > { %v301_v48 = vld [vmem:[%s3424_s11] sm:$0xff]  ;;  %v2910_v58 = vld [vmem:[%s4143_s1 + $0xd4] ss:$8 sps:$4 sm:$0xff]   ;;  %v2914_v60 = vld [vmem:[%s4143_s1 + $0xd0] ss:$8 sps:$4 sm:$0xff]  }
  0x18   : > { %1942 = vmatpush1.bf16.msra.mxu1 %v2860_v18  ;;  %v309_v49 = vld [vmem:[%s3424_s11 + $0x40] sm:$0xff]  ;;  %v2912_v59 = vld [vmem:[%s4143_s1 + $0x4d4] ss:$8 sps:$4 sm:$0xff]   ;;  %v2915_v61 = vld [vmem:[%s4143_s1 + $0x4d0] ss:$8 sps:$4 sm:$0xff]  }
  0x19   : > { %2114 = vmatpush1.bf16.msra.mxu0 %v2861_v19  ;;  %1943 = vmatprep.subr.bf16.mxu1 %v2862_v20  ;;  %v2904_v50 = vld [vmem:[%s4143_s1 + $0xc4] ss:$8 sps:$4 sm:$0xff]   ;;  %v2501_v52 = vcombine.high %v301_v48, %v309_v49  ;;  %v2908_v56 = vld [vmem:[%s4143_s1 + $0xc0] ss:$8 sps:$4 sm:$0xff]   ;;  %v2922_v2 = vld [vmem:[%s4143_s1 + $0xf4] ss:$8 sps:$4 sm:$0xff]   ;;  %v2500_v8 = vcombine.low %v301_v48, %v309_v49 }
  0x1a   : > { %2115 = vmatprep.subr.bf16.mxu0 %v2864_v21  ;;  %v2906_v51 = vld [vmem:[%s4143_s1 + $0x4c4] ss:$8 sps:$4 sm:$0xff]   ;;  %v2909_v57 = vld [vmem:[%s4143_s1 + $0x4c0] ss:$8 sps:$4 sm:$0xff]   ;;  %v2924_v3 = vld [vmem:[%s4143_s1 + $0x4f4] ss:$8 sps:$4 sm:$0xff]  }
  0x1b   : > { %v305_v53 = vld [vmem:[%s3424_s11 + $0x20] sm:$0xff]  ;;  %1965 = vmatprep.mubr.bf16.mxu1 %v2501_v52  ;;  %v2926_v4 = vld [vmem:[%s4143_s1 + $0xf0] ss:$8 sps:$4 sm:$0xff]   ;;  %v2936_v12 = vld [vmem:[%s4143_s1 + $0x114] ss:$8 sps:$4 sm:$0xff]  }
  0x1c   : > { %1944 = vmatpush1.bf16.msra.mxu1 %v2866_v22  ;;  %v313_v54 = vld [vmem:[%s3424_s11 + $0x60] sm:$0xff]  ;;  %v2927_v5 = vld [vmem:[%s4143_s1 + $0x4f0] ss:$8 sps:$4 sm:$0xff]   ;;  %v2939_v13 = vld [vmem:[%s4143_s1 + $0x514] ss:$8 sps:$4 sm:$0xff]  }
  0x1d   : > { %2116 = vmatpush1.bf16.msra.mxu0 %v2867_v23  ;;  %1945 = vmatprep.subr.bf16.mxu1 %v2868_v24  ;;  %v2509_v55 = vcombine.high %v305_v53, %v313_v54  ;;  %v2916_v62 = vld [vmem:[%s4143_s1 + $0xe4] ss:$8 sps:$4 sm:$0xff]   ;;  %v2920_v0 = vld [vmem:[%s4143_s1 + $0xe0] ss:$8 sps:$4 sm:$0xff]   ;;  %v2508_v10 = vcombine.low %v305_v53, %v313_v54  ;;  %v2934_v14 = vld [vmem:[%s4143_s1 + $0x110] ss:$8 sps:$4 sm:$0xff]  }
  0x1e   : > { %2117 = vmatprep.subr.bf16.mxu0 %v2870_v25  ;;  %v2918_v63 = vld [vmem:[%s4143_s1 + $0x4e4] ss:$8 sps:$4 sm:$0xff]   ;;  %v2921_v1 = vld [vmem:[%s4143_s1 + $0x4e0] ss:$8 sps:$4 sm:$0xff]   ;;  %v2937_v15 = vld [vmem:[%s4143_s1 + $0x510] ss:$8 sps:$4 sm:$0xff]  }
  0x1f   : > { %2137 = vmatprep.mubr.bf16.mxu0 %v2509_v55  ;;  %v2930_v6 = vld [vmem:[%s4143_s1 + $0x104] ss:$8 sps:$4 sm:$0xff]   ;;  %v2928_v9 = vld [vmem:[%s4143_s1 + $0x100] ss:$8 sps:$4 sm:$0xff]   ;;  %v2948_v20 = vld [vmem:[%s4143_s1 + $0x134] ss:$8 sps:$4 sm:$0xff]  }
  0x20   : > { %1946 = vmatpush1.bf16.msra.mxu1 %v2872_v26  ;;  %v2933_v7 = vld [vmem:[%s4143_s1 + $0x504] ss:$8 sps:$4 sm:$0xff]   ;;  %v2931_v11 = vld [vmem:[%s4143_s1 + $0x500] ss:$8 sps:$4 sm:$0xff]   ;;  %v2951_v21 = vld [vmem:[%s4143_s1 + $0x534] ss:$8 sps:$4 sm:$0xff]  }
  0x21   : > { %2118 = vmatpush1.bf16.msra.mxu0 %v2873_v27  ;;  %1947 = vmatprep.subr.bf16.mxu1 %v2874_v28  ;;  %v2942_v16 = vld [vmem:[%s4143_s1 + $0x124] ss:$8 sps:$4 sm:$0xff]   ;;  %v2940_v18 = vld [vmem:[%s4143_s1 + $0x120] ss:$8 sps:$4 sm:$0xff]   ;;  %v2946_v22 = vld [vmem:[%s4143_s1 + $0x130] ss:$8 sps:$4 sm:$0xff]  }
  0x22   : > { %2119 = vmatprep.subr.bf16.mxu0 %v2876_v29  ;;  %v2945_v17 = vld [vmem:[%s4143_s1 + $0x524] ss:$8 sps:$4 sm:$0xff]   ;;  %v2943_v19 = vld [vmem:[%s4143_s1 + $0x520] ss:$8 sps:$4 sm:$0xff]   ;;  %v2949_v23 = vld [vmem:[%s4143_s1 + $0x530] ss:$8 sps:$4 sm:$0xff]  }
  0x23   : > { %v2954_v24 = vld [vmem:[%s4143_s1 + $0x144] ss:$8 sps:$4 sm:$0xff]   ;;  %v2952_v26 = vld [vmem:[%s4143_s1 + $0x140] ss:$8 sps:$4 sm:$0xff]   ;;  %v2960_v28 = vld [vmem:[%s4143_s1 + $0x154] ss:$8 sps:$4 sm:$0xff]  }
  0x24   : > { %1948 = vmatpush1.bf16.msra.mxu1 %v2878_v30  ;;  %v2957_v25 = vld [vmem:[%s4143_s1 + $0x544] ss:$8 sps:$4 sm:$0xff]   ;;  %v2955_v27 = vld [vmem:[%s4143_s1 + $0x540] ss:$8 sps:$4 sm:$0xff]   ;;  %v2963_v29 = vld [vmem:[%s4143_s1 + $0x554] ss:$8 sps:$4 sm:$0xff]  }
  0x25   : > { %2120 = vmatpush1.bf16.msra.mxu0 %v2879_v31  ;;  %1949 = vmatprep.subr.bf16.mxu1 %v2880_v32  ;;  %v2958_v30 = vld [vmem:[%s4143_s1 + $0x150] ss:$8 sps:$4 sm:$0xff]   ;;  %v2966_v32 = vld [vmem:[%s4143_s1 + $0x164] ss:$8 sps:$4 sm:$0xff]   ;;  %v2976_v48 = vld [vmem:[%s4143_s1 + $0x180] ss:$8 sps:$4 sm:$0xff]  }
  0x26   : > { %2121 = vmatprep.subr.bf16.mxu0 %v2882_v33  ;;  %v2961_v31 = vld [vmem:[%s4143_s1 + $0x550] ss:$8 sps:$4 sm:$0xff]   ;;  %v2969_v33 = vld [vmem:[%s4143_s1 + $0x564] ss:$8 sps:$4 sm:$0xff]   ;;  %v2979_v49 = vld [vmem:[%s4143_s1 + $0x580] ss:$8 sps:$4 sm:$0xff]  }
  0x27   : > { %v2982_v52 = vld [vmem:[%s4143_s1 + $0x190] ss:$8 sps:$4 sm:$0xff]   ;;  %v2990_v54 = vld [vmem:[%s4143_s1 + $0x1a4] ss:$8 sps:$4 sm:$0xff]  }
  0x28   : > { %1950 = vmatpush1.bf16.msra.mxu1 %v2884_v34  ;;  %v2964_v34 = vld [vmem:[%s4143_s1 + $0x160] ss:$8 sps:$4 sm:$0xff]   ;;  %v2985_v53 = vld [vmem:[%s4143_s1 + $0x590] ss:$8 sps:$4 sm:$0xff]   ;;  %v2993_v55 = vld [vmem:[%s4143_s1 + $0x5a4] ss:$8 sps:$4 sm:$0xff]  }
  0x29   : > { %2122 = vmatpush1.bf16.msra.mxu0 %v2885_v35  ;;  %1951 = vmatprep.subr.bf16.mxu1 %v2886_v36  ;;  %v2967_v35 = vld [vmem:[%s4143_s1 + $0x560] ss:$8 sps:$4 sm:$0xff]  }
  0x2a   : > { %2123 = vmatprep.subr.bf16.mxu0 %v2888_v37  ;;  %v3575_v36 = vld [vmem:[%s3424_s11 + $0x8] sm:$0xff] }
  0x2b   : > { %v3578_v37 = vld [vmem:[%s3424_s11 + $0x48] sm:$0xff] }
  0x2c   : > { %1952 = vmatpush1.bf16.msra.mxu1 %v2890_v38  ;;  %v2972_v38 = vld [vmem:[%s4143_s1 + $0x174] ss:$8 sps:$4 sm:$0xff]  }
  0x2d   : > { %2124 = vmatpush1.bf16.msra.mxu0 %v2891_v39  ;;  %1953 = vmatprep.subr.bf16.mxu1 %v2892_v40  ;;  %v2975_v39 = vld [vmem:[%s4143_s1 + $0x574] ss:$8 sps:$4 sm:$0xff]   ;;  %v2503_v40 = vcombine.high %v3575_v36, %v3578_v37 }
  0x2e   : > { %2125 = vmatprep.subr.bf16.mxu0 %v2894_v41  ;;  %v3589_v41 = vld [vmem:[%s3424_s11 + $0x28] sm:$0xff] }
  0x30   : > { %1954 = vmatpush1.bf16.msra.mxu1 %v2896_v42  ;;  %v3592_v42 = vld [vmem:[%s3424_s11 + $0x68] sm:$0xff] }
  0x31   : > { %2126 = vmatpush1.bf16.msra.mxu0 %v2897_v43  ;;  %1955 = vmatprep.subr.bf16.mxu1 %v2898_v44  ;;  %v2511_v43 = vcombine.high %v3589_v41, %v3592_v42  ;;  %v2970_v44 = vld [vmem:[%s4143_s1 + $0x170] ss:$8 sps:$4 sm:$0xff]  }
  0x32   : > { %2127 = vmatprep.subr.bf16.mxu0 %v2900_v45  ;;  %v2973_v45 = vld [vmem:[%s4143_s1 + $0x570] ss:$8 sps:$4 sm:$0xff]  }
  0x34   : > { %1956 = vmatpush1.bf16.msra.mxu1 %v2902_v46  ;;  %v2978_v46 = vld [vmem:[%s4143_s1 + $0x184] ss:$8 sps:$4 sm:$0xff]  }
  0x35   : > { %2128 = vmatpush1.bf16.msra.mxu0 %v2903_v47  ;;  %1957 = vmatprep.subr.bf16.mxu1 %v2904_v50  ;;  %v2981_v47 = vld [vmem:[%s4143_s1 + $0x584] ss:$8 sps:$4 sm:$0xff]   ;;  %v2984_v50 = vld [vmem:[%s4143_s1 + $0x194] ss:$8 sps:$4 sm:$0xff]  }
  0x36   : > { %2129 = vmatprep.subr.bf16.mxu0 %v2906_v51  ;;  %v2987_v51 = vld [vmem:[%s4143_s1 + $0x594] ss:$8 sps:$4 sm:$0xff]  }
  0x38   : > { %1958 = vmatpush1.bf16.msra.mxu1 %v2908_v56  ;;  %v2988_v56 = vld [vmem:[%s4143_s1 + $0x1a0] ss:$8 sps:$4 sm:$0xff]  }
  0x39   : > { %2130 = vmatpush1.bf16.msra.mxu0 %v2909_v57  ;;  %1959 = vmatprep.subr.bf16.mxu1 %v2910_v58  ;;  %v2991_v57 = vld [vmem:[%s4143_s1 + $0x5a0] ss:$8 sps:$4 sm:$0xff]   ;;  %v2996_v58 = vld [vmem:[%s4143_s1 + $0x1b4] ss:$8 sps:$4 sm:$0xff]  }
  0x3a   : > { %2131 = vmatprep.subr.bf16.mxu0 %v2912_v59  ;;  %v2999_v59 = vld [vmem:[%s4143_s1 + $0x5b4] ss:$8 sps:$4 sm:$0xff]  }
  0x3c   : > { %1960 = vmatpush1.bf16.msra.mxu1 %v2914_v60  ;;  %v2994_v60 = vld [vmem:[%s4143_s1 + $0x1b0] ss:$8 sps:$4 sm:$0xff]  }
  0x3d   : > { %2132 = vmatpush1.bf16.msra.mxu0 %v2915_v61  ;;  %1961 = vmatprep.subr.bf16.mxu1 %v2916_v62  ;;  %v2997_v61 = vld [vmem:[%s4143_s1 + $0x5b0] ss:$8 sps:$4 sm:$0xff]   ;;  %v3002_v62 = vld [vmem:[%s4143_s1 + $0x1c4] ss:$8 sps:$4 sm:$0xff]  }
  0x3e   : > { %2133 = vmatprep.subr.bf16.mxu0 %v2918_v63  ;;  %v3005_v63 = vld [vmem:[%s4143_s1 + $0x5c4] ss:$8 sps:$4 sm:$0xff]  }
  0x40   : > { %1962 = vmatpush1.bf16.msra.mxu1 %v2920_v0  ;;  %v3000_v0 = vld [vmem:[%s4143_s1 + $0x1c0] ss:$8 sps:$4 sm:$0xff]  }
  0x41   : > { %2134 = vmatpush1.bf16.msra.mxu0 %v2921_v1  ;;  %1963 = vmatprep.subr.bf16.mxu1 %v2922_v2  ;;  %v3003_v1 = vld [vmem:[%s4143_s1 + $0x5c0] ss:$8 sps:$4 sm:$0xff]   ;;  %v3008_v2 = vld [vmem:[%s4143_s1 + $0x1d4] ss:$8 sps:$4 sm:$0xff]  }
  0x42   : > { %2135 = vmatprep.subr.bf16.mxu0 %v2924_v3  ;;  %v3011_v3 = vld [vmem:[%s4143_s1 + $0x5d4] ss:$8 sps:$4 sm:$0xff]  }
  0x44   : > { %1964 = vmatpush1.bf16.msra.mxu1 %v2926_v4  ;;  %v3006_v4 = vld [vmem:[%s4143_s1 + $0x1d0] ss:$8 sps:$4 sm:$0xff]  }
  0x45   : > { %2136 = vmatpush1.bf16.msra.mxu0 %v2927_v5  ;;  %1976 = vmatprep.subr.bf16.mxu1 %v2930_v6  ;;  %v3009_v5 = vld [vmem:[%s4143_s1 + $0x5d0] ss:$8 sps:$4 sm:$0xff]   ;;  %v3014_v6 = vld [vmem:[%s4143_s1 + $0x1e4] ss:$8 sps:$4 sm:$0xff]  }
  0x46   : > { %2148 = vmatprep.subr.bf16.mxu0 %v2933_v7  ;;  %v3017_v7 = vld [vmem:[%s4143_s1 + $0x5e4] ss:$8 sps:$4 sm:$0xff]  }
  0x47   : > { %1966 = vmatmul.mubr.bf16.vlgmr.msra.gmra.mrb[0].mxu1 %v2500_v8  ;;  %v3012_v8 = vld [vmem:[%s4143_s1 + $0x1e0] ss:$8 sps:$4 sm:$0xff]  }
  0x48   : > { %2138 = vmatmul.mubr.bf16.vlgmr.msra.gmra.mrb[0].mxu0 %v2508_v10  ;;  %1977 = vmatpush1.bf16.msra.mxu1 %v2928_v9  ;;  %v3015_v9 = vld [vmem:[%s4143_s1 + $0x5e0] ss:$8 sps:$4 sm:$0xff]   ;;  %v3020_v10 = vld [vmem:[%s4143_s1 + $0x1f4] ss:$8 sps:$4 sm:$0xff]  }
  0x49   : > { %2149 = vmatpush1.bf16.msra.mxu0 %v2931_v11  ;;  %1978 = vmatprep.subr.bf16.mxu1 %v2936_v12  ;;  %v3023_v11 = vld [vmem:[%s4143_s1 + $0x5f4] ss:$8 sps:$4 sm:$0xff]   ;;  %v3018_v12 = vld [vmem:[%s4143_s1 + $0x1f0] ss:$8 sps:$4 sm:$0xff]  }
  0x4a   : > { %2150 = vmatprep.subr.bf16.mxu0 %v2939_v13  ;;  %2008 = vmatprep.mubr.bf16.mxu1 %v2503_v40  ;;  %v3021_v13 = vld [vmem:[%s4143_s1 + $0x5f0] ss:$8 sps:$4 sm:$0xff]   ;;  %v3048_v40 = vld [vmem:[%s4143_s1 + $0x240] ss:$8 sps:$4 sm:$0xff]  }
  0x4b   : > { %2180 = vmatprep.mubr.bf16.mxu0 %v2511_v43  ;;  %v3059_v43 = vld [vmem:[%s4143_s1 + $0x654] ss:$8 sps:$4 sm:$0xff]  }
  0x4c   : > { %1979 = vmatpush1.bf16.msra.mxu1 %v2934_v14  ;;  %v3026_v14 = vld [vmem:[%s4143_s1 + $0x204] ss:$8 sps:$4 sm:$0xff]  }
  0x4d   : > { %2151 = vmatpush1.bf16.msra.mxu0 %v2937_v15  ;;  %1980 = vmatprep.subr.bf16.mxu1 %v2942_v16  ;;  %v3029_v15 = vld [vmem:[%s4143_s1 + $0x604] ss:$8 sps:$4 sm:$0xff]   ;;  %v2502_v16 = vcombine.low %v3575_v36, %v3578_v37  ;;  %v3042_v36 = vld [vmem:[%s4143_s1 + $0x230] ss:$8 sps:$4 sm:$0xff]  }
  0x4e   : > { %2152 = vmatprep.subr.bf16.mxu0 %v2945_v17  ;;  %v3024_v17 = vld [vmem:[%s4143_s1 + $0x200] ss:$8 sps:$4 sm:$0xff]   ;;  %v3045_v37 = vld [vmem:[%s4143_s1 + $0x630] ss:$8 sps:$4 sm:$0xff]  }
  0x50   : > { %1981 = vmatpush1.bf16.msra.mxu1 %v2940_v18  ;;  %v2510_v18 = vcombine.low %v3589_v41, %v3592_v42  ;;  %v3051_v41 = vld [vmem:[%s4143_s1 + $0x640] ss:$8 sps:$4 sm:$0xff]   ;;  %v3056_v42 = vld [vmem:[%s4143_s1 + $0x254] ss:$8 sps:$4 sm:$0xff]  }
  0x51   : > { %2153 = vmatpush1.bf16.msra.mxu0 %v2943_v19  ;;  %1982 = vmatprep.subr.bf16.mxu1 %v2948_v20  ;;  %v3027_v19 = vld [vmem:[%s4143_s1 + $0x600] ss:$8 sps:$4 sm:$0xff]   ;;  %v3032_v20 = vld [vmem:[%s4143_s1 + $0x214] ss:$8 sps:$4 sm:$0xff]  }
  0x52   : > { %2154 = vmatprep.subr.bf16.mxu0 %v2951_v21  ;;  %v3035_v21 = vld [vmem:[%s4143_s1 + $0x614] ss:$8 sps:$4 sm:$0xff]  }
  0x54   : > { %1983 = vmatpush1.bf16.msra.mxu1 %v2946_v22  ;;  %v3030_v22 = vld [vmem:[%s4143_s1 + $0x210] ss:$8 sps:$4 sm:$0xff]  }
  0x55   : > { %2155 = vmatpush1.bf16.msra.mxu0 %v2949_v23  ;;  %1984 = vmatprep.subr.bf16.mxu1 %v2954_v24  ;;  %v3033_v23 = vld [vmem:[%s4143_s1 + $0x610] ss:$8 sps:$4 sm:$0xff]  }
  0x56   : > { %2156 = vmatprep.subr.bf16.mxu0 %v2957_v25  ;;  %v3727_v24 = vld [vmem:[%s3424_s11 + $0x10] sm:$0xff] }
  0x57   : > { %v3730_v25 = vld [vmem:[%s3424_s11 + $0x50] sm:$0xff] }
  0x58   : > { %1985 = vmatpush1.bf16.msra.mxu1 %v2952_v26  ;;  %v3038_v26 = vld [vmem:[%s4143_s1 + $0x224] ss:$8 sps:$4 sm:$0xff]  }
  0x59   : > { %2157 = vmatpush1.bf16.msra.mxu0 %v2955_v27  ;;  %1986 = vmatprep.subr.bf16.mxu1 %v2960_v28  ;;  %v3041_v27 = vld [vmem:[%s4143_s1 + $0x624] ss:$8 sps:$4 sm:$0xff]   ;;  %v2505_v28 = vcombine.high %v3727_v24, %v3730_v25 }
  0x5a   : > { %2158 = vmatprep.subr.bf16.mxu0 %v2963_v29  ;;  %v3741_v29 = vld [vmem:[%s3424_s11 + $0x30] sm:$0xff] }
  0x5c   : > { %1987 = vmatpush1.bf16.msra.mxu1 %v2958_v30  ;;  %v3744_v30 = vld [vmem:[%s3424_s11 + $0x70] sm:$0xff] }
  0x5d   : > { %2159 = vmatpush1.bf16.msra.mxu0 %v2961_v31  ;;  %1988 = vmatprep.subr.bf16.mxu1 %v2966_v32  ;;  %v2513_v31 = vcombine.high %v3741_v29, %v3744_v30  ;;  %v3036_v32 = vld [vmem:[%s4143_s1 + $0x220] ss:$8 sps:$4 sm:$0xff]  }
  0x5e   : > { %2160 = vmatprep.subr.bf16.mxu0 %v2969_v33  ;;  %v3039_v33 = vld [vmem:[%s4143_s1 + $0x620] ss:$8 sps:$4 sm:$0xff]  }
  0x60   : > { %1989 = vmatpush1.bf16.msra.mxu1 %v2964_v34  ;;  %v3044_v34 = vld [vmem:[%s4143_s1 + $0x234] ss:$8 sps:$4 sm:$0xff]  }
  0x61   : > { %2161 = vmatpush1.bf16.msra.mxu0 %v2967_v35  ;;  %1990 = vmatprep.subr.bf16.mxu1 %v2972_v38  ;;  %v3047_v35 = vld [vmem:[%s4143_s1 + $0x634] ss:$8 sps:$4 sm:$0xff]   ;;  %v3050_v38 = vld [vmem:[%s4143_s1 + $0x244] ss:$8 sps:$4 sm:$0xff]  }
  0x62   : > { %2162 = vmatprep.subr.bf16.mxu0 %v2975_v39  ;;  %v3053_v39 = vld [vmem:[%s4143_s1 + $0x644] ss:$8 sps:$4 sm:$0xff]  }
  0x64   : > { %1991 = vmatpush1.bf16.msra.mxu1 %v2970_v44  ;;  %v3054_v44 = vld [vmem:[%s4143_s1 + $0x250] ss:$8 sps:$4 sm:$0xff]  }
  0x65   : > { %2163 = vmatpush1.bf16.msra.mxu0 %v2973_v45  ;;  %1992 = vmatprep.subr.bf16.mxu1 %v2978_v46  ;;  %v3057_v45 = vld [vmem:[%s4143_s1 + $0x650] ss:$8 sps:$4 sm:$0xff]   ;;  %v3062_v46 = vld [vmem:[%s4143_s1 + $0x264] ss:$8 sps:$4 sm:$0xff]  }
  0x66   : > { %2164 = vmatprep.subr.bf16.mxu0 %v2981_v47  ;;  %v3065_v47 = vld [vmem:[%s4143_s1 + $0x664] ss:$8 sps:$4 sm:$0xff]  }
  0x68   : > { %1993 = vmatpush1.bf16.msra.mxu1 %v2976_v48  ;;  %v3060_v48 = vld [vmem:[%s4143_s1 + $0x260] ss:$8 sps:$4 sm:$0xff]  }
  0x69   : > { %2165 = vmatpush1.bf16.msra.mxu0 %v2979_v49  ;;  %1994 = vmatprep.subr.bf16.mxu1 %v2984_v50  ;;  %v3063_v49 = vld [vmem:[%s4143_s1 + $0x660] ss:$8 sps:$4 sm:$0xff]   ;;  %v3068_v50 = vld [vmem:[%s4143_s1 + $0x274] ss:$8 sps:$4 sm:$0xff]  }
  0x6a   : > { %2166 = vmatprep.subr.bf16.mxu0 %v2987_v51  ;;  %v3071_v51 = vld [vmem:[%s4143_s1 + $0x674] ss:$8 sps:$4 sm:$0xff]  }
  0x6c   : > { %1995 = vmatpush1.bf16.msra.mxu1 %v2982_v52  ;;  %v3066_v52 = vld [vmem:[%s4143_s1 + $0x270] ss:$8 sps:$4 sm:$0xff]  }
  0x6d   : > { %2167 = vmatpush1.bf16.msra.mxu0 %v2985_v53  ;;  %1996 = vmatprep.subr.bf16.mxu1 %v2990_v54  ;;  %v3069_v53 = vld [vmem:[%s4143_s1 + $0x670] ss:$8 sps:$4 sm:$0xff]   ;;  %v3074_v54 = vld [vmem:[%s4143_s1 + $0x284] ss:$8 sps:$4 sm:$0xff]  }
  0x6e   : > { %2168 = vmatprep.subr.bf16.mxu0 %v2993_v55  ;;  %v3077_v55 = vld [vmem:[%s4143_s1 + $0x684] ss:$8 sps:$4 sm:$0xff]  }
  0x70   : > { %1997 = vmatpush1.bf16.msra.mxu1 %v2988_v56  ;;  %v3072_v56 = vld [vmem:[%s4143_s1 + $0x280] ss:$8 sps:$4 sm:$0xff]  }
  0x71   : > { %2169 = vmatpush1.bf16.msra.mxu0 %v2991_v57  ;;  %1998 = vmatprep.subr.bf16.mxu1 %v2996_v58  ;;  %v3075_v57 = vld [vmem:[%s4143_s1 + $0x680] ss:$8 sps:$4 sm:$0xff]   ;;  %v3080_v58 = vld [vmem:[%s4143_s1 + $0x294] ss:$8 sps:$4 sm:$0xff]  }
  0x72   : > { %2170 = vmatprep.subr.bf16.mxu0 %v2999_v59  ;;  %v3083_v59 = vld [vmem:[%s4143_s1 + $0x694] ss:$8 sps:$4 sm:$0xff]  }
  0x74   : > { %1999 = vmatpush1.bf16.msra.mxu1 %v2994_v60  ;;  %v3078_v60 = vld [vmem:[%s4143_s1 + $0x290] ss:$8 sps:$4 sm:$0xff]  }
  0x75   : > { %2171 = vmatpush1.bf16.msra.mxu0 %v2997_v61  ;;  %2000 = vmatprep.subr.bf16.mxu1 %v3002_v62  ;;  %v3081_v61 = vld [vmem:[%s4143_s1 + $0x690] ss:$8 sps:$4 sm:$0xff]   ;;  %v3086_v62 = vld [vmem:[%s4143_s1 + $0x2a4] ss:$8 sps:$4 sm:$0xff]  }
  0x76   : > { %2172 = vmatprep.subr.bf16.mxu0 %v3005_v63  ;;  %v3089_v63 = vld [vmem:[%s4143_s1 + $0x6a4] ss:$8 sps:$4 sm:$0xff]  }
  0x78   : > { %2001 = vmatpush1.bf16.msra.mxu1 %v3000_v0  ;;  %v3084_v0 = vld [vmem:[%s4143_s1 + $0x2a0] ss:$8 sps:$4 sm:$0xff]  }
  0x79   : > { %2173 = vmatpush1.bf16.msra.mxu0 %v3003_v1  ;;  %2002 = vmatprep.subr.bf16.mxu1 %v3008_v2  ;;  %v3087_v1 = vld [vmem:[%s4143_s1 + $0x6a0] ss:$8 sps:$4 sm:$0xff]   ;;  %v3092_v2 = vld [vmem:[%s4143_s1 + $0x2b4] ss:$8 sps:$4 sm:$0xff]  }
  0x7a   : > { %2174 = vmatprep.subr.bf16.mxu0 %v3011_v3  ;;  %v3095_v3 = vld [vmem:[%s4143_s1 + $0x6b4] ss:$8 sps:$4 sm:$0xff]  }
  0x7c   : > { %2003 = vmatpush1.bf16.msra.mxu1 %v3006_v4  ;;  %v3090_v4 = vld [vmem:[%s4143_s1 + $0x2b0] ss:$8 sps:$4 sm:$0xff]  }
  0x7d   : > { %2175 = vmatpush1.bf16.msra.mxu0 %v3009_v5  ;;  %2004 = vmatprep.subr.bf16.mxu1 %v3014_v6  ;;  %v3093_v5 = vld [vmem:[%s4143_s1 + $0x6b0] ss:$8 sps:$4 sm:$0xff]   ;;  %v3098_v6 = vld [vmem:[%s4143_s1 + $0x2c4] ss:$8 sps:$4 sm:$0xff]  }
  0x7e   : > { %2176 = vmatprep.subr.bf16.mxu0 %v3017_v7  ;;  %v3101_v7 = vld [vmem:[%s4143_s1 + $0x6c4] ss:$8 sps:$4 sm:$0xff]  }
  0x80   : > { %2005 = vmatpush1.bf16.msra.mxu1 %v3012_v8  ;;  %v3096_v8 = vld [vmem:[%s4143_s1 + $0x2c0] ss:$8 sps:$4 sm:$0xff]  }
  0x81   : > { %2177 = vmatpush1.bf16.msra.mxu0 %v3015_v9  ;;  %2006 = vmatprep.subr.bf16.mxu1 %v3020_v10  ;;  %v3099_v9 = vld [vmem:[%s4143_s1 + $0x6c0] ss:$8 sps:$4 sm:$0xff]   ;;  %v3104_v10 = vld [vmem:[%s4143_s1 + $0x2d4] ss:$8 sps:$4 sm:$0xff]  }
  0x82   : > { %2178 = vmatprep.subr.bf16.mxu0 %v3023_v11  ;;  %v3107_v11 = vld [vmem:[%s4143_s1 + $0x6d4] ss:$8 sps:$4 sm:$0xff]  }
  0x84   : > { %2007 = vmatpush1.bf16.msra.mxu1 %v3018_v12  ;;  %v3102_v12 = vld [vmem:[%s4143_s1 + $0x2d0] ss:$8 sps:$4 sm:$0xff]  }
  0x85   : > { %2179 = vmatpush1.bf16.msra.mxu0 %v3021_v13  ;;  %2019 = vmatprep.subr.bf16.mxu1 %v3026_v14  ;;  %v3105_v13 = vld [vmem:[%s4143_s1 + $0x6d0] ss:$8 sps:$4 sm:$0xff]   ;;  %v3110_v14 = vld [vmem:[%s4143_s1 + $0x2e4] ss:$8 sps:$4 sm:$0xff]  }
  0x86   : > { %2191 = vmatprep.subr.bf16.mxu0 %v3029_v15  ;;  %v3113_v15 = vld [vmem:[%s4143_s1 + $0x6e4] ss:$8 sps:$4 sm:$0xff]  }
  0x87   : > { %2009 = vmatmul.mubr.bf16.vlgmr.msra.gmra.mrb[0].mxu1 %v2502_v16  ;;  %v3108_v16 = vld [vmem:[%s4143_s1 + $0x2e0] ss:$8 sps:$4 sm:$0xff]  }
  0x88   : > { %2181 = vmatmul.mubr.bf16.vlgmr.msra.gmra.mrb[0].mxu0 %v2510_v18  ;;  %2020 = vmatpush1.bf16.msra.mxu1 %v3024_v17  ;;  %v3111_v17 = vld [vmem:[%s4143_s1 + $0x6e0] ss:$8 sps:$4 sm:$0xff]   ;;  %v3116_v18 = vld [vmem:[%s4143_s1 + $0x2f4] ss:$8 sps:$4 sm:$0xff]  }
  0x89   : > { %2192 = vmatpush1.bf16.msra.mxu0 %v3027_v19  ;;  %2021 = vmatprep.subr.bf16.mxu1 %v3032_v20  ;;  %v3119_v19 = vld [vmem:[%s4143_s1 + $0x6f4] ss:$8 sps:$4 sm:$0xff]   ;;  %v3114_v20 = vld [vmem:[%s4143_s1 + $0x2f0] ss:$8 sps:$4 sm:$0xff]  }
  0x8a   : > { %2193 = vmatprep.subr.bf16.mxu0 %v3035_v21  ;;  %2051 = vmatprep.mubr.bf16.mxu1 %v2505_v28  ;;  %v3117_v21 = vld [vmem:[%s4143_s1 + $0x6f0] ss:$8 sps:$4 sm:$0xff]   ;;  %v2512_v28 = vcombine.low %v3741_v29, %v3744_v30 }
  0x8b   : > { %2223 = vmatprep.mubr.bf16.mxu0 %v2513_v31  ;;  %v3924_v31 = vld [vmem:[%s3424_s11 + $0x58] sm:$0xff] }
  0x8c   : > { %2022 = vmatpush1.bf16.msra.mxu1 %v3030_v22  ;;  %v3122_v22 = vld [vmem:[%s4143_s1 + $0x304] ss:$8 sps:$4 sm:$0xff]  }
  0x8d   : > { %2194 = vmatpush1.bf16.msra.mxu0 %v3033_v23  ;;  %2023 = vmatprep.subr.bf16.mxu1 %v3038_v26  ;;  %v3125_v23 = vld [vmem:[%s4143_s1 + $0x704] ss:$8 sps:$4 sm:$0xff]   ;;  %v3917_v26 = vld [vmem:[%s3424_s11 + $0x18] sm:$0xff] }
  0x8e   : > { %2195 = vmatprep.subr.bf16.mxu0 %v3041_v27  ;;  %v2504_v27 = vcombine.low %v3727_v24, %v3730_v25  ;;  %v3128_v24 = vld [vmem:[%s4143_s1 + $0x314] ss:$8 sps:$4 sm:$0xff]   ;;  %v2507_v29 = vcombine.high %v3917_v26, %v3924_v31 }
  0x8f   : > { %v3131_v25 = vld [vmem:[%s4143_s1 + $0x714] ss:$8 sps:$4 sm:$0xff]  }
  0x90   : > { %2024 = vmatpush1.bf16.msra.mxu1 %v3036_v32  ;;  %v3927_v32 = vld [vmem:[%s3424_s11 + $0x38] sm:$0xff] }
  0x91   : > { %2196 = vmatpush1.bf16.msra.mxu0 %v3039_v33  ;;  %2025 = vmatprep.subr.bf16.mxu1 %v3044_v34  ;;  %v3930_v33 = vld [vmem:[%s3424_s11 + $0x78] sm:$0xff]  ;;  %v3120_v34 = vld [vmem:[%s4143_s1 + $0x300] ss:$8 sps:$4 sm:$0xff]  }
  0x92   : > { %2197 = vmatprep.subr.bf16.mxu0 %v3047_v35  ;;  %v3123_v35 = vld [vmem:[%s4143_s1 + $0x700] ss:$8 sps:$4 sm:$0xff]   ;;  %v2515_v30 = vcombine.high %v3927_v32, %v3930_v33 }
  0x94   : > { %2026 = vmatpush1.bf16.msra.mxu1 %v3042_v36  ;;  %v3126_v36 = vld [vmem:[%s4143_s1 + $0x310] ss:$8 sps:$4 sm:$0xff]  }
  0x95   : > { %2198 = vmatpush1.bf16.msra.mxu0 %v3045_v37  ;;  %2027 = vmatprep.subr.bf16.mxu1 %v3050_v38  ;;  %v3129_v37 = vld [vmem:[%s4143_s1 + $0x710] ss:$8 sps:$4 sm:$0xff]   ;;  %v3134_v38 = vld [vmem:[%s4143_s1 + $0x324] ss:$8 sps:$4 sm:$0xff]  }
  0x96   : > { %2199 = vmatprep.subr.bf16.mxu0 %v3053_v39  ;;  %v3137_v39 = vld [vmem:[%s4143_s1 + $0x724] ss:$8 sps:$4 sm:$0xff]  }
  0x98   : > { %2028 = vmatpush1.bf16.msra.mxu1 %v3048_v40  ;;  %v3132_v40 = vld [vmem:[%s4143_s1 + $0x320] ss:$8 sps:$4 sm:$0xff]  }
  0x99   : > { %2200 = vmatpush1.bf16.msra.mxu0 %v3051_v41  ;;  %2029 = vmatprep.subr.bf16.mxu1 %v3056_v42  ;;  %v3135_v41 = vld [vmem:[%s4143_s1 + $0x720] ss:$8 sps:$4 sm:$0xff]   ;;  %v3140_v42 = vld [vmem:[%s4143_s1 + $0x334] ss:$8 sps:$4 sm:$0xff]  }
  0x9a   : > { %2201 = vmatprep.subr.bf16.mxu0 %v3059_v43  ;;  %v3143_v43 = vld [vmem:[%s4143_s1 + $0x734] ss:$8 sps:$4 sm:$0xff]  }
  0x9c   : > { %2030 = vmatpush1.bf16.msra.mxu1 %v3054_v44  ;;  %v3138_v44 = vld [vmem:[%s4143_s1 + $0x330] ss:$8 sps:$4 sm:$0xff]  }
  0x9d   : > { %2202 = vmatpush1.bf16.msra.mxu0 %v3057_v45  ;;  %2031 = vmatprep.subr.bf16.mxu1 %v3062_v46  ;;  %v3141_v45 = vld [vmem:[%s4143_s1 + $0x730] ss:$8 sps:$4 sm:$0xff]   ;;  %v3146_v46 = vld [vmem:[%s4143_s1 + $0x344] ss:$8 sps:$4 sm:$0xff]  }
  0x9e   : > { %2203 = vmatprep.subr.bf16.mxu0 %v3065_v47  ;;  %v3149_v47 = vld [vmem:[%s4143_s1 + $0x744] ss:$8 sps:$4 sm:$0xff]  }
  0xa0   : > { %2032 = vmatpush1.bf16.msra.mxu1 %v3060_v48  ;;  %v3144_v48 = vld [vmem:[%s4143_s1 + $0x340] ss:$8 sps:$4 sm:$0xff]  }
  0xa1   : > { %2204 = vmatpush1.bf16.msra.mxu0 %v3063_v49  ;;  %2033 = vmatprep.subr.bf16.mxu1 %v3068_v50  ;;  %v3147_v49 = vld [vmem:[%s4143_s1 + $0x740] ss:$8 sps:$4 sm:$0xff]   ;;  %v3152_v50 = vld [vmem:[%s4143_s1 + $0x354] ss:$8 sps:$4 sm:$0xff]  }
  0xa2   : > { %2205 = vmatprep.subr.bf16.mxu0 %v3071_v51  ;;  %v3155_v51 = vld [vmem:[%s4143_s1 + $0x754] ss:$8 sps:$4 sm:$0xff]  }
  0xa4   : > { %2034 = vmatpush1.bf16.msra.mxu1 %v3066_v52  ;;  %v3150_v52 = vld [vmem:[%s4143_s1 + $0x350] ss:$8 sps:$4 sm:$0xff]  }
  0xa5   : > { %2206 = vmatpush1.bf16.msra.mxu0 %v3069_v53  ;;  %2035 = vmatprep.subr.bf16.mxu1 %v3074_v54  ;;  %v3153_v53 = vld [vmem:[%s4143_s1 + $0x750] ss:$8 sps:$4 sm:$0xff]   ;;  %v3158_v54 = vld [vmem:[%s4143_s1 + $0x364] ss:$8 sps:$4 sm:$0xff]  }
  0xa6   : > { %2207 = vmatprep.subr.bf16.mxu0 %v3077_v55  ;;  %v3161_v55 = vld [vmem:[%s4143_s1 + $0x764] ss:$8 sps:$4 sm:$0xff]  }
  0xa8   : > { %2036 = vmatpush1.bf16.msra.mxu1 %v3072_v56  ;;  %v3156_v56 = vld [vmem:[%s4143_s1 + $0x360] ss:$8 sps:$4 sm:$0xff]  }
  0xa9   : > { %2208 = vmatpush1.bf16.msra.mxu0 %v3075_v57  ;;  %2037 = vmatprep.subr.bf16.mxu1 %v3080_v58  ;;  %v3159_v57 = vld [vmem:[%s4143_s1 + $0x760] ss:$8 sps:$4 sm:$0xff]   ;;  %v3164_v58 = vld [vmem:[%s4143_s1 + $0x374] ss:$8 sps:$4 sm:$0xff]  }
  0xaa   : > { %2209 = vmatprep.subr.bf16.mxu0 %v3083_v59  ;;  %v3167_v59 = vld [vmem:[%s4143_s1 + $0x774] ss:$8 sps:$4 sm:$0xff]  }
  0xac   : > { %2038 = vmatpush1.bf16.msra.mxu1 %v3078_v60  ;;  %v3162_v60 = vld [vmem:[%s4143_s1 + $0x370] ss:$8 sps:$4 sm:$0xff]  }
  0xad   : > { %2210 = vmatpush1.bf16.msra.mxu0 %v3081_v61  ;;  %2039 = vmatprep.subr.bf16.mxu1 %v3086_v62  ;;  %v3165_v61 = vld [vmem:[%s4143_s1 + $0x770] ss:$8 sps:$4 sm:$0xff]   ;;  %v3170_v62 = vld [vmem:[%s4143_s1 + $0x384] ss:$8 sps:$4 sm:$0xff]  }
  0xae   : > { %2211 = vmatprep.subr.bf16.mxu0 %v3089_v63  ;;  %v3173_v63 = vld [vmem:[%s4143_s1 + $0x784] ss:$8 sps:$4 sm:$0xff]  }
  0xb0   : > { %2040 = vmatpush1.bf16.msra.mxu1 %v3084_v0  ;;  %v3168_v0 = vld [vmem:[%s4143_s1 + $0x380] ss:$8 sps:$4 sm:$0xff]  }
  0xb1   : > { %2212 = vmatpush1.bf16.msra.mxu0 %v3087_v1  ;;  %2041 = vmatprep.subr.bf16.mxu1 %v3092_v2  ;;  %v3171_v1 = vld [vmem:[%s4143_s1 + $0x780] ss:$8 sps:$4 sm:$0xff]   ;;  %v3176_v2 = vld [vmem:[%s4143_s1 + $0x394] ss:$8 sps:$4 sm:$0xff]  }
  0xb2   : > { %2213 = vmatprep.subr.bf16.mxu0 %v3095_v3  ;;  %v3179_v3 = vld [vmem:[%s4143_s1 + $0x794] ss:$8 sps:$4 sm:$0xff]  }
  0xb4   : > { %2042 = vmatpush1.bf16.msra.mxu1 %v3090_v4  ;;  %v3174_v4 = vld [vmem:[%s4143_s1 + $0x390] ss:$8 sps:$4 sm:$0xff]  }
  0xb5   : > { %2214 = vmatpush1.bf16.msra.mxu0 %v3093_v5  ;;  %2043 = vmatprep.subr.bf16.mxu1 %v3098_v6  ;;  %v3177_v5 = vld [vmem:[%s4143_s1 + $0x790] ss:$8 sps:$4 sm:$0xff]   ;;  %v3182_v6 = vld [vmem:[%s4143_s1 + $0x3a4] ss:$8 sps:$4 sm:$0xff]  }
  0xb6   : > { %2215 = vmatprep.subr.bf16.mxu0 %v3101_v7  ;;  %v3185_v7 = vld [vmem:[%s4143_s1 + $0x7a4] ss:$8 sps:$4 sm:$0xff]  }
  0xb8   : > { %2044 = vmatpush1.bf16.msra.mxu1 %v3096_v8  ;;  %v3180_v8 = vld [vmem:[%s4143_s1 + $0x3a0] ss:$8 sps:$4 sm:$0xff]  }
  0xb9   : > { %2216 = vmatpush1.bf16.msra.mxu0 %v3099_v9  ;;  %2045 = vmatprep.subr.bf16.mxu1 %v3104_v10  ;;  %v3183_v9 = vld [vmem:[%s4143_s1 + $0x7a0] ss:$8 sps:$4 sm:$0xff]   ;;  %v3188_v10 = vld [vmem:[%s4143_s1 + $0x3b4] ss:$8 sps:$4 sm:$0xff]  }
  0xba   : > { %2217 = vmatprep.subr.bf16.mxu0 %v3107_v11  ;;  %v3191_v11 = vld [vmem:[%s4143_s1 + $0x7b4] ss:$8 sps:$4 sm:$0xff]  }
  0xbc   : > { %2046 = vmatpush1.bf16.msra.mxu1 %v3102_v12  ;;  %v3186_v12 = vld [vmem:[%s4143_s1 + $0x3b0] ss:$8 sps:$4 sm:$0xff]  }
  0xbd   : > { %2218 = vmatpush1.bf16.msra.mxu0 %v3105_v13  ;;  %2047 = vmatprep.subr.bf16.mxu1 %v3110_v14  ;;  %v3189_v13 = vld [vmem:[%s4143_s1 + $0x7b0] ss:$8 sps:$4 sm:$0xff]   ;;  %v3194_v14 = vld [vmem:[%s4143_s1 + $0x3c4] ss:$8 sps:$4 sm:$0xff]  }
  0xbe   : > { %2219 = vmatprep.subr.bf16.mxu0 %v3113_v15  ;;  %v3197_v15 = vld [vmem:[%s4143_s1 + $0x7c4] ss:$8 sps:$4 sm:$0xff]  }
  0xc0   : > { %2048 = vmatpush1.bf16.msra.mxu1 %v3108_v16  ;;  %v3192_v16 = vld [vmem:[%s4143_s1 + $0x3c0] ss:$8 sps:$4 sm:$0xff]  }
  0xc1   : > { %2220 = vmatpush1.bf16.msra.mxu0 %v3111_v17  ;;  %2049 = vmatprep.subr.bf16.mxu1 %v3116_v18  ;;  %v3195_v17 = vld [vmem:[%s4143_s1 + $0x7c0] ss:$8 sps:$4 sm:$0xff]   ;;  %v3200_v18 = vld [vmem:[%s4143_s1 + $0x3d4] ss:$8 sps:$4 sm:$0xff]  }
  0xc2   : > { %2221 = vmatprep.subr.bf16.mxu0 %v3119_v19  ;;  %v3203_v19 = vld [vmem:[%s4143_s1 + $0x7d4] ss:$8 sps:$4 sm:$0xff]  }
  0xc4   : > { %2050 = vmatpush1.bf16.msra.mxu1 %v3114_v20  ;;  %v3198_v20 = vld [vmem:[%s4143_s1 + $0x3d0] ss:$8 sps:$4 sm:$0xff]  }
  0xc5   : > { %2222 = vmatpush1.bf16.msra.mxu0 %v3117_v21  ;;  %2062 = vmatprep.subr.bf16.mxu1 %v3122_v22  ;;  %v3201_v21 = vld [vmem:[%s4143_s1 + $0x7d0] ss:$8 sps:$4 sm:$0xff]   ;;  %v3206_v22 = vld [vmem:[%s4143_s1 + $0x3e4] ss:$8 sps:$4 sm:$0xff]  }
  0xc6   : > { %2234 = vmatprep.subr.bf16.mxu0 %v3125_v23  ;;  %v3209_v23 = vld [vmem:[%s4143_s1 + $0x7e4] ss:$8 sps:$4 sm:$0xff]  }
  0xc7   : > { %2052 = vmatmul.mubr.bf16.vlgmr.msra.gmra.mrb[0].mxu1 %v2504_v27  ;;  %v3204_v27 = vld [vmem:[%s4143_s1 + $0x3e0] ss:$8 sps:$4 sm:$0xff]  }
  0xc8   : > { %2224 = vmatmul.mubr.bf16.vlgmr.msra.gmra.mrb[0].mxu0 %v2512_v28  ;;  %2063 = vmatpush1.bf16.msra.mxu1 %v3120_v34  ;;  %v3207_v28 = vld [vmem:[%s4143_s1 + $0x7e0] ss:$8 sps:$4 sm:$0xff]   ;;  %v3212_v34 = vld [vmem:[%s4143_s1 + $0x3f4] ss:$8 sps:$4 sm:$0xff]  }
  0xc9   : > { %2235 = vmatpush1.bf16.msra.mxu0 %v3123_v35  ;;  %2064 = vmatprep.subr.bf16.mxu1 %v3128_v24  ;;  %v3215_v35 = vld [vmem:[%s4143_s1 + $0x7f4] ss:$8 sps:$4 sm:$0xff]   ;;  %v3210_v24 = vld [vmem:[%s4143_s1 + $0x3f0] ss:$8 sps:$4 sm:$0xff]  }
  0xca   : > { %2236 = vmatprep.subr.bf16.mxu0 %v3131_v25  ;;  %2094 = vmatprep.mubr.bf16.mxu1 %v2507_v29  ;;  %v3213_v25 = vld [vmem:[%s4143_s1 + $0x7f0] ss:$8 sps:$4 sm:$0xff]   ;;  %v2506_v29 = vcombine.low %v3917_v26, %v3924_v31 }
  0xcb   : > { %2266 = vmatprep.mubr.bf16.mxu0 %v2515_v30  ;;  %v2514_v30 = vcombine.low %v3927_v32, %v3930_v33 }
  0xcc   : > { %2065 = vmatpush1.bf16.msra.mxu1 %v3126_v36  ;;  %v283_v36 = vlaneseq }
  0xcd   : > { %2237 = vmatpush1.bf16.msra.mxu0 %v3129_v37  ;;  %2066 = vmatprep.subr.bf16.mxu1 %v3134_v38 }
  0xce   : > { %2238 = vmatprep.subr.bf16.mxu0 %v3137_v39  ;;  %v284_v37 = vshrl.u32 %v283_v36, 7  ;;  %v281_v39 = vld [vmem:[%s4144_s2] sm:$0x3] }
  0xd0   : > { %2067 = vmatpush1.bf16.msra.mxu1 %v3132_v40  ;;  %v285_v38 = vsub.s32 0, %v284_v37  ;;  %v289_v40 = vsub.s32 1, %v284_v37 }
  0xd1   : > { %2239 = vmatpush1.bf16.msra.mxu0 %v3135_v41  ;;  %2068 = vmatprep.subr.bf16.mxu1 %v3140_v42 }
  0xd2   : > { %2240 = vmatprep.subr.bf16.mxu0 %v3143_v43  ;;  %v286_v43 = vrot.slane %v281_v39, %v285_v38 }
  0xd4   : > { %2069 = vmatpush1.bf16.msra.mxu1 %v3138_v44 }
  0xd5   : > { %2241 = vmatpush1.bf16.msra.mxu0 %v3141_v45  ;;  %2070 = vmatprep.subr.bf16.mxu1 %v3146_v46  ;;  %v290_v45 = vrot.slane %v281_v39, %v289_v40 }
  0xd6   : > { %2242 = vmatprep.subr.bf16.mxu0 %v3149_v47 }
  0xd8   : > { %2071 = vmatpush1.bf16.msra.mxu1 %v3144_v48 }
  0xd9   : > { %2243 = vmatpush1.bf16.msra.mxu0 %v3147_v49  ;;  %2072 = vmatprep.subr.bf16.mxu1 %v3152_v50 }
  0xda   : > { %2244 = vmatprep.subr.bf16.mxu0 %v3155_v51 }
  0xdc   : > { %2073 = vmatpush1.bf16.msra.mxu1 %v3150_v52 }
  0xdd   : > { %2245 = vmatpush1.bf16.msra.mxu0 %v3153_v53  ;;  %2074 = vmatprep.subr.bf16.mxu1 %v3158_v54 }
  0xde   : > { %2246 = vmatprep.subr.bf16.mxu0 %v3161_v55 }
  0xe0   : > { %2075 = vmatpush1.bf16.msra.mxu1 %v3156_v56 }
  0xe1   : > { %2247 = vmatpush1.bf16.msra.mxu0 %v3159_v57  ;;  %2076 = vmatprep.subr.bf16.mxu1 %v3164_v58 }
  0xe2   : > { %2248 = vmatprep.subr.bf16.mxu0 %v3167_v59 }
  0xe4   : > { %2077 = vmatpush1.bf16.msra.mxu1 %v3162_v60 }
  0xe5   : > { %2249 = vmatpush1.bf16.msra.mxu0 %v3165_v61  ;;  %2078 = vmatprep.subr.bf16.mxu1 %v3170_v62 }
  0xe6   : > { %2250 = vmatprep.subr.bf16.mxu0 %v3173_v63 }
  0xe8   : > { %2079 = vmatpush1.bf16.msra.mxu1 %v3168_v0 }
  0xe9   : > { %2251 = vmatpush1.bf16.msra.mxu0 %v3171_v1  ;;  %2080 = vmatprep.subr.bf16.mxu1 %v3176_v2 }
  0xea   : > { %2252 = vmatprep.subr.bf16.mxu0 %v3179_v3 }
  0xec   : > { %2081 = vmatpush1.bf16.msra.mxu1 %v3174_v4 }
  0xed   : > { %2253 = vmatpush1.bf16.msra.mxu0 %v3177_v5  ;;  %2082 = vmatprep.subr.bf16.mxu1 %v3182_v6 }
  0xee   : > { %2254 = vmatprep.subr.bf16.mxu0 %v3185_v7 }
  0xf0   : > { %2083 = vmatpush1.bf16.msra.mxu1 %v3180_v8 }
  0xf1   : > { %2255 = vmatpush1.bf16.msra.mxu0 %v3183_v9  ;;  %2084 = vmatprep.subr.bf16.mxu1 %v3188_v10 }
  0xf2   : > { %2256 = vmatprep.subr.bf16.mxu0 %v3191_v11 }
  0xf4   : > { %2085 = vmatpush1.bf16.msra.mxu1 %v3186_v12 }
  0xf5   : > { %2257 = vmatpush1.bf16.msra.mxu0 %v3189_v13  ;;  %2086 = vmatprep.subr.bf16.mxu1 %v3194_v14 }
  0xf6   : > { %2258 = vmatprep.subr.bf16.mxu0 %v3197_v15 }
  0xf8   : > { %2087 = vmatpush1.bf16.msra.mxu1 %v3192_v16 }
  0xf9   : > { %2259 = vmatpush1.bf16.msra.mxu0 %v3195_v17  ;;  %2088 = vmatprep.subr.bf16.mxu1 %v3200_v18 }
  0xfa   : > { %2260 = vmatprep.subr.bf16.mxu0 %v3203_v19 }
  0xfc   : > { %2089 = vmatpush1.bf16.msra.mxu1 %v3198_v20 }
  0xfd   : > { %2261 = vmatpush1.bf16.msra.mxu0 %v3201_v21  ;;  %2090 = vmatprep.subr.bf16.mxu1 %v3206_v22 }
  0xfe   : > { %2262 = vmatprep.subr.bf16.mxu0 %v3209_v23 }
 0x100   : > { %2091 = vmatpush1.bf16.msra.mxu1 %v3204_v27 }
 0x101   : > { %2263 = vmatpush1.bf16.msra.mxu0 %v3207_v28  ;;  %2092 = vmatprep.subr.bf16.mxu1 %v3212_v34 }
 0x102   : > { %2264 = vmatprep.subr.bf16.mxu0 %v3215_v35 }
 0x104   : > { %2093 = vmatpush1.bf16.msra.mxu1 %v3210_v24 }
 0x105   : > { %2265 = vmatpush1.bf16.msra.mxu0 %v3213_v25 }
 0x107   : > { %2095 = vmatmul.mubr.bf16.vlgmr.msra.gmra.mrb[0].mxu1 %v2506_v29 }
 0x108   : > { %2267 = vmatmul.mubr.bf16.vlgmr.msra.gmra.mrb[0].mxu0 %v2514_v30 }
 0x1da   : > { %v2096_v41 = vpop.f32.mrb[0].mxu1 }
 0x1db   : > { %v2268_v42 = vpop.f32.mrb[0].mxu0  ;;  %v2098_v26 = vpop.f32.mrb[1].mxu1 }
 0x1dc   : > { %v2780_v44 = vadd.f32 %v2268_v42, %v2096_v41  ;;  %v2270_v31 = vpop.f32.mrb[1].mxu0  ;;  %v2100_v33 = vpop.f32.mrb[2].mxu1 }
 0x1dd   : > { %v2781_v32 = vadd.f32 %v2270_v31, %v2098_v26  ;;  %v2272_v46 = vpop.f32.mrb[2].mxu0  ;;  %v2102_v48 = vpop.f32.mrb[3].mxu1 }
 0x1de   : > { %v2782_v47 = vadd.f32 %v2272_v46, %v2100_v33  ;;  %v2274_v49 = vpop.f32.mrb[3].mxu0  ;;  %v2277_v51 = vadd.f32 %v2780_v44, %v286_v43 }
 0x1df   : > { %v2783_v50 = vadd.f32 %v2274_v49, %v2102_v48  ;;  %v2278_v53 = vadd.f32 %v2781_v32, %v290_v45 }
 0x1e0   : > { %v2279_v52 = vadd.f32 %v2782_v47, %v286_v43 }
 0x1e1   : > { %v2280_v54 = vadd.f32 %v2783_v50, %v290_v45 }
 0x1e2   : > { %v2292_v55 = vadd.f32 %v2279_v52, %v2277_v51 }
 0x1e3   : > { %v2299_v56 = vadd.f32 %v2280_v54, %v2278_v53 }
 0x1e4   : > { %v2293_v57 = vrot.slane %v2292_v55, 4 }
 0x1e5   : > { %v2300_v58 = vrot.slane %v2299_v56, 4 }
 0x1e6   : > { %v2294_v59 = vadd.f32 %v2293_v57, %v2292_v55 }
 0x1e7   : > { %v2301_v60 = vadd.f32 %v2300_v58, %v2299_v56 }
 0x1e8   : > { %v2295_v61 = vrot.slane %v2294_v59, 2 }
 0x1e9   : > { %v2302_v62 = vrot.slane %v2301_v60, 2 }
 0x1ea   : > { %v2296_v63 = vadd.f32 %v2295_v61, %v2294_v59 }
 0x1eb   : > { %v2303_v0 = vadd.f32 %v2302_v62, %v2301_v60 }
 0x1ec   : > { %v2297_v1 = vrot.slane %v2296_v63, 1 }
 0x1ed   : > { %v2304_v2 = vrot.slane %v2303_v0, 1 }
 0x1ee   : > { %v2298_v3 = vadd.f32 %v2297_v1, %v2296_v63 }
 0x1ef   : > { %v2305_v4 = vadd.f32 %v2304_v2, %v2303_v0 }
 0x1f0   : > { %v2306_v5 = vmul.f32 0.0625, %v2298_v3 }
 0x1f1   : > { %v2307_v6 = vmul.f32 0.0625, %v2305_v4 }
 0x1f2   : > { %v2308_v7 = vsub.f32 %v2277_v51, %v2306_v5  ;;  %v2310_v8 = vsub.f32 %v2279_v52, %v2306_v5 }
 0x1f3   : > { %v2309_v9 = vsub.f32 %v2278_v53, %v2307_v6  ;;  %v2311_v10 = vsub.f32 %v2280_v54, %v2307_v6 }
 0x1f4   : > { %v2312_v11 = vmul.f32 %v2308_v7, %v2308_v7  ;;  %v2314_v12 = vmul.f32 %v2310_v8, %v2310_v8 }
 0x1f5   : > { %v2313_v13 = vmul.f32 %v2309_v9, %v2309_v9  ;;  %v2315_v14 = vmul.f32 %v2311_v10, %v2311_v10 }
 0x1f6   : > { %v2316_v15 = vadd.f32 %v2314_v12, %v2312_v11 }
 0x1f7   : > { %v2323_v16 = vadd.f32 %v2315_v14, %v2313_v13 }
 0x1f8   : > { %v2317_v17 = vrot.slane %v2316_v15, 4 }
 0x1f9   : > { %v2324_v18 = vrot.slane %v2323_v16, 4 }
 0x1fa   : > { %v2318_v19 = vadd.f32 %v2317_v17, %v2316_v15 }
 0x1fb   : > { %v2325_v20 = vadd.f32 %v2324_v18, %v2323_v16 }
 0x1fc   : > { %v2319_v21 = vrot.slane %v2318_v19, 2 }
 0x1fd   : > { %v2326_v22 = vrot.slane %v2325_v20, 2 }
 0x1fe   : > { %v2320_v23 = vadd.f32 %v2319_v21, %v2318_v19 }
 0x1ff   : > { %v2327_v27 = vadd.f32 %v2326_v22, %v2325_v20 }
 0x200   : > { %v2321_v28 = vrot.slane %v2320_v23, 1 }
 0x201   : > { %v2328_v34 = vrot.slane %v2327_v27, 1 }
 0x202   : > { %v2322_v35 = vadd.f32 %v2321_v28, %v2320_v23 }
 0x203   : > { %v2329_v24 = vadd.f32 %v2328_v34, %v2327_v27 }
 0x204   : > { %v2330_v25 = vmul.f32 0.0625, %v2322_v35 }
 0x205   : > { %v2331_v29 = vmul.f32 0.0625, %v2329_v24 }
 0x206   : > { %v2332_v30 = vadd.f32 1e-05, %v2330_v25 }
 0x207   : > { %v2333_v36 = vadd.f32 1e-05, %v2331_v29 }
 0x208   : > { %3216 = vrsqrt.f32 %v2332_v30 }
 0x209   : > { %3218 = vrsqrt.f32 %v2333_v36 }
 0x212   : > { %v3217_v37 = vpop.eup %3216 }
 0x213   : > { %v3219_v38 = vpop.eup %3218  ;;  %v2336_v39 = vmul.f32 %v3217_v37, %v2308_v7  ;;  %v2338_v40 = vmul.f32 %v3217_v37, %v2310_v8 }
 0x214   : > { %v2337_v41 = vmul.f32 %v3219_v38, %v2309_v9  ;;  %v2339_v42 = vmul.f32 %v3219_v38, %v2311_v10 }
 0x215   : > { %vm2340_vm0 = vcmp.ge.f32.partialorder %v2336_v39, 0.0  ;;  %vm2342_vm1 = vcmp.ge.f32.partialorder %v2338_v40, 0.0  ;;  %v2344_v43 = vmul.f32 0.2, %v2336_v39  ;;  %v2346_v44 = vmul.f32 0.2, %v2338_v40 }
 0x216   : > { %vm2341_vm2 = vcmp.ge.f32.partialorder %v2337_v41, 0.0  ;;  %vm2343_vm3 = vcmp.ge.f32.partialorder %v2339_v42, 0.0  ;;  %v2345_v26 = vmul.f32 0.2, %v2337_v41  ;;  %v2347_v31 = vmul.f32 0.2, %v2339_v42 }
 0x217   : > { %v2348_v45 = vsel %vm2340_vm0, %v2336_v39, %v2344_v43  ;;  %v2350_v32 = vsel %vm2342_vm1, %v2338_v40, %v2346_v44 }
 0x218   : > { %v2349_v33 = vsel %vm2341_vm2, %v2337_v41, %v2345_v26  ;;  %v2351_v46 = vsel %vm2343_vm3, %v2339_v42, %v2347_v31 }
 0x219   : > { %v2778_v47 = vpack.c.bf16 %v2349_v33, %v2348_v45  ;;  %v2779_v48 = vpack.c.bf16 %v2351_v46, %v2350_v32 }
 0x21b   : > { %2364 = vst [vmem:[%s275_s21] sm:$0xff] %v2778_v47  ;;  %2365 = vst [vmem:[%s275_s21 + $0x8] sm:$0xff] %v2779_v48 }
 0x21c PF: > { %s13_s14 = sadd.s32 1, %s3242_s14   ;;  %s4146_s12 = smov %s3238_s13 }
 0x21d   : > { %p10_p5 = scmp.ge.s32.totalorder %s13_s14, 4   ;;  %s4147_s13 = smov %s4149_s15 }
 0x21f   :  { %12 = sbr.rel (!%p10_p5) target bundleno = 2 (0x2), region = 76 }

// kernel: discriminator_forward.8
= control target key start
LH: loop header
LB: loop body
LE: loop exit
PB: predicated region body
PF: predicated region fallthrough
CT: control target
= control target key end

     0   :  { %s10219_s12 = smov 0   ;;  %s10221_s13 = smov 0   ;;  %s12042_s0 = inlined_call_operand.vmem [shape: bf16[2,16,4096], index: 0, kind: input, shape index: {}]   ;;  %s12043_s1 = inlined_call_operand.vmem [shape: bf16[4096,512], index: 1, kind: input, shape index: {}]   ;;  %s12044_s2 = inlined_call_operand.vmem [shape: f32[1,512], index: 2, kind: input, shape index: {}]   ;;  %s12045_s3 = inlined_call_operand.vmem [shape: bf16[2,16,512], index: 3, kind: output, shape index: {}]  }
   0x1   :  { %s10223_s14 = smov 0   ;;  %s10225_s15 = smov 0  }
   0x2   :  { %s10227_s16 = smov 0   ;;  %s10229_s17 = smov 0  }
   0x3   :  { %s10231_s18 = smov 0   ;;  %s10233_s19 = smov 0  }
   0x4   :  { %s10235_s20 = smov 0  }
   0x5 LB: > { %s8654_s21 = sadd.s32 4294967295, %s10197_s20   ;;  %s28_s22 = sadd.s32 1, %s10189_s18  ;;  %s10197_s20 = sphi %s10235_s20, %s13_s20   ;;  %s10193_s19 = sphi %s10233_s19, %s12054_s19   ;;  %s10189_s18 = sphi %s10231_s18, %s12053_s18   ;;  %s10185_s17 = sphi %s10229_s17, %s12052_s17   ;;  %s10181_s16 = sphi %s10227_s16, %s12051_s16   ;;  %s10177_s15 = sphi %s10225_s15, %s12050_s15   ;;  %s10173_s14 = sphi %s10223_s14, %s12049_s14   ;;  %s10169_s13 = sphi %s10221_s13, %s12048_s13   ;;  %s10165_s12 = sphi %s10219_s12, %s12047_s12  }
   0x6   : > { %p30_p0 = scmp.ge.s32.totalorder %s28_s22, 2  ;;  %s32_s23 = sadd.s32 1, %s10193_s19 }
   0x7   : > { %s69_s24 = sadd.s32 1, %s10177_s15  ;;  %p76_p1 = scmp.ne.s32.totalorder %s10177_s15, %s10173_s14 }
   0x8   : > { %s12056_s22 = smov (%p30_p0, %s28_s22), 0  ;;  %s12058_s23 = smov (!%p30_p0, %s32_s23), %s10193_s19 }
   0x9   : > { %s65_s25 = ssub.s32 %s10189_s18, %s12056_s22  ;;  %p77_p2 = scmp.eq.s32.totalorder %s10197_s20, 0 }
   0xa   : > { %p34_p3 = scmp.ge.s32.totalorder %s12058_s23, 2  ;;  %p67_p4 = scmp.eq.s32.totalorder %s65_s25, 0 }
   0xb   : > { %p78_p5 = por %p77_p2, %p76_p1  ;;  %s123_s26 = sadd.s32 1, %s10169_s13 }
   0xc   : > { %s12060_s23 = smov (%p34_p3, %s12058_s23), 0  ;;  %p133_p6 = scmp.ne.s32.totalorder %s10169_s13, %s10165_s12 }
   0xd   : > { %s10280_s27 = scalar_select %p67_p4, %s10177_s15, %s69_s24  }
   0xe   : > { %s118_s28 = ssub.s32 %s10193_s19, %s12060_s23  ;;  %p134_p7 = scmp.eq.s32.totalorder %s8654_s21, 3 }
   0xf   : > { %s120_s29 = sor.u32 %s118_s28, %s65_s25  ;;  %p8657_p10 = scmp.ge.s32.totalorder %s10197_s20, 4 }
  0x10   : > { %p121_p8 = scmp.eq.s32.totalorder %s120_s29, 0  ;;  %p10286_p9 = por %p134_p7, %p133_p6 }
  0x11   : > { %156 = sbr.rel (%p8657_p10) target bundleno = 284 (0x11c), region = 16 }
  0x12   : > { %s10291_s4 = scalar_select %p121_p8, %s10169_s13, %s123_s26  }
  0x18   : > { %172 = sbr.rel (!%p78_p5) target bundleno = 284 (0x11c), region = 24  ;;  %s174_s5 = sand.u32 (%p78_p5), 1, %s10177_s15  }
  0x19   : > { %s9219_s6 = sshll.u32 (%p78_p5), %s10189_s18, 3  ;;  %s8658_s7 = sshll.u32 (%p78_p5), %s174_s5, 12 }
  0x1a   : > { %s10299_s10 = scalar_lea.vmem (%p78_p5), %s12043_s1, %s9219_s6  ;;  %s10304_s11 = scalar_lea.vmem (%p78_p5), [#allocation3], %s8658_s7 }
  0x1b   : > { %v1235_v0 = vld [vmem:[%s10299_s10] sm:$0xff] (%p78_p5)  ;;  %v1237_v1 = vld [vmem:[%s10299_s10 + $0x10] sm:$0xff] (%p78_p5) }
  0x1c   : > { %v1239_v2 = vld [vmem:[%s10299_s10 + $0x20] sm:$0xff] (%p78_p5)  ;;  %1236 = vst [vmem:[%s10304_s11] sm:$0xff] (%p78_p5), %v1235_v0  ;;  %1238 = vst [vmem:[%s10304_s11 + $0x8] sm:$0xff] (%p78_p5), %v1237_v1  ;;  %v1241_v3 = vld [vmem:[%s10299_s10 + $0x30] sm:$0xff] (%p78_p5) }
  0x1d   : > { %1240 = vst [vmem:[%s10304_s11 + $0x10] sm:$0xff] (%p78_p5), %v1239_v2  ;;  %v1243_v4 = vld [vmem:[%s10299_s10 + $0x40] sm:$0xff] (%p78_p5)  ;;  %v1245_v5 = vld [vmem:[%s10299_s10 + $0x50] sm:$0xff] (%p78_p5)  ;;  %1242 = vst [vmem:[%s10304_s11 + $0x18] sm:$0xff] (%p78_p5), %v1241_v3 }
  0x1e   : > { %1244 = vst [vmem:[%s10304_s11 + $0x20] sm:$0xff] (%p78_p5), %v1243_v4  ;;  %1246 = vst [vmem:[%s10304_s11 + $0x28] sm:$0xff] (%p78_p5), %v1245_v5  ;;  %v1247_v6 = vld [vmem:[%s10299_s10 + $0x60] sm:$0xff] (%p78_p5)  ;;  %v1249_v7 = vld [vmem:[%s10299_s10 + $0x70] sm:$0xff] (%p78_p5) }
  0x1f   : > { %v1251_v8 = vld [vmem:[%s10299_s10 + $0x80] sm:$0xff]  ;;  %1248 = vst [vmem:[%s10304_s11 + $0x30] sm:$0xff] %v1247_v6  ;;  %1250 = vst [vmem:[%s10304_s11 + $0x38] sm:$0xff] %v1249_v7  ;;  %v1253_v9 = vld [vmem:[%s10299_s10 + $0x90] sm:$0xff] }
  0x20   : > { %1252 = vst [vmem:[%s10304_s11 + $0x40] sm:$0xff] %v1251_v8  ;;  %v1255_v10 = vld [vmem:[%s10299_s10 + $0xa0] sm:$0xff]  ;;  %v1257_v11 = vld [vmem:[%s10299_s10 + $0xb0] sm:$0xff]  ;;  %1254 = vst [vmem:[%s10304_s11 + $0x48] sm:$0xff] %v1253_v9 }
  0x21   : > { %1256 = vst [vmem:[%s10304_s11 + $0x50] sm:$0xff] %v1255_v10  ;;  %1258 = vst [vmem:[%s10304_s11 + $0x58] sm:$0xff] %v1257_v11  ;;  %v1259_v12 = vld [vmem:[%s10299_s10 + $0xc0] sm:$0xff]  ;;  %v1261_v13 = vld [vmem:[%s10299_s10 + $0xd0] sm:$0xff] }
  0x22   : > { %v1263_v14 = vld [vmem:[%s10299_s10 + $0xe0] sm:$0xff]  ;;  %1260 = vst [vmem:[%s10304_s11 + $0x60] sm:$0xff] %v1259_v12  ;;  %1262 = vst [vmem:[%s10304_s11 + $0x68] sm:$0xff] %v1261_v13  ;;  %v1265_v15 = vld [vmem:[%s10299_s10 + $0xf0] sm:$0xff] }
  0x23   : > { %1264 = vst [vmem:[%s10304_s11 + $0x70] sm:$0xff] %v1263_v14  ;;  %v1267_v16 = vld [vmem:[%s10299_s10 + $0x100] sm:$0xff]  ;;  %v1269_v17 = vld [vmem:[%s10299_s10 + $0x110] sm:$0xff]  ;;  %1266 = vst [vmem:[%s10304_s11 + $0x78] sm:$0xff] %v1265_v15 }
  0x24   : > { %1268 = vst [vmem:[%s10304_s11 + $0x80] sm:$0xff] %v1267_v16  ;;  %1270 = vst [vmem:[%s10304_s11 + $0x88] sm:$0xff] %v1269_v17  ;;  %v1271_v18 = vld [vmem:[%s10299_s10 + $0x120] sm:$0xff]  ;;  %v1273_v19 = vld [vmem:[%s10299_s10 + $0x130] sm:$0xff] }
  0x25   : > { %v1275_v20 = vld [vmem:[%s10299_s10 + $0x140] sm:$0xff]  ;;  %1272 = vst [vmem:[%s10304_s11 + $0x90] sm:$0xff] %v1271_v18  ;;  %1274 = vst [vmem:[%s10304_s11 + $0x98] sm:$0xff] %v1273_v19  ;;  %v1277_v21 = vld [vmem:[%s10299_s10 + $0x150] sm:$0xff] }
  0x26   : > { %1276 = vst [vmem:[%s10304_s11 + $0xa0] sm:$0xff] %v1275_v20  ;;  %v1279_v22 = vld [vmem:[%s10299_s10 + $0x160] sm:$0xff]  ;;  %v1281_v23 = vld [vmem:[%s10299_s10 + $0x170] sm:$0xff]  ;;  %1278 = vst [vmem:[%s10304_s11 + $0xa8] sm:$0xff] %v1277_v21 }
  0x27   : > { %1280 = vst [vmem:[%s10304_s11 + $0xb0] sm:$0xff] %v1279_v22  ;;  %1282 = vst [vmem:[%s10304_s11 + $0xb8] sm:$0xff] %v1281_v23  ;;  %v1283_v24 = vld [vmem:[%s10299_s10 + $0x180] sm:$0xff]  ;;  %v1285_v25 = vld [vmem:[%s10299_s10 + $0x190] sm:$0xff] }
  0x28   : > { %v1287_v26 = vld [vmem:[%s10299_s10 + $0x1a0] sm:$0xff]  ;;  %1284 = vst [vmem:[%s10304_s11 + $0xc0] sm:$0xff] %v1283_v24  ;;  %1286 = vst [vmem:[%s10304_s11 + $0xc8] sm:$0xff] %v1285_v25  ;;  %v1289_v27 = vld [vmem:[%s10299_s10 + $0x1b0] sm:$0xff] }
  0x29   : > { %1288 = vst [vmem:[%s10304_s11 + $0xd0] sm:$0xff] %v1287_v26  ;;  %v1291_v28 = vld [vmem:[%s10299_s10 + $0x1c0] sm:$0xff]  ;;  %v1293_v29 = vld [vmem:[%s10299_s10 + $0x1d0] sm:$0xff]  ;;  %1290 = vst [vmem:[%s10304_s11 + $0xd8] sm:$0xff] %v1289_v27 }
  0x2a   : > { %1292 = vst [vmem:[%s10304_s11 + $0xe0] sm:$0xff] %v1291_v28  ;;  %1294 = vst [vmem:[%s10304_s11 + $0xe8] sm:$0xff] %v1293_v29  ;;  %v1295_v30 = vld [vmem:[%s10299_s10 + $0x1e0] sm:$0xff]  ;;  %v1297_v31 = vld [vmem:[%s10299_s10 + $0x1f0] sm:$0xff] }
  0x2b   : > { %v1299_v32 = vld [vmem:[%s10299_s10 + $0x200] sm:$0xff]  ;;  %1296 = vst [vmem:[%s10304_s11 + $0xf0] sm:$0xff] %v1295_v30  ;;  %1298 = vst [vmem:[%s10304_s11 + $0xf8] sm:$0xff] %v1297_v31  ;;  %v1301_v33 = vld [vmem:[%s10299_s10 + $0x210] sm:$0xff] }
  0x2c   : > { %1300 = vst [vmem:[%s10304_s11 + $0x100] sm:$0xff] %v1299_v32  ;;  %v1303_v34 = vld [vmem:[%s10299_s10 + $0x220] sm:$0xff]  ;;  %v1305_v35 = vld [vmem:[%s10299_s10 + $0x230] sm:$0xff]  ;;  %1302 = vst [vmem:[%s10304_s11 + $0x108] sm:$0xff] %v1301_v33 }
  0x2d   : > { %1304 = vst [vmem:[%s10304_s11 + $0x110] sm:$0xff] %v1303_v34  ;;  %1306 = vst [vmem:[%s10304_s11 + $0x118] sm:$0xff] %v1305_v35  ;;  %v1307_v36 = vld [vmem:[%s10299_s10 + $0x240] sm:$0xff]  ;;  %v1309_v37 = vld [vmem:[%s10299_s10 + $0x250] sm:$0xff] }
  0x2e   : > { %v1311_v38 = vld [vmem:[%s10299_s10 + $0x260] sm:$0xff]  ;;  %1308 = vst [vmem:[%s10304_s11 + $0x120] sm:$0xff] %v1307_v36  ;;  %1310 = vst [vmem:[%s10304_s11 + $0x128] sm:$0xff] %v1309_v37  ;;  %v1313_v39 = vld [vmem:[%s10299_s10 + $0x270] sm:$0xff] }
  0x2f   : > { %1312 = vst [vmem:[%s10304_s11 + $0x130] sm:$0xff] %v1311_v38  ;;  %v1315_v40 = vld [vmem:[%s10299_s10 + $0x280] sm:$0xff]  ;;  %v1317_v41 = vld [vmem:[%s10299_s10 + $0x290] sm:$0xff]  ;;  %1314 = vst [vmem:[%s10304_s11 + $0x138] sm:$0xff] %v1313_v39 }
  0x30   : > { %1316 = vst [vmem:[%s10304_s11 + $0x140] sm:$0xff] %v1315_v40  ;;  %1318 = vst [vmem:[%s10304_s11 + $0x148] sm:$0xff] %v1317_v41  ;;  %v1319_v42 = vld [vmem:[%s10299_s10 + $0x2a0] sm:$0xff]  ;;  %v1321_v43 = vld [vmem:[%s10299_s10 + $0x2b0] sm:$0xff] }
  0x31   : > { %v1323_v44 = vld [vmem:[%s10299_s10 + $0x2c0] sm:$0xff]  ;;  %1320 = vst [vmem:[%s10304_s11 + $0x150] sm:$0xff] %v1319_v42  ;;  %1322 = vst [vmem:[%s10304_s11 + $0x158] sm:$0xff] %v1321_v43  ;;  %v1325_v45 = vld [vmem:[%s10299_s10 + $0x2d0] sm:$0xff] }
  0x32   : > { %1324 = vst [vmem:[%s10304_s11 + $0x160] sm:$0xff] %v1323_v44  ;;  %v1327_v46 = vld [vmem:[%s10299_s10 + $0x2e0] sm:$0xff]  ;;  %v1329_v47 = vld [vmem:[%s10299_s10 + $0x2f0] sm:$0xff]  ;;  %1326 = vst [vmem:[%s10304_s11 + $0x168] sm:$0xff] %v1325_v45 }
  0x33   : > { %1328 = vst [vmem:[%s10304_s11 + $0x170] sm:$0xff] %v1327_v46  ;;  %1330 = vst [vmem:[%s10304_s11 + $0x178] sm:$0xff] %v1329_v47  ;;  %v1331_v48 = vld [vmem:[%s10299_s10 + $0x300] sm:$0xff]  ;;  %v1333_v49 = vld [vmem:[%s10299_s10 + $0x310] sm:$0xff] }
  0x34   : > { %v1335_v50 = vld [vmem:[%s10299_s10 + $0x320] sm:$0xff]  ;;  %1332 = vst [vmem:[%s10304_s11 + $0x180] sm:$0xff] %v1331_v48  ;;  %1334 = vst [vmem:[%s10304_s11 + $0x188] sm:$0xff] %v1333_v49  ;;  %v1337_v51 = vld [vmem:[%s10299_s10 + $0x330] sm:$0xff] }
  0x35   : > { %1336 = vst [vmem:[%s10304_s11 + $0x190] sm:$0xff] %v1335_v50  ;;  %v1339_v52 = vld [vmem:[%s10299_s10 + $0x340] sm:$0xff]  ;;  %v1341_v53 = vld [vmem:[%s10299_s10 + $0x350] sm:$0xff]  ;;  %1338 = vst [vmem:[%s10304_s11 + $0x198] sm:$0xff] %v1337_v51 }
  0x36   : > { %1340 = vst [vmem:[%s10304_s11 + $0x1a0] sm:$0xff] %v1339_v52  ;;  %1342 = vst [vmem:[%s10304_s11 + $0x1a8] sm:$0xff] %v1341_v53  ;;  %v1343_v54 = vld [vmem:[%s10299_s10 + $0x360] sm:$0xff]  ;;  %v1345_v55 = vld [vmem:[%s10299_s10 + $0x370] sm:$0xff] }
  0x37   : > { %v1347_v56 = vld [vmem:[%s10299_s10 + $0x380] sm:$0xff]  ;;  %1344 = vst [vmem:[%s10304_s11 + $0x1b0] sm:$0xff] %v1343_v54  ;;  %1346 = vst [vmem:[%s10304_s11 + $0x1b8] sm:$0xff] %v1345_v55  ;;  %v1349_v57 = vld [vmem:[%s10299_s10 + $0x390] sm:$0xff] }
  0x38   : > { %1348 = vst [vmem:[%s10304_s11 + $0x1c0] sm:$0xff] %v1347_v56  ;;  %v1351_v58 = vld [vmem:[%s10299_s10 + $0x3a0] sm:$0xff]  ;;  %v1353_v59 = vld [vmem:[%s10299_s10 + $0x3b0] sm:$0xff]  ;;  %1350 = vst [vmem:[%s10304_s11 + $0x1c8] sm:$0xff] %v1349_v57 }
  0x39   : > { %1352 = vst [vmem:[%s10304_s11 + $0x1d0] sm:$0xff] %v1351_v58  ;;  %1354 = vst [vmem:[%s10304_s11 + $0x1d8] sm:$0xff] %v1353_v59  ;;  %v1355_v60 = vld [vmem:[%s10299_s10 + $0x3c0] sm:$0xff]  ;;  %v1357_v61 = vld [vmem:[%s10299_s10 + $0x3d0] sm:$0xff] }
  0x3a   : > { %v1359_v62 = vld [vmem:[%s10299_s10 + $0x3e0] sm:$0xff]  ;;  %1356 = vst [vmem:[%s10304_s11 + $0x1e0] sm:$0xff] %v1355_v60  ;;  %1358 = vst [vmem:[%s10304_s11 + $0x1e8] sm:$0xff] %v1357_v61  ;;  %v1361_v63 = vld [vmem:[%s10299_s10 + $0x3f0] sm:$0xff] }
  0x3b   : > { %1360 = vst [vmem:[%s10304_s11 + $0x1f0] sm:$0xff] %v1359_v62  ;;  %v1363_v0 = vld [vmem:[%s10299_s10 + $0x400] sm:$0xff]  ;;  %v1365_v1 = vld [vmem:[%s10299_s10 + $0x410] sm:$0xff]  ;;  %1362 = vst [vmem:[%s10304_s11 + $0x1f8] sm:$0xff] %v1361_v63 }
  0x3c   : > { %1364 = vst [vmem:[%s10304_s11 + $0x200] sm:$0xff] %v1363_v0  ;;  %1366 = vst [vmem:[%s10304_s11 + $0x208] sm:$0xff] %v1365_v1  ;;  %v1367_v2 = vld [vmem:[%s10299_s10 + $0x420] sm:$0xff]  ;;  %v1369_v3 = vld [vmem:[%s10299_s10 + $0x430] sm:$0xff] }
  0x3d   : > { %v1371_v4 = vld [vmem:[%s10299_s10 + $0x440] sm:$0xff]  ;;  %1368 = vst [vmem:[%s10304_s11 + $0x210] sm:$0xff] %v1367_v2  ;;  %1370 = vst [vmem:[%s10304_s11 + $0x218] sm:$0xff] %v1369_v3  ;;  %v1373_v5 = vld [vmem:[%s10299_s10 + $0x450] sm:$0xff] }
  0x3e   : > { %1372 = vst [vmem:[%s10304_s11 + $0x220] sm:$0xff] %v1371_v4  ;;  %v1375_v6 = vld [vmem:[%s10299_s10 + $0x460] sm:$0xff]  ;;  %v1377_v7 = vld [vmem:[%s10299_s10 + $0x470] sm:$0xff]  ;;  %1374 = vst [vmem:[%s10304_s11 + $0x228] sm:$0xff] %v1373_v5 }
  0x3f   : > { %1376 = vst [vmem:[%s10304_s11 + $0x230] sm:$0xff] %v1375_v6  ;;  %1378 = vst [vmem:[%s10304_s11 + $0x238] sm:$0xff] %v1377_v7  ;;  %v1379_v8 = vld [vmem:[%s10299_s10 + $0x480] sm:$0xff]  ;;  %v1381_v9 = vld [vmem:[%s10299_s10 + $0x490] sm:$0xff] }
  0x40   : > { %v1383_v10 = vld [vmem:[%s10299_s10 + $0x4a0] sm:$0xff]  ;;  %1380 = vst [vmem:[%s10304_s11 + $0x240] sm:$0xff] %v1379_v8  ;;  %1382 = vst [vmem:[%s10304_s11 + $0x248] sm:$0xff] %v1381_v9  ;;  %v1385_v11 = vld [vmem:[%s10299_s10 + $0x4b0] sm:$0xff] }
  0x41   : > { %1384 = vst [vmem:[%s10304_s11 + $0x250] sm:$0xff] %v1383_v10  ;;  %v1387_v12 = vld [vmem:[%s10299_s10 + $0x4c0] sm:$0xff]  ;;  %v1389_v13 = vld [vmem:[%s10299_s10 + $0x4d0] sm:$0xff]  ;;  %1386 = vst [vmem:[%s10304_s11 + $0x258] sm:$0xff] %v1385_v11 }
  0x42   : > { %1388 = vst [vmem:[%s10304_s11 + $0x260] sm:$0xff] %v1387_v12  ;;  %1390 = vst [vmem:[%s10304_s11 + $0x268] sm:$0xff] %v1389_v13  ;;  %v1391_v14 = vld [vmem:[%s10299_s10 + $0x4e0] sm:$0xff]  ;;  %v1393_v15 = vld [vmem:[%s10299_s10 + $0x4f0] sm:$0xff] }
  0x43   : > { %v1395_v16 = vld [vmem:[%s10299_s10 + $0x500] sm:$0xff]  ;;  %1392 = vst [vmem:[%s10304_s11 + $0x270] sm:$0xff] %v1391_v14  ;;  %1394 = vst [vmem:[%s10304_s11 + $0x278] sm:$0xff] %v1393_v15  ;;  %v1397_v17 = vld [vmem:[%s10299_s10 + $0x510] sm:$0xff] }
  0x44   : > { %1396 = vst [vmem:[%s10304_s11 + $0x280] sm:$0xff] %v1395_v16  ;;  %v1399_v18 = vld [vmem:[%s10299_s10 + $0x520] sm:$0xff]  ;;  %v1401_v19 = vld [vmem:[%s10299_s10 + $0x530] sm:$0xff]  ;;  %1398 = vst [vmem:[%s10304_s11 + $0x288] sm:$0xff] %v1397_v17 }
  0x45   : > { %1400 = vst [vmem:[%s10304_s11 + $0x290] sm:$0xff] %v1399_v18  ;;  %1402 = vst [vmem:[%s10304_s11 + $0x298] sm:$0xff] %v1401_v19  ;;  %v1403_v20 = vld [vmem:[%s10299_s10 + $0x540] sm:$0xff]  ;;  %v1405_v21 = vld [vmem:[%s10299_s10 + $0x550] sm:$0xff] }
  0x46   : > { %v1407_v22 = vld [vmem:[%s10299_s10 + $0x560] sm:$0xff]  ;;  %1404 = vst [vmem:[%s10304_s11 + $0x2a0] sm:$0xff] %v1403_v20  ;;  %1406 = vst [vmem:[%s10304_s11 + $0x2a8] sm:$0xff] %v1405_v21  ;;  %v1409_v23 = vld [vmem:[%s10299_s10 + $0x570] sm:$0xff] }
  0x47   : > { %1408 = vst [vmem:[%s10304_s11 + $0x2b0] sm:$0xff] %v1407_v22  ;;  %v1411_v24 = vld [vmem:[%s10299_s10 + $0x580] sm:$0xff]  ;;  %v1413_v25 = vld [vmem:[%s10299_s10 + $0x590] sm:$0xff]  ;;  %1410 = vst [vmem:[%s10304_s11 + $0x2b8] sm:$0xff] %v1409_v23 }
  0x48   : > { %1412 = vst [vmem:[%s10304_s11 + $0x2c0] sm:$0xff] %v1411_v24  ;;  %1414 = vst [vmem:[%s10304_s11 + $0x2c8] sm:$0xff] %v1413_v25  ;;  %v1415_v26 = vld [vmem:[%s10299_s10 + $0x5a0] sm:$0xff]  ;;  %v1417_v27 = vld [vmem:[%s10299_s10 + $0x5b0] sm:$0xff] }
  0x49   : > { %v1419_v28 = vld [vmem:[%s10299_s10 + $0x5c0] sm:$0xff]  ;;  %1416 = vst [vmem:[%s10304_s11 + $0x2d0] sm:$0xff] %v1415_v26  ;;  %1418 = vst [vmem:[%s10304_s11 + $0x2d8] sm:$0xff] %v1417_v27  ;;  %v1421_v29 = vld [vmem:[%s10299_s10 + $0x5d0] sm:$0xff] }
  0x4a   : > { %1420 = vst [vmem:[%s10304_s11 + $0x2e0] sm:$0xff] %v1419_v28  ;;  %v1423_v30 = vld [vmem:[%s10299_s10 + $0x5e0] sm:$0xff]  ;;  %v1425_v31 = vld [vmem:[%s10299_s10 + $0x5f0] sm:$0xff]  ;;  %1422 = vst [vmem:[%s10304_s11 + $0x2e8] sm:$0xff] %v1421_v29 }
  0x4b   : > { %1424 = vst [vmem:[%s10304_s11 + $0x2f0] sm:$0xff] %v1423_v30  ;;  %1426 = vst [vmem:[%s10304_s11 + $0x2f8] sm:$0xff] %v1425_v31  ;;  %v1427_v32 = vld [vmem:[%s10299_s10 + $0x600] sm:$0xff]  ;;  %v1429_v33 = vld [vmem:[%s10299_s10 + $0x610] sm:$0xff] }
  0x4c   : > { %v1431_v34 = vld [vmem:[%s10299_s10 + $0x620] sm:$0xff]  ;;  %1428 = vst [vmem:[%s10304_s11 + $0x300] sm:$0xff] %v1427_v32  ;;  %1430 = vst [vmem:[%s10304_s11 + $0x308] sm:$0xff] %v1429_v33  ;;  %v1433_v35 = vld [vmem:[%s10299_s10 + $0x630] sm:$0xff] }
  0x4d   : > { %1432 = vst [vmem:[%s10304_s11 + $0x310] sm:$0xff] %v1431_v34  ;;  %v1435_v36 = vld [vmem:[%s10299_s10 + $0x640] sm:$0xff]  ;;  %v1437_v37 = vld [vmem:[%s10299_s10 + $0x650] sm:$0xff]  ;;  %1434 = vst [vmem:[%s10304_s11 + $0x318] sm:$0xff] %v1433_v35 }
  0x4e   : > { %1436 = vst [vmem:[%s10304_s11 + $0x320] sm:$0xff] %v1435_v36  ;;  %1438 = vst [vmem:[%s10304_s11 + $0x328] sm:$0xff] %v1437_v37  ;;  %v1439_v38 = vld [vmem:[%s10299_s10 + $0x660] sm:$0xff]  ;;  %v1441_v39 = vld [vmem:[%s10299_s10 + $0x670] sm:$0xff] }
  0x4f   : > { %v1443_v40 = vld [vmem:[%s10299_s10 + $0x680] sm:$0xff]  ;;  %1440 = vst [vmem:[%s10304_s11 + $0x330] sm:$0xff] %v1439_v38  ;;  %1442 = vst [vmem:[%s10304_s11 + $0x338] sm:$0xff] %v1441_v39  ;;  %v1445_v41 = vld [vmem:[%s10299_s10 + $0x690] sm:$0xff] }
  0x50   : > { %1444 = vst [vmem:[%s10304_s11 + $0x340] sm:$0xff] %v1443_v40  ;;  %v1447_v42 = vld [vmem:[%s10299_s10 + $0x6a0] sm:$0xff]  ;;  %v1449_v43 = vld [vmem:[%s10299_s10 + $0x6b0] sm:$0xff]  ;;  %1446 = vst [vmem:[%s10304_s11 + $0x348] sm:$0xff] %v1445_v41 }
  0x51   : > { %1448 = vst [vmem:[%s10304_s11 + $0x350] sm:$0xff] %v1447_v42  ;;  %1450 = vst [vmem:[%s10304_s11 + $0x358] sm:$0xff] %v1449_v43  ;;  %v1451_v44 = vld [vmem:[%s10299_s10 + $0x6c0] sm:$0xff]  ;;  %v1453_v45 = vld [vmem:[%s10299_s10 + $0x6d0] sm:$0xff] }
  0x52   : > { %v1455_v46 = vld [vmem:[%s10299_s10 + $0x6e0] sm:$0xff]  ;;  %1452 = vst [vmem:[%s10304_s11 + $0x360] sm:$0xff] %v1451_v44  ;;  %1454 = vst [vmem:[%s10304_s11 + $0x368] sm:$0xff] %v1453_v45  ;;  %v1457_v47 = vld [vmem:[%s10299_s10 + $0x6f0] sm:$0xff] }
  0x53   : > { %1456 = vst [vmem:[%s10304_s11 + $0x370] sm:$0xff] %v1455_v46  ;;  %v1459_v48 = vld [vmem:[%s10299_s10 + $0x700] sm:$0xff]  ;;  %v1461_v49 = vld [vmem:[%s10299_s10 + $0x710] sm:$0xff]  ;;  %1458 = vst [vmem:[%s10304_s11 + $0x378] sm:$0xff] %v1457_v47 }
  0x54   : > { %1460 = vst [vmem:[%s10304_s11 + $0x380] sm:$0xff] %v1459_v48  ;;  %1462 = vst [vmem:[%s10304_s11 + $0x388] sm:$0xff] %v1461_v49  ;;  %v1463_v50 = vld [vmem:[%s10299_s10 + $0x720] sm:$0xff]  ;;  %v1465_v51 = vld [vmem:[%s10299_s10 + $0x730] sm:$0xff] }
  0x55   : > { %v1467_v52 = vld [vmem:[%s10299_s10 + $0x740] sm:$0xff]  ;;  %1464 = vst [vmem:[%s10304_s11 + $0x390] sm:$0xff] %v1463_v50  ;;  %1466 = vst [vmem:[%s10304_s11 + $0x398] sm:$0xff] %v1465_v51  ;;  %v1469_v53 = vld [vmem:[%s10299_s10 + $0x750] sm:$0xff] }
  0x56   : > { %1468 = vst [vmem:[%s10304_s11 + $0x3a0] sm:$0xff] %v1467_v52  ;;  %v1471_v54 = vld [vmem:[%s10299_s10 + $0x760] sm:$0xff]  ;;  %v1473_v55 = vld [vmem:[%s10299_s10 + $0x770] sm:$0xff]  ;;  %1470 = vst [vmem:[%s10304_s11 + $0x3a8] sm:$0xff] %v1469_v53 }
  0x57   : > { %1472 = vst [vmem:[%s10304_s11 + $0x3b0] sm:$0xff] %v1471_v54  ;;  %1474 = vst [vmem:[%s10304_s11 + $0x3b8] sm:$0xff] %v1473_v55  ;;  %v1475_v56 = vld [vmem:[%s10299_s10 + $0x780] sm:$0xff]  ;;  %v1477_v57 = vld [vmem:[%s10299_s10 + $0x790] sm:$0xff] }
  0x58   : > { %v1479_v58 = vld [vmem:[%s10299_s10 + $0x7a0] sm:$0xff]  ;;  %1476 = vst [vmem:[%s10304_s11 + $0x3c0] sm:$0xff] %v1475_v56  ;;  %1478 = vst [vmem:[%s10304_s11 + $0x3c8] sm:$0xff] %v1477_v57  ;;  %v1481_v59 = vld [vmem:[%s10299_s10 + $0x7b0] sm:$0xff] }
  0x59   : > { %1480 = vst [vmem:[%s10304_s11 + $0x3d0] sm:$0xff] %v1479_v58  ;;  %v1483_v60 = vld [vmem:[%s10299_s10 + $0x7c0] sm:$0xff]  ;;  %v1485_v61 = vld [vmem:[%s10299_s10 + $0x7d0] sm:$0xff]  ;;  %1482 = vst [vmem:[%s10304_s11 + $0x3d8] sm:$0xff] %v1481_v59 }
  0x5a   : > { %1484 = vst [vmem:[%s10304_s11 + $0x3e0] sm:$0xff] %v1483_v60  ;;  %1486 = vst [vmem:[%s10304_s11 + $0x3e8] sm:$0xff] %v1485_v61  ;;  %v1487_v62 = vld [vmem:[%s10299_s10 + $0x7e0] sm:$0xff]  ;;  %v1489_v63 = vld [vmem:[%s10299_s10 + $0x7f0] sm:$0xff] }
  0x5b   : > { %v1491_v0 = vld [vmem:[%s10299_s10 + $0x800] sm:$0xff]  ;;  %1488 = vst [vmem:[%s10304_s11 + $0x3f0] sm:$0xff] %v1487_v62  ;;  %1490 = vst [vmem:[%s10304_s11 + $0x3f8] sm:$0xff] %v1489_v63  ;;  %v1493_v1 = vld [vmem:[%s10299_s10 + $0x810] sm:$0xff] }
  0x5c   : > { %1492 = vst [vmem:[%s10304_s11 + $0x400] sm:$0xff] %v1491_v0  ;;  %v1495_v2 = vld [vmem:[%s10299_s10 + $0x820] sm:$0xff]  ;;  %v1497_v3 = vld [vmem:[%s10299_s10 + $0x830] sm:$0xff]  ;;  %1494 = vst [vmem:[%s10304_s11 + $0x408] sm:$0xff] %v1493_v1 }
  0x5d   : > { %1496 = vst [vmem:[%s10304_s11 + $0x410] sm:$0xff] %v1495_v2  ;;  %1498 = vst [vmem:[%s10304_s11 + $0x418] sm:$0xff] %v1497_v3  ;;  %v1499_v4 = vld [vmem:[%s10299_s10 + $0x840] sm:$0xff]  ;;  %v1501_v5 = vld [vmem:[%s10299_s10 + $0x850] sm:$0xff] }
  0x5e   : > { %v1503_v6 = vld [vmem:[%s10299_s10 + $0x860] sm:$0xff]  ;;  %1500 = vst [vmem:[%s10304_s11 + $0x420] sm:$0xff] %v1499_v4  ;;  %1502 = vst [vmem:[%s10304_s11 + $0x428] sm:$0xff] %v1501_v5  ;;  %v1505_v7 = vld [vmem:[%s10299_s10 + $0x870] sm:$0xff] }
  0x5f   : > { %1504 = vst [vmem:[%s10304_s11 + $0x430] sm:$0xff] %v1503_v6  ;;  %v1507_v8 = vld [vmem:[%s10299_s10 + $0x880] sm:$0xff]  ;;  %v1509_v9 = vld [vmem:[%s10299_s10 + $0x890] sm:$0xff]  ;;  %1506 = vst [vmem:[%s10304_s11 + $0x438] sm:$0xff] %v1505_v7 }
  0x60   : > { %1508 = vst [vmem:[%s10304_s11 + $0x440] sm:$0xff] %v1507_v8  ;;  %1510 = vst [vmem:[%s10304_s11 + $0x448] sm:$0xff] %v1509_v9  ;;  %v1511_v10 = vld [vmem:[%s10299_s10 + $0x8a0] sm:$0xff]  ;;  %v1513_v11 = vld [vmem:[%s10299_s10 + $0x8b0] sm:$0xff] }
  0x61   : > { %v1515_v12 = vld [vmem:[%s10299_s10 + $0x8c0] sm:$0xff]  ;;  %1512 = vst [vmem:[%s10304_s11 + $0x450] sm:$0xff] %v1511_v10  ;;  %1514 = vst [vmem:[%s10304_s11 + $0x458] sm:$0xff] %v1513_v11  ;;  %v1517_v13 = vld [vmem:[%s10299_s10 + $0x8d0] sm:$0xff] }
  0x62   : > { %1516 = vst [vmem:[%s10304_s11 + $0x460] sm:$0xff] %v1515_v12  ;;  %v1519_v14 = vld [vmem:[%s10299_s10 + $0x8e0] sm:$0xff]  ;;  %v1521_v15 = vld [vmem:[%s10299_s10 + $0x8f0] sm:$0xff]  ;;  %1518 = vst [vmem:[%s10304_s11 + $0x468] sm:$0xff] %v1517_v13 }
  0x63   : > { %1520 = vst [vmem:[%s10304_s11 + $0x470] sm:$0xff] %v1519_v14  ;;  %1522 = vst [vmem:[%s10304_s11 + $0x478] sm:$0xff] %v1521_v15  ;;  %v1523_v16 = vld [vmem:[%s10299_s10 + $0x900] sm:$0xff]  ;;  %v1525_v17 = vld [vmem:[%s10299_s10 + $0x910] sm:$0xff] }
  0x64   : > { %v1527_v18 = vld [vmem:[%s10299_s10 + $0x920] sm:$0xff]  ;;  %1524 = vst [vmem:[%s10304_s11 + $0x480] sm:$0xff] %v1523_v16  ;;  %1526 = vst [vmem:[%s10304_s11 + $0x488] sm:$0xff] %v1525_v17  ;;  %v1529_v19 = vld [vmem:[%s10299_s10 + $0x930] sm:$0xff] }
  0x65   : > { %1528 = vst [vmem:[%s10304_s11 + $0x490] sm:$0xff] %v1527_v18  ;;  %v1531_v20 = vld [vmem:[%s10299_s10 + $0x940] sm:$0xff]  ;;  %v1533_v21 = vld [vmem:[%s10299_s10 + $0x950] sm:$0xff]  ;;  %1530 = vst [vmem:[%s10304_s11 + $0x498] sm:$0xff] %v1529_v19 }
  0x66   : > { %1532 = vst [vmem:[%s10304_s11 + $0x4a0] sm:$0xff] %v1531_v20  ;;  %1534 = vst [vmem:[%s10304_s11 + $0x4a8] sm:$0xff] %v1533_v21  ;;  %v1535_v22 = vld [vmem:[%s10299_s10 + $0x960] sm:$0xff]  ;;  %v1537_v23 = vld [vmem:[%s10299_s10 + $0x970] sm:$0xff] }
  0x67   : > { %v1539_v24 = vld [vmem:[%s10299_s10 + $0x980] sm:$0xff]  ;;  %1536 = vst [vmem:[%s10304_s11 + $0x4b0] sm:$0xff] %v1535_v22  ;;  %1538 = vst [vmem:[%s10304_s11 + $0x4b8] sm:$0xff] %v1537_v23  ;;  %v1541_v25 = vld [vmem:[%s10299_s10 + $0x990] sm:$0xff] }
  0x68   : > { %1540 = vst [vmem:[%s10304_s11 + $0x4c0] sm:$0xff] %v1539_v24  ;;  %v1543_v26 = vld [vmem:[%s10299_s10 + $0x9a0] sm:$0xff]  ;;  %v1545_v27 = vld [vmem:[%s10299_s10 + $0x9b0] sm:$0xff]  ;;  %1542 = vst [vmem:[%s10304_s11 + $0x4c8] sm:$0xff] %v1541_v25 }
  0x69   : > { %1544 = vst [vmem:[%s10304_s11 + $0x4d0] sm:$0xff] %v1543_v26  ;;  %1546 = vst [vmem:[%s10304_s11 + $0x4d8] sm:$0xff] %v1545_v27  ;;  %v1547_v28 = vld [vmem:[%s10299_s10 + $0x9c0] sm:$0xff]  ;;  %v1549_v29 = vld [vmem:[%s10299_s10 + $0x9d0] sm:$0xff] }
  0x6a   : > { %v1551_v30 = vld [vmem:[%s10299_s10 + $0x9e0] sm:$0xff]  ;;  %1548 = vst [vmem:[%s10304_s11 + $0x4e0] sm:$0xff] %v1547_v28  ;;  %1550 = vst [vmem:[%s10304_s11 + $0x4e8] sm:$0xff] %v1549_v29  ;;  %v1553_v31 = vld [vmem:[%s10299_s10 + $0x9f0] sm:$0xff] }
  0x6b   : > { %1552 = vst [vmem:[%s10304_s11 + $0x4f0] sm:$0xff] %v1551_v30  ;;  %v1555_v32 = vld [vmem:[%s10299_s10 + $0xa00] sm:$0xff]  ;;  %v1557_v33 = vld [vmem:[%s10299_s10 + $0xa10] sm:$0xff]  ;;  %1554 = vst [vmem:[%s10304_s11 + $0x4f8] sm:$0xff] %v1553_v31 }
  0x6c   : > { %1556 = vst [vmem:[%s10304_s11 + $0x500] sm:$0xff] %v1555_v32  ;;  %1558 = vst [vmem:[%s10304_s11 + $0x508] sm:$0xff] %v1557_v33  ;;  %v1559_v34 = vld [vmem:[%s10299_s10 + $0xa20] sm:$0xff]  ;;  %v1561_v35 = vld [vmem:[%s10299_s10 + $0xa30] sm:$0xff] }
  0x6d   : > { %v1563_v36 = vld [vmem:[%s10299_s10 + $0xa40] sm:$0xff]  ;;  %1560 = vst [vmem:[%s10304_s11 + $0x510] sm:$0xff] %v1559_v34  ;;  %1562 = vst [vmem:[%s10304_s11 + $0x518] sm:$0xff] %v1561_v35  ;;  %v1565_v37 = vld [vmem:[%s10299_s10 + $0xa50] sm:$0xff] }
  0x6e   : > { %1564 = vst [vmem:[%s10304_s11 + $0x520] sm:$0xff] %v1563_v36  ;;  %v1567_v38 = vld [vmem:[%s10299_s10 + $0xa60] sm:$0xff]  ;;  %v1569_v39 = vld [vmem:[%s10299_s10 + $0xa70] sm:$0xff]  ;;  %1566 = vst [vmem:[%s10304_s11 + $0x528] sm:$0xff] %v1565_v37 }
  0x6f   : > { %1568 = vst [vmem:[%s10304_s11 + $0x530] sm:$0xff] %v1567_v38  ;;  %1570 = vst [vmem:[%s10304_s11 + $0x538] sm:$0xff] %v1569_v39  ;;  %v1571_v40 = vld [vmem:[%s10299_s10 + $0xa80] sm:$0xff]  ;;  %v1573_v41 = vld [vmem:[%s10299_s10 + $0xa90] sm:$0xff] }
  0x70   : > { %v1575_v42 = vld [vmem:[%s10299_s10 + $0xaa0] sm:$0xff]  ;;  %1572 = vst [vmem:[%s10304_s11 + $0x540] sm:$0xff] %v1571_v40  ;;  %1574 = vst [vmem:[%s10304_s11 + $0x548] sm:$0xff] %v1573_v41  ;;  %v1577_v43 = vld [vmem:[%s10299_s10 + $0xab0] sm:$0xff] }
  0x71   : > { %1576 = vst [vmem:[%s10304_s11 + $0x550] sm:$0xff] %v1575_v42  ;;  %v1579_v44 = vld [vmem:[%s10299_s10 + $0xac0] sm:$0xff]  ;;  %v1581_v45 = vld [vmem:[%s10299_s10 + $0xad0] sm:$0xff]  ;;  %1578 = vst [vmem:[%s10304_s11 + $0x558] sm:$0xff] %v1577_v43 }
  0x72   : > { %1580 = vst [vmem:[%s10304_s11 + $0x560] sm:$0xff] %v1579_v44  ;;  %1582 = vst [vmem:[%s10304_s11 + $0x568] sm:$0xff] %v1581_v45  ;;  %v1583_v46 = vld [vmem:[%s10299_s10 + $0xae0] sm:$0xff]  ;;  %v1585_v47 = vld [vmem:[%s10299_s10 + $0xaf0] sm:$0xff] }
  0x73   : > { %v1587_v48 = vld [vmem:[%s10299_s10 + $0xb00] sm:$0xff]  ;;  %1584 = vst [vmem:[%s10304_s11 + $0x570] sm:$0xff] %v1583_v46  ;;  %1586 = vst [vmem:[%s10304_s11 + $0x578] sm:$0xff] %v1585_v47  ;;  %v1589_v49 = vld [vmem:[%s10299_s10 + $0xb10] sm:$0xff] }
  0x74   : > { %1588 = vst [vmem:[%s10304_s11 + $0x580] sm:$0xff] %v1587_v48  ;;  %v1591_v50 = vld [vmem:[%s10299_s10 + $0xb20] sm:$0xff]  ;;  %v1593_v51 = vld [vmem:[%s10299_s10 + $0xb30] sm:$0xff]  ;;  %1590 = vst [vmem:[%s10304_s11 + $0x588] sm:$0xff] %v1589_v49 }
  0x75   : > { %1592 = vst [vmem:[%s10304_s11 + $0x590] sm:$0xff] %v1591_v50  ;;  %1594 = vst [vmem:[%s10304_s11 + $0x598] sm:$0xff] %v1593_v51  ;;  %v1595_v52 = vld [vmem:[%s10299_s10 + $0xb40] sm:$0xff]  ;;  %v1597_v53 = vld [vmem:[%s10299_s10 + $0xb50] sm:$0xff] }
  0x76   : > { %v1599_v54 = vld [vmem:[%s10299_s10 + $0xb60] sm:$0xff]  ;;  %1596 = vst [vmem:[%s10304_s11 + $0x5a0] sm:$0xff] %v1595_v52  ;;  %1598 = vst [vmem:[%s10304_s11 + $0x5a8] sm:$0xff] %v1597_v53  ;;  %v1601_v55 = vld [vmem:[%s10299_s10 + $0xb70] sm:$0xff] }
  0x77   : > { %1600 = vst [vmem:[%s10304_s11 + $0x5b0] sm:$0xff] %v1599_v54  ;;  %v1603_v56 = vld [vmem:[%s10299_s10 + $0xb80] sm:$0xff]  ;;  %v1605_v57 = vld [vmem:[%s10299_s10 + $0xb90] sm:$0xff]  ;;  %1602 = vst [vmem:[%s10304_s11 + $0x5b8] sm:$0xff] %v1601_v55 }
  0x78   : > { %1604 = vst [vmem:[%s10304_s11 + $0x5c0] sm:$0xff] %v1603_v56  ;;  %1606 = vst [vmem:[%s10304_s11 + $0x5c8] sm:$0xff] %v1605_v57  ;;  %v1607_v58 = vld [vmem:[%s10299_s10 + $0xba0] sm:$0xff]  ;;  %v1609_v59 = vld [vmem:[%s10299_s10 + $0xbb0] sm:$0xff] }
  0x79   : > { %v1611_v60 = vld [vmem:[%s10299_s10 + $0xbc0] sm:$0xff]  ;;  %1608 = vst [vmem:[%s10304_s11 + $0x5d0] sm:$0xff] %v1607_v58  ;;  %1610 = vst [vmem:[%s10304_s11 + $0x5d8] sm:$0xff] %v1609_v59  ;;  %v1613_v61 = vld [vmem:[%s10299_s10 + $0xbd0] sm:$0xff] }
  0x7a   : > { %1612 = vst [vmem:[%s10304_s11 + $0x5e0] sm:$0xff] %v1611_v60  ;;  %v1615_v62 = vld [vmem:[%s10299_s10 + $0xbe0] sm:$0xff]  ;;  %v1617_v63 = vld [vmem:[%s10299_s10 + $0xbf0] sm:$0xff]  ;;  %1614 = vst [vmem:[%s10304_s11 + $0x5e8] sm:$0xff] %v1613_v61 }
  0x7b   : > { %1616 = vst [vmem:[%s10304_s11 + $0x5f0] sm:$0xff] %v1615_v62  ;;  %1618 = vst [vmem:[%s10304_s11 + $0x5f8] sm:$0xff] %v1617_v63  ;;  %v1619_v0 = vld [vmem:[%s10299_s10 + $0xc00] sm:$0xff]  ;;  %v1621_v1 = vld [vmem:[%s10299_s10 + $0xc10] sm:$0xff] }
  0x7c   : > { %v1623_v2 = vld [vmem:[%s10299_s10 + $0xc20] sm:$0xff]  ;;  %1620 = vst [vmem:[%s10304_s11 + $0x600] sm:$0xff] %v1619_v0  ;;  %1622 = vst [vmem:[%s10304_s11 + $0x608] sm:$0xff] %v1621_v1  ;;  %v1625_v3 = vld [vmem:[%s10299_s10 + $0xc30] sm:$0xff] }
  0x7d   : > { %1624 = vst [vmem:[%s10304_s11 + $0x610] sm:$0xff] %v1623_v2  ;;  %v1627_v4 = vld [vmem:[%s10299_s10 + $0xc40] sm:$0xff]  ;;  %v1629_v5 = vld [vmem:[%s10299_s10 + $0xc50] sm:$0xff]  ;;  %1626 = vst [vmem:[%s10304_s11 + $0x618] sm:$0xff] %v1625_v3 }
  0x7e   : > { %1628 = vst [vmem:[%s10304_s11 + $0x620] sm:$0xff] %v1627_v4  ;;  %1630 = vst [vmem:[%s10304_s11 + $0x628] sm:$0xff] %v1629_v5  ;;  %v1631_v6 = vld [vmem:[%s10299_s10 + $0xc60] sm:$0xff]  ;;  %v1633_v7 = vld [vmem:[%s10299_s10 + $0xc70] sm:$0xff] }
  0x7f   : > { %v1635_v8 = vld [vmem:[%s10299_s10 + $0xc80] sm:$0xff]  ;;  %1632 = vst [vmem:[%s10304_s11 + $0x630] sm:$0xff] %v1631_v6  ;;  %1634 = vst [vmem:[%s10304_s11 + $0x638] sm:$0xff] %v1633_v7  ;;  %v1637_v9 = vld [vmem:[%s10299_s10 + $0xc90] sm:$0xff] }
  0x80   : > { %1636 = vst [vmem:[%s10304_s11 + $0x640] sm:$0xff] %v1635_v8  ;;  %v1639_v10 = vld [vmem:[%s10299_s10 + $0xca0] sm:$0xff]  ;;  %v1641_v11 = vld [vmem:[%s10299_s10 + $0xcb0] sm:$0xff]  ;;  %1638 = vst [vmem:[%s10304_s11 + $0x648] sm:$0xff] %v1637_v9 }
  0x81   : > { %1640 = vst [vmem:[%s10304_s11 + $0x650] sm:$0xff] %v1639_v10  ;;  %1642 = vst [vmem:[%s10304_s11 + $0x658] sm:$0xff] %v1641_v11  ;;  %v1643_v12 = vld [vmem:[%s10299_s10 + $0xcc0] sm:$0xff]  ;;  %v1645_v13 = vld [vmem:[%s10299_s10 + $0xcd0] sm:$0xff] }
  0x82   : > { %v1647_v14 = vld [vmem:[%s10299_s10 + $0xce0] sm:$0xff]  ;;  %1644 = vst [vmem:[%s10304_s11 + $0x660] sm:$0xff] %v1643_v12  ;;  %1646 = vst [vmem:[%s10304_s11 + $0x668] sm:$0xff] %v1645_v13  ;;  %v1649_v15 = vld [vmem:[%s10299_s10 + $0xcf0] sm:$0xff] }
  0x83   : > { %1648 = vst [vmem:[%s10304_s11 + $0x670] sm:$0xff] %v1647_v14  ;;  %v1651_v16 = vld [vmem:[%s10299_s10 + $0xd00] sm:$0xff]  ;;  %v1653_v17 = vld [vmem:[%s10299_s10 + $0xd10] sm:$0xff]  ;;  %1650 = vst [vmem:[%s10304_s11 + $0x678] sm:$0xff] %v1649_v15 }
  0x84   : > { %1652 = vst [vmem:[%s10304_s11 + $0x680] sm:$0xff] %v1651_v16  ;;  %1654 = vst [vmem:[%s10304_s11 + $0x688] sm:$0xff] %v1653_v17  ;;  %v1655_v18 = vld [vmem:[%s10299_s10 + $0xd20] sm:$0xff]  ;;  %v1657_v19 = vld [vmem:[%s10299_s10 + $0xd30] sm:$0xff] }
  0x85   : > { %v1659_v20 = vld [vmem:[%s10299_s10 + $0xd40] sm:$0xff]  ;;  %1656 = vst [vmem:[%s10304_s11 + $0x690] sm:$0xff] %v1655_v18  ;;  %1658 = vst [vmem:[%s10304_s11 + $0x698] sm:$0xff] %v1657_v19  ;;  %v1661_v21 = vld [vmem:[%s10299_s10 + $0xd50] sm:$0xff] }
  0x86   : > { %1660 = vst [vmem:[%s10304_s11 + $0x6a0] sm:$0xff] %v1659_v20  ;;  %v1663_v22 = vld [vmem:[%s10299_s10 + $0xd60] sm:$0xff]  ;;  %v1665_v23 = vld [vmem:[%s10299_s10 + $0xd70] sm:$0xff]  ;;  %1662 = vst [vmem:[%s10304_s11 + $0x6a8] sm:$0xff] %v1661_v21 }
  0x87   : > { %1664 = vst [vmem:[%s10304_s11 + $0x6b0] sm:$0xff] %v1663_v22  ;;  %1666 = vst [vmem:[%s10304_s11 + $0x6b8] sm:$0xff] %v1665_v23  ;;  %v1667_v24 = vld [vmem:[%s10299_s10 + $0xd80] sm:$0xff]  ;;  %v1669_v25 = vld [vmem:[%s10299_s10 + $0xd90] sm:$0xff] }
  0x88   : > { %v1671_v26 = vld [vmem:[%s10299_s10 + $0xda0] sm:$0xff]  ;;  %1668 = vst [vmem:[%s10304_s11 + $0x6c0] sm:$0xff] %v1667_v24  ;;  %1670 = vst [vmem:[%s10304_s11 + $0x6c8] sm:$0xff] %v1669_v25  ;;  %v1673_v27 = vld [vmem:[%s10299_s10 + $0xdb0] sm:$0xff] }
  0x89   : > { %1672 = vst [vmem:[%s10304_s11 + $0x6d0] sm:$0xff] %v1671_v26  ;;  %v1675_v28 = vld [vmem:[%s10299_s10 + $0xdc0] sm:$0xff]  ;;  %v1677_v29 = vld [vmem:[%s10299_s10 + $0xdd0] sm:$0xff]  ;;  %1674 = vst [vmem:[%s10304_s11 + $0x6d8] sm:$0xff] %v1673_v27 }
  0x8a   : > { %1676 = vst [vmem:[%s10304_s11 + $0x6e0] sm:$0xff] %v1675_v28  ;;  %1678 = vst [vmem:[%s10304_s11 + $0x6e8] sm:$0xff] %v1677_v29  ;;  %v1679_v30 = vld [vmem:[%s10299_s10 + $0xde0] sm:$0xff]  ;;  %v1681_v31 = vld [vmem:[%s10299_s10 + $0xdf0] sm:$0xff] }
  0x8b   : > { %v1683_v32 = vld [vmem:[%s10299_s10 + $0xe00] sm:$0xff]  ;;  %1680 = vst [vmem:[%s10304_s11 + $0x6f0] sm:$0xff] %v1679_v30  ;;  %1682 = vst [vmem:[%s10304_s11 + $0x6f8] sm:$0xff] %v1681_v31  ;;  %v1685_v33 = vld [vmem:[%s10299_s10 + $0xe10] sm:$0xff] }
  0x8c   : > { %1684 = vst [vmem:[%s10304_s11 + $0x700] sm:$0xff] %v1683_v32  ;;  %v1687_v34 = vld [vmem:[%s10299_s10 + $0xe20] sm:$0xff]  ;;  %v1689_v35 = vld [vmem:[%s10299_s10 + $0xe30] sm:$0xff]  ;;  %1686 = vst [vmem:[%s10304_s11 + $0x708] sm:$0xff] %v1685_v33 }
  0x8d   : > { %1688 = vst [vmem:[%s10304_s11 + $0x710] sm:$0xff] %v1687_v34  ;;  %1690 = vst [vmem:[%s10304_s11 + $0x718] sm:$0xff] %v1689_v35  ;;  %v1691_v36 = vld [vmem:[%s10299_s10 + $0xe40] sm:$0xff]  ;;  %v1693_v37 = vld [vmem:[%s10299_s10 + $0xe50] sm:$0xff] }
  0x8e   : > { %v1695_v38 = vld [vmem:[%s10299_s10 + $0xe60] sm:$0xff]  ;;  %1692 = vst [vmem:[%s10304_s11 + $0x720] sm:$0xff] %v1691_v36  ;;  %1694 = vst [vmem:[%s10304_s11 + $0x728] sm:$0xff] %v1693_v37  ;;  %v1697_v39 = vld [vmem:[%s10299_s10 + $0xe70] sm:$0xff] }
  0x8f   : > { %1696 = vst [vmem:[%s10304_s11 + $0x730] sm:$0xff] %v1695_v38  ;;  %v1699_v40 = vld [vmem:[%s10299_s10 + $0xe80] sm:$0xff]  ;;  %v1701_v41 = vld [vmem:[%s10299_s10 + $0xe90] sm:$0xff]  ;;  %1698 = vst [vmem:[%s10304_s11 + $0x738] sm:$0xff] %v1697_v39 }
  0x90   : > { %1700 = vst [vmem:[%s10304_s11 + $0x740] sm:$0xff] %v1699_v40  ;;  %1702 = vst [vmem:[%s10304_s11 + $0x748] sm:$0xff] %v1701_v41  ;;  %v1703_v42 = vld [vmem:[%s10299_s10 + $0xea0] sm:$0xff]  ;;  %v1705_v43 = vld [vmem:[%s10299_s10 + $0xeb0] sm:$0xff] }
  0x91   : > { %v1707_v44 = vld [vmem:[%s10299_s10 + $0xec0] sm:$0xff]  ;;  %1704 = vst [vmem:[%s10304_s11 + $0x750] sm:$0xff] %v1703_v42  ;;  %1706 = vst [vmem:[%s10304_s11 + $0x758] sm:$0xff] %v1705_v43  ;;  %v1709_v45 = vld [vmem:[%s10299_s10 + $0xed0] sm:$0xff] }
  0x92   : > { %1708 = vst [vmem:[%s10304_s11 + $0x760] sm:$0xff] %v1707_v44  ;;  %v1711_v46 = vld [vmem:[%s10299_s10 + $0xee0] sm:$0xff]  ;;  %v1713_v47 = vld [vmem:[%s10299_s10 + $0xef0] sm:$0xff]  ;;  %1710 = vst [vmem:[%s10304_s11 + $0x768] sm:$0xff] %v1709_v45 }
  0x93   : > { %1712 = vst [vmem:[%s10304_s11 + $0x770] sm:$0xff] %v1711_v46  ;;  %1714 = vst [vmem:[%s10304_s11 + $0x778] sm:$0xff] %v1713_v47  ;;  %v1715_v48 = vld [vmem:[%s10299_s10 + $0xf00] sm:$0xff]  ;;  %v1717_v49 = vld [vmem:[%s10299_s10 + $0xf10] sm:$0xff] }
  0x94   : > { %v1719_v50 = vld [vmem:[%s10299_s10 + $0xf20] sm:$0xff]  ;;  %1716 = vst [vmem:[%s10304_s11 + $0x780] sm:$0xff] %v1715_v48  ;;  %1718 = vst [vmem:[%s10304_s11 + $0x788] sm:$0xff] %v1717_v49  ;;  %v1721_v51 = vld [vmem:[%s10299_s10 + $0xf30] sm:$0xff] }
  0x95   : > { %1720 = vst [vmem:[%s10304_s11 + $0x790] sm:$0xff] %v1719_v50  ;;  %v1723_v52 = vld [vmem:[%s10299_s10 + $0xf40] sm:$0xff]  ;;  %v1725_v53 = vld [vmem:[%s10299_s10 + $0xf50] sm:$0xff]  ;;  %1722 = vst [vmem:[%s10304_s11 + $0x798] sm:$0xff] %v1721_v51 }
  0x96   : > { %1724 = vst [vmem:[%s10304_s11 + $0x7a0] sm:$0xff] %v1723_v52  ;;  %1726 = vst [vmem:[%s10304_s11 + $0x7a8] sm:$0xff] %v1725_v53  ;;  %v1727_v54 = vld [vmem:[%s10299_s10 + $0xf60] sm:$0xff]  ;;  %v1729_v55 = vld [vmem:[%s10299_s10 + $0xf70] sm:$0xff] }
  0x97   : > { %v1731_v56 = vld [vmem:[%s10299_s10 + $0xf80] sm:$0xff]  ;;  %1728 = vst [vmem:[%s10304_s11 + $0x7b0] sm:$0xff] %v1727_v54  ;;  %1730 = vst [vmem:[%s10304_s11 + $0x7b8] sm:$0xff] %v1729_v55  ;;  %v1733_v57 = vld [vmem:[%s10299_s10 + $0xf90] sm:$0xff] }
  0x98   : > { %1732 = vst [vmem:[%s10304_s11 + $0x7c0] sm:$0xff] %v1731_v56  ;;  %v1735_v58 = vld [vmem:[%s10299_s10 + $0xfa0] sm:$0xff]  ;;  %v1737_v59 = vld [vmem:[%s10299_s10 + $0xfb0] sm:$0xff]  ;;  %1734 = vst [vmem:[%s10304_s11 + $0x7c8] sm:$0xff] %v1733_v57 }
  0x99   : > { %1736 = vst [vmem:[%s10304_s11 + $0x7d0] sm:$0xff] %v1735_v58  ;;  %1738 = vst [vmem:[%s10304_s11 + $0x7d8] sm:$0xff] %v1737_v59  ;;  %v1739_v60 = vld [vmem:[%s10299_s10 + $0xfc0] sm:$0xff]  ;;  %v1741_v61 = vld [vmem:[%s10299_s10 + $0xfd0] sm:$0xff] }
  0x9a   : > { %v1743_v62 = vld [vmem:[%s10299_s10 + $0xfe0] sm:$0xff]  ;;  %1740 = vst [vmem:[%s10304_s11 + $0x7e0] sm:$0xff] %v1739_v60  ;;  %1742 = vst [vmem:[%s10304_s11 + $0x7e8] sm:$0xff] %v1741_v61  ;;  %v1745_v63 = vld [vmem:[%s10299_s10 + $0xff0] sm:$0xff] }
  0x9b   : > { %1744 = vst [vmem:[%s10304_s11 + $0x7f0] sm:$0xff] %v1743_v62  ;;  %v1747_v0 = vld [vmem:[%s10299_s10 + $0x1000] sm:$0xff]  ;;  %v1749_v1 = vld [vmem:[%s10299_s10 + $0x1010] sm:$0xff]  ;;  %1746 = vst [vmem:[%s10304_s11 + $0x7f8] sm:$0xff] %v1745_v63 }
  0x9c   : > { %1748 = vst [vmem:[%s10304_s11 + $0x800] sm:$0xff] %v1747_v0  ;;  %1750 = vst [vmem:[%s10304_s11 + $0x808] sm:$0xff] %v1749_v1  ;;  %v1751_v2 = vld [vmem:[%s10299_s10 + $0x1020] sm:$0xff]  ;;  %v1753_v3 = vld [vmem:[%s10299_s10 + $0x1030] sm:$0xff] }
  0x9d   : > { %v1755_v4 = vld [vmem:[%s10299_s10 + $0x1040] sm:$0xff]  ;;  %1752 = vst [vmem:[%s10304_s11 + $0x810] sm:$0xff] %v1751_v2  ;;  %1754 = vst [vmem:[%s10304_s11 + $0x818] sm:$0xff] %v1753_v3  ;;  %v1757_v5 = vld [vmem:[%s10299_s10 + $0x1050] sm:$0xff] }
  0x9e   : > { %1756 = vst [vmem:[%s10304_s11 + $0x820] sm:$0xff] %v1755_v4  ;;  %v1759_v6 = vld [vmem:[%s10299_s10 + $0x1060] sm:$0xff]  ;;  %v1761_v7 = vld [vmem:[%s10299_s10 + $0x1070] sm:$0xff]  ;;  %1758 = vst [vmem:[%s10304_s11 + $0x828] sm:$0xff] %v1757_v5 }
  0x9f   : > { %1760 = vst [vmem:[%s10304_s11 + $0x830] sm:$0xff] %v1759_v6  ;;  %1762 = vst [vmem:[%s10304_s11 + $0x838] sm:$0xff] %v1761_v7  ;;  %v1763_v8 = vld [vmem:[%s10299_s10 + $0x1080] sm:$0xff]  ;;  %v1765_v9 = vld [vmem:[%s10299_s10 + $0x1090] sm:$0xff] }
  0xa0   : > { %v1767_v10 = vld [vmem:[%s10299_s10 + $0x10a0] sm:$0xff]  ;;  %1764 = vst [vmem:[%s10304_s11 + $0x840] sm:$0xff] %v1763_v8  ;;  %1766 = vst [vmem:[%s10304_s11 + $0x848] sm:$0xff] %v1765_v9  ;;  %v1769_v11 = vld [vmem:[%s10299_s10 + $0x10b0] sm:$0xff] }
  0xa1   : > { %1768 = vst [vmem:[%s10304_s11 + $0x850] sm:$0xff] %v1767_v10  ;;  %v1771_v12 = vld [vmem:[%s10299_s10 + $0x10c0] sm:$0xff]  ;;  %v1773_v13 = vld [vmem:[%s10299_s10 + $0x10d0] sm:$0xff]  ;;  %1770 = vst [vmem:[%s10304_s11 + $0x858] sm:$0xff] %v1769_v11 }
  0xa2   : > { %1772 = vst [vmem:[%s10304_s11 + $0x860] sm:$0xff] %v1771_v12  ;;  %1774 = vst [vmem:[%s10304_s11 + $0x868] sm:$0xff] %v1773_v13  ;;  %v1775_v14 = vld [vmem:[%s10299_s10 + $0x10e0] sm:$0xff]  ;;  %v1777_v15 = vld [vmem:[%s10299_s10 + $0x10f0] sm:$0xff] }
  0xa3   : > { %v1779_v16 = vld [vmem:[%s10299_s10 + $0x1100] sm:$0xff]  ;;  %1776 = vst [vmem:[%s10304_s11 + $0x870] sm:$0xff] %v1775_v14  ;;  %1778 = vst [vmem:[%s10304_s11 + $0x878] sm:$0xff] %v1777_v15  ;;  %v1781_v17 = vld [vmem:[%s10299_s10 + $0x1110] sm:$0xff] }
  0xa4   : > { %1780 = vst [vmem:[%s10304_s11 + $0x880] sm:$0xff] %v1779_v16  ;;  %v1783_v18 = vld [vmem:[%s10299_s10 + $0x1120] sm:$0xff]  ;;  %v1785_v19 = vld [vmem:[%s10299_s10 + $0x1130] sm:$0xff]  ;;  %1782 = vst [vmem:[%s10304_s11 + $0x888] sm:$0xff] %v1781_v17 }
  0xa5   : > { %1784 = vst [vmem:[%s10304_s11 + $0x890] sm:$0xff] %v1783_v18  ;;  %1786 = vst [vmem:[%s10304_s11 + $0x898] sm:$0xff] %v1785_v19  ;;  %v1787_v20 = vld [vmem:[%s10299_s10 + $0x1140] sm:$0xff]  ;;  %v1789_v21 = vld [vmem:[%s10299_s10 + $0x1150] sm:$0xff] }
  0xa6   : > { %v1791_v22 = vld [vmem:[%s10299_s10 + $0x1160] sm:$0xff]  ;;  %1788 = vst [vmem:[%s10304_s11 + $0x8a0] sm:$0xff] %v1787_v20  ;;  %1790 = vst [vmem:[%s10304_s11 + $0x8a8] sm:$0xff] %v1789_v21  ;;  %v1793_v23 = vld [vmem:[%s10299_s10 + $0x1170] sm:$0xff] }
  0xa7   : > { %1792 = vst [vmem:[%s10304_s11 + $0x8b0] sm:$0xff] %v1791_v22  ;;  %v1795_v24 = vld [vmem:[%s10299_s10 + $0x1180] sm:$0xff]  ;;  %v1797_v25 = vld [vmem:[%s10299_s10 + $0x1190] sm:$0xff]  ;;  %1794 = vst [vmem:[%s10304_s11 + $0x8b8] sm:$0xff] %v1793_v23 }
  0xa8   : > { %1796 = vst [vmem:[%s10304_s11 + $0x8c0] sm:$0xff] %v1795_v24  ;;  %1798 = vst [vmem:[%s10304_s11 + $0x8c8] sm:$0xff] %v1797_v25  ;;  %v1799_v26 = vld [vmem:[%s10299_s10 + $0x11a0] sm:$0xff]  ;;  %v1801_v27 = vld [vmem:[%s10299_s10 + $0x11b0] sm:$0xff] }
  0xa9   : > { %v1803_v28 = vld [vmem:[%s10299_s10 + $0x11c0] sm:$0xff]  ;;  %1800 = vst [vmem:[%s10304_s11 + $0x8d0] sm:$0xff] %v1799_v26  ;;  %1802 = vst [vmem:[%s10304_s11 + $0x8d8] sm:$0xff] %v1801_v27  ;;  %v1805_v29 = vld [vmem:[%s10299_s10 + $0x11d0] sm:$0xff] }
  0xaa   : > { %1804 = vst [vmem:[%s10304_s11 + $0x8e0] sm:$0xff] %v1803_v28  ;;  %v1807_v30 = vld [vmem:[%s10299_s10 + $0x11e0] sm:$0xff]  ;;  %v1809_v31 = vld [vmem:[%s10299_s10 + $0x11f0] sm:$0xff]  ;;  %1806 = vst [vmem:[%s10304_s11 + $0x8e8] sm:$0xff] %v1805_v29 }
  0xab   : > { %1808 = vst [vmem:[%s10304_s11 + $0x8f0] sm:$0xff] %v1807_v30  ;;  %1810 = vst [vmem:[%s10304_s11 + $0x8f8] sm:$0xff] %v1809_v31  ;;  %v1811_v32 = vld [vmem:[%s10299_s10 + $0x1200] sm:$0xff]  ;;  %v1813_v33 = vld [vmem:[%s10299_s10 + $0x1210] sm:$0xff] }
  0xac   : > { %v1815_v34 = vld [vmem:[%s10299_s10 + $0x1220] sm:$0xff]  ;;  %1812 = vst [vmem:[%s10304_s11 + $0x900] sm:$0xff] %v1811_v32  ;;  %1814 = vst [vmem:[%s10304_s11 + $0x908] sm:$0xff] %v1813_v33  ;;  %v1817_v35 = vld [vmem:[%s10299_s10 + $0x1230] sm:$0xff] }
  0xad   : > { %1816 = vst [vmem:[%s10304_s11 + $0x910] sm:$0xff] %v1815_v34  ;;  %v1819_v36 = vld [vmem:[%s10299_s10 + $0x1240] sm:$0xff]  ;;  %v1821_v37 = vld [vmem:[%s10299_s10 + $0x1250] sm:$0xff]  ;;  %1818 = vst [vmem:[%s10304_s11 + $0x918] sm:$0xff] %v1817_v35 }
  0xae   : > { %1820 = vst [vmem:[%s10304_s11 + $0x920] sm:$0xff] %v1819_v36  ;;  %1822 = vst [vmem:[%s10304_s11 + $0x928] sm:$0xff] %v1821_v37  ;;  %v1823_v38 = vld [vmem:[%s10299_s10 + $0x1260] sm:$0xff]  ;;  %v1825_v39 = vld [vmem:[%s10299_s10 + $0x1270] sm:$0xff] }
  0xaf   : > { %v1827_v40 = vld [vmem:[%s10299_s10 + $0x1280] sm:$0xff]  ;;  %1824 = vst [vmem:[%s10304_s11 + $0x930] sm:$0xff] %v1823_v38  ;;  %1826 = vst [vmem:[%s10304_s11 + $0x938] sm:$0xff] %v1825_v39  ;;  %v1829_v41 = vld [vmem:[%s10299_s10 + $0x1290] sm:$0xff] }
  0xb0   : > { %1828 = vst [vmem:[%s10304_s11 + $0x940] sm:$0xff] %v1827_v40  ;;  %v1831_v42 = vld [vmem:[%s10299_s10 + $0x12a0] sm:$0xff]  ;;  %v1833_v43 = vld [vmem:[%s10299_s10 + $0x12b0] sm:$0xff]  ;;  %1830 = vst [vmem:[%s10304_s11 + $0x948] sm:$0xff] %v1829_v41 }
  0xb1   : > { %1832 = vst [vmem:[%s10304_s11 + $0x950] sm:$0xff] %v1831_v42  ;;  %1834 = vst [vmem:[%s10304_s11 + $0x958] sm:$0xff] %v1833_v43  ;;  %v1835_v44 = vld [vmem:[%s10299_s10 + $0x12c0] sm:$0xff]  ;;  %v1837_v45 = vld [vmem:[%s10299_s10 + $0x12d0] sm:$0xff] }
  0xb2   : > { %v1839_v46 = vld [vmem:[%s10299_s10 + $0x12e0] sm:$0xff]  ;;  %1836 = vst [vmem:[%s10304_s11 + $0x960] sm:$0xff] %v1835_v44  ;;  %1838 = vst [vmem:[%s10304_s11 + $0x968] sm:$0xff] %v1837_v45  ;;  %v1841_v47 = vld [vmem:[%s10299_s10 + $0x12f0] sm:$0xff] }
  0xb3   : > { %1840 = vst [vmem:[%s10304_s11 + $0x970] sm:$0xff] %v1839_v46  ;;  %v1843_v48 = vld [vmem:[%s10299_s10 + $0x1300] sm:$0xff]  ;;  %v1845_v49 = vld [vmem:[%s10299_s10 + $0x1310] sm:$0xff]  ;;  %1842 = vst [vmem:[%s10304_s11 + $0x978] sm:$0xff] %v1841_v47 }
  0xb4   : > { %1844 = vst [vmem:[%s10304_s11 + $0x980] sm:$0xff] %v1843_v48  ;;  %1846 = vst [vmem:[%s10304_s11 + $0x988] sm:$0xff] %v1845_v49  ;;  %v1847_v50 = vld [vmem:[%s10299_s10 + $0x1320] sm:$0xff]  ;;  %v1849_v51 = vld [vmem:[%s10299_s10 + $0x1330] sm:$0xff] }
  0xb5   : > { %v1851_v52 = vld [vmem:[%s10299_s10 + $0x1340] sm:$0xff]  ;;  %1848 = vst [vmem:[%s10304_s11 + $0x990] sm:$0xff] %v1847_v50  ;;  %1850 = vst [vmem:[%s10304_s11 + $0x998] sm:$0xff] %v1849_v51  ;;  %v1853_v53 = vld [vmem:[%s10299_s10 + $0x1350] sm:$0xff] }
  0xb6   : > { %1852 = vst [vmem:[%s10304_s11 + $0x9a0] sm:$0xff] %v1851_v52  ;;  %v1855_v54 = vld [vmem:[%s10299_s10 + $0x1360] sm:$0xff]  ;;  %v1857_v55 = vld [vmem:[%s10299_s10 + $0x1370] sm:$0xff]  ;;  %1854 = vst [vmem:[%s10304_s11 + $0x9a8] sm:$0xff] %v1853_v53 }
  0xb7   : > { %1856 = vst [vmem:[%s10304_s11 + $0x9b0] sm:$0xff] %v1855_v54  ;;  %1858 = vst [vmem:[%s10304_s11 + $0x9b8] sm:$0xff] %v1857_v55  ;;  %v1859_v56 = vld [vmem:[%s10299_s10 + $0x1380] sm:$0xff]  ;;  %v1861_v57 = vld [vmem:[%s10299_s10 + $0x1390] sm:$0xff] }
  0xb8   : > { %v1863_v58 = vld [vmem:[%s10299_s10 + $0x13a0] sm:$0xff]  ;;  %1860 = vst [vmem:[%s10304_s11 + $0x9c0] sm:$0xff] %v1859_v56  ;;  %1862 = vst [vmem:[%s10304_s11 + $0x9c8] sm:$0xff] %v1861_v57  ;;  %v1865_v59 = vld [vmem:[%s10299_s10 + $0x13b0] sm:$0xff] }
  0xb9   : > { %1864 = vst [vmem:[%s10304_s11 + $0x9d0] sm:$0xff] %v1863_v58  ;;  %v1867_v60 = vld [vmem:[%s10299_s10 + $0x13c0] sm:$0xff]  ;;  %v1869_v61 = vld [vmem:[%s10299_s10 + $0x13d0] sm:$0xff]  ;;  %1866 = vst [vmem:[%s10304_s11 + $0x9d8] sm:$0xff] %v1865_v59 }
  0xba   : > { %1868 = vst [vmem:[%s10304_s11 + $0x9e0] sm:$0xff] %v1867_v60  ;;  %1870 = vst [vmem:[%s10304_s11 + $0x9e8] sm:$0xff] %v1869_v61  ;;  %v1871_v62 = vld [vmem:[%s10299_s10 + $0x13e0] sm:$0xff]  ;;  %v1873_v63 = vld [vmem:[%s10299_s10 + $0x13f0] sm:$0xff] }
  0xbb   : > { %v1875_v0 = vld [vmem:[%s10299_s10 + $0x1400] sm:$0xff]  ;;  %1872 = vst [vmem:[%s10304_s11 + $0x9f0] sm:$0xff] %v1871_v62  ;;  %1874 = vst [vmem:[%s10304_s11 + $0x9f8] sm:$0xff] %v1873_v63  ;;  %v1877_v1 = vld [vmem:[%s10299_s10 + $0x1410] sm:$0xff] }
  0xbc   : > { %1876 = vst [vmem:[%s10304_s11 + $0xa00] sm:$0xff] %v1875_v0  ;;  %v1879_v2 = vld [vmem:[%s10299_s10 + $0x1420] sm:$0xff]  ;;  %v1881_v3 = vld [vmem:[%s10299_s10 + $0x1430] sm:$0xff]  ;;  %1878 = vst [vmem:[%s10304_s11 + $0xa08] sm:$0xff] %v1877_v1 }
  0xbd   : > { %1880 = vst [vmem:[%s10304_s11 + $0xa10] sm:$0xff] %v1879_v2  ;;  %1882 = vst [vmem:[%s10304_s11 + $0xa18] sm:$0xff] %v1881_v3  ;;  %v1883_v4 = vld [vmem:[%s10299_s10 + $0x1440] sm:$0xff]  ;;  %v1885_v5 = vld [vmem:[%s10299_s10 + $0x1450] sm:$0xff] }
  0xbe   : > { %v1887_v6 = vld [vmem:[%s10299_s10 + $0x1460] sm:$0xff]  ;;  %1884 = vst [vmem:[%s10304_s11 + $0xa20] sm:$0xff] %v1883_v4  ;;  %1886 = vst [vmem:[%s10304_s11 + $0xa28] sm:$0xff] %v1885_v5  ;;  %v1889_v7 = vld [vmem:[%s10299_s10 + $0x1470] sm:$0xff] }
  0xbf   : > { %1888 = vst [vmem:[%s10304_s11 + $0xa30] sm:$0xff] %v1887_v6  ;;  %v1891_v8 = vld [vmem:[%s10299_s10 + $0x1480] sm:$0xff]  ;;  %v1893_v9 = vld [vmem:[%s10299_s10 + $0x1490] sm:$0xff]  ;;  %1890 = vst [vmem:[%s10304_s11 + $0xa38] sm:$0xff] %v1889_v7 }
  0xc0   : > { %1892 = vst [vmem:[%s10304_s11 + $0xa40] sm:$0xff] %v1891_v8  ;;  %1894 = vst [vmem:[%s10304_s11 + $0xa48] sm:$0xff] %v1893_v9  ;;  %v1895_v10 = vld [vmem:[%s10299_s10 + $0x14a0] sm:$0xff]  ;;  %v1897_v11 = vld [vmem:[%s10299_s10 + $0x14b0] sm:$0xff] }
  0xc1   : > { %v1899_v12 = vld [vmem:[%s10299_s10 + $0x14c0] sm:$0xff]  ;;  %1896 = vst [vmem:[%s10304_s11 + $0xa50] sm:$0xff] %v1895_v10  ;;  %1898 = vst [vmem:[%s10304_s11 + $0xa58] sm:$0xff] %v1897_v11  ;;  %v1901_v13 = vld [vmem:[%s10299_s10 + $0x14d0] sm:$0xff] }
  0xc2   : > { %1900 = vst [vmem:[%s10304_s11 + $0xa60] sm:$0xff] %v1899_v12  ;;  %v1903_v14 = vld [vmem:[%s10299_s10 + $0x14e0] sm:$0xff]  ;;  %v1905_v15 = vld [vmem:[%s10299_s10 + $0x14f0] sm:$0xff]  ;;  %1902 = vst [vmem:[%s10304_s11 + $0xa68] sm:$0xff] %v1901_v13 }
  0xc3   : > { %1904 = vst [vmem:[%s10304_s11 + $0xa70] sm:$0xff] %v1903_v14  ;;  %1906 = vst [vmem:[%s10304_s11 + $0xa78] sm:$0xff] %v1905_v15  ;;  %v1907_v16 = vld [vmem:[%s10299_s10 + $0x1500] sm:$0xff]  ;;  %v1909_v17 = vld [vmem:[%s10299_s10 + $0x1510] sm:$0xff] }
  0xc4   : > { %v1911_v18 = vld [vmem:[%s10299_s10 + $0x1520] sm:$0xff]  ;;  %1908 = vst [vmem:[%s10304_s11 + $0xa80] sm:$0xff] %v1907_v16  ;;  %1910 = vst [vmem:[%s10304_s11 + $0xa88] sm:$0xff] %v1909_v17  ;;  %v1913_v19 = vld [vmem:[%s10299_s10 + $0x1530] sm:$0xff] }
  0xc5   : > { %1912 = vst [vmem:[%s10304_s11 + $0xa90] sm:$0xff] %v1911_v18  ;;  %v1915_v20 = vld [vmem:[%s10299_s10 + $0x1540] sm:$0xff]  ;;  %v1917_v21 = vld [vmem:[%s10299_s10 + $0x1550] sm:$0xff]  ;;  %1914 = vst [vmem:[%s10304_s11 + $0xa98] sm:$0xff] %v1913_v19 }
  0xc6   : > { %1916 = vst [vmem:[%s10304_s11 + $0xaa0] sm:$0xff] %v1915_v20  ;;  %1918 = vst [vmem:[%s10304_s11 + $0xaa8] sm:$0xff] %v1917_v21  ;;  %v1919_v22 = vld [vmem:[%s10299_s10 + $0x1560] sm:$0xff]  ;;  %v1921_v23 = vld [vmem:[%s10299_s10 + $0x1570] sm:$0xff] }
  0xc7   : > { %v1923_v24 = vld [vmem:[%s10299_s10 + $0x1580] sm:$0xff]  ;;  %1920 = vst [vmem:[%s10304_s11 + $0xab0] sm:$0xff] %v1919_v22  ;;  %1922 = vst [vmem:[%s10304_s11 + $0xab8] sm:$0xff] %v1921_v23  ;;  %v1925_v25 = vld [vmem:[%s10299_s10 + $0x1590] sm:$0xff] }
  0xc8   : > { %1924 = vst [vmem:[%s10304_s11 + $0xac0] sm:$0xff] %v1923_v24  ;;  %v1927_v26 = vld [vmem:[%s10299_s10 + $0x15a0] sm:$0xff]  ;;  %v1929_v27 = vld [vmem:[%s10299_s10 + $0x15b0] sm:$0xff]  ;;  %1926 = vst [vmem:[%s10304_s11 + $0xac8] sm:$0xff] %v1925_v25 }
  0xc9   : > { %1928 = vst [vmem:[%s10304_s11 + $0xad0] sm:$0xff] %v1927_v26  ;;  %1930 = vst [vmem:[%s10304_s11 + $0xad8] sm:$0xff] %v1929_v27  ;;  %v1931_v28 = vld [vmem:[%s10299_s10 + $0x15c0] sm:$0xff]  ;;  %v1933_v29 = vld [vmem:[%s10299_s10 + $0x15d0] sm:$0xff] }
  0xca   : > { %v1935_v30 = vld [vmem:[%s10299_s10 + $0x15e0] sm:$0xff]  ;;  %1932 = vst [vmem:[%s10304_s11 + $0xae0] sm:$0xff] %v1931_v28  ;;  %1934 = vst [vmem:[%s10304_s11 + $0xae8] sm:$0xff] %v1933_v29  ;;  %v1937_v31 = vld [vmem:[%s10299_s10 + $0x15f0] sm:$0xff] }
  0xcb   : > { %1936 = vst [vmem:[%s10304_s11 + $0xaf0] sm:$0xff] %v1935_v30  ;;  %v1939_v32 = vld [vmem:[%s10299_s10 + $0x1600] sm:$0xff]  ;;  %v1941_v33 = vld [vmem:[%s10299_s10 + $0x1610] sm:$0xff]  ;;  %1938 = vst [vmem:[%s10304_s11 + $0xaf8] sm:$0xff] %v1937_v31 }
  0xcc   : > { %1940 = vst [vmem:[%s10304_s11 + $0xb00] sm:$0xff] %v1939_v32  ;;  %1942 = vst [vmem:[%s10304_s11 + $0xb08] sm:$0xff] %v1941_v33  ;;  %v1943_v34 = vld [vmem:[%s10299_s10 + $0x1620] sm:$0xff]  ;;  %v1945_v35 = vld [vmem:[%s10299_s10 + $0x1630] sm:$0xff] }
  0xcd   : > { %v1947_v36 = vld [vmem:[%s10299_s10 + $0x1640] sm:$0xff]  ;;  %1944 = vst [vmem:[%s10304_s11 + $0xb10] sm:$0xff] %v1943_v34  ;;  %1946 = vst [vmem:[%s10304_s11 + $0xb18] sm:$0xff] %v1945_v35  ;;  %v1949_v37 = vld [vmem:[%s10299_s10 + $0x1650] sm:$0xff] }
  0xce   : > { %1948 = vst [vmem:[%s10304_s11 + $0xb20] sm:$0xff] %v1947_v36  ;;  %v1951_v38 = vld [vmem:[%s10299_s10 + $0x1660] sm:$0xff]  ;;  %v1953_v39 = vld [vmem:[%s10299_s10 + $0x1670] sm:$0xff]  ;;  %1950 = vst [vmem:[%s10304_s11 + $0xb28] sm:$0xff] %v1949_v37 }
  0xcf   : > { %1952 = vst [vmem:[%s10304_s11 + $0xb30] sm:$0xff] %v1951_v38  ;;  %1954 = vst [vmem:[%s10304_s11 + $0xb38] sm:$0xff] %v1953_v39  ;;  %v1955_v40 = vld [vmem:[%s10299_s10 + $0x1680] sm:$0xff]  ;;  %v1957_v41 = vld [vmem:[%s10299_s10 + $0x1690] sm:$0xff] }
  0xd0   : > { %v1959_v42 = vld [vmem:[%s10299_s10 + $0x16a0] sm:$0xff]  ;;  %1956 = vst [vmem:[%s10304_s11 + $0xb40] sm:$0xff] %v1955_v40  ;;  %1958 = vst [vmem:[%s10304_s11 + $0xb48] sm:$0xff] %v1957_v41  ;;  %v1961_v43 = vld [vmem:[%s10299_s10 + $0x16b0] sm:$0xff] }
  0xd1   : > { %1960 = vst [vmem:[%s10304_s11 + $0xb50] sm:$0xff] %v1959_v42  ;;  %v1963_v44 = vld [vmem:[%s10299_s10 + $0x16c0] sm:$0xff]  ;;  %v1965_v45 = vld [vmem:[%s10299_s10 + $0x16d0] sm:$0xff]  ;;  %1962 = vst [vmem:[%s10304_s11 + $0xb58] sm:$0xff] %v1961_v43 }
  0xd2   : > { %1964 = vst [vmem:[%s10304_s11 + $0xb60] sm:$0xff] %v1963_v44  ;;  %1966 = vst [vmem:[%s10304_s11 + $0xb68] sm:$0xff] %v1965_v45  ;;  %v1967_v46 = vld [vmem:[%s10299_s10 + $0x16e0] sm:$0xff]  ;;  %v1969_v47 = vld [vmem:[%s10299_s10 + $0x16f0] sm:$0xff] }
  0xd3   : > { %v1971_v48 = vld [vmem:[%s10299_s10 + $0x1700] sm:$0xff]  ;;  %1968 = vst [vmem:[%s10304_s11 + $0xb70] sm:$0xff] %v1967_v46  ;;  %1970 = vst [vmem:[%s10304_s11 + $0xb78] sm:$0xff] %v1969_v47  ;;  %v1973_v49 = vld [vmem:[%s10299_s10 + $0x1710] sm:$0xff] }
  0xd4   : > { %1972 = vst [vmem:[%s10304_s11 + $0xb80] sm:$0xff] %v1971_v48  ;;  %v1975_v50 = vld [vmem:[%s10299_s10 + $0x1720] sm:$0xff]  ;;  %v1977_v51 = vld [vmem:[%s10299_s10 + $0x1730] sm:$0xff]  ;;  %1974 = vst [vmem:[%s10304_s11 + $0xb88] sm:$0xff] %v1973_v49 }
  0xd5   : > { %1976 = vst [vmem:[%s10304_s11 + $0xb90] sm:$0xff] %v1975_v50  ;;  %1978 = vst [vmem:[%s10304_s11 + $0xb98] sm:$0xff] %v1977_v51  ;;  %v1979_v52 = vld [vmem:[%s10299_s10 + $0x1740] sm:$0xff]  ;;  %v1981_v53 = vld [vmem:[%s10299_s10 + $0x1750] sm:$0xff] }
  0xd6   : > { %v1983_v54 = vld [vmem:[%s10299_s10 + $0x1760] sm:$0xff]  ;;  %1980 = vst [vmem:[%s10304_s11 + $0xba0] sm:$0xff] %v1979_v52  ;;  %1982 = vst [vmem:[%s10304_s11 + $0xba8] sm:$0xff] %v1981_v53  ;;  %v1985_v55 = vld [vmem:[%s10299_s10 + $0x1770] sm:$0xff] }
  0xd7   : > { %1984 = vst [vmem:[%s10304_s11 + $0xbb0] sm:$0xff] %v1983_v54  ;;  %v1987_v56 = vld [vmem:[%s10299_s10 + $0x1780] sm:$0xff]  ;;  %v1989_v57 = vld [vmem:[%s10299_s10 + $0x1790] sm:$0xff]  ;;  %1986 = vst [vmem:[%s10304_s11 + $0xbb8] sm:$0xff] %v1985_v55 }
  0xd8   : > { %1988 = vst [vmem:[%s10304_s11 + $0xbc0] sm:$0xff] %v1987_v56  ;;  %1990 = vst [vmem:[%s10304_s11 + $0xbc8] sm:$0xff] %v1989_v57  ;;  %v1991_v58 = vld [vmem:[%s10299_s10 + $0x17a0] sm:$0xff]  ;;  %v1993_v59 = vld [vmem:[%s10299_s10 + $0x17b0] sm:$0xff] }
  0xd9   : > { %v1995_v60 = vld [vmem:[%s10299_s10 + $0x17c0] sm:$0xff]  ;;  %1992 = vst [vmem:[%s10304_s11 + $0xbd0] sm:$0xff] %v1991_v58  ;;  %1994 = vst [vmem:[%s10304_s11 + $0xbd8] sm:$0xff] %v1993_v59  ;;  %v1997_v61 = vld [vmem:[%s10299_s10 + $0x17d0] sm:$0xff] }
  0xda   : > { %1996 = vst [vmem:[%s10304_s11 + $0xbe0] sm:$0xff] %v1995_v60  ;;  %v1999_v62 = vld [vmem:[%s10299_s10 + $0x17e0] sm:$0xff]  ;;  %v2001_v63 = vld [vmem:[%s10299_s10 + $0x17f0] sm:$0xff]  ;;  %1998 = vst [vmem:[%s10304_s11 + $0xbe8] sm:$0xff] %v1997_v61 }
  0xdb   : > { %2000 = vst [vmem:[%s10304_s11 + $0xbf0] sm:$0xff] %v1999_v62  ;;  %2002 = vst [vmem:[%s10304_s11 + $0xbf8] sm:$0xff] %v2001_v63  ;;  %v2003_v0 = vld [vmem:[%s10299_s10 + $0x1800] sm:$0xff]  ;;  %v2005_v1 = vld [vmem:[%s10299_s10 + $0x1810] sm:$0xff] }
  0xdc   : > { %v2007_v2 = vld [vmem:[%s10299_s10 + $0x1820] sm:$0xff]  ;;  %2004 = vst [vmem:[%s10304_s11 + $0xc00] sm:$0xff] %v2003_v0  ;;  %2006 = vst [vmem:[%s10304_s11 + $0xc08] sm:$0xff] %v2005_v1  ;;  %v2009_v3 = vld [vmem:[%s10299_s10 + $0x1830] sm:$0xff] }
  0xdd   : > { %2008 = vst [vmem:[%s10304_s11 + $0xc10] sm:$0xff] %v2007_v2  ;;  %v2011_v4 = vld [vmem:[%s10299_s10 + $0x1840] sm:$0xff]  ;;  %v2013_v5 = vld [vmem:[%s10299_s10 + $0x1850] sm:$0xff]  ;;  %2010 = vst [vmem:[%s10304_s11 + $0xc18] sm:$0xff] %v2009_v3 }
  0xde   : > { %2012 = vst [vmem:[%s10304_s11 + $0xc20] sm:$0xff] %v2011_v4  ;;  %2014 = vst [vmem:[%s10304_s11 + $0xc28] sm:$0xff] %v2013_v5  ;;  %v2015_v6 = vld [vmem:[%s10299_s10 + $0x1860] sm:$0xff]  ;;  %v2017_v7 = vld [vmem:[%s10299_s10 + $0x1870] sm:$0xff] }
  0xdf   : > { %v2019_v8 = vld [vmem:[%s10299_s10 + $0x1880] sm:$0xff]  ;;  %2016 = vst [vmem:[%s10304_s11 + $0xc30] sm:$0xff] %v2015_v6  ;;  %2018 = vst [vmem:[%s10304_s11 + $0xc38] sm:$0xff] %v2017_v7  ;;  %v2021_v9 = vld [vmem:[%s10299_s10 + $0x1890] sm:$0xff] }
  0xe0   : > { %2020 = vst [vmem:[%s10304_s11 + $0xc40] sm:$0xff] %v2019_v8  ;;  %v2023_v10 = vld [vmem:[%s10299_s10 + $0x18a0] sm:$0xff]  ;;  %v2025_v11 = vld [vmem:[%s10299_s10 + $0x18b0] sm:$0xff]  ;;  %2022 = vst [vmem:[%s10304_s11 + $0xc48] sm:$0xff] %v2021_v9 }
  0xe1   : > { %2024 = vst [vmem:[%s10304_s11 + $0xc50] sm:$0xff] %v2023_v10  ;;  %2026 = vst [vmem:[%s10304_s11 + $0xc58] sm:$0xff] %v2025_v11  ;;  %v2027_v12 = vld [vmem:[%s10299_s10 + $0x18c0] sm:$0xff]  ;;  %v2029_v13 = vld [vmem:[%s10299_s10 + $0x18d0] sm:$0xff] }
  0xe2   : > { %v2031_v14 = vld [vmem:[%s10299_s10 + $0x18e0] sm:$0xff]  ;;  %2028 = vst [vmem:[%s10304_s11 + $0xc60] sm:$0xff] %v2027_v12  ;;  %2030 = vst [vmem:[%s10304_s11 + $0xc68] sm:$0xff] %v2029_v13  ;;  %v2033_v15 = vld [vmem:[%s10299_s10 + $0x18f0] sm:$0xff] }
  0xe3   : > { %2032 = vst [vmem:[%s10304_s11 + $0xc70] sm:$0xff] %v2031_v14  ;;  %v2035_v16 = vld [vmem:[%s10299_s10 + $0x1900] sm:$0xff]  ;;  %v2037_v17 = vld [vmem:[%s10299_s10 + $0x1910] sm:$0xff]  ;;  %2034 = vst [vmem:[%s10304_s11 + $0xc78] sm:$0xff] %v2033_v15 }
  0xe4   : > { %2036 = vst [vmem:[%s10304_s11 + $0xc80] sm:$0xff] %v2035_v16  ;;  %2038 = vst [vmem:[%s10304_s11 + $0xc88] sm:$0xff] %v2037_v17  ;;  %v2039_v18 = vld [vmem:[%s10299_s10 + $0x1920] sm:$0xff]  ;;  %v2041_v19 = vld [vmem:[%s10299_s10 + $0x1930] sm:$0xff] }
  0xe5   : > { %v2043_v20 = vld [vmem:[%s10299_s10 + $0x1940] sm:$0xff]  ;;  %2040 = vst [vmem:[%s10304_s11 + $0xc90] sm:$0xff] %v2039_v18  ;;  %2042 = vst [vmem:[%s10304_s11 + $0xc98] sm:$0xff] %v2041_v19  ;;  %v2045_v21 = vld [vmem:[%s10299_s10 + $0x1950] sm:$0xff] }
  0xe6   : > { %2044 = vst [vmem:[%s10304_s11 + $0xca0] sm:$0xff] %v2043_v20  ;;  %v2047_v22 = vld [vmem:[%s10299_s10 + $0x1960] sm:$0xff]  ;;  %v2049_v23 = vld [vmem:[%s10299_s10 + $0x1970] sm:$0xff]  ;;  %2046 = vst [vmem:[%s10304_s11 + $0xca8] sm:$0xff] %v2045_v21 }
  0xe7   : > { %2048 = vst [vmem:[%s10304_s11 + $0xcb0] sm:$0xff] %v2047_v22  ;;  %2050 = vst [vmem:[%s10304_s11 + $0xcb8] sm:$0xff] %v2049_v23  ;;  %v2051_v24 = vld [vmem:[%s10299_s10 + $0x1980] sm:$0xff]  ;;  %v2053_v25 = vld [vmem:[%s10299_s10 + $0x1990] sm:$0xff] }
  0xe8   : > { %v2055_v26 = vld [vmem:[%s10299_s10 + $0x19a0] sm:$0xff]  ;;  %2052 = vst [vmem:[%s10304_s11 + $0xcc0] sm:$0xff] %v2051_v24  ;;  %2054 = vst [vmem:[%s10304_s11 + $0xcc8] sm:$0xff] %v2053_v25  ;;  %v2057_v27 = vld [vmem:[%s10299_s10 + $0x19b0] sm:$0xff] }
  0xe9   : > { %2056 = vst [vmem:[%s10304_s11 + $0xcd0] sm:$0xff] %v2055_v26  ;;  %v2059_v28 = vld [vmem:[%s10299_s10 + $0x19c0] sm:$0xff]  ;;  %v2061_v29 = vld [vmem:[%s10299_s10 + $0x19d0] sm:$0xff]  ;;  %2058 = vst [vmem:[%s10304_s11 + $0xcd8] sm:$0xff] %v2057_v27 }
  0xea   : > { %2060 = vst [vmem:[%s10304_s11 + $0xce0] sm:$0xff] %v2059_v28  ;;  %2062 = vst [vmem:[%s10304_s11 + $0xce8] sm:$0xff] %v2061_v29  ;;  %v2063_v30 = vld [vmem:[%s10299_s10 + $0x19e0] sm:$0xff]  ;;  %v2065_v31 = vld [vmem:[%s10299_s10 + $0x19f0] sm:$0xff] }
  0xeb   : > { %v2067_v32 = vld [vmem:[%s10299_s10 + $0x1a00] sm:$0xff]  ;;  %2064 = vst [vmem:[%s10304_s11 + $0xcf0] sm:$0xff] %v2063_v30  ;;  %2066 = vst [vmem:[%s10304_s11 + $0xcf8] sm:$0xff] %v2065_v31  ;;  %v2069_v33 = vld [vmem:[%s10299_s10 + $0x1a10] sm:$0xff] }
  0xec   : > { %2068 = vst [vmem:[%s10304_s11 + $0xd00] sm:$0xff] %v2067_v32  ;;  %v2071_v34 = vld [vmem:[%s10299_s10 + $0x1a20] sm:$0xff]  ;;  %v2073_v35 = vld [vmem:[%s10299_s10 + $0x1a30] sm:$0xff]  ;;  %2070 = vst [vmem:[%s10304_s11 + $0xd08] sm:$0xff] %v2069_v33 }
  0xed   : > { %2072 = vst [vmem:[%s10304_s11 + $0xd10] sm:$0xff] %v2071_v34  ;;  %2074 = vst [vmem:[%s10304_s11 + $0xd18] sm:$0xff] %v2073_v35  ;;  %v2075_v36 = vld [vmem:[%s10299_s10 + $0x1a40] sm:$0xff]  ;;  %v2077_v37 = vld [vmem:[%s10299_s10 + $0x1a50] sm:$0xff] }
  0xee   : > { %v2079_v38 = vld [vmem:[%s10299_s10 + $0x1a60] sm:$0xff]  ;;  %2076 = vst [vmem:[%s10304_s11 + $0xd20] sm:$0xff] %v2075_v36  ;;  %2078 = vst [vmem:[%s10304_s11 + $0xd28] sm:$0xff] %v2077_v37  ;;  %v2081_v39 = vld [vmem:[%s10299_s10 + $0x1a70] sm:$0xff] }
  0xef   : > { %2080 = vst [vmem:[%s10304_s11 + $0xd30] sm:$0xff] %v2079_v38  ;;  %v2083_v40 = vld [vmem:[%s10299_s10 + $0x1a80] sm:$0xff]  ;;  %v2085_v41 = vld [vmem:[%s10299_s10 + $0x1a90] sm:$0xff]  ;;  %2082 = vst [vmem:[%s10304_s11 + $0xd38] sm:$0xff] %v2081_v39 }
  0xf0   : > { %2084 = vst [vmem:[%s10304_s11 + $0xd40] sm:$0xff] %v2083_v40  ;;  %2086 = vst [vmem:[%s10304_s11 + $0xd48] sm:$0xff] %v2085_v41  ;;  %v2087_v42 = vld [vmem:[%s10299_s10 + $0x1aa0] sm:$0xff]  ;;  %v2089_v43 = vld [vmem:[%s10299_s10 + $0x1ab0] sm:$0xff] }
  0xf1   : > { %v2091_v44 = vld [vmem:[%s10299_s10 + $0x1ac0] sm:$0xff]  ;;  %2088 = vst [vmem:[%s10304_s11 + $0xd50] sm:$0xff] %v2087_v42  ;;  %2090 = vst [vmem:[%s10304_s11 + $0xd58] sm:$0xff] %v2089_v43  ;;  %v2093_v45 = vld [vmem:[%s10299_s10 + $0x1ad0] sm:$0xff] }
  0xf2   : > { %2092 = vst [vmem:[%s10304_s11 + $0xd60] sm:$0xff] %v2091_v44  ;;  %v2095_v46 = vld [vmem:[%s10299_s10 + $0x1ae0] sm:$0xff]  ;;  %v2097_v47 = vld [vmem:[%s10299_s10 + $0x1af0] sm:$0xff]  ;;  %2094 = vst [vmem:[%s10304_s11 + $0xd68] sm:$0xff] %v2093_v45 }
  0xf3   : > { %2096 = vst [vmem:[%s10304_s11 + $0xd70] sm:$0xff] %v2095_v46  ;;  %2098 = vst [vmem:[%s10304_s11 + $0xd78] sm:$0xff] %v2097_v47  ;;  %v2099_v48 = vld [vmem:[%s10299_s10 + $0x1b00] sm:$0xff]  ;;  %v2101_v49 = vld [vmem:[%s10299_s10 + $0x1b10] sm:$0xff] }
  0xf4   : > { %v2103_v50 = vld [vmem:[%s10299_s10 + $0x1b20] sm:$0xff]  ;;  %2100 = vst [vmem:[%s10304_s11 + $0xd80] sm:$0xff] %v2099_v48  ;;  %2102 = vst [vmem:[%s10304_s11 + $0xd88] sm:$0xff] %v2101_v49  ;;  %v2105_v51 = vld [vmem:[%s10299_s10 + $0x1b30] sm:$0xff] }
  0xf5   : > { %2104 = vst [vmem:[%s10304_s11 + $0xd90] sm:$0xff] %v2103_v50  ;;  %v2107_v52 = vld [vmem:[%s10299_s10 + $0x1b40] sm:$0xff]  ;;  %v2109_v53 = vld [vmem:[%s10299_s10 + $0x1b50] sm:$0xff]  ;;  %2106 = vst [vmem:[%s10304_s11 + $0xd98] sm:$0xff] %v2105_v51 }
  0xf6   : > { %2108 = vst [vmem:[%s10304_s11 + $0xda0] sm:$0xff] %v2107_v52  ;;  %2110 = vst [vmem:[%s10304_s11 + $0xda8] sm:$0xff] %v2109_v53  ;;  %v2111_v54 = vld [vmem:[%s10299_s10 + $0x1b60] sm:$0xff]  ;;  %v2113_v55 = vld [vmem:[%s10299_s10 + $0x1b70] sm:$0xff] }
  0xf7   : > { %v2115_v56 = vld [vmem:[%s10299_s10 + $0x1b80] sm:$0xff]  ;;  %2112 = vst [vmem:[%s10304_s11 + $0xdb0] sm:$0xff] %v2111_v54  ;;  %2114 = vst [vmem:[%s10304_s11 + $0xdb8] sm:$0xff] %v2113_v55  ;;  %v2117_v57 = vld [vmem:[%s10299_s10 + $0x1b90] sm:$0xff] }
  0xf8   : > { %2116 = vst [vmem:[%s10304_s11 + $0xdc0] sm:$0xff] %v2115_v56  ;;  %v2119_v58 = vld [vmem:[%s10299_s10 + $0x1ba0] sm:$0xff]  ;;  %v2121_v59 = vld [vmem:[%s10299_s10 + $0x1bb0] sm:$0xff]  ;;  %2118 = vst [vmem:[%s10304_s11 + $0xdc8] sm:$0xff] %v2117_v57 }
  0xf9   : > { %2120 = vst [vmem:[%s10304_s11 + $0xdd0] sm:$0xff] %v2119_v58  ;;  %2122 = vst [vmem:[%s10304_s11 + $0xdd8] sm:$0xff] %v2121_v59  ;;  %v2123_v60 = vld [vmem:[%s10299_s10 + $0x1bc0] sm:$0xff]  ;;  %v2125_v61 = vld [vmem:[%s10299_s10 + $0x1bd0] sm:$0xff] }
  0xfa   : > { %v2127_v62 = vld [vmem:[%s10299_s10 + $0x1be0] sm:$0xff]  ;;  %2124 = vst [vmem:[%s10304_s11 + $0xde0] sm:$0xff] %v2123_v60  ;;  %2126 = vst [vmem:[%s10304_s11 + $0xde8] sm:$0xff] %v2125_v61  ;;  %v2129_v63 = vld [vmem:[%s10299_s10 + $0x1bf0] sm:$0xff] }
  0xfb   : > { %2128 = vst [vmem:[%s10304_s11 + $0xdf0] sm:$0xff] %v2127_v62  ;;  %v2131_v0 = vld [vmem:[%s10299_s10 + $0x1c00] sm:$0xff]  ;;  %v2133_v1 = vld [vmem:[%s10299_s10 + $0x1c10] sm:$0xff]  ;;  %2130 = vst [vmem:[%s10304_s11 + $0xdf8] sm:$0xff] %v2129_v63 }
  0xfc   : > { %2132 = vst [vmem:[%s10304_s11 + $0xe00] sm:$0xff] %v2131_v0  ;;  %2134 = vst [vmem:[%s10304_s11 + $0xe08] sm:$0xff] %v2133_v1  ;;  %v2135_v2 = vld [vmem:[%s10299_s10 + $0x1c20] sm:$0xff]  ;;  %v2137_v3 = vld [vmem:[%s10299_s10 + $0x1c30] sm:$0xff] }
  0xfd   : > { %v2139_v4 = vld [vmem:[%s10299_s10 + $0x1c40] sm:$0xff]  ;;  %2136 = vst [vmem:[%s10304_s11 + $0xe10] sm:$0xff] %v2135_v2  ;;  %2138 = vst [vmem:[%s10304_s11 + $0xe18] sm:$0xff] %v2137_v3  ;;  %v2141_v5 = vld [vmem:[%s10299_s10 + $0x1c50] sm:$0xff] }
  0xfe   : > { %2140 = vst [vmem:[%s10304_s11 + $0xe20] sm:$0xff] %v2139_v4  ;;  %v2143_v6 = vld [vmem:[%s10299_s10 + $0x1c60] sm:$0xff]  ;;  %v2145_v7 = vld [vmem:[%s10299_s10 + $0x1c70] sm:$0xff]  ;;  %2142 = vst [vmem:[%s10304_s11 + $0xe28] sm:$0xff] %v2141_v5 }
  0xff   : > { %2144 = vst [vmem:[%s10304_s11 + $0xe30] sm:$0xff] %v2143_v6  ;;  %2146 = vst [vmem:[%s10304_s11 + $0xe38] sm:$0xff] %v2145_v7  ;;  %v2147_v8 = vld [vmem:[%s10299_s10 + $0x1c80] sm:$0xff]  ;;  %v2149_v9 = vld [vmem:[%s10299_s10 + $0x1c90] sm:$0xff] }
 0x100   : > { %v2151_v10 = vld [vmem:[%s10299_s10 + $0x1ca0] sm:$0xff]  ;;  %2148 = vst [vmem:[%s10304_s11 + $0xe40] sm:$0xff] %v2147_v8  ;;  %2150 = vst [vmem:[%s10304_s11 + $0xe48] sm:$0xff] %v2149_v9  ;;  %v2153_v11 = vld [vmem:[%s10299_s10 + $0x1cb0] sm:$0xff] }
 0x101   : > { %2152 = vst [vmem:[%s10304_s11 + $0xe50] sm:$0xff] %v2151_v10  ;;  %v2155_v12 = vld [vmem:[%s10299_s10 + $0x1cc0] sm:$0xff]  ;;  %v2157_v13 = vld [vmem:[%s10299_s10 + $0x1cd0] sm:$0xff]  ;;  %2154 = vst [vmem:[%s10304_s11 + $0xe58] sm:$0xff] %v2153_v11 }
 0x102   : > { %2156 = vst [vmem:[%s10304_s11 + $0xe60] sm:$0xff] %v2155_v12  ;;  %2158 = vst [vmem:[%s10304_s11 + $0xe68] sm:$0xff] %v2157_v13  ;;  %v2159_v14 = vld [vmem:[%s10299_s10 + $0x1ce0] sm:$0xff]  ;;  %v2161_v15 = vld [vmem:[%s10299_s10 + $0x1cf0] sm:$0xff] }
 0x103   : > { %v2163_v16 = vld [vmem:[%s10299_s10 + $0x1d00] sm:$0xff]  ;;  %2160 = vst [vmem:[%s10304_s11 + $0xe70] sm:$0xff] %v2159_v14  ;;  %2162 = vst [vmem:[%s10304_s11 + $0xe78] sm:$0xff] %v2161_v15  ;;  %v2165_v17 = vld [vmem:[%s10299_s10 + $0x1d10] sm:$0xff] }
 0x104   : > { %2164 = vst [vmem:[%s10304_s11 + $0xe80] sm:$0xff] %v2163_v16  ;;  %v2167_v18 = vld [vmem:[%s10299_s10 + $0x1d20] sm:$0xff]  ;;  %v2169_v19 = vld [vmem:[%s10299_s10 + $0x1d30] sm:$0xff]  ;;  %2166 = vst [vmem:[%s10304_s11 + $0xe88] sm:$0xff] %v2165_v17 }
 0x105   : > { %2168 = vst [vmem:[%s10304_s11 + $0xe90] sm:$0xff] %v2167_v18  ;;  %2170 = vst [vmem:[%s10304_s11 + $0xe98] sm:$0xff] %v2169_v19  ;;  %v2171_v20 = vld [vmem:[%s10299_s10 + $0x1d40] sm:$0xff]  ;;  %v2173_v21 = vld [vmem:[%s10299_s10 + $0x1d50] sm:$0xff] }
 0x106   : > { %v2175_v22 = vld [vmem:[%s10299_s10 + $0x1d60] sm:$0xff]  ;;  %2172 = vst [vmem:[%s10304_s11 + $0xea0] sm:$0xff] %v2171_v20  ;;  %2174 = vst [vmem:[%s10304_s11 + $0xea8] sm:$0xff] %v2173_v21  ;;  %v2177_v23 = vld [vmem:[%s10299_s10 + $0x1d70] sm:$0xff] }
 0x107   : > { %2176 = vst [vmem:[%s10304_s11 + $0xeb0] sm:$0xff] %v2175_v22  ;;  %v2179_v24 = vld [vmem:[%s10299_s10 + $0x1d80] sm:$0xff]  ;;  %v2181_v25 = vld [vmem:[%s10299_s10 + $0x1d90] sm:$0xff]  ;;  %2178 = vst [vmem:[%s10304_s11 + $0xeb8] sm:$0xff] %v2177_v23 }
 0x108   : > { %2180 = vst [vmem:[%s10304_s11 + $0xec0] sm:$0xff] %v2179_v24  ;;  %2182 = vst [vmem:[%s10304_s11 + $0xec8] sm:$0xff] %v2181_v25  ;;  %v2183_v26 = vld [vmem:[%s10299_s10 + $0x1da0] sm:$0xff]  ;;  %v2185_v27 = vld [vmem:[%s10299_s10 + $0x1db0] sm:$0xff] }
 0x109   : > { %v2187_v28 = vld [vmem:[%s10299_s10 + $0x1dc0] sm:$0xff]  ;;  %2184 = vst [vmem:[%s10304_s11 + $0xed0] sm:$0xff] %v2183_v26  ;;  %2186 = vst [vmem:[%s10304_s11 + $0xed8] sm:$0xff] %v2185_v27  ;;  %v2189_v29 = vld [vmem:[%s10299_s10 + $0x1dd0] sm:$0xff] }
 0x10a   : > { %2188 = vst [vmem:[%s10304_s11 + $0xee0] sm:$0xff] %v2187_v28  ;;  %v2191_v30 = vld [vmem:[%s10299_s10 + $0x1de0] sm:$0xff]  ;;  %v2193_v31 = vld [vmem:[%s10299_s10 + $0x1df0] sm:$0xff]  ;;  %2190 = vst [vmem:[%s10304_s11 + $0xee8] sm:$0xff] %v2189_v29 }
 0x10b   : > { %2192 = vst [vmem:[%s10304_s11 + $0xef0] sm:$0xff] %v2191_v30  ;;  %2194 = vst [vmem:[%s10304_s11 + $0xef8] sm:$0xff] %v2193_v31  ;;  %v2195_v32 = vld [vmem:[%s10299_s10 + $0x1e00] sm:$0xff]  ;;  %v2197_v33 = vld [vmem:[%s10299_s10 + $0x1e10] sm:$0xff] }
 0x10c   : > { %v2199_v34 = vld [vmem:[%s10299_s10 + $0x1e20] sm:$0xff]  ;;  %2196 = vst [vmem:[%s10304_s11 + $0xf00] sm:$0xff] %v2195_v32  ;;  %2198 = vst [vmem:[%s10304_s11 + $0xf08] sm:$0xff] %v2197_v33  ;;  %v2201_v35 = vld [vmem:[%s10299_s10 + $0x1e30] sm:$0xff] }
 0x10d   : > { %2200 = vst [vmem:[%s10304_s11 + $0xf10] sm:$0xff] %v2199_v34  ;;  %v2203_v36 = vld [vmem:[%s10299_s10 + $0x1e40] sm:$0xff]  ;;  %v2205_v37 = vld [vmem:[%s10299_s10 + $0x1e50] sm:$0xff]  ;;  %2202 = vst [vmem:[%s10304_s11 + $0xf18] sm:$0xff] %v2201_v35 }
 0x10e   : > { %2204 = vst [vmem:[%s10304_s11 + $0xf20] sm:$0xff] %v2203_v36  ;;  %2206 = vst [vmem:[%s10304_s11 + $0xf28] sm:$0xff] %v2205_v37  ;;  %v2207_v38 = vld [vmem:[%s10299_s10 + $0x1e60] sm:$0xff]  ;;  %v2209_v39 = vld [vmem:[%s10299_s10 + $0x1e70] sm:$0xff] }
 0x10f   : > { %v2211_v40 = vld [vmem:[%s10299_s10 + $0x1e80] sm:$0xff]  ;;  %2208 = vst [vmem:[%s10304_s11 + $0xf30] sm:$0xff] %v2207_v38  ;;  %2210 = vst [vmem:[%s10304_s11 + $0xf38] sm:$0xff] %v2209_v39  ;;  %v2213_v41 = vld [vmem:[%s10299_s10 + $0x1e90] sm:$0xff] }
 0x110   : > { %2212 = vst [vmem:[%s10304_s11 + $0xf40] sm:$0xff] %v2211_v40  ;;  %v2215_v42 = vld [vmem:[%s10299_s10 + $0x1ea0] sm:$0xff]  ;;  %v2217_v43 = vld [vmem:[%s10299_s10 + $0x1eb0] sm:$0xff]  ;;  %2214 = vst [vmem:[%s10304_s11 + $0xf48] sm:$0xff] %v2213_v41 }
 0x111   : > { %2216 = vst [vmem:[%s10304_s11 + $0xf50] sm:$0xff] %v2215_v42  ;;  %2218 = vst [vmem:[%s10304_s11 + $0xf58] sm:$0xff] %v2217_v43  ;;  %v2219_v44 = vld [vmem:[%s10299_s10 + $0x1ec0] sm:$0xff]  ;;  %v2221_v45 = vld [vmem:[%s10299_s10 + $0x1ed0] sm:$0xff] }
 0x112   : > { %v2223_v46 = vld [vmem:[%s10299_s10 + $0x1ee0] sm:$0xff]  ;;  %2220 = vst [vmem:[%s10304_s11 + $0xf60] sm:$0xff] %v2219_v44  ;;  %2222 = vst [vmem:[%s10304_s11 + $0xf68] sm:$0xff] %v2221_v45  ;;  %v2225_v47 = vld [vmem:[%s10299_s10 + $0x1ef0] sm:$0xff] }
 0x113   : > { %2224 = vst [vmem:[%s10304_s11 + $0xf70] sm:$0xff] %v2223_v46  ;;  %v2227_v48 = vld [vmem:[%s10299_s10 + $0x1f00] sm:$0xff]  ;;  %v2229_v49 = vld [vmem:[%s10299_s10 + $0x1f10] sm:$0xff]  ;;  %2226 = vst [vmem:[%s10304_s11 + $0xf78] sm:$0xff] %v2225_v47 }
 0x114   : > { %2228 = vst [vmem:[%s10304_s11 + $0xf80] sm:$0xff] %v2227_v48  ;;  %2230 = vst [vmem:[%s10304_s11 + $0xf88] sm:$0xff] %v2229_v49  ;;  %v2231_v50 = vld [vmem:[%s10299_s10 + $0x1f20] sm:$0xff]  ;;  %v2233_v51 = vld [vmem:[%s10299_s10 + $0x1f30] sm:$0xff] }
 0x115   : > { %v2235_v52 = vld [vmem:[%s10299_s10 + $0x1f40] sm:$0xff]  ;;  %2232 = vst [vmem:[%s10304_s11 + $0xf90] sm:$0xff] %v2231_v50  ;;  %2234 = vst [vmem:[%s10304_s11 + $0xf98] sm:$0xff] %v2233_v51  ;;  %v2237_v53 = vld [vmem:[%s10299_s10 + $0x1f50] sm:$0xff] }
 0x116   : > { %2236 = vst [vmem:[%s10304_s11 + $0xfa0] sm:$0xff] %v2235_v52  ;;  %v2239_v54 = vld [vmem:[%s10299_s10 + $0x1f60] sm:$0xff]  ;;  %v2241_v55 = vld [vmem:[%s10299_s10 + $0x1f70] sm:$0xff]  ;;  %2238 = vst [vmem:[%s10304_s11 + $0xfa8] sm:$0xff] %v2237_v53 }
 0x117   : > { %2240 = vst [vmem:[%s10304_s11 + $0xfb0] sm:$0xff] %v2239_v54  ;;  %2242 = vst [vmem:[%s10304_s11 + $0xfb8] sm:$0xff] %v2241_v55  ;;  %v2243_v56 = vld [vmem:[%s10299_s10 + $0x1f80] sm:$0xff]  ;;  %v2245_v57 = vld [vmem:[%s10299_s10 + $0x1f90] sm:$0xff] }
 0x118   : > { %v2247_v58 = vld [vmem:[%s10299_s10 + $0x1fa0] sm:$0xff]  ;;  %2244 = vst [vmem:[%s10304_s11 + $0xfc0] sm:$0xff] %v2243_v56  ;;  %2246 = vst [vmem:[%s10304_s11 + $0xfc8] sm:$0xff] %v2245_v57  ;;  %v2249_v59 = vld [vmem:[%s10299_s10 + $0x1fb0] sm:$0xff] }
 0x119   : > { %2248 = vst [vmem:[%s10304_s11 + $0xfd0] sm:$0xff] %v2247_v58  ;;  %v2251_v60 = vld [vmem:[%s10299_s10 + $0x1fc0] sm:$0xff]  ;;  %v2253_v61 = vld [vmem:[%s10299_s10 + $0x1fd0] sm:$0xff]  ;;  %2250 = vst [vmem:[%s10304_s11 + $0xfd8] sm:$0xff] %v2249_v59 }
 0x11a   : > { %2252 = vst [vmem:[%s10304_s11 + $0xfe0] sm:$0xff] %v2251_v60  ;;  %2254 = vst [vmem:[%s10304_s11 + $0xfe8] sm:$0xff] %v2253_v61  ;;  %v2255_v62 = vld [vmem:[%s10299_s10 + $0x1fe0] sm:$0xff]  ;;  %v2257_v63 = vld [vmem:[%s10299_s10 + $0x1ff0] sm:$0xff] }
 0x11b   : > { %2256 = vst [vmem:[%s10304_s11 + $0xff0] sm:$0xff] %v2255_v62  ;;  %2258 = vst [vmem:[%s10304_s11 + $0xff8] sm:$0xff] %v2257_v63 }
 0x11c PF: > { %p8661_p11 = scmp.ge.s32.totalorder %s10197_s20, 1  ;;  %p4355_p12 = scmp.lt.s32.totalorder %s10197_s20, 5 }
 0x11e   : > { %p4356_p13 = pnand %p8661_p11, %p4355_p12 }
 0x11f   : > { %s4362_s21 = sand.u32 (!%p4356_p13), 1, %s10173_s14   ;;  %p4398_p0 = scmp.lt.s32.totalorder (!%p4356_p13), %s10185_s17, 1 }
 0x120   : > { %4359 = sbr.rel (%p4356_p13) target bundleno = 1084 (0x43c), region = 80  ;;  %s8662_s24 = sshll.u32 (!%p4356_p13), %s4362_s21, 12 }
 0x121   : > { %s11330_s25 = scalar_lea.vmem (!%p4356_p13), [#allocation3], %s8662_s24  ;;  %s11996_s6 = sshll.u32 (!%p4356_p13), %s10181_s16, 1 }
 0x122   : > { %v9355_v0 = vld [vmem:[%s11330_s25 + $0x4] ss:$8 sps:$4 sm:$0xff] (!%p4356_p13)   ;;  %v9359_v2 = vld [vmem:[%s11330_s25] ss:$8 sps:$4 sm:$0xff] (!%p4356_p13)   ;;  %v9361_v4 = vld [vmem:[%s11330_s25 + $0x14] ss:$8 sps:$4 sm:$0xff] (!%p4356_p13)  }
 0x123   : > { %v9357_v1 = vld [vmem:[%s11330_s25 + $0x804] ss:$8 sps:$4 sm:$0xff] (!%p4356_p13)   ;;  %7703 = vmatprep.subr.bf16.mxu1 (!%p4356_p13), %v9355_v0  ;;  %v9360_v3 = vld [vmem:[%s11330_s25 + $0x800] ss:$8 sps:$4 sm:$0xff] (!%p4356_p13)   ;;  %v9363_v5 = vld [vmem:[%s11330_s25 + $0x814] ss:$8 sps:$4 sm:$0xff] (!%p4356_p13)  }
 0x124   : > { %8047 = vmatprep.subr.bf16.mxu0 (!%p4356_p13), %v9357_v1  ;;  %7704 = vmatpush1.bf16.msra.mxu1 (!%p4356_p13), %v9359_v2  ;;  %v9365_v6 = vld [vmem:[%s11330_s25 + $0x10] ss:$8 sps:$4 sm:$0xff] (!%p4356_p13)   ;;  %v9367_v8 = vld [vmem:[%s11330_s25 + $0x24] ss:$8 sps:$4 sm:$0xff] (!%p4356_p13)   ;;  %v9371_v10 = vld [vmem:[%s11330_s25 + $0x20] ss:$8 sps:$4 sm:$0xff] (!%p4356_p13)  }
 0x125   : > { %8048 = vmatpush1.bf16.msra.mxu0 (!%p4356_p13), %v9360_v3  ;;  %7705 = vmatprep.subr.bf16.mxu1 (!%p4356_p13), %v9361_v4  ;;  %v9366_v7 = vld [vmem:[%s11330_s25 + $0x810] ss:$8 sps:$4 sm:$0xff] (!%p4356_p13)   ;;  %v9369_v9 = vld [vmem:[%s11330_s25 + $0x824] ss:$8 sps:$4 sm:$0xff] (!%p4356_p13)   ;;  %v9372_v11 = vld [vmem:[%s11330_s25 + $0x820] ss:$8 sps:$4 sm:$0xff] (!%p4356_p13)  }
 0x126   : > { %8049 = vmatprep.subr.bf16.mxu0 (!%p4356_p13), %v9363_v5  ;;  %v9373_v12 = vld [vmem:[%s11330_s25 + $0x34] ss:$8 sps:$4 sm:$0xff] (!%p4356_p13)   ;;  %v9377_v14 = vld [vmem:[%s11330_s25 + $0x30] ss:$8 sps:$4 sm:$0xff] (!%p4356_p13)   ;;  %v9379_v16 = vld [vmem:[%s11330_s25 + $0x44] ss:$8 sps:$4 sm:$0xff] (!%p4356_p13)  }
 0x127   : > { %v9375_v13 = vld [vmem:[%s11330_s25 + $0x834] ss:$8 sps:$4 sm:$0xff]   ;;  %v9378_v15 = vld [vmem:[%s11330_s25 + $0x830] ss:$8 sps:$4 sm:$0xff]   ;;  %v9381_v17 = vld [vmem:[%s11330_s25 + $0x844] ss:$8 sps:$4 sm:$0xff]  }
 0x128   : > { %7706 = vmatpush1.bf16.msra.mxu1 %v9365_v6  ;;  %v9383_v18 = vld [vmem:[%s11330_s25 + $0x40] ss:$8 sps:$4 sm:$0xff]   ;;  %v9385_v20 = vld [vmem:[%s11330_s25 + $0x54] ss:$8 sps:$4 sm:$0xff]   ;;  %v9389_v22 = vld [vmem:[%s11330_s25 + $0x50] ss:$8 sps:$4 sm:$0xff]  }
 0x129   : > { %8050 = vmatpush1.bf16.msra.mxu0 %v9366_v7  ;;  %7707 = vmatprep.subr.bf16.mxu1 %v9367_v8  ;;  %v9384_v19 = vld [vmem:[%s11330_s25 + $0x840] ss:$8 sps:$4 sm:$0xff]   ;;  %v9387_v21 = vld [vmem:[%s11330_s25 + $0x854] ss:$8 sps:$4 sm:$0xff]   ;;  %v9390_v23 = vld [vmem:[%s11330_s25 + $0x850] ss:$8 sps:$4 sm:$0xff]  }
 0x12a   : > { %8051 = vmatprep.subr.bf16.mxu0 %v9369_v9  ;;  %v9391_v24 = vld [vmem:[%s11330_s25 + $0x64] ss:$8 sps:$4 sm:$0xff]   ;;  %v9395_v26 = vld [vmem:[%s11330_s25 + $0x60] ss:$8 sps:$4 sm:$0xff]   ;;  %v9397_v28 = vld [vmem:[%s11330_s25 + $0x74] ss:$8 sps:$4 sm:$0xff]  }
 0x12b   : > { %v9393_v25 = vld [vmem:[%s11330_s25 + $0x864] ss:$8 sps:$4 sm:$0xff]   ;;  %v9396_v27 = vld [vmem:[%s11330_s25 + $0x860] ss:$8 sps:$4 sm:$0xff]   ;;  %v9399_v29 = vld [vmem:[%s11330_s25 + $0x874] ss:$8 sps:$4 sm:$0xff]  }
 0x12c   : > { %7708 = vmatpush1.bf16.msra.mxu1 %v9371_v10  ;;  %v9401_v30 = vld [vmem:[%s11330_s25 + $0x70] ss:$8 sps:$4 sm:$0xff]   ;;  %v9403_v32 = vld [vmem:[%s11330_s25 + $0x84] ss:$8 sps:$4 sm:$0xff]   ;;  %v9407_v34 = vld [vmem:[%s11330_s25 + $0x80] ss:$8 sps:$4 sm:$0xff]  }
 0x12d   : > { %8052 = vmatpush1.bf16.msra.mxu0 %v9372_v11  ;;  %7709 = vmatprep.subr.bf16.mxu1 %v9373_v12  ;;  %v9402_v31 = vld [vmem:[%s11330_s25 + $0x870] ss:$8 sps:$4 sm:$0xff]   ;;  %v9405_v33 = vld [vmem:[%s11330_s25 + $0x884] ss:$8 sps:$4 sm:$0xff]   ;;  %v9408_v35 = vld [vmem:[%s11330_s25 + $0x880] ss:$8 sps:$4 sm:$0xff]  }
 0x12e   : > { %8053 = vmatprep.subr.bf16.mxu0 %v9375_v13  ;;  %v9409_v36 = vld [vmem:[%s11330_s25 + $0x94] ss:$8 sps:$4 sm:$0xff]   ;;  %s4399_s14 = scalar_select %p4398_p0, %s10185_s17, 1  ;;  %v9413_v38 = vld [vmem:[%s11330_s25 + $0x90] ss:$8 sps:$4 sm:$0xff]  }
 0x12f   : > { %v9411_v37 = vld [vmem:[%s11330_s25 + $0x894] ss:$8 sps:$4 sm:$0xff]   ;;  %v9414_v39 = vld [vmem:[%s11330_s25 + $0x890] ss:$8 sps:$4 sm:$0xff]   ;;  %v9415_v40 = vld [vmem:[%s11330_s25 + $0xa4] ss:$8 sps:$4 sm:$0xff]  }
 0x130   : > { %7710 = vmatpush1.bf16.msra.mxu1 %v9377_v14  ;;  %s9220_s26 = sshll.u32 %s4399_s14, 8  ;;  %v9417_v41 = vld [vmem:[%s11330_s25 + $0x8a4] ss:$8 sps:$4 sm:$0xff]   ;;  %v9419_v42 = vld [vmem:[%s11330_s25 + $0xa0] ss:$8 sps:$4 sm:$0xff]   ;;  %p4410_p1 = scmp.lt.s32.totalorder %s11996_s6, 3 }
 0x131   : > { %8054 = vmatpush1.bf16.msra.mxu0 %v9378_v15  ;;  %7711 = vmatprep.subr.bf16.mxu1 %v9379_v16  ;;  %v9420_v43 = vld [vmem:[%s11330_s25 + $0x8a0] ss:$8 sps:$4 sm:$0xff]   ;;  %s11381_s5 = scalar_lea.vmem %s12042_s0, %s9220_s26  ;;  %v9421_v44 = vld [vmem:[%s11330_s25 + $0xb4] ss:$8 sps:$4 sm:$0xff]   ;;  %v9425_v46 = vld [vmem:[%s11330_s25 + $0xb0] ss:$8 sps:$4 sm:$0xff]  }
 0x132   : > { %8055 = vmatprep.subr.bf16.mxu0 %v9381_v17  ;;  %v9423_v45 = vld [vmem:[%s11330_s25 + $0x8b4] ss:$8 sps:$4 sm:$0xff]   ;;  %v9426_v47 = vld [vmem:[%s11330_s25 + $0x8b0] ss:$8 sps:$4 sm:$0xff]   ;;  %v4439_v48 = vld [vmem:[%s11381_s5] sm:$0xff]  ;;  %s4411_s7 = scalar_select %p4410_p1, %s11996_s6, 3 }
 0x133   : > { %v4455_v49 = vld [vmem:[%s11381_s5 + $0x80] sm:$0xff]  ;;  %v9433_v58 = vld [vmem:[%s11330_s25 + $0xd4] ss:$8 sps:$4 sm:$0xff]   ;;  %v9437_v60 = vld [vmem:[%s11330_s25 + $0xd0] ss:$8 sps:$4 sm:$0xff]   ;;  %s4394_s16 = sand.u32 1, %s10165_s12  }
 0x134   : > { %7712 = vmatpush1.bf16.msra.mxu1 %v9383_v18  ;;  %v9427_v50 = vld [vmem:[%s11330_s25 + $0xc4] ss:$8 sps:$4 sm:$0xff]   ;;  %v8668_v52 = vcombine.high %v4439_v48, %v4455_v49  ;;  %v9431_v56 = vld [vmem:[%s11330_s25 + $0xc0] ss:$8 sps:$4 sm:$0xff]   ;;  %v9435_v59 = vld [vmem:[%s11330_s25 + $0x8d4] ss:$8 sps:$4 sm:$0xff]   ;;  %v8667_v8 = vcombine.low %v4439_v48, %v4455_v49  ;;  %s4412_s10 = scalar_lea.vmem %s12044_s2, %s4411_s7 }
 0x135   : > { %8056 = vmatpush1.bf16.msra.mxu0 %v9384_v19  ;;  %7713 = vmatprep.subr.bf16.mxu1 %v9385_v20  ;;  %v9429_v51 = vld [vmem:[%s11330_s25 + $0x8c4] ss:$8 sps:$4 sm:$0xff]   ;;  %v9432_v57 = vld [vmem:[%s11330_s25 + $0x8c0] ss:$8 sps:$4 sm:$0xff]   ;;  %v9438_v61 = vld [vmem:[%s11330_s25 + $0x8d0] ss:$8 sps:$4 sm:$0xff]  }
 0x136   : > { %8057 = vmatprep.subr.bf16.mxu0 %v9387_v21  ;;  %v4447_v53 = vld [vmem:[%s11381_s5 + $0x40] sm:$0xff]  ;;  %7735 = vmatprep.mubr.bf16.mxu1 %v8668_v52  ;;  %v9445_v2 = vld [vmem:[%s11330_s25 + $0xf4] ss:$8 sps:$4 sm:$0xff]   ;;  %v9449_v4 = vld [vmem:[%s11330_s25 + $0xf0] ss:$8 sps:$4 sm:$0xff]   ;;  %s8663_s11 = sshll.u32 %s4394_s16, 4 }
 0x137   : > { %v4463_v54 = vld [vmem:[%s11381_s5 + $0xc0] sm:$0xff]  ;;  %v9447_v3 = vld [vmem:[%s11330_s25 + $0x8f4] ss:$8 sps:$4 sm:$0xff]   ;;  %v9450_v5 = vld [vmem:[%s11330_s25 + $0x8f0] ss:$8 sps:$4 sm:$0xff]   ;;  %s4396_s12 = scalar_lea.vmem [#allocation4], %s8663_s11 }
 0x138   : > { %7714 = vmatpush1.bf16.msra.mxu1 %v9389_v22  ;;  %v8684_v55 = vcombine.high %v4447_v53, %v4463_v54  ;;  %v9439_v62 = vld [vmem:[%s11330_s25 + $0xe4] ss:$8 sps:$4 sm:$0xff]   ;;  %v9443_v0 = vld [vmem:[%s11330_s25 + $0xe0] ss:$8 sps:$4 sm:$0xff]   ;;  %v8683_v10 = vcombine.low %v4447_v53, %v4463_v54  ;;  %v9459_v12 = vld [vmem:[%s11330_s25 + $0x114] ss:$8 sps:$4 sm:$0xff]  }
 0x139   : > { %8058 = vmatpush1.bf16.msra.mxu0 %v9390_v23  ;;  %7715 = vmatprep.subr.bf16.mxu1 %v9391_v24  ;;  %v9441_v63 = vld [vmem:[%s11330_s25 + $0x8e4] ss:$8 sps:$4 sm:$0xff]   ;;  %v9444_v1 = vld [vmem:[%s11330_s25 + $0x8e0] ss:$8 sps:$4 sm:$0xff]   ;;  %v9462_v13 = vld [vmem:[%s11330_s25 + $0x914] ss:$8 sps:$4 sm:$0xff]  }
 0x13a   : > { %8059 = vmatprep.subr.bf16.mxu0 %v9393_v25  ;;  %8079 = vmatprep.mubr.bf16.mxu0 %v8684_v55  ;;  %v9453_v6 = vld [vmem:[%s11330_s25 + $0x104] ss:$8 sps:$4 sm:$0xff]   ;;  %v9451_v9 = vld [vmem:[%s11330_s25 + $0x100] ss:$8 sps:$4 sm:$0xff]   ;;  %v9457_v14 = vld [vmem:[%s11330_s25 + $0x110] ss:$8 sps:$4 sm:$0xff]  }
 0x13b   : > { %v9456_v7 = vld [vmem:[%s11330_s25 + $0x904] ss:$8 sps:$4 sm:$0xff]   ;;  %v9454_v11 = vld [vmem:[%s11330_s25 + $0x900] ss:$8 sps:$4 sm:$0xff]   ;;  %v9460_v15 = vld [vmem:[%s11330_s25 + $0x910] ss:$8 sps:$4 sm:$0xff]  }
 0x13c   : > { %7716 = vmatpush1.bf16.msra.mxu1 %v9395_v26  ;;  %v9465_v16 = vld [vmem:[%s11330_s25 + $0x124] ss:$8 sps:$4 sm:$0xff]   ;;  %v9463_v18 = vld [vmem:[%s11330_s25 + $0x120] ss:$8 sps:$4 sm:$0xff]   ;;  %v9471_v20 = vld [vmem:[%s11330_s25 + $0x134] ss:$8 sps:$4 sm:$0xff]  }
 0x13d   : > { %8060 = vmatpush1.bf16.msra.mxu0 %v9396_v27  ;;  %7717 = vmatprep.subr.bf16.mxu1 %v9397_v28  ;;  %v9468_v17 = vld [vmem:[%s11330_s25 + $0x924] ss:$8 sps:$4 sm:$0xff]   ;;  %v9466_v19 = vld [vmem:[%s11330_s25 + $0x920] ss:$8 sps:$4 sm:$0xff]   ;;  %v9474_v21 = vld [vmem:[%s11330_s25 + $0x934] ss:$8 sps:$4 sm:$0xff]  }
 0x13e   : > { %8061 = vmatprep.subr.bf16.mxu0 %v9399_v29  ;;  %v9469_v22 = vld [vmem:[%s11330_s25 + $0x130] ss:$8 sps:$4 sm:$0xff]   ;;  %v9477_v24 = vld [vmem:[%s11330_s25 + $0x144] ss:$8 sps:$4 sm:$0xff]   ;;  %v9475_v26 = vld [vmem:[%s11330_s25 + $0x140] ss:$8 sps:$4 sm:$0xff]  }
 0x13f   : > { %v9472_v23 = vld [vmem:[%s11330_s25 + $0x930] ss:$8 sps:$4 sm:$0xff]   ;;  %v9480_v25 = vld [vmem:[%s11330_s25 + $0x944] ss:$8 sps:$4 sm:$0xff]   ;;  %v9478_v27 = vld [vmem:[%s11330_s25 + $0x940] ss:$8 sps:$4 sm:$0xff]  }
 0x140   : > { %7718 = vmatpush1.bf16.msra.mxu1 %v9401_v30  ;;  %v9483_v28 = vld [vmem:[%s11330_s25 + $0x154] ss:$8 sps:$4 sm:$0xff]   ;;  %v9481_v30 = vld [vmem:[%s11330_s25 + $0x150] ss:$8 sps:$4 sm:$0xff]   ;;  %v9499_v48 = vld [vmem:[%s11330_s25 + $0x180] ss:$8 sps:$4 sm:$0xff]  }
 0x141   : > { %8062 = vmatpush1.bf16.msra.mxu0 %v9402_v31  ;;  %7719 = vmatprep.subr.bf16.mxu1 %v9403_v32  ;;  %v9486_v29 = vld [vmem:[%s11330_s25 + $0x954] ss:$8 sps:$4 sm:$0xff]   ;;  %v9484_v31 = vld [vmem:[%s11330_s25 + $0x950] ss:$8 sps:$4 sm:$0xff]   ;;  %v9489_v32 = vld [vmem:[%s11330_s25 + $0x164] ss:$8 sps:$4 sm:$0xff]  }
 0x142   : > { %8063 = vmatprep.subr.bf16.mxu0 %v9405_v33  ;;  %v9492_v33 = vld [vmem:[%s11330_s25 + $0x964] ss:$8 sps:$4 sm:$0xff]   ;;  %v9502_v49 = vld [vmem:[%s11330_s25 + $0x980] ss:$8 sps:$4 sm:$0xff]   ;;  %v9505_v52 = vld [vmem:[%s11330_s25 + $0x190] ss:$8 sps:$4 sm:$0xff]  }
 0x143   : > { %v9508_v53 = vld [vmem:[%s11330_s25 + $0x990] ss:$8 sps:$4 sm:$0xff]   ;;  %v9513_v54 = vld [vmem:[%s11330_s25 + $0x1a4] ss:$8 sps:$4 sm:$0xff]   ;;  %s9215_s21 = sshll.u32 (%p10286_p9), %s10185_s17, 3 }
 0x144   : > { %7720 = vmatpush1.bf16.msra.mxu1 %v9407_v34  ;;  %v9487_v34 = vld [vmem:[%s11330_s25 + $0x160] ss:$8 sps:$4 sm:$0xff]   ;;  %v9516_v55 = vld [vmem:[%s11330_s25 + $0x9a4] ss:$8 sps:$4 sm:$0xff]   ;;  %s8502_s24 = sadd.s32 (%p10286_p9), %s9215_s21, %s11996_s6 }
 0x145   : > { %8064 = vmatpush1.bf16.msra.mxu0 %v9408_v35  ;;  %7721 = vmatprep.subr.bf16.mxu1 %v9409_v36  ;;  %v9490_v35 = vld [vmem:[%s11330_s25 + $0x960] ss:$8 sps:$4 sm:$0xff]  }
 0x146   : > { %8065 = vmatprep.subr.bf16.mxu0 %v9411_v37  ;;  %v11436_v36 = vld [vmem:[%s11381_s5 + $0x8] sm:$0xff] }
 0x147   : > { %v11439_v37 = vld [vmem:[%s11381_s5 + $0x88] sm:$0xff] }
 0x148   : > { %7722 = vmatpush1.bf16.msra.mxu1 %v9413_v38  ;;  %v9495_v38 = vld [vmem:[%s11330_s25 + $0x174] ss:$8 sps:$4 sm:$0xff]  }
 0x149   : > { %8066 = vmatpush1.bf16.msra.mxu0 %v9414_v39  ;;  %7723 = vmatprep.subr.bf16.mxu1 %v9415_v40  ;;  %v9498_v39 = vld [vmem:[%s11330_s25 + $0x974] ss:$8 sps:$4 sm:$0xff]   ;;  %v8670_v40 = vcombine.high %v11436_v36, %v11439_v37 }
 0x14a   : > { %8067 = vmatprep.subr.bf16.mxu0 %v9417_v41  ;;  %v11446_v41 = vld [vmem:[%s11381_s5 + $0x48] sm:$0xff] }
 0x14c   : > { %7724 = vmatpush1.bf16.msra.mxu1 %v9419_v42  ;;  %v11449_v42 = vld [vmem:[%s11381_s5 + $0xc8] sm:$0xff] }
 0x14d   : > { %8068 = vmatpush1.bf16.msra.mxu0 %v9420_v43  ;;  %7725 = vmatprep.subr.bf16.mxu1 %v9421_v44  ;;  %v8686_v43 = vcombine.high %v11446_v41, %v11449_v42  ;;  %v9493_v44 = vld [vmem:[%s11330_s25 + $0x170] ss:$8 sps:$4 sm:$0xff]  }
 0x14e   : > { %8069 = vmatprep.subr.bf16.mxu0 %v9423_v45  ;;  %v9496_v45 = vld [vmem:[%s11330_s25 + $0x970] ss:$8 sps:$4 sm:$0xff]  }
 0x150   : > { %7726 = vmatpush1.bf16.msra.mxu1 %v9425_v46  ;;  %v9501_v46 = vld [vmem:[%s11330_s25 + $0x184] ss:$8 sps:$4 sm:$0xff]  }
 0x151   : > { %8070 = vmatpush1.bf16.msra.mxu0 %v9426_v47  ;;  %7727 = vmatprep.subr.bf16.mxu1 %v9427_v50  ;;  %v9504_v47 = vld [vmem:[%s11330_s25 + $0x984] ss:$8 sps:$4 sm:$0xff]   ;;  %v9507_v50 = vld [vmem:[%s11330_s25 + $0x194] ss:$8 sps:$4 sm:$0xff]  }
 0x152   : > { %8071 = vmatprep.subr.bf16.mxu0 %v9429_v51  ;;  %v9510_v51 = vld [vmem:[%s11330_s25 + $0x994] ss:$8 sps:$4 sm:$0xff]  }
 0x154   : > { %7728 = vmatpush1.bf16.msra.mxu1 %v9431_v56  ;;  %v9511_v56 = vld [vmem:[%s11330_s25 + $0x1a0] ss:$8 sps:$4 sm:$0xff]  }
 0x155   : > { %8072 = vmatpush1.bf16.msra.mxu0 %v9432_v57  ;;  %7729 = vmatprep.subr.bf16.mxu1 %v9433_v58  ;;  %v9514_v57 = vld [vmem:[%s11330_s25 + $0x9a0] ss:$8 sps:$4 sm:$0xff]   ;;  %v9519_v58 = vld [vmem:[%s11330_s25 + $0x1b4] ss:$8 sps:$4 sm:$0xff]  }
 0x156   : > { %8073 = vmatprep.subr.bf16.mxu0 %v9435_v59  ;;  %v9522_v59 = vld [vmem:[%s11330_s25 + $0x9b4] ss:$8 sps:$4 sm:$0xff]  }
 0x158   : > { %7730 = vmatpush1.bf16.msra.mxu1 %v9437_v60  ;;  %v9517_v60 = vld [vmem:[%s11330_s25 + $0x1b0] ss:$8 sps:$4 sm:$0xff]  }
 0x159   : > { %8074 = vmatpush1.bf16.msra.mxu0 %v9438_v61  ;;  %7731 = vmatprep.subr.bf16.mxu1 %v9439_v62  ;;  %v9520_v61 = vld [vmem:[%s11330_s25 + $0x9b0] ss:$8 sps:$4 sm:$0xff]   ;;  %v9525_v62 = vld [vmem:[%s11330_s25 + $0x1c4] ss:$8 sps:$4 sm:$0xff]  }
 0x15a   : > { %8075 = vmatprep.subr.bf16.mxu0 %v9441_v63  ;;  %v9528_v63 = vld [vmem:[%s11330_s25 + $0x9c4] ss:$8 sps:$4 sm:$0xff]  }
 0x15c   : > { %7732 = vmatpush1.bf16.msra.mxu1 %v9443_v0  ;;  %v9523_v0 = vld [vmem:[%s11330_s25 + $0x1c0] ss:$8 sps:$4 sm:$0xff]  }
 0x15d   : > { %8076 = vmatpush1.bf16.msra.mxu0 %v9444_v1  ;;  %7733 = vmatprep.subr.bf16.mxu1 %v9445_v2  ;;  %v9526_v1 = vld [vmem:[%s11330_s25 + $0x9c0] ss:$8 sps:$4 sm:$0xff]   ;;  %v9531_v2 = vld [vmem:[%s11330_s25 + $0x1d4] ss:$8 sps:$4 sm:$0xff]  }
 0x15e   : > { %8077 = vmatprep.subr.bf16.mxu0 %v9447_v3  ;;  %v9534_v3 = vld [vmem:[%s11330_s25 + $0x9d4] ss:$8 sps:$4 sm:$0xff]  }
 0x160   : > { %7734 = vmatpush1.bf16.msra.mxu1 %v9449_v4  ;;  %v9529_v4 = vld [vmem:[%s11330_s25 + $0x1d0] ss:$8 sps:$4 sm:$0xff]  }
 0x161   : > { %8078 = vmatpush1.bf16.msra.mxu0 %v9450_v5  ;;  %7746 = vmatprep.subr.bf16.mxu1 %v9453_v6  ;;  %v9532_v5 = vld [vmem:[%s11330_s25 + $0x9d0] ss:$8 sps:$4 sm:$0xff]   ;;  %v9537_v6 = vld [vmem:[%s11330_s25 + $0x1e4] ss:$8 sps:$4 sm:$0xff]  }
 0x162   : > { %8090 = vmatprep.subr.bf16.mxu0 %v9456_v7  ;;  %v9540_v7 = vld [vmem:[%s11330_s25 + $0x9e4] ss:$8 sps:$4 sm:$0xff]  }
 0x163   : > { %7736 = vmatmul.mubr.bf16.vlgmr.msra.gmra.mrb[0].mxu1 %v8667_v8  ;;  %v9535_v8 = vld [vmem:[%s11330_s25 + $0x1e0] ss:$8 sps:$4 sm:$0xff]  }
 0x164   : > { %8080 = vmatmul.mubr.bf16.vlgmr.msra.gmra.mrb[0].mxu0 %v8683_v10  ;;  %7747 = vmatpush1.bf16.msra.mxu1 %v9451_v9  ;;  %v9538_v9 = vld [vmem:[%s11330_s25 + $0x9e0] ss:$8 sps:$4 sm:$0xff]   ;;  %v9543_v10 = vld [vmem:[%s11330_s25 + $0x1f4] ss:$8 sps:$4 sm:$0xff]  }
 0x165   : > { %8091 = vmatpush1.bf16.msra.mxu0 %v9454_v11  ;;  %7748 = vmatprep.subr.bf16.mxu1 %v9459_v12  ;;  %v9546_v11 = vld [vmem:[%s11330_s25 + $0x9f4] ss:$8 sps:$4 sm:$0xff]   ;;  %v9541_v12 = vld [vmem:[%s11330_s25 + $0x1f0] ss:$8 sps:$4 sm:$0xff]  }
 0x166   : > { %8092 = vmatprep.subr.bf16.mxu0 %v9462_v13  ;;  %7778 = vmatprep.mubr.bf16.mxu1 %v8670_v40  ;;  %v9544_v13 = vld [vmem:[%s11330_s25 + $0x9f0] ss:$8 sps:$4 sm:$0xff]   ;;  %v9571_v40 = vld [vmem:[%s11330_s25 + $0x240] ss:$8 sps:$4 sm:$0xff]  }
 0x167   : > { %8122 = vmatprep.mubr.bf16.mxu0 %v8686_v43  ;;  %v9582_v43 = vld [vmem:[%s11330_s25 + $0xa54] ss:$8 sps:$4 sm:$0xff]  }
 0x168   : > { %7749 = vmatpush1.bf16.msra.mxu1 %v9457_v14  ;;  %v9549_v14 = vld [vmem:[%s11330_s25 + $0x204] ss:$8 sps:$4 sm:$0xff]  }
 0x169   : > { %8093 = vmatpush1.bf16.msra.mxu0 %v9460_v15  ;;  %7750 = vmatprep.subr.bf16.mxu1 %v9465_v16  ;;  %v9552_v15 = vld [vmem:[%s11330_s25 + $0xa04] ss:$8 sps:$4 sm:$0xff]   ;;  %v8669_v16 = vcombine.low %v11436_v36, %v11439_v37  ;;  %v9565_v36 = vld [vmem:[%s11330_s25 + $0x230] ss:$8 sps:$4 sm:$0xff]  }
 0x16a   : > { %8094 = vmatprep.subr.bf16.mxu0 %v9468_v17  ;;  %v9547_v17 = vld [vmem:[%s11330_s25 + $0x200] ss:$8 sps:$4 sm:$0xff]   ;;  %v9568_v37 = vld [vmem:[%s11330_s25 + $0xa30] ss:$8 sps:$4 sm:$0xff]  }
 0x16c   : > { %7751 = vmatpush1.bf16.msra.mxu1 %v9463_v18  ;;  %v8685_v18 = vcombine.low %v11446_v41, %v11449_v42  ;;  %v9574_v41 = vld [vmem:[%s11330_s25 + $0xa40] ss:$8 sps:$4 sm:$0xff]   ;;  %v9579_v42 = vld [vmem:[%s11330_s25 + $0x254] ss:$8 sps:$4 sm:$0xff]  }
 0x16d   : > { %8095 = vmatpush1.bf16.msra.mxu0 %v9466_v19  ;;  %7752 = vmatprep.subr.bf16.mxu1 %v9471_v20  ;;  %v9550_v19 = vld [vmem:[%s11330_s25 + $0xa00] ss:$8 sps:$4 sm:$0xff]   ;;  %v9555_v20 = vld [vmem:[%s11330_s25 + $0x214] ss:$8 sps:$4 sm:$0xff]  }
 0x16e   : > { %8096 = vmatprep.subr.bf16.mxu0 %v9474_v21  ;;  %v9558_v21 = vld [vmem:[%s11330_s25 + $0xa14] ss:$8 sps:$4 sm:$0xff]  }
 0x170   : > { %7753 = vmatpush1.bf16.msra.mxu1 %v9469_v22  ;;  %v9553_v22 = vld [vmem:[%s11330_s25 + $0x210] ss:$8 sps:$4 sm:$0xff]  }
 0x171   : > { %8097 = vmatpush1.bf16.msra.mxu0 %v9472_v23  ;;  %7754 = vmatprep.subr.bf16.mxu1 %v9477_v24  ;;  %v9556_v23 = vld [vmem:[%s11330_s25 + $0xa10] ss:$8 sps:$4 sm:$0xff]  }
 0x172   : > { %8098 = vmatprep.subr.bf16.mxu0 %v9480_v25  ;;  %v11500_v24 = vld [vmem:[%s11381_s5 + $0x10] sm:$0xff] }
 0x173   : > { %v11503_v25 = vld [vmem:[%s11381_s5 + $0x90] sm:$0xff] }
 0x174   : > { %7755 = vmatpush1.bf16.msra.mxu1 %v9475_v26  ;;  %v9561_v26 = vld [vmem:[%s11330_s25 + $0x224] ss:$8 sps:$4 sm:$0xff]  }
 0x175   : > { %8099 = vmatpush1.bf16.msra.mxu0 %v9478_v27  ;;  %7756 = vmatprep.subr.bf16.mxu1 %v9483_v28  ;;  %v9564_v27 = vld [vmem:[%s11330_s25 + $0xa24] ss:$8 sps:$4 sm:$0xff]   ;;  %v8672_v28 = vcombine.high %v11500_v24, %v11503_v25 }
 0x176   : > { %8100 = vmatprep.subr.bf16.mxu0 %v9486_v29  ;;  %v11510_v29 = vld [vmem:[%s11381_s5 + $0x50] sm:$0xff] }
 0x178   : > { %7757 = vmatpush1.bf16.msra.mxu1 %v9481_v30  ;;  %v11513_v30 = vld [vmem:[%s11381_s5 + $0xd0] sm:$0xff] }
 0x179   : > { %8101 = vmatpush1.bf16.msra.mxu0 %v9484_v31  ;;  %7758 = vmatprep.subr.bf16.mxu1 %v9489_v32  ;;  %v8688_v31 = vcombine.high %v11510_v29, %v11513_v30  ;;  %v9559_v32 = vld [vmem:[%s11330_s25 + $0x220] ss:$8 sps:$4 sm:$0xff]  }
 0x17a   : > { %8102 = vmatprep.subr.bf16.mxu0 %v9492_v33  ;;  %v9562_v33 = vld [vmem:[%s11330_s25 + $0xa20] ss:$8 sps:$4 sm:$0xff]  }
 0x17c   : > { %7759 = vmatpush1.bf16.msra.mxu1 %v9487_v34  ;;  %v9567_v34 = vld [vmem:[%s11330_s25 + $0x234] ss:$8 sps:$4 sm:$0xff]  }
 0x17d   : > { %8103 = vmatpush1.bf16.msra.mxu0 %v9490_v35  ;;  %7760 = vmatprep.subr.bf16.mxu1 %v9495_v38  ;;  %v9570_v35 = vld [vmem:[%s11330_s25 + $0xa34] ss:$8 sps:$4 sm:$0xff]   ;;  %v9573_v38 = vld [vmem:[%s11330_s25 + $0x244] ss:$8 sps:$4 sm:$0xff]  }
 0x17e   : > { %8104 = vmatprep.subr.bf16.mxu0 %v9498_v39  ;;  %v9576_v39 = vld [vmem:[%s11330_s25 + $0xa44] ss:$8 sps:$4 sm:$0xff]  }
 0x180   : > { %7761 = vmatpush1.bf16.msra.mxu1 %v9493_v44  ;;  %v9577_v44 = vld [vmem:[%s11330_s25 + $0x250] ss:$8 sps:$4 sm:$0xff]  }
 0x181   : > { %8105 = vmatpush1.bf16.msra.mxu0 %v9496_v45  ;;  %7762 = vmatprep.subr.bf16.mxu1 %v9501_v46  ;;  %v9580_v45 = vld [vmem:[%s11330_s25 + $0xa50] ss:$8 sps:$4 sm:$0xff]   ;;  %v9585_v46 = vld [vmem:[%s11330_s25 + $0x264] ss:$8 sps:$4 sm:$0xff]  }
 0x182   : > { %8106 = vmatprep.subr.bf16.mxu0 %v9504_v47  ;;  %v9588_v47 = vld [vmem:[%s11330_s25 + $0xa64] ss:$8 sps:$4 sm:$0xff]  }
 0x184   : > { %7763 = vmatpush1.bf16.msra.mxu1 %v9499_v48  ;;  %v9583_v48 = vld [vmem:[%s11330_s25 + $0x260] ss:$8 sps:$4 sm:$0xff]  }
 0x185   : > { %8107 = vmatpush1.bf16.msra.mxu0 %v9502_v49  ;;  %7764 = vmatprep.subr.bf16.mxu1 %v9507_v50  ;;  %v9586_v49 = vld [vmem:[%s11330_s25 + $0xa60] ss:$8 sps:$4 sm:$0xff]   ;;  %v9591_v50 = vld [vmem:[%s11330_s25 + $0x274] ss:$8 sps:$4 sm:$0xff]  }
 0x186   : > { %8108 = vmatprep.subr.bf16.mxu0 %v9510_v51  ;;  %v9594_v51 = vld [vmem:[%s11330_s25 + $0xa74] ss:$8 sps:$4 sm:$0xff]  }
 0x188   : > { %7765 = vmatpush1.bf16.msra.mxu1 %v9505_v52  ;;  %v9589_v52 = vld [vmem:[%s11330_s25 + $0x270] ss:$8 sps:$4 sm:$0xff]  }
 0x189   : > { %8109 = vmatpush1.bf16.msra.mxu0 %v9508_v53  ;;  %7766 = vmatprep.subr.bf16.mxu1 %v9513_v54  ;;  %v9592_v53 = vld [vmem:[%s11330_s25 + $0xa70] ss:$8 sps:$4 sm:$0xff]   ;;  %v9597_v54 = vld [vmem:[%s11330_s25 + $0x284] ss:$8 sps:$4 sm:$0xff]  }
 0x18a   : > { %8110 = vmatprep.subr.bf16.mxu0 %v9516_v55  ;;  %v9600_v55 = vld [vmem:[%s11330_s25 + $0xa84] ss:$8 sps:$4 sm:$0xff]  }
 0x18c   : > { %7767 = vmatpush1.bf16.msra.mxu1 %v9511_v56  ;;  %v9595_v56 = vld [vmem:[%s11330_s25 + $0x280] ss:$8 sps:$4 sm:$0xff]  }
 0x18d   : > { %8111 = vmatpush1.bf16.msra.mxu0 %v9514_v57  ;;  %7768 = vmatprep.subr.bf16.mxu1 %v9519_v58  ;;  %v9598_v57 = vld [vmem:[%s11330_s25 + $0xa80] ss:$8 sps:$4 sm:$0xff]   ;;  %v9603_v58 = vld [vmem:[%s11330_s25 + $0x294] ss:$8 sps:$4 sm:$0xff]  }
 0x18e   : > { %8112 = vmatprep.subr.bf16.mxu0 %v9522_v59  ;;  %v9606_v59 = vld [vmem:[%s11330_s25 + $0xa94] ss:$8 sps:$4 sm:$0xff]  }
 0x190   : > { %7769 = vmatpush1.bf16.msra.mxu1 %v9517_v60  ;;  %v9601_v60 = vld [vmem:[%s11330_s25 + $0x290] ss:$8 sps:$4 sm:$0xff]  }
 0x191   : > { %8113 = vmatpush1.bf16.msra.mxu0 %v9520_v61  ;;  %7770 = vmatprep.subr.bf16.mxu1 %v9525_v62  ;;  %v9604_v61 = vld [vmem:[%s11330_s25 + $0xa90] ss:$8 sps:$4 sm:$0xff]   ;;  %v9609_v62 = vld [vmem:[%s11330_s25 + $0x2a4] ss:$8 sps:$4 sm:$0xff]  }
 0x192   : > { %8114 = vmatprep.subr.bf16.mxu0 %v9528_v63  ;;  %v9612_v63 = vld [vmem:[%s11330_s25 + $0xaa4] ss:$8 sps:$4 sm:$0xff]  }
 0x194   : > { %7771 = vmatpush1.bf16.msra.mxu1 %v9523_v0  ;;  %v9607_v0 = vld [vmem:[%s11330_s25 + $0x2a0] ss:$8 sps:$4 sm:$0xff]  }
 0x195   : > { %8115 = vmatpush1.bf16.msra.mxu0 %v9526_v1  ;;  %7772 = vmatprep.subr.bf16.mxu1 %v9531_v2  ;;  %v9610_v1 = vld [vmem:[%s11330_s25 + $0xaa0] ss:$8 sps:$4 sm:$0xff]   ;;  %v9615_v2 = vld [vmem:[%s11330_s25 + $0x2b4] ss:$8 sps:$4 sm:$0xff]  }
 0x196   : > { %8116 = vmatprep.subr.bf16.mxu0 %v9534_v3  ;;  %v9618_v3 = vld [vmem:[%s11330_s25 + $0xab4] ss:$8 sps:$4 sm:$0xff]  }
 0x198   : > { %7773 = vmatpush1.bf16.msra.mxu1 %v9529_v4  ;;  %v9613_v4 = vld [vmem:[%s11330_s25 + $0x2b0] ss:$8 sps:$4 sm:$0xff]  }
 0x199   : > { %8117 = vmatpush1.bf16.msra.mxu0 %v9532_v5  ;;  %7774 = vmatprep.subr.bf16.mxu1 %v9537_v6  ;;  %v9616_v5 = vld [vmem:[%s11330_s25 + $0xab0] ss:$8 sps:$4 sm:$0xff]   ;;  %v9621_v6 = vld [vmem:[%s11330_s25 + $0x2c4] ss:$8 sps:$4 sm:$0xff]  }
 0x19a   : > { %8118 = vmatprep.subr.bf16.mxu0 %v9540_v7  ;;  %v9624_v7 = vld [vmem:[%s11330_s25 + $0xac4] ss:$8 sps:$4 sm:$0xff]  }
 0x19c   : > { %7775 = vmatpush1.bf16.msra.mxu1 %v9535_v8  ;;  %v9619_v8 = vld [vmem:[%s11330_s25 + $0x2c0] ss:$8 sps:$4 sm:$0xff]  }
 0x19d   : > { %8119 = vmatpush1.bf16.msra.mxu0 %v9538_v9  ;;  %7776 = vmatprep.subr.bf16.mxu1 %v9543_v10  ;;  %v9622_v9 = vld [vmem:[%s11330_s25 + $0xac0] ss:$8 sps:$4 sm:$0xff]   ;;  %v9627_v10 = vld [vmem:[%s11330_s25 + $0x2d4] ss:$8 sps:$4 sm:$0xff]  }
 0x19e   : > { %8120 = vmatprep.subr.bf16.mxu0 %v9546_v11  ;;  %v9630_v11 = vld [vmem:[%s11330_s25 + $0xad4] ss:$8 sps:$4 sm:$0xff]  }
 0x1a0   : > { %7777 = vmatpush1.bf16.msra.mxu1 %v9541_v12  ;;  %v9625_v12 = vld [vmem:[%s11330_s25 + $0x2d0] ss:$8 sps:$4 sm:$0xff]  }
 0x1a1   : > { %8121 = vmatpush1.bf16.msra.mxu0 %v9544_v13  ;;  %7789 = vmatprep.subr.bf16.mxu1 %v9549_v14  ;;  %v9628_v13 = vld [vmem:[%s11330_s25 + $0xad0] ss:$8 sps:$4 sm:$0xff]   ;;  %v9633_v14 = vld [vmem:[%s11330_s25 + $0x2e4] ss:$8 sps:$4 sm:$0xff]  }
 0x1a2   : > { %8133 = vmatprep.subr.bf16.mxu0 %v9552_v15  ;;  %v9636_v15 = vld [vmem:[%s11330_s25 + $0xae4] ss:$8 sps:$4 sm:$0xff]  }
 0x1a3   : > { %7779 = vmatmul.mubr.bf16.vlgmr.msra.gmra.mrb[0].mxu1 %v8669_v16  ;;  %v9631_v16 = vld [vmem:[%s11330_s25 + $0x2e0] ss:$8 sps:$4 sm:$0xff]  }
 0x1a4   : > { %8123 = vmatmul.mubr.bf16.vlgmr.msra.gmra.mrb[0].mxu0 %v8685_v18  ;;  %7790 = vmatpush1.bf16.msra.mxu1 %v9547_v17  ;;  %v9634_v17 = vld [vmem:[%s11330_s25 + $0xae0] ss:$8 sps:$4 sm:$0xff]   ;;  %v9639_v18 = vld [vmem:[%s11330_s25 + $0x2f4] ss:$8 sps:$4 sm:$0xff]  }
 0x1a5   : > { %8134 = vmatpush1.bf16.msra.mxu0 %v9550_v19  ;;  %7791 = vmatprep.subr.bf16.mxu1 %v9555_v20  ;;  %v9642_v19 = vld [vmem:[%s11330_s25 + $0xaf4] ss:$8 sps:$4 sm:$0xff]   ;;  %v9637_v20 = vld [vmem:[%s11330_s25 + $0x2f0] ss:$8 sps:$4 sm:$0xff]  }
 0x1a6   : > { %8135 = vmatprep.subr.bf16.mxu0 %v9558_v21  ;;  %7821 = vmatprep.mubr.bf16.mxu1 %v8672_v28  ;;  %v9640_v21 = vld [vmem:[%s11330_s25 + $0xaf0] ss:$8 sps:$4 sm:$0xff]  }
 0x1a7   : > { %8165 = vmatprep.mubr.bf16.mxu0 %v8688_v31  ;;  %v11576_v28 = vld [vmem:[%s11381_s5 + $0x18] sm:$0xff] }
 0x1a8   : > { %7792 = vmatpush1.bf16.msra.mxu1 %v9553_v22  ;;  %v9645_v22 = vld [vmem:[%s11330_s25 + $0x304] ss:$8 sps:$4 sm:$0xff]   ;;  %v11579_v31 = vld [vmem:[%s11381_s5 + $0x98] sm:$0xff] }
 0x1a9   : > { %8136 = vmatpush1.bf16.msra.mxu0 %v9556_v23  ;;  %7793 = vmatprep.subr.bf16.mxu1 %v9561_v26  ;;  %v9648_v23 = vld [vmem:[%s11330_s25 + $0xb04] ss:$8 sps:$4 sm:$0xff]   ;;  %v9643_v26 = vld [vmem:[%s11330_s25 + $0x300] ss:$8 sps:$4 sm:$0xff]  }
 0x1aa   : > { %8137 = vmatprep.subr.bf16.mxu0 %v9564_v27  ;;  %v9646_v27 = vld [vmem:[%s11330_s25 + $0xb00] ss:$8 sps:$4 sm:$0xff]  }
 0x1ac   : > { %7794 = vmatpush1.bf16.msra.mxu1 %v9559_v32  ;;  %v8671_v32 = vcombine.low %v11500_v24, %v11503_v25  ;;  %v8674_v24 = vcombine.high %v11576_v28, %v11579_v31 }
 0x1ad   : > { %8138 = vmatpush1.bf16.msra.mxu0 %v9562_v33  ;;  %7795 = vmatprep.subr.bf16.mxu1 %v9567_v34  ;;  %v8687_v33 = vcombine.low %v11510_v29, %v11513_v30  ;;  %v11586_v34 = vld [vmem:[%s11381_s5 + $0x58] sm:$0xff] }
 0x1ae   : > { %8139 = vmatprep.subr.bf16.mxu0 %v9570_v35  ;;  %v11589_v35 = vld [vmem:[%s11381_s5 + $0xd8] sm:$0xff] }
 0x1af   : > { %v8690_v25 = vcombine.high %v11586_v34, %v11589_v35  ;;  %v9649_v29 = vld [vmem:[%s11330_s25 + $0x310] ss:$8 sps:$4 sm:$0xff]  }
 0x1b0   : > { %7796 = vmatpush1.bf16.msra.mxu1 %v9565_v36  ;;  %v9651_v36 = vld [vmem:[%s11330_s25 + $0x314] ss:$8 sps:$4 sm:$0xff]   ;;  %v9652_v30 = vld [vmem:[%s11330_s25 + $0xb10] ss:$8 sps:$4 sm:$0xff]  }
 0x1b1   : > { %8140 = vmatpush1.bf16.msra.mxu0 %v9568_v37  ;;  %7797 = vmatprep.subr.bf16.mxu1 %v9573_v38  ;;  %v9654_v37 = vld [vmem:[%s11330_s25 + $0xb14] ss:$8 sps:$4 sm:$0xff]   ;;  %v9657_v38 = vld [vmem:[%s11330_s25 + $0x324] ss:$8 sps:$4 sm:$0xff]  }
 0x1b2   : > { %8141 = vmatprep.subr.bf16.mxu0 %v9576_v39  ;;  %v9660_v39 = vld [vmem:[%s11330_s25 + $0xb24] ss:$8 sps:$4 sm:$0xff]  }
 0x1b4   : > { %7798 = vmatpush1.bf16.msra.mxu1 %v9571_v40  ;;  %v9655_v40 = vld [vmem:[%s11330_s25 + $0x320] ss:$8 sps:$4 sm:$0xff]  }
 0x1b5   : > { %8142 = vmatpush1.bf16.msra.mxu0 %v9574_v41  ;;  %7799 = vmatprep.subr.bf16.mxu1 %v9579_v42  ;;  %v9658_v41 = vld [vmem:[%s11330_s25 + $0xb20] ss:$8 sps:$4 sm:$0xff]   ;;  %v9663_v42 = vld [vmem:[%s11330_s25 + $0x334] ss:$8 sps:$4 sm:$0xff]  }
 0x1b6   : > { %8143 = vmatprep.subr.bf16.mxu0 %v9582_v43  ;;  %v9666_v43 = vld [vmem:[%s11330_s25 + $0xb34] ss:$8 sps:$4 sm:$0xff]  }
 0x1b8   : > { %7800 = vmatpush1.bf16.msra.mxu1 %v9577_v44  ;;  %v9661_v44 = vld [vmem:[%s11330_s25 + $0x330] ss:$8 sps:$4 sm:$0xff]  }
 0x1b9   : > { %8144 = vmatpush1.bf16.msra.mxu0 %v9580_v45  ;;  %7801 = vmatprep.subr.bf16.mxu1 %v9585_v46  ;;  %v9664_v45 = vld [vmem:[%s11330_s25 + $0xb30] ss:$8 sps:$4 sm:$0xff]   ;;  %v9669_v46 = vld [vmem:[%s11330_s25 + $0x344] ss:$8 sps:$4 sm:$0xff]  }
 0x1ba   : > { %8145 = vmatprep.subr.bf16.mxu0 %v9588_v47  ;;  %v9672_v47 = vld [vmem:[%s11330_s25 + $0xb44] ss:$8 sps:$4 sm:$0xff]  }
 0x1bc   : > { %7802 = vmatpush1.bf16.msra.mxu1 %v9583_v48  ;;  %v9667_v48 = vld [vmem:[%s11330_s25 + $0x340] ss:$8 sps:$4 sm:$0xff]  }
 0x1bd   : > { %8146 = vmatpush1.bf16.msra.mxu0 %v9586_v49  ;;  %7803 = vmatprep.subr.bf16.mxu1 %v9591_v50  ;;  %v9670_v49 = vld [vmem:[%s11330_s25 + $0xb40] ss:$8 sps:$4 sm:$0xff]   ;;  %v9675_v50 = vld [vmem:[%s11330_s25 + $0x354] ss:$8 sps:$4 sm:$0xff]  }
 0x1be   : > { %8147 = vmatprep.subr.bf16.mxu0 %v9594_v51  ;;  %v9678_v51 = vld [vmem:[%s11330_s25 + $0xb54] ss:$8 sps:$4 sm:$0xff]  }
 0x1c0   : > { %7804 = vmatpush1.bf16.msra.mxu1 %v9589_v52  ;;  %v9673_v52 = vld [vmem:[%s11330_s25 + $0x350] ss:$8 sps:$4 sm:$0xff]  }
 0x1c1   : > { %8148 = vmatpush1.bf16.msra.mxu0 %v9592_v53  ;;  %7805 = vmatprep.subr.bf16.mxu1 %v9597_v54  ;;  %v9676_v53 = vld [vmem:[%s11330_s25 + $0xb50] ss:$8 sps:$4 sm:$0xff]   ;;  %v9681_v54 = vld [vmem:[%s11330_s25 + $0x364] ss:$8 sps:$4 sm:$0xff]  }
 0x1c2   : > { %8149 = vmatprep.subr.bf16.mxu0 %v9600_v55  ;;  %v9684_v55 = vld [vmem:[%s11330_s25 + $0xb64] ss:$8 sps:$4 sm:$0xff]  }
 0x1c4   : > { %7806 = vmatpush1.bf16.msra.mxu1 %v9595_v56  ;;  %v9679_v56 = vld [vmem:[%s11330_s25 + $0x360] ss:$8 sps:$4 sm:$0xff]  }
 0x1c5   : > { %8150 = vmatpush1.bf16.msra.mxu0 %v9598_v57  ;;  %7807 = vmatprep.subr.bf16.mxu1 %v9603_v58  ;;  %v9682_v57 = vld [vmem:[%s11330_s25 + $0xb60] ss:$8 sps:$4 sm:$0xff]   ;;  %v9687_v58 = vld [vmem:[%s11330_s25 + $0x374] ss:$8 sps:$4 sm:$0xff]  }
 0x1c6   : > { %8151 = vmatprep.subr.bf16.mxu0 %v9606_v59  ;;  %v9690_v59 = vld [vmem:[%s11330_s25 + $0xb74] ss:$8 sps:$4 sm:$0xff]  }
 0x1c8   : > { %7808 = vmatpush1.bf16.msra.mxu1 %v9601_v60  ;;  %v9685_v60 = vld [vmem:[%s11330_s25 + $0x370] ss:$8 sps:$4 sm:$0xff]  }
 0x1c9   : > { %8152 = vmatpush1.bf16.msra.mxu0 %v9604_v61  ;;  %7809 = vmatprep.subr.bf16.mxu1 %v9609_v62  ;;  %v9688_v61 = vld [vmem:[%s11330_s25 + $0xb70] ss:$8 sps:$4 sm:$0xff]   ;;  %v9693_v62 = vld [vmem:[%s11330_s25 + $0x384] ss:$8 sps:$4 sm:$0xff]  }
 0x1ca   : > { %8153 = vmatprep.subr.bf16.mxu0 %v9612_v63  ;;  %v9696_v63 = vld [vmem:[%s11330_s25 + $0xb84] ss:$8 sps:$4 sm:$0xff]  }
 0x1cc   : > { %7810 = vmatpush1.bf16.msra.mxu1 %v9607_v0  ;;  %v9691_v0 = vld [vmem:[%s11330_s25 + $0x380] ss:$8 sps:$4 sm:$0xff]  }
 0x1cd   : > { %8154 = vmatpush1.bf16.msra.mxu0 %v9610_v1  ;;  %7811 = vmatprep.subr.bf16.mxu1 %v9615_v2  ;;  %v9694_v1 = vld [vmem:[%s11330_s25 + $0xb80] ss:$8 sps:$4 sm:$0xff]   ;;  %v9699_v2 = vld [vmem:[%s11330_s25 + $0x394] ss:$8 sps:$4 sm:$0xff]  }
 0x1ce   : > { %8155 = vmatprep.subr.bf16.mxu0 %v9618_v3  ;;  %v9702_v3 = vld [vmem:[%s11330_s25 + $0xb94] ss:$8 sps:$4 sm:$0xff]  }
 0x1d0   : > { %7812 = vmatpush1.bf16.msra.mxu1 %v9613_v4  ;;  %v9697_v4 = vld [vmem:[%s11330_s25 + $0x390] ss:$8 sps:$4 sm:$0xff]  }
 0x1d1   : > { %8156 = vmatpush1.bf16.msra.mxu0 %v9616_v5  ;;  %7813 = vmatprep.subr.bf16.mxu1 %v9621_v6  ;;  %v9700_v5 = vld [vmem:[%s11330_s25 + $0xb90] ss:$8 sps:$4 sm:$0xff]   ;;  %v9705_v6 = vld [vmem:[%s11330_s25 + $0x3a4] ss:$8 sps:$4 sm:$0xff]  }
 0x1d2   : > { %8157 = vmatprep.subr.bf16.mxu0 %v9624_v7  ;;  %v9708_v7 = vld [vmem:[%s11330_s25 + $0xba4] ss:$8 sps:$4 sm:$0xff]  }
 0x1d4   : > { %7814 = vmatpush1.bf16.msra.mxu1 %v9619_v8  ;;  %v9703_v8 = vld [vmem:[%s11330_s25 + $0x3a0] ss:$8 sps:$4 sm:$0xff]  }
 0x1d5   : > { %8158 = vmatpush1.bf16.msra.mxu0 %v9622_v9  ;;  %7815 = vmatprep.subr.bf16.mxu1 %v9627_v10  ;;  %v9706_v9 = vld [vmem:[%s11330_s25 + $0xba0] ss:$8 sps:$4 sm:$0xff]   ;;  %v9711_v10 = vld [vmem:[%s11330_s25 + $0x3b4] ss:$8 sps:$4 sm:$0xff]  }
 0x1d6   : > { %8159 = vmatprep.subr.bf16.mxu0 %v9630_v11  ;;  %v9714_v11 = vld [vmem:[%s11330_s25 + $0xbb4] ss:$8 sps:$4 sm:$0xff]  }
 0x1d8   : > { %7816 = vmatpush1.bf16.msra.mxu1 %v9625_v12  ;;  %v9709_v12 = vld [vmem:[%s11330_s25 + $0x3b0] ss:$8 sps:$4 sm:$0xff]  }
 0x1d9   : > { %8160 = vmatpush1.bf16.msra.mxu0 %v9628_v13  ;;  %7817 = vmatprep.subr.bf16.mxu1 %v9633_v14  ;;  %v9712_v13 = vld [vmem:[%s11330_s25 + $0xbb0] ss:$8 sps:$4 sm:$0xff]   ;;  %v9717_v14 = vld [vmem:[%s11330_s25 + $0x3c4] ss:$8 sps:$4 sm:$0xff]  }
 0x1da   : > { %8161 = vmatprep.subr.bf16.mxu0 %v9636_v15  ;;  %v9720_v15 = vld [vmem:[%s11330_s25 + $0xbc4] ss:$8 sps:$4 sm:$0xff]  }
 0x1dc   : > { %7818 = vmatpush1.bf16.msra.mxu1 %v9631_v16  ;;  %v9715_v16 = vld [vmem:[%s11330_s25 + $0x3c0] ss:$8 sps:$4 sm:$0xff]  }
 0x1dd   : > { %8162 = vmatpush1.bf16.msra.mxu0 %v9634_v17  ;;  %7819 = vmatprep.subr.bf16.mxu1 %v9639_v18  ;;  %v9718_v17 = vld [vmem:[%s11330_s25 + $0xbc0] ss:$8 sps:$4 sm:$0xff]   ;;  %v9723_v18 = vld [vmem:[%s11330_s25 + $0x3d4] ss:$8 sps:$4 sm:$0xff]  }
 0x1de   : > { %8163 = vmatprep.subr.bf16.mxu0 %v9642_v19  ;;  %v9726_v19 = vld [vmem:[%s11330_s25 + $0xbd4] ss:$8 sps:$4 sm:$0xff]  }
 0x1e0   : > { %7820 = vmatpush1.bf16.msra.mxu1 %v9637_v20  ;;  %v9721_v20 = vld [vmem:[%s11330_s25 + $0x3d0] ss:$8 sps:$4 sm:$0xff]  }
 0x1e1   : > { %8164 = vmatpush1.bf16.msra.mxu0 %v9640_v21  ;;  %7832 = vmatprep.subr.bf16.mxu1 %v9645_v22  ;;  %v9724_v21 = vld [vmem:[%s11330_s25 + $0xbd0] ss:$8 sps:$4 sm:$0xff]   ;;  %v9729_v22 = vld [vmem:[%s11330_s25 + $0x3e4] ss:$8 sps:$4 sm:$0xff]  }
 0x1e2   : > { %8176 = vmatprep.subr.bf16.mxu0 %v9648_v23  ;;  %v9732_v23 = vld [vmem:[%s11330_s25 + $0xbe4] ss:$8 sps:$4 sm:$0xff]  }
 0x1e3   : > { %7822 = vmatmul.mubr.bf16.vlgmr.msra.gmra.mrb[0].mxu1 %v8671_v32  ;;  %v9735_v32 = vld [vmem:[%s11330_s25 + $0x3f4] ss:$8 sps:$4 sm:$0xff]  }
 0x1e4   : > { %8166 = vmatmul.mubr.bf16.vlgmr.msra.gmra.mrb[0].mxu0 %v8687_v33  ;;  %7833 = vmatpush1.bf16.msra.mxu1 %v9643_v26  ;;  %v9727_v26 = vld [vmem:[%s11330_s25 + $0x3e0] ss:$8 sps:$4 sm:$0xff]   ;;  %v9738_v33 = vld [vmem:[%s11330_s25 + $0xbf4] ss:$8 sps:$4 sm:$0xff]  }
 0x1e5   : > { %8177 = vmatpush1.bf16.msra.mxu0 %v9646_v27  ;;  %7834 = vmatprep.subr.bf16.mxu1 %v9651_v36  ;;  %v9730_v27 = vld [vmem:[%s11330_s25 + $0xbe0] ss:$8 sps:$4 sm:$0xff]   ;;  %v9733_v36 = vld [vmem:[%s11330_s25 + $0x3f0] ss:$8 sps:$4 sm:$0xff]  }
 0x1e6   : > { %8178 = vmatprep.subr.bf16.mxu0 %v9654_v37  ;;  %7864 = vmatprep.mubr.bf16.mxu1 %v8674_v24  ;;  %v9736_v37 = vld [vmem:[%s11330_s25 + $0xbf0] ss:$8 sps:$4 sm:$0xff]   ;;  %v9741_v24 = vld [vmem:[%s11330_s25 + $0x404] ss:$8 sps:$4 sm:$0xff]  }
 0x1e7   : > { %8208 = vmatprep.mubr.bf16.mxu0 %v8690_v25  ;;  %v9744_v25 = vld [vmem:[%s11330_s25 + $0xc04] ss:$8 sps:$4 sm:$0xff]  }
 0x1e8   : > { %7835 = vmatpush1.bf16.msra.mxu1 %v9649_v29  ;;  %v9739_v29 = vld [vmem:[%s11330_s25 + $0x400] ss:$8 sps:$4 sm:$0xff]  }
 0x1e9   : > { %8179 = vmatpush1.bf16.msra.mxu0 %v9652_v30  ;;  %7836 = vmatprep.subr.bf16.mxu1 %v9657_v38  ;;  %v9742_v30 = vld [vmem:[%s11330_s25 + $0xc00] ss:$8 sps:$4 sm:$0xff]  }
 0x1ea   : > { %8180 = vmatprep.subr.bf16.mxu0 %v9660_v39  ;;  %v11660_v38 = vld [vmem:[%s11381_s5 + $0x20] sm:$0xff] }
 0x1eb   : > { %v11663_v39 = vld [vmem:[%s11381_s5 + $0xa0] sm:$0xff] }
 0x1ec   : > { %7837 = vmatpush1.bf16.msra.mxu1 %v9655_v40  ;;  %v8673_v40 = vcombine.low %v11576_v28, %v11579_v31  ;;  %v9745_v31 = vld [vmem:[%s11330_s25 + $0x410] ss:$8 sps:$4 sm:$0xff]  }
 0x1ed   : > { %8181 = vmatpush1.bf16.msra.mxu0 %v9658_v41  ;;  %7838 = vmatprep.subr.bf16.mxu1 %v9663_v42  ;;  %v8689_v41 = vcombine.low %v11586_v34, %v11589_v35  ;;  %v11670_v42 = vld [vmem:[%s11381_s5 + $0x60] sm:$0xff]  ;;  %v9748_v34 = vld [vmem:[%s11330_s25 + $0xc10] ss:$8 sps:$4 sm:$0xff]  }
 0x1ee   : > { %8182 = vmatprep.subr.bf16.mxu0 %v9666_v43  ;;  %v11673_v43 = vld [vmem:[%s11381_s5 + $0xe0] sm:$0xff] }
 0x1ef   : > { %v8692_v28 = vcombine.high %v11670_v42, %v11673_v43  ;;  %v9753_v35 = vld [vmem:[%s11330_s25 + $0x424] ss:$8 sps:$4 sm:$0xff]  }
 0x1f0   : > { %7839 = vmatpush1.bf16.msra.mxu1 %v9661_v44  ;;  %v9747_v44 = vld [vmem:[%s11330_s25 + $0x414] ss:$8 sps:$4 sm:$0xff]  }
 0x1f1   : > { %8183 = vmatpush1.bf16.msra.mxu0 %v9664_v45  ;;  %7840 = vmatprep.subr.bf16.mxu1 %v9669_v46  ;;  %v9750_v45 = vld [vmem:[%s11330_s25 + $0xc14] ss:$8 sps:$4 sm:$0xff]   ;;  %v8676_v46 = vcombine.high %v11660_v38, %v11663_v39 }
 0x1f2   : > { %8184 = vmatprep.subr.bf16.mxu0 %v9672_v47  ;;  %v9756_v47 = vld [vmem:[%s11330_s25 + $0xc24] ss:$8 sps:$4 sm:$0xff]  }
 0x1f4   : > { %7841 = vmatpush1.bf16.msra.mxu1 %v9667_v48  ;;  %v9751_v48 = vld [vmem:[%s11330_s25 + $0x420] ss:$8 sps:$4 sm:$0xff]  }
 0x1f5   : > { %8185 = vmatpush1.bf16.msra.mxu0 %v9670_v49  ;;  %7842 = vmatprep.subr.bf16.mxu1 %v9675_v50  ;;  %v9754_v49 = vld [vmem:[%s11330_s25 + $0xc20] ss:$8 sps:$4 sm:$0xff]   ;;  %v9759_v50 = vld [vmem:[%s11330_s25 + $0x434] ss:$8 sps:$4 sm:$0xff]  }
 0x1f6   : > { %8186 = vmatprep.subr.bf16.mxu0 %v9678_v51  ;;  %v9762_v51 = vld [vmem:[%s11330_s25 + $0xc34] ss:$8 sps:$4 sm:$0xff]  }
 0x1f8   : > { %7843 = vmatpush1.bf16.msra.mxu1 %v9673_v52  ;;  %v9757_v52 = vld [vmem:[%s11330_s25 + $0x430] ss:$8 sps:$4 sm:$0xff]  }
 0x1f9   : > { %8187 = vmatpush1.bf16.msra.mxu0 %v9676_v53  ;;  %7844 = vmatprep.subr.bf16.mxu1 %v9681_v54  ;;  %v9760_v53 = vld [vmem:[%s11330_s25 + $0xc30] ss:$8 sps:$4 sm:$0xff]   ;;  %v9765_v54 = vld [vmem:[%s11330_s25 + $0x444] ss:$8 sps:$4 sm:$0xff]  }
 0x1fa   : > { %8188 = vmatprep.subr.bf16.mxu0 %v9684_v55  ;;  %v9768_v55 = vld [vmem:[%s11330_s25 + $0xc44] ss:$8 sps:$4 sm:$0xff]  }
 0x1fc   : > { %7845 = vmatpush1.bf16.msra.mxu1 %v9679_v56  ;;  %v9763_v56 = vld [vmem:[%s11330_s25 + $0x440] ss:$8 sps:$4 sm:$0xff]  }
 0x1fd   : > { %8189 = vmatpush1.bf16.msra.mxu0 %v9682_v57  ;;  %7846 = vmatprep.subr.bf16.mxu1 %v9687_v58  ;;  %v9766_v57 = vld [vmem:[%s11330_s25 + $0xc40] ss:$8 sps:$4 sm:$0xff]   ;;  %v9771_v58 = vld [vmem:[%s11330_s25 + $0x454] ss:$8 sps:$4 sm:$0xff]  }
 0x1fe   : > { %8190 = vmatprep.subr.bf16.mxu0 %v9690_v59  ;;  %v9774_v59 = vld [vmem:[%s11330_s25 + $0xc54] ss:$8 sps:$4 sm:$0xff]  }
 0x200   : > { %7847 = vmatpush1.bf16.msra.mxu1 %v9685_v60  ;;  %v9769_v60 = vld [vmem:[%s11330_s25 + $0x450] ss:$8 sps:$4 sm:$0xff]  }
 0x201   : > { %8191 = vmatpush1.bf16.msra.mxu0 %v9688_v61  ;;  %7848 = vmatprep.subr.bf16.mxu1 %v9693_v62  ;;  %v9772_v61 = vld [vmem:[%s11330_s25 + $0xc50] ss:$8 sps:$4 sm:$0xff]   ;;  %v9777_v62 = vld [vmem:[%s11330_s25 + $0x464] ss:$8 sps:$4 sm:$0xff]  }
 0x202   : > { %8192 = vmatprep.subr.bf16.mxu0 %v9696_v63  ;;  %v9780_v63 = vld [vmem:[%s11330_s25 + $0xc64] ss:$8 sps:$4 sm:$0xff]  }
 0x204   : > { %7849 = vmatpush1.bf16.msra.mxu1 %v9691_v0  ;;  %v9775_v0 = vld [vmem:[%s11330_s25 + $0x460] ss:$8 sps:$4 sm:$0xff]  }
 0x205   : > { %8193 = vmatpush1.bf16.msra.mxu0 %v9694_v1  ;;  %7850 = vmatprep.subr.bf16.mxu1 %v9699_v2  ;;  %v9778_v1 = vld [vmem:[%s11330_s25 + $0xc60] ss:$8 sps:$4 sm:$0xff]   ;;  %v9783_v2 = vld [vmem:[%s11330_s25 + $0x474] ss:$8 sps:$4 sm:$0xff]  }
 0x206   : > { %8194 = vmatprep.subr.bf16.mxu0 %v9702_v3  ;;  %v9786_v3 = vld [vmem:[%s11330_s25 + $0xc74] ss:$8 sps:$4 sm:$0xff]  }
 0x208   : > { %7851 = vmatpush1.bf16.msra.mxu1 %v9697_v4  ;;  %v9781_v4 = vld [vmem:[%s11330_s25 + $0x470] ss:$8 sps:$4 sm:$0xff]  }
 0x209   : > { %8195 = vmatpush1.bf16.msra.mxu0 %v9700_v5  ;;  %7852 = vmatprep.subr.bf16.mxu1 %v9705_v6  ;;  %v9784_v5 = vld [vmem:[%s11330_s25 + $0xc70] ss:$8 sps:$4 sm:$0xff]   ;;  %v9789_v6 = vld [vmem:[%s11330_s25 + $0x484] ss:$8 sps:$4 sm:$0xff]  }
 0x20a   : > { %8196 = vmatprep.subr.bf16.mxu0 %v9708_v7  ;;  %v9792_v7 = vld [vmem:[%s11330_s25 + $0xc84] ss:$8 sps:$4 sm:$0xff]  }
 0x20c   : > { %7853 = vmatpush1.bf16.msra.mxu1 %v9703_v8  ;;  %v9787_v8 = vld [vmem:[%s11330_s25 + $0x480] ss:$8 sps:$4 sm:$0xff]  }
 0x20d   : > { %8197 = vmatpush1.bf16.msra.mxu0 %v9706_v9  ;;  %7854 = vmatprep.subr.bf16.mxu1 %v9711_v10  ;;  %v9790_v9 = vld [vmem:[%s11330_s25 + $0xc80] ss:$8 sps:$4 sm:$0xff]   ;;  %v9795_v10 = vld [vmem:[%s11330_s25 + $0x494] ss:$8 sps:$4 sm:$0xff]  }
 0x20e   : > { %8198 = vmatprep.subr.bf16.mxu0 %v9714_v11  ;;  %v9798_v11 = vld [vmem:[%s11330_s25 + $0xc94] ss:$8 sps:$4 sm:$0xff]  }
 0x210   : > { %7855 = vmatpush1.bf16.msra.mxu1 %v9709_v12  ;;  %v9793_v12 = vld [vmem:[%s11330_s25 + $0x490] ss:$8 sps:$4 sm:$0xff]  }
 0x211   : > { %8199 = vmatpush1.bf16.msra.mxu0 %v9712_v13  ;;  %7856 = vmatprep.subr.bf16.mxu1 %v9717_v14  ;;  %v9796_v13 = vld [vmem:[%s11330_s25 + $0xc90] ss:$8 sps:$4 sm:$0xff]   ;;  %v9801_v14 = vld [vmem:[%s11330_s25 + $0x4a4] ss:$8 sps:$4 sm:$0xff]  }
 0x212   : > { %8200 = vmatprep.subr.bf16.mxu0 %v9720_v15  ;;  %v9804_v15 = vld [vmem:[%s11330_s25 + $0xca4] ss:$8 sps:$4 sm:$0xff]  }
 0x214   : > { %7857 = vmatpush1.bf16.msra.mxu1 %v9715_v16  ;;  %v9799_v16 = vld [vmem:[%s11330_s25 + $0x4a0] ss:$8 sps:$4 sm:$0xff]  }
 0x215   : > { %8201 = vmatpush1.bf16.msra.mxu0 %v9718_v17  ;;  %7858 = vmatprep.subr.bf16.mxu1 %v9723_v18  ;;  %v9802_v17 = vld [vmem:[%s11330_s25 + $0xca0] ss:$8 sps:$4 sm:$0xff]   ;;  %v9807_v18 = vld [vmem:[%s11330_s25 + $0x4b4] ss:$8 sps:$4 sm:$0xff]  }
 0x216   : > { %8202 = vmatprep.subr.bf16.mxu0 %v9726_v19  ;;  %v9810_v19 = vld [vmem:[%s11330_s25 + $0xcb4] ss:$8 sps:$4 sm:$0xff]  }
 0x218   : > { %7859 = vmatpush1.bf16.msra.mxu1 %v9721_v20  ;;  %v9805_v20 = vld [vmem:[%s11330_s25 + $0x4b0] ss:$8 sps:$4 sm:$0xff]  }
 0x219   : > { %8203 = vmatpush1.bf16.msra.mxu0 %v9724_v21  ;;  %7860 = vmatprep.subr.bf16.mxu1 %v9729_v22  ;;  %v9808_v21 = vld [vmem:[%s11330_s25 + $0xcb0] ss:$8 sps:$4 sm:$0xff]   ;;  %v9813_v22 = vld [vmem:[%s11330_s25 + $0x4c4] ss:$8 sps:$4 sm:$0xff]  }
 0x21a   : > { %8204 = vmatprep.subr.bf16.mxu0 %v9732_v23  ;;  %v9816_v23 = vld [vmem:[%s11330_s25 + $0xcc4] ss:$8 sps:$4 sm:$0xff]  }
 0x21c   : > { %7861 = vmatpush1.bf16.msra.mxu1 %v9727_v26  ;;  %v9811_v26 = vld [vmem:[%s11330_s25 + $0x4c0] ss:$8 sps:$4 sm:$0xff]  }
 0x21d   : > { %8205 = vmatpush1.bf16.msra.mxu0 %v9730_v27  ;;  %7862 = vmatprep.subr.bf16.mxu1 %v9735_v32  ;;  %v9814_v27 = vld [vmem:[%s11330_s25 + $0xcc0] ss:$8 sps:$4 sm:$0xff]   ;;  %v9819_v32 = vld [vmem:[%s11330_s25 + $0x4d4] ss:$8 sps:$4 sm:$0xff]  }
 0x21e   : > { %8206 = vmatprep.subr.bf16.mxu0 %v9738_v33  ;;  %v9822_v33 = vld [vmem:[%s11330_s25 + $0xcd4] ss:$8 sps:$4 sm:$0xff]  }
 0x220   : > { %7863 = vmatpush1.bf16.msra.mxu1 %v9733_v36  ;;  %v9817_v36 = vld [vmem:[%s11330_s25 + $0x4d0] ss:$8 sps:$4 sm:$0xff]  }
 0x221   : > { %8207 = vmatpush1.bf16.msra.mxu0 %v9736_v37  ;;  %7875 = vmatprep.subr.bf16.mxu1 %v9741_v24  ;;  %v9820_v37 = vld [vmem:[%s11330_s25 + $0xcd0] ss:$8 sps:$4 sm:$0xff]   ;;  %v9825_v24 = vld [vmem:[%s11330_s25 + $0x4e4] ss:$8 sps:$4 sm:$0xff]  }
 0x222   : > { %8219 = vmatprep.subr.bf16.mxu0 %v9744_v25  ;;  %v9828_v25 = vld [vmem:[%s11330_s25 + $0xce4] ss:$8 sps:$4 sm:$0xff]  }
 0x223   : > { %7865 = vmatmul.mubr.bf16.vlgmr.msra.gmra.mrb[0].mxu1 %v8673_v40  ;;  %v9831_v40 = vld [vmem:[%s11330_s25 + $0x4f4] ss:$8 sps:$4 sm:$0xff]  }
 0x224   : > { %8209 = vmatmul.mubr.bf16.vlgmr.msra.gmra.mrb[0].mxu0 %v8689_v41  ;;  %7876 = vmatpush1.bf16.msra.mxu1 %v9739_v29  ;;  %v9823_v29 = vld [vmem:[%s11330_s25 + $0x4e0] ss:$8 sps:$4 sm:$0xff]   ;;  %v9834_v41 = vld [vmem:[%s11330_s25 + $0xcf4] ss:$8 sps:$4 sm:$0xff]  }
 0x225   : > { %8220 = vmatpush1.bf16.msra.mxu0 %v9742_v30  ;;  %7877 = vmatprep.subr.bf16.mxu1 %v9747_v44  ;;  %v9826_v30 = vld [vmem:[%s11330_s25 + $0xce0] ss:$8 sps:$4 sm:$0xff]   ;;  %v9829_v44 = vld [vmem:[%s11330_s25 + $0x4f0] ss:$8 sps:$4 sm:$0xff]  }
 0x226   : > { %8221 = vmatprep.subr.bf16.mxu0 %v9750_v45  ;;  %7907 = vmatprep.mubr.bf16.mxu1 %v8676_v46  ;;  %v9832_v45 = vld [vmem:[%s11330_s25 + $0xcf0] ss:$8 sps:$4 sm:$0xff]   ;;  %v9837_v46 = vld [vmem:[%s11330_s25 + $0x504] ss:$8 sps:$4 sm:$0xff]  }
 0x227   : > { %8251 = vmatprep.mubr.bf16.mxu0 %v8692_v28  ;;  %v9840_v28 = vld [vmem:[%s11330_s25 + $0xd04] ss:$8 sps:$4 sm:$0xff]  }
 0x228   : > { %7878 = vmatpush1.bf16.msra.mxu1 %v9745_v31  ;;  %v11742_v31 = vld [vmem:[%s11381_s5 + $0x28] sm:$0xff] }
 0x229   : > { %8222 = vmatpush1.bf16.msra.mxu0 %v9748_v34  ;;  %7879 = vmatprep.subr.bf16.mxu1 %v9753_v35  ;;  %v11745_v34 = vld [vmem:[%s11381_s5 + $0xa8] sm:$0xff] }
 0x22a   : > { %8223 = vmatprep.subr.bf16.mxu0 %v9756_v47  ;;  %v11748_v35 = vld [vmem:[%s11381_s5 + $0x68] sm:$0xff] }
 0x22b   : > { %v11751_v47 = vld [vmem:[%s11381_s5 + $0xe8] sm:$0xff] }
 0x22c   : > { %7880 = vmatpush1.bf16.msra.mxu1 %v9751_v48  ;;  %v8675_v48 = vcombine.low %v11660_v38, %v11663_v39  ;;  %v8694_v38 = vcombine.high %v11748_v35, %v11751_v47  ;;  %v9841_v39 = vld [vmem:[%s11330_s25 + $0x510] ss:$8 sps:$4 sm:$0xff]  }
 0x22d   : > { %8224 = vmatpush1.bf16.msra.mxu0 %v9754_v49  ;;  %7881 = vmatprep.subr.bf16.mxu1 %v9759_v50  ;;  %v8691_v49 = vcombine.low %v11670_v42, %v11673_v43  ;;  %v9835_v50 = vld [vmem:[%s11330_s25 + $0x500] ss:$8 sps:$4 sm:$0xff]   ;;  %v9844_v42 = vld [vmem:[%s11330_s25 + $0xd10] ss:$8 sps:$4 sm:$0xff]   ;;  %v9849_v43 = vld [vmem:[%s11330_s25 + $0x524] ss:$8 sps:$4 sm:$0xff]  }
 0x22e   : > { %8225 = vmatprep.subr.bf16.mxu0 %v9762_v51  ;;  %v9838_v51 = vld [vmem:[%s11330_s25 + $0xd00] ss:$8 sps:$4 sm:$0xff]  }
 0x230   : > { %7882 = vmatpush1.bf16.msra.mxu1 %v9757_v52  ;;  %v9843_v52 = vld [vmem:[%s11330_s25 + $0x514] ss:$8 sps:$4 sm:$0xff]  }
 0x231   : > { %8226 = vmatpush1.bf16.msra.mxu0 %v9760_v53  ;;  %7883 = vmatprep.subr.bf16.mxu1 %v9765_v54  ;;  %v9846_v53 = vld [vmem:[%s11330_s25 + $0xd14] ss:$8 sps:$4 sm:$0xff]   ;;  %v8678_v54 = vcombine.high %v11742_v31, %v11745_v34 }
 0x232   : > { %8227 = vmatprep.subr.bf16.mxu0 %v9768_v55  ;;  %v9852_v55 = vld [vmem:[%s11330_s25 + $0xd24] ss:$8 sps:$4 sm:$0xff]  }
 0x234   : > { %7884 = vmatpush1.bf16.msra.mxu1 %v9763_v56  ;;  %v9847_v56 = vld [vmem:[%s11330_s25 + $0x520] ss:$8 sps:$4 sm:$0xff]  }
 0x235   : > { %8228 = vmatpush1.bf16.msra.mxu0 %v9766_v57  ;;  %7885 = vmatprep.subr.bf16.mxu1 %v9771_v58  ;;  %v9850_v57 = vld [vmem:[%s11330_s25 + $0xd20] ss:$8 sps:$4 sm:$0xff]   ;;  %v9855_v58 = vld [vmem:[%s11330_s25 + $0x534] ss:$8 sps:$4 sm:$0xff]  }
 0x236   : > { %8229 = vmatprep.subr.bf16.mxu0 %v9774_v59  ;;  %v9858_v59 = vld [vmem:[%s11330_s25 + $0xd34] ss:$8 sps:$4 sm:$0xff]  }
 0x238   : > { %7886 = vmatpush1.bf16.msra.mxu1 %v9769_v60  ;;  %v9853_v60 = vld [vmem:[%s11330_s25 + $0x530] ss:$8 sps:$4 sm:$0xff]  }
 0x239   : > { %8230 = vmatpush1.bf16.msra.mxu0 %v9772_v61  ;;  %7887 = vmatprep.subr.bf16.mxu1 %v9777_v62  ;;  %v9856_v61 = vld [vmem:[%s11330_s25 + $0xd30] ss:$8 sps:$4 sm:$0xff]   ;;  %v9861_v62 = vld [vmem:[%s11330_s25 + $0x544] ss:$8 sps:$4 sm:$0xff]  }
 0x23a   : > { %8231 = vmatprep.subr.bf16.mxu0 %v9780_v63  ;;  %v9864_v63 = vld [vmem:[%s11330_s25 + $0xd44] ss:$8 sps:$4 sm:$0xff]  }
 0x23c   : > { %7888 = vmatpush1.bf16.msra.mxu1 %v9775_v0  ;;  %v9859_v0 = vld [vmem:[%s11330_s25 + $0x540] ss:$8 sps:$4 sm:$0xff]  }
 0x23d   : > { %8232 = vmatpush1.bf16.msra.mxu0 %v9778_v1  ;;  %7889 = vmatprep.subr.bf16.mxu1 %v9783_v2  ;;  %v9862_v1 = vld [vmem:[%s11330_s25 + $0xd40] ss:$8 sps:$4 sm:$0xff]   ;;  %v9867_v2 = vld [vmem:[%s11330_s25 + $0x554] ss:$8 sps:$4 sm:$0xff]  }
 0x23e   : > { %8233 = vmatprep.subr.bf16.mxu0 %v9786_v3  ;;  %v9870_v3 = vld [vmem:[%s11330_s25 + $0xd54] ss:$8 sps:$4 sm:$0xff]  }
 0x240   : > { %7890 = vmatpush1.bf16.msra.mxu1 %v9781_v4  ;;  %v9865_v4 = vld [vmem:[%s11330_s25 + $0x550] ss:$8 sps:$4 sm:$0xff]  }
 0x241   : > { %8234 = vmatpush1.bf16.msra.mxu0 %v9784_v5  ;;  %7891 = vmatprep.subr.bf16.mxu1 %v9789_v6  ;;  %v9868_v5 = vld [vmem:[%s11330_s25 + $0xd50] ss:$8 sps:$4 sm:$0xff]   ;;  %v9873_v6 = vld [vmem:[%s11330_s25 + $0x564] ss:$8 sps:$4 sm:$0xff]  }
 0x242   : > { %8235 = vmatprep.subr.bf16.mxu0 %v9792_v7  ;;  %v9876_v7 = vld [vmem:[%s11330_s25 + $0xd64] ss:$8 sps:$4 sm:$0xff]  }
 0x244   : > { %7892 = vmatpush1.bf16.msra.mxu1 %v9787_v8  ;;  %v9871_v8 = vld [vmem:[%s11330_s25 + $0x560] ss:$8 sps:$4 sm:$0xff]  }
 0x245   : > { %8236 = vmatpush1.bf16.msra.mxu0 %v9790_v9  ;;  %7893 = vmatprep.subr.bf16.mxu1 %v9795_v10  ;;  %v9874_v9 = vld [vmem:[%s11330_s25 + $0xd60] ss:$8 sps:$4 sm:$0xff]   ;;  %v9879_v10 = vld [vmem:[%s11330_s25 + $0x574] ss:$8 sps:$4 sm:$0xff]  }
 0x246   : > { %8237 = vmatprep.subr.bf16.mxu0 %v9798_v11  ;;  %v9882_v11 = vld [vmem:[%s11330_s25 + $0xd74] ss:$8 sps:$4 sm:$0xff]  }
 0x248   : > { %7894 = vmatpush1.bf16.msra.mxu1 %v9793_v12  ;;  %v9877_v12 = vld [vmem:[%s11330_s25 + $0x570] ss:$8 sps:$4 sm:$0xff]  }
 0x249   : > { %8238 = vmatpush1.bf16.msra.mxu0 %v9796_v13  ;;  %7895 = vmatprep.subr.bf16.mxu1 %v9801_v14  ;;  %v9880_v13 = vld [vmem:[%s11330_s25 + $0xd70] ss:$8 sps:$4 sm:$0xff]   ;;  %v9885_v14 = vld [vmem:[%s11330_s25 + $0x584] ss:$8 sps:$4 sm:$0xff]  }
 0x24a   : > { %8239 = vmatprep.subr.bf16.mxu0 %v9804_v15  ;;  %v9888_v15 = vld [vmem:[%s11330_s25 + $0xd84] ss:$8 sps:$4 sm:$0xff]  }
 0x24c   : > { %7896 = vmatpush1.bf16.msra.mxu1 %v9799_v16  ;;  %v9883_v16 = vld [vmem:[%s11330_s25 + $0x580] ss:$8 sps:$4 sm:$0xff]  }
 0x24d   : > { %8240 = vmatpush1.bf16.msra.mxu0 %v9802_v17  ;;  %7897 = vmatprep.subr.bf16.mxu1 %v9807_v18  ;;  %v9886_v17 = vld [vmem:[%s11330_s25 + $0xd80] ss:$8 sps:$4 sm:$0xff]   ;;  %v9891_v18 = vld [vmem:[%s11330_s25 + $0x594] ss:$8 sps:$4 sm:$0xff]  }
 0x24e   : > { %8241 = vmatprep.subr.bf16.mxu0 %v9810_v19  ;;  %v9894_v19 = vld [vmem:[%s11330_s25 + $0xd94] ss:$8 sps:$4 sm:$0xff]  }
 0x250   : > { %7898 = vmatpush1.bf16.msra.mxu1 %v9805_v20  ;;  %v9889_v20 = vld [vmem:[%s11330_s25 + $0x590] ss:$8 sps:$4 sm:$0xff]  }
 0x251   : > { %8242 = vmatpush1.bf16.msra.mxu0 %v9808_v21  ;;  %7899 = vmatprep.subr.bf16.mxu1 %v9813_v22  ;;  %v9892_v21 = vld [vmem:[%s11330_s25 + $0xd90] ss:$8 sps:$4 sm:$0xff]   ;;  %v9897_v22 = vld [vmem:[%s11330_s25 + $0x5a4] ss:$8 sps:$4 sm:$0xff]  }
 0x252   : > { %8243 = vmatprep.subr.bf16.mxu0 %v9816_v23  ;;  %v9900_v23 = vld [vmem:[%s11330_s25 + $0xda4] ss:$8 sps:$4 sm:$0xff]  }
 0x254   : > { %7900 = vmatpush1.bf16.msra.mxu1 %v9811_v26  ;;  %v9895_v26 = vld [vmem:[%s11330_s25 + $0x5a0] ss:$8 sps:$4 sm:$0xff]  }
 0x255   : > { %8244 = vmatpush1.bf16.msra.mxu0 %v9814_v27  ;;  %7901 = vmatprep.subr.bf16.mxu1 %v9819_v32  ;;  %v9898_v27 = vld [vmem:[%s11330_s25 + $0xda0] ss:$8 sps:$4 sm:$0xff]   ;;  %v9903_v32 = vld [vmem:[%s11330_s25 + $0x5b4] ss:$8 sps:$4 sm:$0xff]  }
 0x256   : > { %8245 = vmatprep.subr.bf16.mxu0 %v9822_v33  ;;  %v9906_v33 = vld [vmem:[%s11330_s25 + $0xdb4] ss:$8 sps:$4 sm:$0xff]  }
 0x258   : > { %7902 = vmatpush1.bf16.msra.mxu1 %v9817_v36  ;;  %v9901_v36 = vld [vmem:[%s11330_s25 + $0x5b0] ss:$8 sps:$4 sm:$0xff]  }
 0x259   : > { %8246 = vmatpush1.bf16.msra.mxu0 %v9820_v37  ;;  %7903 = vmatprep.subr.bf16.mxu1 %v9825_v24  ;;  %v9904_v37 = vld [vmem:[%s11330_s25 + $0xdb0] ss:$8 sps:$4 sm:$0xff]   ;;  %v9909_v24 = vld [vmem:[%s11330_s25 + $0x5c4] ss:$8 sps:$4 sm:$0xff]  }
 0x25a   : > { %8247 = vmatprep.subr.bf16.mxu0 %v9828_v25  ;;  %v9912_v25 = vld [vmem:[%s11330_s25 + $0xdc4] ss:$8 sps:$4 sm:$0xff]  }
 0x25c   : > { %7904 = vmatpush1.bf16.msra.mxu1 %v9823_v29  ;;  %v9907_v29 = vld [vmem:[%s11330_s25 + $0x5c0] ss:$8 sps:$4 sm:$0xff]  }
 0x25d   : > { %8248 = vmatpush1.bf16.msra.mxu0 %v9826_v30  ;;  %7905 = vmatprep.subr.bf16.mxu1 %v9831_v40  ;;  %v9910_v30 = vld [vmem:[%s11330_s25 + $0xdc0] ss:$8 sps:$4 sm:$0xff]   ;;  %v9915_v40 = vld [vmem:[%s11330_s25 + $0x5d4] ss:$8 sps:$4 sm:$0xff]  }
 0x25e   : > { %8249 = vmatprep.subr.bf16.mxu0 %v9834_v41  ;;  %v9918_v41 = vld [vmem:[%s11330_s25 + $0xdd4] ss:$8 sps:$4 sm:$0xff]  }
 0x260   : > { %7906 = vmatpush1.bf16.msra.mxu1 %v9829_v44  ;;  %v9913_v44 = vld [vmem:[%s11330_s25 + $0x5d0] ss:$8 sps:$4 sm:$0xff]  }
 0x261   : > { %8250 = vmatpush1.bf16.msra.mxu0 %v9832_v45  ;;  %7918 = vmatprep.subr.bf16.mxu1 %v9837_v46  ;;  %v9916_v45 = vld [vmem:[%s11330_s25 + $0xdd0] ss:$8 sps:$4 sm:$0xff]   ;;  %v9921_v46 = vld [vmem:[%s11330_s25 + $0x5e4] ss:$8 sps:$4 sm:$0xff]  }
 0x262   : > { %8262 = vmatprep.subr.bf16.mxu0 %v9840_v28  ;;  %v9924_v28 = vld [vmem:[%s11330_s25 + $0xde4] ss:$8 sps:$4 sm:$0xff]  }
 0x263   : > { %7908 = vmatmul.mubr.bf16.vlgmr.msra.gmra.mrb[0].mxu1 %v8675_v48  ;;  %v9919_v48 = vld [vmem:[%s11330_s25 + $0x5e0] ss:$8 sps:$4 sm:$0xff]  }
 0x264   : > { %8252 = vmatmul.mubr.bf16.vlgmr.msra.gmra.mrb[0].mxu0 %v8691_v49  ;;  %7919 = vmatpush1.bf16.msra.mxu1 %v9835_v50  ;;  %v9922_v49 = vld [vmem:[%s11330_s25 + $0xde0] ss:$8 sps:$4 sm:$0xff]   ;;  %v9927_v50 = vld [vmem:[%s11330_s25 + $0x5f4] ss:$8 sps:$4 sm:$0xff]  }
 0x265   : > { %8263 = vmatpush1.bf16.msra.mxu0 %v9838_v51  ;;  %7920 = vmatprep.subr.bf16.mxu1 %v9843_v52  ;;  %v9930_v51 = vld [vmem:[%s11330_s25 + $0xdf4] ss:$8 sps:$4 sm:$0xff]   ;;  %v9925_v52 = vld [vmem:[%s11330_s25 + $0x5f0] ss:$8 sps:$4 sm:$0xff]  }
 0x266   : > { %8264 = vmatprep.subr.bf16.mxu0 %v9846_v53  ;;  %7950 = vmatprep.mubr.bf16.mxu1 %v8678_v54  ;;  %v9928_v53 = vld [vmem:[%s11330_s25 + $0xdf0] ss:$8 sps:$4 sm:$0xff]   ;;  %v9933_v54 = vld [vmem:[%s11330_s25 + $0x604] ss:$8 sps:$4 sm:$0xff]  }
 0x267   : > { %8294 = vmatprep.mubr.bf16.mxu0 %v8694_v38  ;;  %v9936_v38 = vld [vmem:[%s11330_s25 + $0xe04] ss:$8 sps:$4 sm:$0xff]  }
 0x268   : > { %7921 = vmatpush1.bf16.msra.mxu1 %v9841_v39  ;;  %v11826_v39 = vld [vmem:[%s11381_s5 + $0x30] sm:$0xff] }
 0x269   : > { %8265 = vmatpush1.bf16.msra.mxu0 %v9844_v42  ;;  %7922 = vmatprep.subr.bf16.mxu1 %v9849_v43  ;;  %v8677_v42 = vcombine.low %v11742_v31, %v11745_v34  ;;  %v8693_v43 = vcombine.low %v11748_v35, %v11751_v47  ;;  %v9939_v31 = vld [vmem:[%s11330_s25 + $0x614] ss:$8 sps:$4 sm:$0xff]  }
 0x26a   : > { %8266 = vmatprep.subr.bf16.mxu0 %v9852_v55  ;;  %v11833_v55 = vld [vmem:[%s11381_s5 + $0xb0] sm:$0xff] }
 0x26b   : > { %v9942_v34 = vld [vmem:[%s11330_s25 + $0xe14] ss:$8 sps:$4 sm:$0xff]   ;;  %v8680_v35 = vcombine.high %v11826_v39, %v11833_v55 }
 0x26c   : > { %7923 = vmatpush1.bf16.msra.mxu1 %v9847_v56  ;;  %v11836_v56 = vld [vmem:[%s11381_s5 + $0x70] sm:$0xff] }
 0x26d   : > { %8267 = vmatpush1.bf16.msra.mxu0 %v9850_v57  ;;  %7924 = vmatprep.subr.bf16.mxu1 %v9855_v58  ;;  %v11839_v57 = vld [vmem:[%s11381_s5 + $0xf0] sm:$0xff]  ;;  %v9931_v58 = vld [vmem:[%s11330_s25 + $0x600] ss:$8 sps:$4 sm:$0xff]  }
 0x26e   : > { %8268 = vmatprep.subr.bf16.mxu0 %v9858_v59  ;;  %v9934_v59 = vld [vmem:[%s11330_s25 + $0xe00] ss:$8 sps:$4 sm:$0xff]   ;;  %v8696_v47 = vcombine.high %v11836_v56, %v11839_v57 }
 0x270   : > { %7925 = vmatpush1.bf16.msra.mxu1 %v9853_v60  ;;  %v9937_v60 = vld [vmem:[%s11330_s25 + $0x610] ss:$8 sps:$4 sm:$0xff]  }
 0x271   : > { %8269 = vmatpush1.bf16.msra.mxu0 %v9856_v61  ;;  %7926 = vmatprep.subr.bf16.mxu1 %v9861_v62  ;;  %v9940_v61 = vld [vmem:[%s11330_s25 + $0xe10] ss:$8 sps:$4 sm:$0xff]   ;;  %v9945_v62 = vld [vmem:[%s11330_s25 + $0x624] ss:$8 sps:$4 sm:$0xff]  }
 0x272   : > { %8270 = vmatprep.subr.bf16.mxu0 %v9864_v63  ;;  %v9948_v63 = vld [vmem:[%s11330_s25 + $0xe24] ss:$8 sps:$4 sm:$0xff]  }
 0x274   : > { %7927 = vmatpush1.bf16.msra.mxu1 %v9859_v0  ;;  %v9943_v0 = vld [vmem:[%s11330_s25 + $0x620] ss:$8 sps:$4 sm:$0xff]  }
 0x275   : > { %8271 = vmatpush1.bf16.msra.mxu0 %v9862_v1  ;;  %7928 = vmatprep.subr.bf16.mxu1 %v9867_v2  ;;  %v9946_v1 = vld [vmem:[%s11330_s25 + $0xe20] ss:$8 sps:$4 sm:$0xff]   ;;  %v9951_v2 = vld [vmem:[%s11330_s25 + $0x634] ss:$8 sps:$4 sm:$0xff]  }
 0x276   : > { %8272 = vmatprep.subr.bf16.mxu0 %v9870_v3  ;;  %v9954_v3 = vld [vmem:[%s11330_s25 + $0xe34] ss:$8 sps:$4 sm:$0xff]  }
 0x278   : > { %7929 = vmatpush1.bf16.msra.mxu1 %v9865_v4  ;;  %v9949_v4 = vld [vmem:[%s11330_s25 + $0x630] ss:$8 sps:$4 sm:$0xff]  }
 0x279   : > { %8273 = vmatpush1.bf16.msra.mxu0 %v9868_v5  ;;  %7930 = vmatprep.subr.bf16.mxu1 %v9873_v6  ;;  %v9952_v5 = vld [vmem:[%s11330_s25 + $0xe30] ss:$8 sps:$4 sm:$0xff]   ;;  %v9957_v6 = vld [vmem:[%s11330_s25 + $0x644] ss:$8 sps:$4 sm:$0xff]  }
 0x27a   : > { %8274 = vmatprep.subr.bf16.mxu0 %v9876_v7  ;;  %v9960_v7 = vld [vmem:[%s11330_s25 + $0xe44] ss:$8 sps:$4 sm:$0xff]  }
 0x27c   : > { %7931 = vmatpush1.bf16.msra.mxu1 %v9871_v8  ;;  %v9955_v8 = vld [vmem:[%s11330_s25 + $0x640] ss:$8 sps:$4 sm:$0xff]  }
 0x27d   : > { %8275 = vmatpush1.bf16.msra.mxu0 %v9874_v9  ;;  %7932 = vmatprep.subr.bf16.mxu1 %v9879_v10  ;;  %v9958_v9 = vld [vmem:[%s11330_s25 + $0xe40] ss:$8 sps:$4 sm:$0xff]   ;;  %v9963_v10 = vld [vmem:[%s11330_s25 + $0x654] ss:$8 sps:$4 sm:$0xff]  }
 0x27e   : > { %8276 = vmatprep.subr.bf16.mxu0 %v9882_v11  ;;  %v9966_v11 = vld [vmem:[%s11330_s25 + $0xe54] ss:$8 sps:$4 sm:$0xff]  }
 0x280   : > { %7933 = vmatpush1.bf16.msra.mxu1 %v9877_v12  ;;  %v9961_v12 = vld [vmem:[%s11330_s25 + $0x650] ss:$8 sps:$4 sm:$0xff]  }
 0x281   : > { %8277 = vmatpush1.bf16.msra.mxu0 %v9880_v13  ;;  %7934 = vmatprep.subr.bf16.mxu1 %v9885_v14  ;;  %v9964_v13 = vld [vmem:[%s11330_s25 + $0xe50] ss:$8 sps:$4 sm:$0xff]   ;;  %v9969_v14 = vld [vmem:[%s11330_s25 + $0x664] ss:$8 sps:$4 sm:$0xff]  }
 0x282   : > { %8278 = vmatprep.subr.bf16.mxu0 %v9888_v15  ;;  %v9972_v15 = vld [vmem:[%s11330_s25 + $0xe64] ss:$8 sps:$4 sm:$0xff]  }
 0x284   : > { %7935 = vmatpush1.bf16.msra.mxu1 %v9883_v16  ;;  %v9967_v16 = vld [vmem:[%s11330_s25 + $0x660] ss:$8 sps:$4 sm:$0xff]  }
 0x285   : > { %8279 = vmatpush1.bf16.msra.mxu0 %v9886_v17  ;;  %7936 = vmatprep.subr.bf16.mxu1 %v9891_v18  ;;  %v9970_v17 = vld [vmem:[%s11330_s25 + $0xe60] ss:$8 sps:$4 sm:$0xff]   ;;  %v9975_v18 = vld [vmem:[%s11330_s25 + $0x674] ss:$8 sps:$4 sm:$0xff]  }
 0x286   : > { %8280 = vmatprep.subr.bf16.mxu0 %v9894_v19  ;;  %v9978_v19 = vld [vmem:[%s11330_s25 + $0xe74] ss:$8 sps:$4 sm:$0xff]  }
 0x288   : > { %7937 = vmatpush1.bf16.msra.mxu1 %v9889_v20  ;;  %v9973_v20 = vld [vmem:[%s11330_s25 + $0x670] ss:$8 sps:$4 sm:$0xff]  }
 0x289   : > { %8281 = vmatpush1.bf16.msra.mxu0 %v9892_v21  ;;  %7938 = vmatprep.subr.bf16.mxu1 %v9897_v22  ;;  %v9976_v21 = vld [vmem:[%s11330_s25 + $0xe70] ss:$8 sps:$4 sm:$0xff]   ;;  %v9981_v22 = vld [vmem:[%s11330_s25 + $0x684] ss:$8 sps:$4 sm:$0xff]  }
 0x28a   : > { %8282 = vmatprep.subr.bf16.mxu0 %v9900_v23  ;;  %v9984_v23 = vld [vmem:[%s11330_s25 + $0xe84] ss:$8 sps:$4 sm:$0xff]  }
 0x28c   : > { %7939 = vmatpush1.bf16.msra.mxu1 %v9895_v26  ;;  %v9979_v26 = vld [vmem:[%s11330_s25 + $0x680] ss:$8 sps:$4 sm:$0xff]  }
 0x28d   : > { %8283 = vmatpush1.bf16.msra.mxu0 %v9898_v27  ;;  %7940 = vmatprep.subr.bf16.mxu1 %v9903_v32  ;;  %v9982_v27 = vld [vmem:[%s11330_s25 + $0xe80] ss:$8 sps:$4 sm:$0xff]   ;;  %v9987_v32 = vld [vmem:[%s11330_s25 + $0x694] ss:$8 sps:$4 sm:$0xff]  }
 0x28e   : > { %8284 = vmatprep.subr.bf16.mxu0 %v9906_v33  ;;  %v9990_v33 = vld [vmem:[%s11330_s25 + $0xe94] ss:$8 sps:$4 sm:$0xff]  }
 0x290   : > { %7941 = vmatpush1.bf16.msra.mxu1 %v9901_v36  ;;  %v9985_v36 = vld [vmem:[%s11330_s25 + $0x690] ss:$8 sps:$4 sm:$0xff]  }
 0x291   : > { %8285 = vmatpush1.bf16.msra.mxu0 %v9904_v37  ;;  %7942 = vmatprep.subr.bf16.mxu1 %v9909_v24  ;;  %v9988_v37 = vld [vmem:[%s11330_s25 + $0xe90] ss:$8 sps:$4 sm:$0xff]   ;;  %v9993_v24 = vld [vmem:[%s11330_s25 + $0x6a4] ss:$8 sps:$4 sm:$0xff]  }
 0x292   : > { %8286 = vmatprep.subr.bf16.mxu0 %v9912_v25  ;;  %v9996_v25 = vld [vmem:[%s11330_s25 + $0xea4] ss:$8 sps:$4 sm:$0xff]  }
 0x294   : > { %7943 = vmatpush1.bf16.msra.mxu1 %v9907_v29  ;;  %v9991_v29 = vld [vmem:[%s11330_s25 + $0x6a0] ss:$8 sps:$4 sm:$0xff]  }
 0x295   : > { %8287 = vmatpush1.bf16.msra.mxu0 %v9910_v30  ;;  %7944 = vmatprep.subr.bf16.mxu1 %v9915_v40  ;;  %v9994_v30 = vld [vmem:[%s11330_s25 + $0xea0] ss:$8 sps:$4 sm:$0xff]   ;;  %v9999_v40 = vld [vmem:[%s11330_s25 + $0x6b4] ss:$8 sps:$4 sm:$0xff]  }
 0x296   : > { %8288 = vmatprep.subr.bf16.mxu0 %v9918_v41  ;;  %v10002_v41 = vld [vmem:[%s11330_s25 + $0xeb4] ss:$8 sps:$4 sm:$0xff]  }
 0x298   : > { %7945 = vmatpush1.bf16.msra.mxu1 %v9913_v44  ;;  %v9997_v44 = vld [vmem:[%s11330_s25 + $0x6b0] ss:$8 sps:$4 sm:$0xff]  }
 0x299   : > { %8289 = vmatpush1.bf16.msra.mxu0 %v9916_v45  ;;  %7946 = vmatprep.subr.bf16.mxu1 %v9921_v46  ;;  %v10000_v45 = vld [vmem:[%s11330_s25 + $0xeb0] ss:$8 sps:$4 sm:$0xff]   ;;  %v10005_v46 = vld [vmem:[%s11330_s25 + $0x6c4] ss:$8 sps:$4 sm:$0xff]  }
 0x29a   : > { %8290 = vmatprep.subr.bf16.mxu0 %v9924_v28  ;;  %v10008_v28 = vld [vmem:[%s11330_s25 + $0xec4] ss:$8 sps:$4 sm:$0xff]  }
 0x29c   : > { %7947 = vmatpush1.bf16.msra.mxu1 %v9919_v48  ;;  %v10003_v48 = vld [vmem:[%s11330_s25 + $0x6c0] ss:$8 sps:$4 sm:$0xff]  }
 0x29d   : > { %8291 = vmatpush1.bf16.msra.mxu0 %v9922_v49  ;;  %7948 = vmatprep.subr.bf16.mxu1 %v9927_v50  ;;  %v10006_v49 = vld [vmem:[%s11330_s25 + $0xec0] ss:$8 sps:$4 sm:$0xff]   ;;  %v10011_v50 = vld [vmem:[%s11330_s25 + $0x6d4] ss:$8 sps:$4 sm:$0xff]  }
 0x29e   : > { %8292 = vmatprep.subr.bf16.mxu0 %v9930_v51  ;;  %v10014_v51 = vld [vmem:[%s11330_s25 + $0xed4] ss:$8 sps:$4 sm:$0xff]  }
 0x2a0   : > { %7949 = vmatpush1.bf16.msra.mxu1 %v9925_v52  ;;  %v10009_v52 = vld [vmem:[%s11330_s25 + $0x6d0] ss:$8 sps:$4 sm:$0xff]  }
 0x2a1   : > { %8293 = vmatpush1.bf16.msra.mxu0 %v9928_v53  ;;  %7961 = vmatprep.subr.bf16.mxu1 %v9933_v54  ;;  %v10012_v53 = vld [vmem:[%s11330_s25 + $0xed0] ss:$8 sps:$4 sm:$0xff]   ;;  %v10017_v54 = vld [vmem:[%s11330_s25 + $0x6e4] ss:$8 sps:$4 sm:$0xff]  }
 0x2a2   : > { %8305 = vmatprep.subr.bf16.mxu0 %v9936_v38  ;;  %v10020_v38 = vld [vmem:[%s11330_s25 + $0xee4] ss:$8 sps:$4 sm:$0xff]  }
 0x2a3   : > { %7951 = vmatmul.mubr.bf16.vlgmr.msra.gmra.mrb[0].mxu1 %v8677_v42  ;;  %v10015_v42 = vld [vmem:[%s11330_s25 + $0x6e0] ss:$8 sps:$4 sm:$0xff]  }
 0x2a4   : > { %8295 = vmatmul.mubr.bf16.vlgmr.msra.gmra.mrb[0].mxu0 %v8693_v43  ;;  %7962 = vmatpush1.bf16.msra.mxu1 %v9931_v58  ;;  %v10018_v43 = vld [vmem:[%s11330_s25 + $0xee0] ss:$8 sps:$4 sm:$0xff]   ;;  %v10023_v58 = vld [vmem:[%s11330_s25 + $0x6f4] ss:$8 sps:$4 sm:$0xff]  }
 0x2a5   : > { %8306 = vmatpush1.bf16.msra.mxu0 %v9934_v59  ;;  %7963 = vmatprep.subr.bf16.mxu1 %v9939_v31  ;;  %v10026_v59 = vld [vmem:[%s11330_s25 + $0xef4] ss:$8 sps:$4 sm:$0xff]   ;;  %v10021_v31 = vld [vmem:[%s11330_s25 + $0x6f0] ss:$8 sps:$4 sm:$0xff]  }
 0x2a6   : > { %8307 = vmatprep.subr.bf16.mxu0 %v9942_v34  ;;  %7993 = vmatprep.mubr.bf16.mxu1 %v8680_v35  ;;  %v10024_v34 = vld [vmem:[%s11330_s25 + $0xef0] ss:$8 sps:$4 sm:$0xff]   ;;  %v10029_v35 = vld [vmem:[%s11330_s25 + $0x704] ss:$8 sps:$4 sm:$0xff]  }
 0x2a7   : > { %8337 = vmatprep.mubr.bf16.mxu0 %v8696_v47  ;;  %v10032_v47 = vld [vmem:[%s11330_s25 + $0xf04] ss:$8 sps:$4 sm:$0xff]  }
 0x2a8   : > { %7964 = vmatpush1.bf16.msra.mxu1 %v9937_v60  ;;  %v11910_v60 = vld [vmem:[%s11381_s5 + $0x38] sm:$0xff] }
 0x2a9   : > { %8308 = vmatpush1.bf16.msra.mxu0 %v9940_v61  ;;  %7965 = vmatprep.subr.bf16.mxu1 %v9945_v62  ;;  %v8679_v61 = vcombine.low %v11826_v39, %v11833_v55  ;;  %v8695_v62 = vcombine.low %v11836_v56, %v11839_v57  ;;  %v10035_v39 = vld [vmem:[%s11330_s25 + $0x714] ss:$8 sps:$4 sm:$0xff]  }
 0x2aa   : > { %8309 = vmatprep.subr.bf16.mxu0 %v9948_v63  ;;  %v11917_v63 = vld [vmem:[%s11381_s5 + $0xb8] sm:$0xff] }
 0x2ab   : > { %v10038_v55 = vld [vmem:[%s11330_s25 + $0xf14] ss:$8 sps:$4 sm:$0xff]   ;;  %v8682_v56 = vcombine.high %v11910_v60, %v11917_v63 }
 0x2ac   : > { %7966 = vmatpush1.bf16.msra.mxu1 %v9943_v0  ;;  %v11920_v0 = vld [vmem:[%s11381_s5 + $0x78] sm:$0xff] }
 0x2ad   : > { %8310 = vmatpush1.bf16.msra.mxu0 %v9946_v1  ;;  %7967 = vmatprep.subr.bf16.mxu1 %v9951_v2  ;;  %v11923_v1 = vld [vmem:[%s11381_s5 + $0xf8] sm:$0xff]  ;;  %v10027_v2 = vld [vmem:[%s11330_s25 + $0x700] ss:$8 sps:$4 sm:$0xff]  }
 0x2ae   : > { %8311 = vmatprep.subr.bf16.mxu0 %v9954_v3  ;;  %v10030_v3 = vld [vmem:[%s11330_s25 + $0xf00] ss:$8 sps:$4 sm:$0xff]   ;;  %v8698_v57 = vcombine.high %v11920_v0, %v11923_v1 }
 0x2b0   : > { %7968 = vmatpush1.bf16.msra.mxu1 %v9949_v4  ;;  %v10033_v4 = vld [vmem:[%s11330_s25 + $0x710] ss:$8 sps:$4 sm:$0xff]  }
 0x2b1   : > { %8312 = vmatpush1.bf16.msra.mxu0 %v9952_v5  ;;  %7969 = vmatprep.subr.bf16.mxu1 %v9957_v6  ;;  %v10036_v5 = vld [vmem:[%s11330_s25 + $0xf10] ss:$8 sps:$4 sm:$0xff]   ;;  %v10041_v6 = vld [vmem:[%s11330_s25 + $0x724] ss:$8 sps:$4 sm:$0xff]  }
 0x2b2   : > { %8313 = vmatprep.subr.bf16.mxu0 %v9960_v7  ;;  %v10044_v7 = vld [vmem:[%s11330_s25 + $0xf24] ss:$8 sps:$4 sm:$0xff]  }
 0x2b4   : > { %7970 = vmatpush1.bf16.msra.mxu1 %v9955_v8  ;;  %v10039_v8 = vld [vmem:[%s11330_s25 + $0x720] ss:$8 sps:$4 sm:$0xff]  }
 0x2b5   : > { %8314 = vmatpush1.bf16.msra.mxu0 %v9958_v9  ;;  %7971 = vmatprep.subr.bf16.mxu1 %v9963_v10  ;;  %v10042_v9 = vld [vmem:[%s11330_s25 + $0xf20] ss:$8 sps:$4 sm:$0xff]   ;;  %v10047_v10 = vld [vmem:[%s11330_s25 + $0x734] ss:$8 sps:$4 sm:$0xff]  }
 0x2b6   : > { %8315 = vmatprep.subr.bf16.mxu0 %v9966_v11  ;;  %v10050_v11 = vld [vmem:[%s11330_s25 + $0xf34] ss:$8 sps:$4 sm:$0xff]  }
 0x2b8   : > { %7972 = vmatpush1.bf16.msra.mxu1 %v9961_v12  ;;  %v10045_v12 = vld [vmem:[%s11330_s25 + $0x730] ss:$8 sps:$4 sm:$0xff]  }
 0x2b9   : > { %8316 = vmatpush1.bf16.msra.mxu0 %v9964_v13  ;;  %7973 = vmatprep.subr.bf16.mxu1 %v9969_v14  ;;  %v10048_v13 = vld [vmem:[%s11330_s25 + $0xf30] ss:$8 sps:$4 sm:$0xff]   ;;  %v10053_v14 = vld [vmem:[%s11330_s25 + $0x744] ss:$8 sps:$4 sm:$0xff]  }
 0x2ba   : > { %8317 = vmatprep.subr.bf16.mxu0 %v9972_v15  ;;  %v10056_v15 = vld [vmem:[%s11330_s25 + $0xf44] ss:$8 sps:$4 sm:$0xff]  }
 0x2bc   : > { %7974 = vmatpush1.bf16.msra.mxu1 %v9967_v16  ;;  %v10051_v16 = vld [vmem:[%s11330_s25 + $0x740] ss:$8 sps:$4 sm:$0xff]  }
 0x2bd   : > { %8318 = vmatpush1.bf16.msra.mxu0 %v9970_v17  ;;  %7975 = vmatprep.subr.bf16.mxu1 %v9975_v18  ;;  %v10054_v17 = vld [vmem:[%s11330_s25 + $0xf40] ss:$8 sps:$4 sm:$0xff]   ;;  %v10059_v18 = vld [vmem:[%s11330_s25 + $0x754] ss:$8 sps:$4 sm:$0xff]  }
 0x2be   : > { %8319 = vmatprep.subr.bf16.mxu0 %v9978_v19  ;;  %v10062_v19 = vld [vmem:[%s11330_s25 + $0xf54] ss:$8 sps:$4 sm:$0xff]  }
 0x2c0   : > { %7976 = vmatpush1.bf16.msra.mxu1 %v9973_v20  ;;  %v10057_v20 = vld [vmem:[%s11330_s25 + $0x750] ss:$8 sps:$4 sm:$0xff]  }
 0x2c1   : > { %8320 = vmatpush1.bf16.msra.mxu0 %v9976_v21  ;;  %7977 = vmatprep.subr.bf16.mxu1 %v9981_v22  ;;  %v10060_v21 = vld [vmem:[%s11330_s25 + $0xf50] ss:$8 sps:$4 sm:$0xff]   ;;  %v10065_v22 = vld [vmem:[%s11330_s25 + $0x764] ss:$8 sps:$4 sm:$0xff]  }
 0x2c2   : > { %8321 = vmatprep.subr.bf16.mxu0 %v9984_v23  ;;  %v10068_v23 = vld [vmem:[%s11330_s25 + $0xf64] ss:$8 sps:$4 sm:$0xff]  }
 0x2c4   : > { %7978 = vmatpush1.bf16.msra.mxu1 %v9979_v26  ;;  %v10063_v26 = vld [vmem:[%s11330_s25 + $0x760] ss:$8 sps:$4 sm:$0xff]  }
 0x2c5   : > { %8322 = vmatpush1.bf16.msra.mxu0 %v9982_v27  ;;  %7979 = vmatprep.subr.bf16.mxu1 %v9987_v32  ;;  %v10066_v27 = vld [vmem:[%s11330_s25 + $0xf60] ss:$8 sps:$4 sm:$0xff]   ;;  %v10071_v32 = vld [vmem:[%s11330_s25 + $0x774] ss:$8 sps:$4 sm:$0xff]  }
 0x2c6   : > { %8323 = vmatprep.subr.bf16.mxu0 %v9990_v33  ;;  %v10074_v33 = vld [vmem:[%s11330_s25 + $0xf74] ss:$8 sps:$4 sm:$0xff]  }
 0x2c8   : > { %7980 = vmatpush1.bf16.msra.mxu1 %v9985_v36  ;;  %v10069_v36 = vld [vmem:[%s11330_s25 + $0x770] ss:$8 sps:$4 sm:$0xff]  }
 0x2c9   : > { %8324 = vmatpush1.bf16.msra.mxu0 %v9988_v37  ;;  %7981 = vmatprep.subr.bf16.mxu1 %v9993_v24  ;;  %v10072_v37 = vld [vmem:[%s11330_s25 + $0xf70] ss:$8 sps:$4 sm:$0xff]   ;;  %v10077_v24 = vld [vmem:[%s11330_s25 + $0x784] ss:$8 sps:$4 sm:$0xff]  }
 0x2ca   : > { %8325 = vmatprep.subr.bf16.mxu0 %v9996_v25  ;;  %v10080_v25 = vld [vmem:[%s11330_s25 + $0xf84] ss:$8 sps:$4 sm:$0xff]  }
 0x2cc   : > { %7982 = vmatpush1.bf16.msra.mxu1 %v9991_v29  ;;  %v10075_v29 = vld [vmem:[%s11330_s25 + $0x780] ss:$8 sps:$4 sm:$0xff]  }
 0x2cd   : > { %8326 = vmatpush1.bf16.msra.mxu0 %v9994_v30  ;;  %7983 = vmatprep.subr.bf16.mxu1 %v9999_v40  ;;  %v10078_v30 = vld [vmem:[%s11330_s25 + $0xf80] ss:$8 sps:$4 sm:$0xff]   ;;  %v10083_v40 = vld [vmem:[%s11330_s25 + $0x794] ss:$8 sps:$4 sm:$0xff]  }
 0x2ce   : > { %8327 = vmatprep.subr.bf16.mxu0 %v10002_v41  ;;  %v10086_v41 = vld [vmem:[%s11330_s25 + $0xf94] ss:$8 sps:$4 sm:$0xff]  }
 0x2d0   : > { %7984 = vmatpush1.bf16.msra.mxu1 %v9997_v44  ;;  %v10081_v44 = vld [vmem:[%s11330_s25 + $0x790] ss:$8 sps:$4 sm:$0xff]  }
 0x2d1   : > { %8328 = vmatpush1.bf16.msra.mxu0 %v10000_v45  ;;  %7985 = vmatprep.subr.bf16.mxu1 %v10005_v46  ;;  %v10084_v45 = vld [vmem:[%s11330_s25 + $0xf90] ss:$8 sps:$4 sm:$0xff]   ;;  %v10089_v46 = vld [vmem:[%s11330_s25 + $0x7a4] ss:$8 sps:$4 sm:$0xff]  }
 0x2d2   : > { %8329 = vmatprep.subr.bf16.mxu0 %v10008_v28  ;;  %v10092_v28 = vld [vmem:[%s11330_s25 + $0xfa4] ss:$8 sps:$4 sm:$0xff]  }
 0x2d4   : > { %7986 = vmatpush1.bf16.msra.mxu1 %v10003_v48  ;;  %v10087_v48 = vld [vmem:[%s11330_s25 + $0x7a0] ss:$8 sps:$4 sm:$0xff]  }
 0x2d5   : > { %8330 = vmatpush1.bf16.msra.mxu0 %v10006_v49  ;;  %7987 = vmatprep.subr.bf16.mxu1 %v10011_v50  ;;  %v10090_v49 = vld [vmem:[%s11330_s25 + $0xfa0] ss:$8 sps:$4 sm:$0xff]   ;;  %v10095_v50 = vld [vmem:[%s11330_s25 + $0x7b4] ss:$8 sps:$4 sm:$0xff]  }
 0x2d6   : > { %8331 = vmatprep.subr.bf16.mxu0 %v10014_v51  ;;  %v10098_v51 = vld [vmem:[%s11330_s25 + $0xfb4] ss:$8 sps:$4 sm:$0xff]  }
 0x2d8   : > { %7988 = vmatpush1.bf16.msra.mxu1 %v10009_v52  ;;  %v10093_v52 = vld [vmem:[%s11330_s25 + $0x7b0] ss:$8 sps:$4 sm:$0xff]  }
 0x2d9   : > { %8332 = vmatpush1.bf16.msra.mxu0 %v10012_v53  ;;  %7989 = vmatprep.subr.bf16.mxu1 %v10017_v54  ;;  %v10096_v53 = vld [vmem:[%s11330_s25 + $0xfb0] ss:$8 sps:$4 sm:$0xff]   ;;  %v10101_v54 = vld [vmem:[%s11330_s25 + $0x7c4] ss:$8 sps:$4 sm:$0xff]  }
 0x2da   : > { %8333 = vmatprep.subr.bf16.mxu0 %v10020_v38  ;;  %v10104_v38 = vld [vmem:[%s11330_s25 + $0xfc4] ss:$8 sps:$4 sm:$0xff]  }
 0x2dc   : > { %7990 = vmatpush1.bf16.msra.mxu1 %v10015_v42  ;;  %v10099_v42 = vld [vmem:[%s11330_s25 + $0x7c0] ss:$8 sps:$4 sm:$0xff]  }
 0x2dd   : > { %8334 = vmatpush1.bf16.msra.mxu0 %v10018_v43  ;;  %7991 = vmatprep.subr.bf16.mxu1 %v10023_v58  ;;  %v10102_v43 = vld [vmem:[%s11330_s25 + $0xfc0] ss:$8 sps:$4 sm:$0xff]   ;;  %v10107_v58 = vld [vmem:[%s11330_s25 + $0x7d4] ss:$8 sps:$4 sm:$0xff]  }
 0x2de   : > { %8335 = vmatprep.subr.bf16.mxu0 %v10026_v59  ;;  %v10110_v59 = vld [vmem:[%s11330_s25 + $0xfd4] ss:$8 sps:$4 sm:$0xff]  }
 0x2e0   : > { %7992 = vmatpush1.bf16.msra.mxu1 %v10021_v31  ;;  %v10105_v31 = vld [vmem:[%s11330_s25 + $0x7d0] ss:$8 sps:$4 sm:$0xff]  }
 0x2e1   : > { %8336 = vmatpush1.bf16.msra.mxu0 %v10024_v34  ;;  %8004 = vmatprep.subr.bf16.mxu1 %v10029_v35  ;;  %v10108_v34 = vld [vmem:[%s11330_s25 + $0xfd0] ss:$8 sps:$4 sm:$0xff]   ;;  %v10113_v35 = vld [vmem:[%s11330_s25 + $0x7e4] ss:$8 sps:$4 sm:$0xff]  }
 0x2e2   : > { %8348 = vmatprep.subr.bf16.mxu0 %v10032_v47  ;;  %v10116_v47 = vld [vmem:[%s11330_s25 + $0xfe4] ss:$8 sps:$4 sm:$0xff]  }
 0x2e3   : > { %7994 = vmatmul.mubr.bf16.vlgmr.msra.gmra.mrb[0].mxu1 %v8679_v61  ;;  %v10111_v61 = vld [vmem:[%s11330_s25 + $0x7e0] ss:$8 sps:$4 sm:$0xff]  }
 0x2e4   : > { %8338 = vmatmul.mubr.bf16.vlgmr.msra.gmra.mrb[0].mxu0 %v8695_v62  ;;  %8005 = vmatpush1.bf16.msra.mxu1 %v10027_v2  ;;  %v10114_v62 = vld [vmem:[%s11330_s25 + $0xfe0] ss:$8 sps:$4 sm:$0xff]   ;;  %v10119_v2 = vld [vmem:[%s11330_s25 + $0x7f4] ss:$8 sps:$4 sm:$0xff]  }
 0x2e5   : > { %8349 = vmatpush1.bf16.msra.mxu0 %v10030_v3  ;;  %8006 = vmatprep.subr.bf16.mxu1 %v10035_v39  ;;  %v10122_v3 = vld [vmem:[%s11330_s25 + $0xff4] ss:$8 sps:$4 sm:$0xff]   ;;  %v10117_v39 = vld [vmem:[%s11330_s25 + $0x7f0] ss:$8 sps:$4 sm:$0xff]  }
 0x2e6   : > { %8350 = vmatprep.subr.bf16.mxu0 %v10038_v55  ;;  %8036 = vmatprep.mubr.bf16.mxu1 %v8682_v56  ;;  %v10120_v55 = vld [vmem:[%s11330_s25 + $0xff0] ss:$8 sps:$4 sm:$0xff]   ;;  %v8681_v56 = vcombine.low %v11910_v60, %v11917_v63  ;;  %v4419_v63 = vld [vmem:[%s4412_s10] sm:$0x3]  ;;  %s9216_s25 = sshll.u32 (%p10286_p9), %s8502_s24, 2 }
 0x2e7   : > { %8380 = vmatprep.mubr.bf16.mxu0 %v8698_v57  ;;  %v8697_v57 = vcombine.low %v11920_v0, %v11923_v1  ;;  %s8504_s28 = scalar_lea.vmem (%p10286_p9), %s12045_s3, %s9216_s25 }
 0x2e8   : > { %8007 = vmatpush1.bf16.msra.mxu1 %v10033_v4  ;;  %v4421_v4 = vlaneseq }
 0x2e9   : > { %8351 = vmatpush1.bf16.msra.mxu0 %v10036_v5  ;;  %8008 = vmatprep.subr.bf16.mxu1 %v10041_v6 }
 0x2ea   : > { %8352 = vmatprep.subr.bf16.mxu0 %v10044_v7  ;;  %v4422_v5 = vshrl.u32 %v4421_v4, 7 }
 0x2ec   : > { %8009 = vmatpush1.bf16.msra.mxu1 %v10039_v8  ;;  %v4423_v60 = vsub.s32 0, %v4422_v5  ;;  %v4427_v6 = vsub.s32 1, %v4422_v5  ;;  %vm8409_vm0 = vcmp.lt.s32.totalorder %v4422_v5, 4 }
 0x2ed   : > { %8353 = vmatpush1.bf16.msra.mxu0 %v10042_v9  ;;  %8010 = vmatprep.subr.bf16.mxu1 %v10047_v10 }
 0x2ee   : > { %8354 = vmatprep.subr.bf16.mxu0 %v10050_v11  ;;  %v4424_v0 = vrot.slane %v4419_v63, %v4423_v60  ;;  %v4428_v8 = vrot.slane %v4419_v63, %v4427_v6 }
 0x2f0   : > { %8011 = vmatpush1.bf16.msra.mxu1 %v10045_v12 }
 0x2f1   : > { %8355 = vmatpush1.bf16.msra.mxu0 %v10048_v13  ;;  %8012 = vmatprep.subr.bf16.mxu1 %v10053_v14 }
 0x2f2   : > { %8356 = vmatprep.subr.bf16.mxu0 %v10056_v15 }
 0x2f4   : > { %8013 = vmatpush1.bf16.msra.mxu1 %v10051_v16 }
 0x2f5   : > { %8357 = vmatpush1.bf16.msra.mxu0 %v10054_v17  ;;  %8014 = vmatprep.subr.bf16.mxu1 %v10059_v18 }
 0x2f6   : > { %8358 = vmatprep.subr.bf16.mxu0 %v10062_v19 }
 0x2f8   : > { %8015 = vmatpush1.bf16.msra.mxu1 %v10057_v20 }
 0x2f9   : > { %8359 = vmatpush1.bf16.msra.mxu0 %v10060_v21  ;;  %8016 = vmatprep.subr.bf16.mxu1 %v10065_v22 }
 0x2fa   : > { %8360 = vmatprep.subr.bf16.mxu0 %v10068_v23 }
 0x2fc   : > { %8017 = vmatpush1.bf16.msra.mxu1 %v10063_v26 }
 0x2fd   : > { %8361 = vmatpush1.bf16.msra.mxu0 %v10066_v27  ;;  %8018 = vmatprep.subr.bf16.mxu1 %v10071_v32 }
 0x2fe   : > { %8362 = vmatprep.subr.bf16.mxu0 %v10074_v33 }
 0x300   : > { %8019 = vmatpush1.bf16.msra.mxu1 %v10069_v36 }
 0x301   : > { %8363 = vmatpush1.bf16.msra.mxu0 %v10072_v37  ;;  %8020 = vmatprep.subr.bf16.mxu1 %v10077_v24 }
 0x302   : > { %8364 = vmatprep.subr.bf16.mxu0 %v10080_v25 }
 0x304   : > { %8021 = vmatpush1.bf16.msra.mxu1 %v10075_v29 }
 0x305   : > { %8365 = vmatpush1.bf16.msra.mxu0 %v10078_v30  ;;  %8022 = vmatprep.subr.bf16.mxu1 %v10083_v40 }
 0x306   : > { %8366 = vmatprep.subr.bf16.mxu0 %v10086_v41 }
 0x308   : > { %8023 = vmatpush1.bf16.msra.mxu1 %v10081_v44 }
 0x309   : > { %8367 = vmatpush1.bf16.msra.mxu0 %v10084_v45  ;;  %8024 = vmatprep.subr.bf16.mxu1 %v10089_v46 }
 0x30a   : > { %8368 = vmatprep.subr.bf16.mxu0 %v10092_v28 }
 0x30c   : > { %8025 = vmatpush1.bf16.msra.mxu1 %v10087_v48 }
 0x30d   : > { %8369 = vmatpush1.bf16.msra.mxu0 %v10090_v49  ;;  %8026 = vmatprep.subr.bf16.mxu1 %v10095_v50 }
 0x30e   : > { %8370 = vmatprep.subr.bf16.mxu0 %v10098_v51 }
 0x310   : > { %8027 = vmatpush1.bf16.msra.mxu1 %v10093_v52 }
 0x311   : > { %8371 = vmatpush1.bf16.msra.mxu0 %v10096_v53  ;;  %8028 = vmatprep.subr.bf16.mxu1 %v10101_v54 }
 0x312   : > { %8372 = vmatprep.subr.bf16.mxu0 %v10104_v38 }
 0x314   : > { %8029 = vmatpush1.bf16.msra.mxu1 %v10099_v42 }
 0x315   : > { %8373 = vmatpush1.bf16.msra.mxu0 %v10102_v43  ;;  %8030 = vmatprep.subr.bf16.mxu1 %v10107_v58 }
 0x316   : > { %8374 = vmatprep.subr.bf16.mxu0 %v10110_v59 }
 0x318   : > { %8031 = vmatpush1.bf16.msra.mxu1 %v10105_v31 }
 0x319   : > { %8375 = vmatpush1.bf16.msra.mxu0 %v10108_v34  ;;  %8032 = vmatprep.subr.bf16.mxu1 %v10113_v35 }
 0x31a   : > { %8376 = vmatprep.subr.bf16.mxu0 %v10116_v47 }
 0x31c   : > { %8033 = vmatpush1.bf16.msra.mxu1 %v10111_v61 }
 0x31d   : > { %8377 = vmatpush1.bf16.msra.mxu0 %v10114_v62  ;;  %8034 = vmatprep.subr.bf16.mxu1 %v10119_v2 }
 0x31e   : > { %8378 = vmatprep.subr.bf16.mxu0 %v10122_v3 }
 0x320   : > { %8035 = vmatpush1.bf16.msra.mxu1 %v10117_v39 }
 0x321   : > { %8379 = vmatpush1.bf16.msra.mxu0 %v10120_v55 }
 0x323   : > { %8037 = vmatmul.mubr.bf16.vlgmr.msra.gmra.mrb[0].mxu1 %v8681_v56 }
 0x324   : > { %8381 = vmatmul.mubr.bf16.vlgmr.msra.gmra.mrb[0].mxu0 %v8697_v57 }
 0x3f6   : > { %v8038_v1 = vpop.f32.mrb[0].mxu1 }
 0x3f7   : > { %v8382_v7 = vpop.f32.mrb[0].mxu0  ;;  %v8040_v10 = vpop.f32.mrb[1].mxu1 }
 0x3f8   : > { %v9223_v9 = vadd.f32 %v8382_v7, %v8038_v1  ;;  %v8384_v11 = vpop.f32.mrb[1].mxu0  ;;  %v8042_v13 = vpop.f32.mrb[2].mxu1 }
 0x3f9   : > { %v9224_v12 = vadd.f32 %v8384_v11, %v8040_v10  ;;  %v8386_v14 = vpop.f32.mrb[2].mxu0  ;;  %v8044_v17 = vpop.f32.mrb[3].mxu1 }
 0x3fa   : > { %v8391_v15 = vadd.f32 %v9223_v9, %v4424_v0  ;;  %v9225_v16 = vadd.f32 %v8386_v14, %v8042_v13  ;;  %v8388_v18 = vpop.f32.mrb[3].mxu0 }
 0x3fb   : > { %v8392_v19 = vadd.f32 %v9224_v12, %v4428_v8  ;;  %v9226_v20 = vadd.f32 %v8388_v18, %v8044_v17 }
 0x3fc   : > { %v8411_v21 = vsel %vm8409_vm0, %v8391_v15, 0.0  ;;  %v8393_v44 = vadd.f32 %v9225_v16, %v4424_v0 }
 0x3fd   : > { %v8416_v22 = vrot.slane %v8411_v21, 4  ;;  %v8412_v23 = vsel %vm8409_vm0, %v8392_v19, 0.0  ;;  %v8394_v46 = vadd.f32 %v9226_v20, %v4428_v8 }
 0x3fe   : > { %v8423_v26 = vrot.slane %v8412_v23, 4 }
 0x3ff   : > { %v8417_v27 = vadd.f32 %v8416_v22, %v8411_v21 }
 0x400   : > { %v8424_v32 = vadd.f32 %v8423_v26, %v8412_v23 }
 0x401   : > { %v8418_v33 = vrot.slane %v8417_v27, 2 }
 0x402   : > { %v8425_v36 = vrot.slane %v8424_v32, 2 }
 0x403   : > { %v8419_v37 = vadd.f32 %v8418_v33, %v8417_v27 }
 0x404   : > { %v8426_v24 = vadd.f32 %v8425_v36, %v8424_v32 }
 0x405   : > { %v8420_v25 = vrot.slane %v8419_v37, 1 }
 0x406   : > { %v8427_v29 = vrot.slane %v8426_v24, 1 }
 0x407   : > { %v8421_v30 = vadd.f32 %v8420_v25, %v8419_v37 }
 0x408   : > { %v8428_v40 = vadd.f32 %v8427_v29, %v8426_v24 }
 0x409   : > { %v8429_v41 = vmul.f32 0.25, %v8421_v30 }
 0x40a   : > { %v8430_v45 = vmul.f32 0.25, %v8428_v40 }
 0x40b   : > { %v8431_v28 = vsub.f32 %v8391_v15, %v8429_v41  ;;  %v8433_v48 = vsub.f32 %v8393_v44, %v8429_v41 }
 0x40c   : > { %v8432_v49 = vsub.f32 %v8392_v19, %v8430_v45  ;;  %v8434_v50 = vsub.f32 %v8394_v46, %v8430_v45 }
 0x40d   : > { %v8435_v51 = vsel %vm8409_vm0, %v8431_v28, 0.0 }
 0x40e   : > { %v8439_v52 = vmul.f32 %v8435_v51, %v8435_v51  ;;  %v8436_v53 = vsel %vm8409_vm0, %v8432_v49, 0.0 }
 0x40f   : > { %v8440_v54 = vmul.f32 %v8436_v53, %v8436_v53 }
 0x410   : > { %v8444_v38 = vrot.slane %v8439_v52, 4 }
 0x411   : > { %v8451_v42 = vrot.slane %v8440_v54, 4 }
 0x412   : > { %v8445_v43 = vadd.f32 %v8444_v38, %v8439_v52 }
 0x413   : > { %v8452_v58 = vadd.f32 %v8451_v42, %v8440_v54 }
 0x414   : > { %v8446_v59 = vrot.slane %v8445_v43, 2 }
 0x415   : > { %v8453_v31 = vrot.slane %v8452_v58, 2 }
 0x416   : > { %v8447_v34 = vadd.f32 %v8446_v59, %v8445_v43 }
 0x417   : > { %v8454_v35 = vadd.f32 %v8453_v31, %v8452_v58 }
 0x418   : > { %v8448_v47 = vrot.slane %v8447_v34, 1 }
 0x419   : > { %v8455_v61 = vrot.slane %v8454_v35, 1 }
 0x41a   : > { %v8449_v62 = vadd.f32 %v8448_v47, %v8447_v34 }
 0x41b   : > { %v8456_v2 = vadd.f32 %v8455_v61, %v8454_v35 }
 0x41c   : > { %v8457_v3 = vmul.f32 0.25, %v8449_v62 }
 0x41d   : > { %v8458_v39 = vmul.f32 0.25, %v8456_v2 }
 0x41e   : > { %v8459_v55 = vadd.f32 1e-05, %v8457_v3 }
 0x41f   : > { %v8460_v56 = vadd.f32 1e-05, %v8458_v39 }
 0x420   : > { %10123 = vrsqrt.f32 %v8459_v55 }
 0x421   : > { %10125 = vrsqrt.f32 %v8460_v56 }
 0x42a   : > { %v10124_v57 = vpop.eup %10123 }
 0x42b   : > { %v10126_v4 = vpop.eup %10125  ;;  %v8463_v5 = vmul.f32 %v10124_v57, %v8431_v28  ;;  %v8465_v60 = vmul.f32 %v10124_v57, %v8433_v48 }
 0x42c   : > { %v8464_v63 = vmul.f32 %v10126_v4, %v8432_v49  ;;  %v8466_v6 = vmul.f32 %v10126_v4, %v8434_v50 }
 0x42d   : > { %vm8467_vm1 = vcmp.ge.f32.partialorder %v8463_v5, 0.0  ;;  %v8471_v0 = vmul.f32 0.2, %v8463_v5  ;;  %vm8469_vm2 = vcmp.ge.f32.partialorder %v8465_v60, 0.0  ;;  %v8473_v1 = vmul.f32 0.2, %v8465_v60 }
 0x42e   : > { %vm8468_vm3 = vcmp.ge.f32.partialorder %v8464_v63, 0.0  ;;  %v8472_v7 = vmul.f32 0.2, %v8464_v63  ;;  %vm8470_vm4 = vcmp.ge.f32.partialorder %v8466_v6, 0.0  ;;  %v8474_v8 = vmul.f32 0.2, %v8466_v6 }
 0x42f   : > { %v8475_v9 = vsel %vm8467_vm1, %v8463_v5, %v8471_v0  ;;  %v8477_v10 = vsel %vm8469_vm2, %v8465_v60, %v8473_v1  ;;  %8499 = sbr.rel (!%p10286_p9) target bundleno = 1084 (0x43c), region = 96 }
 0x430   : > { %v8476_v11 = vsel %vm8468_vm3, %v8464_v63, %v8472_v7  ;;  %v8478_v12 = vsel %vm8470_vm4, %v8466_v6, %v8474_v8 }
 0x431   : > { %v9221_v13 = vpack.c.bf16 %v8476_v11, %v8475_v9  ;;  %v9222_v14 = vpack.c.bf16 %v8478_v12, %v8477_v10 }
 0x433   : > { %8491 = vst [vmem:[%s4396_s12] sm:$0xff] %v9221_v13  ;;  %8492 = vst [vmem:[%s4396_s12 + $0x8] sm:$0xff] %v9222_v14 }
 0x43a   : > { %v8534_v15 = vld [vmem:[%s4396_s12] sm:$0xff]  ;;  %v8536_v16 = vld [vmem:[%s4396_s12 + $0x8] sm:$0xff] }
 0x43b   : > { %8535 = vst [vmem:[%s8504_s28] sm:$0xff] %v8534_v15  ;;  %8537 = vst [vmem:[%s8504_s28 + $0x10] sm:$0xff] %v8536_v16 }
 0x43c PF: > { %s13_s20 = sadd.s32 1, %s10197_s20   ;;  %s12047_s12 = smov %s10169_s13 }
 0x43d   : > { %p10_p2 = scmp.ge.s32.totalorder %s13_s20, 6   ;;  %s12048_s13 = smov %s10291_s4 }
 0x43e   : > { %s12049_s14 = smov %s10177_s15  ;;  %s12050_s15 = smov %s10280_s27 }
 0x43f   : > { %s12051_s16 = smov %s10189_s18  ;;  %s12052_s17 = smov %s10193_s19 }
 0x440   : > { %s12053_s18 = smov %s12056_s22  ;;  %s12054_s19 = smov %s12060_s23 }
 0x441   :  { %12 = sbr.rel (!%p10_p2) target bundleno = 5 (0x5), region = 177 }

// kernel: discriminator_forward.9
= control target key start
LH: loop header
LB: loop body
LE: loop exit
PB: predicated region body
PF: predicated region fallthrough
CT: control target
= control target key end

     0   :  { %s8073_s12 = smov 0   ;;  %s8075_s13 = smov 0   ;;  %s9767_s0 = inlined_call_operand.vmem [shape: bf16[2,16,8192], index: 0, kind: input, shape index: {}]   ;;  %s9768_s1 = inlined_call_operand.vmem [shape: bf16[8192,128], index: 1, kind: input, shape index: {}]   ;;  %s9769_s2 = inlined_call_operand.vmem [shape: f32[1,128], index: 2, kind: input, shape index: {}]   ;;  %s9770_s3 = inlined_call_operand.vmem [shape: f32[2,16,128], index: 3, kind: output, shape index: {}]  }
   0x1   :  { %s8077_s14 = smov 0  }
   0x2 LB: > { %s32_s15 = sadd.s32 1, %s8047_s13  ;;  %p6203_p0 = scmp.ge.s32.totalorder %s8051_s14, 1  ;;  %s8051_s14 = sphi %s8077_s14, %s13_s14   ;;  %s8047_s13 = sphi %s8075_s13, %s9772_s13   ;;  %s8043_s12 = sphi %s8073_s12, %s9771_s12  }
   0x3   : > { %p34_p1 = scmp.ge.s32.totalorder %s32_s15, 2  ;;  %p189_p2 = scmp.lt.s32.totalorder %s8051_s14, 3 }
   0x5   : > { %s9774_s15 = smov (%p34_p1, %s32_s15), 0  ;;  %p190_p3 = pnand %p6203_p0, %p189_p2 }
   0x6   : > { %v7517_v0 = vld [vmem:[%s9768_s1 + $0x40] sm:$0xff] (!%p190_p3)   ;;  %v7521_v4 = vld [vmem:[%s9768_s1 + $0x48] sm:$0xff] (!%p190_p3)   ;;  %v7525_v8 = vld [vmem:[%s9768_s1 + $0x50] sm:$0xff] (!%p190_p3)   ;;  %p232_p4 = scmp.lt.s32.totalorder (!%p190_p3), %s8043_s12, 1 }
   0x7   : > { %193 = sbr.rel (%p190_p3) target bundleno = 745 (0x2e9), region = 32  ;;  %v7518_v1 = vld [vmem:[%s9768_s1 + $0xc0] sm:$0xff] (!%p190_p3)   ;;  %6789 = vmatprep.subr.bf16.mxu0 (!%p190_p3), %v7517_v0  ;;  %v7522_v5 = vld [vmem:[%s9768_s1 + $0xc8] sm:$0xff] (!%p190_p3)   ;;  %v7526_v9 = vld [vmem:[%s9768_s1 + $0xd0] sm:$0xff] (!%p190_p3)  }
   0x8   : > { %v7519_v2 = vld [vmem:[%s9768_s1] sm:$0xff] (!%p190_p3)   ;;  %6811 = vmatprep.subr.bf16.mxu1 (!%p190_p3), %v7518_v1  ;;  %v7523_v6 = vld [vmem:[%s9768_s1 + $0x8] sm:$0xff] (!%p190_p3)   ;;  %v7527_v10 = vld [vmem:[%s9768_s1 + $0x10] sm:$0xff] (!%p190_p3)  }
   0x9   : > { %v7520_v3 = vld [vmem:[%s9768_s1 + $0x80] sm:$0xff] (!%p190_p3)   ;;  %6790 = vmatpush3.bf16.msra.mxu0 (!%p190_p3), %v7519_v2  ;;  %v7524_v7 = vld [vmem:[%s9768_s1 + $0x88] sm:$0xff] (!%p190_p3)   ;;  %v7528_v11 = vld [vmem:[%s9768_s1 + $0x90] sm:$0xff] (!%p190_p3)  }
   0xa   : > { %6812 = vmatpush3.bf16.msra.mxu1 (!%p190_p3), %v7520_v3  ;;  %6791 = vmatprep.subr.bf16.mxu0 (!%p190_p3), %v7521_v4  ;;  %v7529_v12 = vld [vmem:[%s9768_s1 + $0x58] sm:$0xff] (!%p190_p3)   ;;  %v7533_v16 = vld [vmem:[%s9768_s1 + $0x60] sm:$0xff] (!%p190_p3)   ;;  %v7537_v20 = vld [vmem:[%s9768_s1 + $0x68] sm:$0xff] (!%p190_p3)  }
   0xb   : > { %6813 = vmatprep.subr.bf16.mxu1 (!%p190_p3), %v7522_v5  ;;  %v7530_v13 = vld [vmem:[%s9768_s1 + $0xd8] sm:$0xff] (!%p190_p3)   ;;  %v7534_v17 = vld [vmem:[%s9768_s1 + $0xe0] sm:$0xff] (!%p190_p3)   ;;  %v7538_v21 = vld [vmem:[%s9768_s1 + $0xe8] sm:$0xff] (!%p190_p3)  }
   0xc   : > { %v7531_v14 = vld [vmem:[%s9768_s1 + $0x18] sm:$0xff] (!%p190_p3)   ;;  %v7535_v18 = vld [vmem:[%s9768_s1 + $0x20] sm:$0xff] (!%p190_p3)   ;;  %v7539_v22 = vld [vmem:[%s9768_s1 + $0x28] sm:$0xff] (!%p190_p3)  }
   0xd   : > { %6792 = vmatpush3.bf16.msra.mxu0 (!%p190_p3), %v7523_v6  ;;  %v7532_v15 = vld [vmem:[%s9768_s1 + $0x98] sm:$0xff] (!%p190_p3)   ;;  %v7536_v19 = vld [vmem:[%s9768_s1 + $0xa0] sm:$0xff] (!%p190_p3)   ;;  %v7540_v23 = vld [vmem:[%s9768_s1 + $0xa8] sm:$0xff] (!%p190_p3)  }
   0xe   : > { %6814 = vmatpush3.bf16.msra.mxu1 %v7524_v7  ;;  %6793 = vmatprep.subr.bf16.mxu0 %v7525_v8  ;;  %s9776_s12 = smov (!%p232_p4, %s8043_s12), 1  ;;  %v7541_v24 = vld [vmem:[%s9768_s1 + $0x70] sm:$0xff]   ;;  %v7545_v28 = vld [vmem:[%s9768_s1 + $0x78] sm:$0xff]   ;;  %v7549_v40 = vld [vmem:[%s9768_s1 + $0x140] sm:$0xff]  }
   0xf   : > { %6815 = vmatprep.subr.bf16.mxu1 %v7526_v9  ;;  %v7542_v25 = vld [vmem:[%s9768_s1 + $0xf0] sm:$0xff]   ;;  %s6787_s24 = sshll.u32 %s9776_s12, 9  ;;  %v7546_v29 = vld [vmem:[%s9768_s1 + $0xf8] sm:$0xff]   ;;  %v7550_v41 = vld [vmem:[%s9768_s1 + $0x1c0] sm:$0xff]  }
  0x10   : > { %v7543_v26 = vld [vmem:[%s9768_s1 + $0x30] sm:$0xff]   ;;  %s8191_s6 = scalar_lea.vmem %s9767_s0, %s6787_s24  ;;  %v7547_v30 = vld [vmem:[%s9768_s1 + $0x38] sm:$0xff]   ;;  %v7551_v42 = vld [vmem:[%s9768_s1 + $0x100] sm:$0xff]  }
  0x11   : > { %6794 = vmatpush3.bf16.msra.mxu0 %v7527_v10  ;;  %v7544_v27 = vld [vmem:[%s9768_s1 + $0xb0] sm:$0xff]   ;;  %v7548_v31 = vld [vmem:[%s9768_s1 + $0xb8] sm:$0xff]   ;;  %v277_v32 = vld [vmem:[%s8191_s6] sm:$0xff] }
  0x12   : > { %6816 = vmatpush3.bf16.msra.mxu1 %v7528_v11  ;;  %6795 = vmatprep.subr.bf16.mxu0 %v7529_v12  ;;  %v309_v33 = vld [vmem:[%s8191_s6 + $0x100] sm:$0xff]  ;;  %v278_v34 = vld [vmem:[%s8191_s6 + $0x8] sm:$0xff]  ;;  %v7557_v48 = vld [vmem:[%s9768_s1 + $0x150] sm:$0xff]  }
  0x13   : > { %6817 = vmatprep.subr.bf16.mxu1 %v7530_v13  ;;  %v6209_v35 = vcombine.low %v277_v32, %v309_v33  ;;  %v6210_v36 = vcombine.high %v277_v32, %v309_v33  ;;  %v310_v37 = vld [vmem:[%s8191_s6 + $0x108] sm:$0xff]  ;;  %v7552_v43 = vld [vmem:[%s9768_s1 + $0x180] sm:$0xff]   ;;  %v7558_v49 = vld [vmem:[%s9768_s1 + $0x1d0] sm:$0xff]  }
  0x14   : > { %v6211_v38 = vcombine.low %v278_v34, %v310_v37  ;;  %v6212_v39 = vcombine.high %v278_v34, %v310_v37  ;;  %v7553_v44 = vld [vmem:[%s9768_s1 + $0x148] sm:$0xff]   ;;  %v7559_v50 = vld [vmem:[%s9768_s1 + $0x110] sm:$0xff]   ;;  %v7561_v52 = vld [vmem:[%s9768_s1 + $0x158] sm:$0xff]  }
  0x15   : > { %6796 = vmatpush3.bf16.msra.mxu0 %v7531_v14  ;;  %4789 = vmatprep.mubr.bf16.mxu0 %v6210_v36  ;;  %v7554_v45 = vld [vmem:[%s9768_s1 + $0x1c8] sm:$0xff]   ;;  %v7560_v51 = vld [vmem:[%s9768_s1 + $0x190] sm:$0xff]   ;;  %v7562_v53 = vld [vmem:[%s9768_s1 + $0x1d8] sm:$0xff]  }
  0x16   : > { %6818 = vmatpush3.bf16.msra.mxu1 %v7532_v15  ;;  %6797 = vmatprep.subr.bf16.mxu0 %v7533_v16  ;;  %v7555_v46 = vld [vmem:[%s9768_s1 + $0x108] sm:$0xff]   ;;  %v7563_v54 = vld [vmem:[%s9768_s1 + $0x118] sm:$0xff]   ;;  %v7565_v56 = vld [vmem:[%s9768_s1 + $0x160] sm:$0xff]  }
  0x17   : > { %6819 = vmatprep.subr.bf16.mxu1 %v7534_v17  ;;  %4830 = vmatprep.mubr.bf16.mxu1 %v6212_v39  ;;  %v7556_v47 = vld [vmem:[%s9768_s1 + $0x188] sm:$0xff]   ;;  %v7564_v55 = vld [vmem:[%s9768_s1 + $0x198] sm:$0xff]   ;;  %v7566_v57 = vld [vmem:[%s9768_s1 + $0x1e0] sm:$0xff]  }
  0x18   : > { %v7567_v58 = vld [vmem:[%s9768_s1 + $0x120] sm:$0xff]   ;;  %v7569_v60 = vld [vmem:[%s9768_s1 + $0x168] sm:$0xff]   ;;  %v7573_v0 = vld [vmem:[%s9768_s1 + $0x170] sm:$0xff]  }
  0x19   : > { %6798 = vmatpush3.bf16.msra.mxu0 %v7535_v18  ;;  %v7568_v59 = vld [vmem:[%s9768_s1 + $0x1a0] sm:$0xff]   ;;  %v7570_v61 = vld [vmem:[%s9768_s1 + $0x1e8] sm:$0xff]   ;;  %v7574_v1 = vld [vmem:[%s9768_s1 + $0x1f0] sm:$0xff]  }
  0x1a   : > { %6820 = vmatpush3.bf16.msra.mxu1 %v7536_v19  ;;  %6799 = vmatprep.subr.bf16.mxu0 %v7537_v20  ;;  %v7571_v62 = vld [vmem:[%s9768_s1 + $0x128] sm:$0xff]   ;;  %v7575_v2 = vld [vmem:[%s9768_s1 + $0x130] sm:$0xff]   ;;  %v7577_v4 = vld [vmem:[%s9768_s1 + $0x178] sm:$0xff]  }
  0x1b   : > { %6821 = vmatprep.subr.bf16.mxu1 %v7538_v21  ;;  %v7572_v63 = vld [vmem:[%s9768_s1 + $0x1a8] sm:$0xff]   ;;  %v7576_v3 = vld [vmem:[%s9768_s1 + $0x1b0] sm:$0xff]   ;;  %v7578_v5 = vld [vmem:[%s9768_s1 + $0x1f8] sm:$0xff]  }
  0x1c   : > { %v7579_v6 = vld [vmem:[%s9768_s1 + $0x138] sm:$0xff]   ;;  %v279_v8 = vld [vmem:[%s8191_s6 + $0x10] sm:$0xff]  ;;  %v7581_v16 = vld [vmem:[%s9768_s1 + $0x240] sm:$0xff]  }
  0x1d   : > { %6800 = vmatpush3.bf16.msra.mxu0 %v7539_v22  ;;  %v7580_v7 = vld [vmem:[%s9768_s1 + $0x1b8] sm:$0xff]   ;;  %v311_v9 = vld [vmem:[%s8191_s6 + $0x110] sm:$0xff]  ;;  %v7582_v17 = vld [vmem:[%s9768_s1 + $0x2c0] sm:$0xff]  }
  0x1e   : > { %6822 = vmatpush3.bf16.msra.mxu1 %v7540_v23  ;;  %6801 = vmatprep.subr.bf16.mxu0 %v7541_v24  ;;  %v6213_v10 = vcombine.low %v279_v8, %v311_v9  ;;  %v6214_v11 = vcombine.high %v279_v8, %v311_v9  ;;  %v280_v12 = vld [vmem:[%s8191_s6 + $0x18] sm:$0xff]  ;;  %v7583_v18 = vld [vmem:[%s9768_s1 + $0x200] sm:$0xff]   ;;  %v7585_v20 = vld [vmem:[%s9768_s1 + $0x248] sm:$0xff]  }
  0x1f   : > { %6823 = vmatprep.subr.bf16.mxu1 %v7542_v25  ;;  %v312_v13 = vld [vmem:[%s8191_s6 + $0x118] sm:$0xff]  ;;  %v7584_v19 = vld [vmem:[%s9768_s1 + $0x280] sm:$0xff]   ;;  %v7586_v21 = vld [vmem:[%s9768_s1 + $0x2c8] sm:$0xff]  }
  0x20   : > { %v6215_v14 = vcombine.low %v280_v12, %v312_v13  ;;  %v6216_v15 = vcombine.high %v280_v12, %v312_v13  ;;  %v7587_v22 = vld [vmem:[%s9768_s1 + $0x208] sm:$0xff]   ;;  %v7589_v24 = vld [vmem:[%s9768_s1 + $0x250] sm:$0xff]   ;;  %v7597_v32 = vld [vmem:[%s9768_s1 + $0x260] sm:$0xff]  }
  0x21   : > { %6802 = vmatpush3.bf16.msra.mxu0 %v7543_v26  ;;  %v7588_v23 = vld [vmem:[%s9768_s1 + $0x288] sm:$0xff]   ;;  %v7590_v25 = vld [vmem:[%s9768_s1 + $0x2d0] sm:$0xff]   ;;  %v7598_v33 = vld [vmem:[%s9768_s1 + $0x2e0] sm:$0xff]  }
  0x22   : > { %6824 = vmatpush3.bf16.msra.mxu1 %v7544_v27  ;;  %6803 = vmatprep.subr.bf16.mxu0 %v7545_v28  ;;  %v7591_v26 = vld [vmem:[%s9768_s1 + $0x210] sm:$0xff]   ;;  %v7593_v28 = vld [vmem:[%s9768_s1 + $0x258] sm:$0xff]   ;;  %v7599_v34 = vld [vmem:[%s9768_s1 + $0x220] sm:$0xff]  }
  0x23   : > { %6825 = vmatprep.subr.bf16.mxu1 %v7546_v29  ;;  %v7592_v27 = vld [vmem:[%s9768_s1 + $0x290] sm:$0xff]   ;;  %v7594_v29 = vld [vmem:[%s9768_s1 + $0x2d8] sm:$0xff]   ;;  %v7601_v36 = vld [vmem:[%s9768_s1 + $0x268] sm:$0xff]  }
  0x24   : > { %v7602_v37 = vld [vmem:[%s9768_s1 + $0x2e8] sm:$0xff]   ;;  %v7629_v8 = vld [vmem:[%s9768_s1 + $0x360] sm:$0xff]  }
  0x25   : > { %6804 = vmatpush3.bf16.msra.mxu0 %v7547_v30  ;;  %v7595_v30 = vld [vmem:[%s9768_s1 + $0x218] sm:$0xff]   ;;  %v7604_v39 = vld [vmem:[%s9768_s1 + $0x2a8] sm:$0xff]   ;;  %v7630_v9 = vld [vmem:[%s9768_s1 + $0x3e0] sm:$0xff]  }
  0x26   : > { %6826 = vmatpush3.bf16.msra.mxu1 %v7548_v31  ;;  %6833 = vmatprep.subr.bf16.mxu0 %v7549_v40  ;;  %v7596_v31 = vld [vmem:[%s9768_s1 + $0x298] sm:$0xff]   ;;  %v7605_v40 = vld [vmem:[%s9768_s1 + $0x270] sm:$0xff]   ;;  %v7633_v12 = vld [vmem:[%s9768_s1 + $0x368] sm:$0xff]  }
  0x27   : > { %6855 = vmatprep.subr.bf16.mxu1 %v7550_v41  ;;  %v7606_v41 = vld [vmem:[%s9768_s1 + $0x2f0] sm:$0xff]   ;;  %v7634_v13 = vld [vmem:[%s9768_s1 + $0x3e8] sm:$0xff]  }
  0x28   : > { %4790 = vmatmul.mubr.bf16.vlgmr.msra.gmra.mrb[0].mxu0 %v6209_v35  ;;  %v7600_v35 = vld [vmem:[%s9768_s1 + $0x2a0] sm:$0xff]  }
  0x29   : > { %4831 = vmatmul.mubr.bf16.vlgmr.msra.gmra.mrb[0].mxu1 %v6211_v38  ;;  %6834 = vmatpush3.bf16.msra.mxu0 %v7551_v42  ;;  %v7603_v38 = vld [vmem:[%s9768_s1 + $0x228] sm:$0xff]   ;;  %v7607_v42 = vld [vmem:[%s9768_s1 + $0x230] sm:$0xff]  }
  0x2a   : > { %6856 = vmatpush3.bf16.msra.mxu1 %v7552_v43  ;;  %6835 = vmatprep.subr.bf16.mxu0 %v7553_v44  ;;  %v7608_v43 = vld [vmem:[%s9768_s1 + $0x2b0] sm:$0xff]   ;;  %v7609_v44 = vld [vmem:[%s9768_s1 + $0x278] sm:$0xff]  }
  0x2b   : > { %6857 = vmatprep.subr.bf16.mxu1 %v7554_v45  ;;  %4871 = vmatprep.mubr.bf16.mxu0 %v6214_v11  ;;  %v7610_v45 = vld [vmem:[%s9768_s1 + $0x2f8] sm:$0xff]   ;;  %v7632_v11 = vld [vmem:[%s9768_s1 + $0x3a0] sm:$0xff]  }
  0x2c   : > { %4912 = vmatprep.mubr.bf16.mxu1 %v6216_v15  ;;  %v7636_v15 = vld [vmem:[%s9768_s1 + $0x3a8] sm:$0xff]  }
  0x2d   : > { %6836 = vmatpush3.bf16.msra.mxu0 %v7555_v46  ;;  %v7611_v46 = vld [vmem:[%s9768_s1 + $0x238] sm:$0xff]  }
  0x2e   : > { %6858 = vmatpush3.bf16.msra.mxu1 %v7556_v47  ;;  %6837 = vmatprep.subr.bf16.mxu0 %v7557_v48  ;;  %v7612_v47 = vld [vmem:[%s9768_s1 + $0x2b8] sm:$0xff]   ;;  %v281_v48 = vld [vmem:[%s8191_s6 + $0x20] sm:$0xff] }
  0x2f   : > { %6859 = vmatprep.subr.bf16.mxu1 %v7558_v49  ;;  %v313_v49 = vld [vmem:[%s8191_s6 + $0x120] sm:$0xff] }
  0x31   : > { %6838 = vmatpush3.bf16.msra.mxu0 %v7559_v50  ;;  %v282_v50 = vld [vmem:[%s8191_s6 + $0x28] sm:$0xff] }
  0x32   : > { %6860 = vmatpush3.bf16.msra.mxu1 %v7560_v51  ;;  %6839 = vmatprep.subr.bf16.mxu0 %v7561_v52  ;;  %v314_v51 = vld [vmem:[%s8191_s6 + $0x128] sm:$0xff]  ;;  %v6217_v52 = vcombine.low %v281_v48, %v313_v49 }
  0x33   : > { %6861 = vmatprep.subr.bf16.mxu1 %v7562_v53  ;;  %v6218_v53 = vcombine.high %v281_v48, %v313_v49  ;;  %v7661_v48 = vld [vmem:[%s9768_s1 + $0x460] sm:$0xff]  }
  0x34   : > { %v7662_v49 = vld [vmem:[%s9768_s1 + $0x4e0] sm:$0xff]  }
  0x35   : > { %6840 = vmatpush3.bf16.msra.mxu0 %v7563_v54  ;;  %v6219_v54 = vcombine.low %v282_v50, %v314_v51 }
  0x36   : > { %6862 = vmatpush3.bf16.msra.mxu1 %v7564_v55  ;;  %6841 = vmatprep.subr.bf16.mxu0 %v7565_v56  ;;  %v6220_v55 = vcombine.high %v282_v50, %v314_v51  ;;  %v7613_v56 = vld [vmem:[%s9768_s1 + $0x340] sm:$0xff]  }
  0x37   : > { %6863 = vmatprep.subr.bf16.mxu1 %v7566_v57  ;;  %v7614_v57 = vld [vmem:[%s9768_s1 + $0x3c0] sm:$0xff]  }
  0x38   : > { %v7663_v50 = vld [vmem:[%s9768_s1 + $0x420] sm:$0xff]  }
  0x39   : > { %6842 = vmatpush3.bf16.msra.mxu0 %v7567_v58  ;;  %v7615_v58 = vld [vmem:[%s9768_s1 + $0x300] sm:$0xff]  }
  0x3a   : > { %6864 = vmatpush3.bf16.msra.mxu1 %v7568_v59  ;;  %6843 = vmatprep.subr.bf16.mxu0 %v7569_v60  ;;  %v7616_v59 = vld [vmem:[%s9768_s1 + $0x380] sm:$0xff]   ;;  %v7617_v60 = vld [vmem:[%s9768_s1 + $0x348] sm:$0xff]  }
  0x3b   : > { %6865 = vmatprep.subr.bf16.mxu1 %v7570_v61  ;;  %v7618_v61 = vld [vmem:[%s9768_s1 + $0x3c8] sm:$0xff]   ;;  %v7664_v51 = vld [vmem:[%s9768_s1 + $0x4a0] sm:$0xff]  }
  0x3d   : > { %6844 = vmatpush3.bf16.msra.mxu0 %v7571_v62  ;;  %v7619_v62 = vld [vmem:[%s9768_s1 + $0x308] sm:$0xff]  }
  0x3e   : > { %6866 = vmatpush3.bf16.msra.mxu1 %v7572_v63  ;;  %6845 = vmatprep.subr.bf16.mxu0 %v7573_v0  ;;  %v7620_v63 = vld [vmem:[%s9768_s1 + $0x388] sm:$0xff]   ;;  %v7621_v0 = vld [vmem:[%s9768_s1 + $0x350] sm:$0xff]  }
  0x3f   : > { %6867 = vmatprep.subr.bf16.mxu1 %v7574_v1  ;;  %v7622_v1 = vld [vmem:[%s9768_s1 + $0x3d0] sm:$0xff]  }
  0x41   : > { %6846 = vmatpush3.bf16.msra.mxu0 %v7575_v2  ;;  %v7623_v2 = vld [vmem:[%s9768_s1 + $0x310] sm:$0xff]  }
  0x42   : > { %6868 = vmatpush3.bf16.msra.mxu1 %v7576_v3  ;;  %6847 = vmatprep.subr.bf16.mxu0 %v7577_v4  ;;  %v7624_v3 = vld [vmem:[%s9768_s1 + $0x390] sm:$0xff]   ;;  %v7625_v4 = vld [vmem:[%s9768_s1 + $0x358] sm:$0xff]  }
  0x43   : > { %6869 = vmatprep.subr.bf16.mxu1 %v7578_v5  ;;  %v7626_v5 = vld [vmem:[%s9768_s1 + $0x3d8] sm:$0xff]  }
  0x45   : > { %6848 = vmatpush3.bf16.msra.mxu0 %v7579_v6  ;;  %v7627_v6 = vld [vmem:[%s9768_s1 + $0x318] sm:$0xff]  }
  0x46   : > { %6870 = vmatpush3.bf16.msra.mxu1 %v7580_v7  ;;  %6877 = vmatprep.subr.bf16.mxu0 %v7581_v16  ;;  %v7628_v7 = vld [vmem:[%s9768_s1 + $0x398] sm:$0xff]   ;;  %v7637_v16 = vld [vmem:[%s9768_s1 + $0x370] sm:$0xff]  }
  0x47   : > { %6899 = vmatprep.subr.bf16.mxu1 %v7582_v17  ;;  %v7638_v17 = vld [vmem:[%s9768_s1 + $0x3f0] sm:$0xff]  }
  0x48   : > { %4872 = vmatmul.mubr.bf16.vlgmr.msra.gmra.mrb[4].mxu0 %v6213_v10  ;;  %v7631_v10 = vld [vmem:[%s9768_s1 + $0x320] sm:$0xff]  }
  0x49   : > { %4913 = vmatmul.mubr.bf16.vlgmr.msra.gmra.mrb[4].mxu1 %v6215_v14  ;;  %6878 = vmatpush3.bf16.msra.mxu0 %v7583_v18  ;;  %v7635_v14 = vld [vmem:[%s9768_s1 + $0x328] sm:$0xff]   ;;  %v7639_v18 = vld [vmem:[%s9768_s1 + $0x330] sm:$0xff]  }
  0x4a   : > { %6900 = vmatpush3.bf16.msra.mxu1 %v7584_v19  ;;  %6879 = vmatprep.subr.bf16.mxu0 %v7585_v20  ;;  %v7640_v19 = vld [vmem:[%s9768_s1 + $0x3b0] sm:$0xff]   ;;  %v7641_v20 = vld [vmem:[%s9768_s1 + $0x378] sm:$0xff]  }
  0x4b   : > { %6901 = vmatprep.subr.bf16.mxu1 %v7586_v21  ;;  %4953 = vmatprep.mubr.bf16.mxu0 %v6218_v53  ;;  %v7642_v21 = vld [vmem:[%s9768_s1 + $0x3f8] sm:$0xff]   ;;  %v7666_v53 = vld [vmem:[%s9768_s1 + $0x4e8] sm:$0xff]  }
  0x4c   : > { %4994 = vmatprep.mubr.bf16.mxu1 %v6220_v55  ;;  %v7668_v55 = vld [vmem:[%s9768_s1 + $0x4a8] sm:$0xff]  }
  0x4d   : > { %6880 = vmatpush3.bf16.msra.mxu0 %v7587_v22  ;;  %v7643_v22 = vld [vmem:[%s9768_s1 + $0x338] sm:$0xff]  }
  0x4e   : > { %6902 = vmatpush3.bf16.msra.mxu1 %v7588_v23  ;;  %6881 = vmatprep.subr.bf16.mxu0 %v7589_v24  ;;  %v7644_v23 = vld [vmem:[%s9768_s1 + $0x3b8] sm:$0xff]   ;;  %v283_v24 = vld [vmem:[%s8191_s6 + $0x30] sm:$0xff] }
  0x4f   : > { %6903 = vmatprep.subr.bf16.mxu1 %v7590_v25  ;;  %v315_v25 = vld [vmem:[%s8191_s6 + $0x130] sm:$0xff] }
  0x51   : > { %6882 = vmatpush3.bf16.msra.mxu0 %v7591_v26  ;;  %v284_v26 = vld [vmem:[%s8191_s6 + $0x38] sm:$0xff] }
  0x52   : > { %6904 = vmatpush3.bf16.msra.mxu1 %v7592_v27  ;;  %6883 = vmatprep.subr.bf16.mxu0 %v7593_v28  ;;  %v6221_v27 = vcombine.low %v283_v24, %v315_v25  ;;  %v6222_v28 = vcombine.high %v283_v24, %v315_v25  ;;  %v7693_v24 = vld [vmem:[%s9768_s1 + $0x560] sm:$0xff]  }
  0x53   : > { %6905 = vmatprep.subr.bf16.mxu1 %v7594_v29  ;;  %v316_v29 = vld [vmem:[%s8191_s6 + $0x138] sm:$0xff]  ;;  %v7694_v25 = vld [vmem:[%s9768_s1 + $0x5e0] sm:$0xff]  }
  0x55   : > { %6884 = vmatpush3.bf16.msra.mxu0 %v7595_v30  ;;  %v6223_v30 = vcombine.low %v284_v26, %v316_v29 }
  0x56   : > { %6906 = vmatpush3.bf16.msra.mxu1 %v7596_v31  ;;  %6885 = vmatprep.subr.bf16.mxu0 %v7597_v32  ;;  %v6224_v31 = vcombine.high %v284_v26, %v316_v29  ;;  %v7645_v32 = vld [vmem:[%s9768_s1 + $0x440] sm:$0xff]   ;;  %v7698_v29 = vld [vmem:[%s9768_s1 + $0x5e8] sm:$0xff]  }
  0x57   : > { %6907 = vmatprep.subr.bf16.mxu1 %v7598_v33  ;;  %v7646_v33 = vld [vmem:[%s9768_s1 + $0x4c0] sm:$0xff]  }
  0x58   : > { %v7695_v26 = vld [vmem:[%s9768_s1 + $0x520] sm:$0xff]  }
  0x59   : > { %6886 = vmatpush3.bf16.msra.mxu0 %v7599_v34  ;;  %v7647_v34 = vld [vmem:[%s9768_s1 + $0x400] sm:$0xff]  }
  0x5a   : > { %6908 = vmatpush3.bf16.msra.mxu1 %v7600_v35  ;;  %6887 = vmatprep.subr.bf16.mxu0 %v7601_v36  ;;  %v7648_v35 = vld [vmem:[%s9768_s1 + $0x480] sm:$0xff]   ;;  %v7649_v36 = vld [vmem:[%s9768_s1 + $0x448] sm:$0xff]  }
  0x5b   : > { %6909 = vmatprep.subr.bf16.mxu1 %v7602_v37  ;;  %v7650_v37 = vld [vmem:[%s9768_s1 + $0x4c8] sm:$0xff]  }
  0x5d   : > { %6888 = vmatpush3.bf16.msra.mxu0 %v7603_v38  ;;  %v7651_v38 = vld [vmem:[%s9768_s1 + $0x408] sm:$0xff]  }
  0x5e   : > { %6910 = vmatpush3.bf16.msra.mxu1 %v7604_v39  ;;  %6889 = vmatprep.subr.bf16.mxu0 %v7605_v40  ;;  %v7652_v39 = vld [vmem:[%s9768_s1 + $0x488] sm:$0xff]   ;;  %v7653_v40 = vld [vmem:[%s9768_s1 + $0x450] sm:$0xff]  }
  0x5f   : > { %6911 = vmatprep.subr.bf16.mxu1 %v7606_v41  ;;  %v7654_v41 = vld [vmem:[%s9768_s1 + $0x4d0] sm:$0xff]  }
  0x61   : > { %6890 = vmatpush3.bf16.msra.mxu0 %v7607_v42  ;;  %v7655_v42 = vld [vmem:[%s9768_s1 + $0x410] sm:$0xff]  }
  0x62   : > { %6912 = vmatpush3.bf16.msra.mxu1 %v7608_v43  ;;  %6891 = vmatprep.subr.bf16.mxu0 %v7609_v44  ;;  %v7656_v43 = vld [vmem:[%s9768_s1 + $0x490] sm:$0xff]   ;;  %v7657_v44 = vld [vmem:[%s9768_s1 + $0x458] sm:$0xff]  }
  0x63   : > { %6913 = vmatprep.subr.bf16.mxu1 %v7610_v45  ;;  %v7658_v45 = vld [vmem:[%s9768_s1 + $0x4d8] sm:$0xff]  }
  0x65   : > { %6892 = vmatpush3.bf16.msra.mxu0 %v7611_v46  ;;  %v7659_v46 = vld [vmem:[%s9768_s1 + $0x418] sm:$0xff]  }
  0x66   : > { %6914 = vmatpush3.bf16.msra.mxu1 %v7612_v47  ;;  %6921 = vmatprep.subr.bf16.mxu0 %v7613_v56  ;;  %v7660_v47 = vld [vmem:[%s9768_s1 + $0x498] sm:$0xff]   ;;  %v7669_v56 = vld [vmem:[%s9768_s1 + $0x470] sm:$0xff]  }
  0x67   : > { %6943 = vmatprep.subr.bf16.mxu1 %v7614_v57  ;;  %v7670_v57 = vld [vmem:[%s9768_s1 + $0x4f0] sm:$0xff]  }
  0x68   : > { %4954 = vmatmul.mubr.bf16.vlgmr.msra.gmra.mrb[8].mxu0 %v6217_v52  ;;  %v7665_v52 = vld [vmem:[%s9768_s1 + $0x468] sm:$0xff]  }
  0x69   : > { %4995 = vmatmul.mubr.bf16.vlgmr.msra.gmra.mrb[8].mxu1 %v6219_v54  ;;  %6922 = vmatpush3.bf16.msra.mxu0 %v7615_v58  ;;  %v7667_v54 = vld [vmem:[%s9768_s1 + $0x428] sm:$0xff]   ;;  %v7671_v58 = vld [vmem:[%s9768_s1 + $0x430] sm:$0xff]  }
  0x6a   : > { %6944 = vmatpush3.bf16.msra.mxu1 %v7616_v59  ;;  %6923 = vmatprep.subr.bf16.mxu0 %v7617_v60  ;;  %v7672_v59 = vld [vmem:[%s9768_s1 + $0x4b0] sm:$0xff]   ;;  %v7673_v60 = vld [vmem:[%s9768_s1 + $0x478] sm:$0xff]  }
  0x6b   : > { %6945 = vmatprep.subr.bf16.mxu1 %v7618_v61  ;;  %5035 = vmatprep.mubr.bf16.mxu0 %v6222_v28  ;;  %v7674_v61 = vld [vmem:[%s9768_s1 + $0x4f8] sm:$0xff]   ;;  %v7697_v28 = vld [vmem:[%s9768_s1 + $0x568] sm:$0xff]  }
  0x6c   : > { %5076 = vmatprep.mubr.bf16.mxu1 %v6224_v31  ;;  %v7700_v31 = vld [vmem:[%s9768_s1 + $0x5a8] sm:$0xff]  }
  0x6d   : > { %6924 = vmatpush3.bf16.msra.mxu0 %v7619_v62  ;;  %v7675_v62 = vld [vmem:[%s9768_s1 + $0x438] sm:$0xff]  }
  0x6e   : > { %6946 = vmatpush3.bf16.msra.mxu1 %v7620_v63  ;;  %6925 = vmatprep.subr.bf16.mxu0 %v7621_v0  ;;  %v7676_v63 = vld [vmem:[%s9768_s1 + $0x4b8] sm:$0xff]   ;;  %v285_v0 = vld [vmem:[%s8191_s6 + $0x40] sm:$0xff] }
  0x6f   : > { %6947 = vmatprep.subr.bf16.mxu1 %v7622_v1  ;;  %v317_v1 = vld [vmem:[%s8191_s6 + $0x140] sm:$0xff] }
  0x71   : > { %6926 = vmatpush3.bf16.msra.mxu0 %v7623_v2  ;;  %v6225_v2 = vcombine.low %v285_v0, %v317_v1 }
  0x72   : > { %6948 = vmatpush3.bf16.msra.mxu1 %v7624_v3  ;;  %6927 = vmatprep.subr.bf16.mxu0 %v7625_v4  ;;  %v6226_v3 = vcombine.high %v285_v0, %v317_v1  ;;  %v286_v4 = vld [vmem:[%s8191_s6 + $0x48] sm:$0xff]  ;;  %v7725_v0 = vld [vmem:[%s9768_s1 + $0x660] sm:$0xff]  }
  0x73   : > { %6949 = vmatprep.subr.bf16.mxu1 %v7626_v5  ;;  %v318_v5 = vld [vmem:[%s8191_s6 + $0x148] sm:$0xff]  ;;  %v7726_v1 = vld [vmem:[%s9768_s1 + $0x6e0] sm:$0xff]  }
  0x75   : > { %6928 = vmatpush3.bf16.msra.mxu0 %v7627_v6  ;;  %v6227_v6 = vcombine.low %v286_v4, %v318_v5 }
  0x76   : > { %6950 = vmatpush3.bf16.msra.mxu1 %v7628_v7  ;;  %6929 = vmatprep.subr.bf16.mxu0 %v7629_v8  ;;  %v6228_v7 = vcombine.high %v286_v4, %v318_v5  ;;  %v7677_v8 = vld [vmem:[%s9768_s1 + $0x540] sm:$0xff]   ;;  %v7729_v4 = vld [vmem:[%s9768_s1 + $0x668] sm:$0xff]  }
  0x77   : > { %6951 = vmatprep.subr.bf16.mxu1 %v7630_v9  ;;  %v7678_v9 = vld [vmem:[%s9768_s1 + $0x5c0] sm:$0xff]   ;;  %v7730_v5 = vld [vmem:[%s9768_s1 + $0x6e8] sm:$0xff]  }
  0x79   : > { %6930 = vmatpush3.bf16.msra.mxu0 %v7631_v10  ;;  %v7679_v10 = vld [vmem:[%s9768_s1 + $0x500] sm:$0xff]  }
  0x7a   : > { %6952 = vmatpush3.bf16.msra.mxu1 %v7632_v11  ;;  %6931 = vmatprep.subr.bf16.mxu0 %v7633_v12  ;;  %v7680_v11 = vld [vmem:[%s9768_s1 + $0x580] sm:$0xff]   ;;  %v7681_v12 = vld [vmem:[%s9768_s1 + $0x548] sm:$0xff]  }
  0x7b   : > { %6953 = vmatprep.subr.bf16.mxu1 %v7634_v13  ;;  %v7682_v13 = vld [vmem:[%s9768_s1 + $0x5c8] sm:$0xff]  }
  0x7d   : > { %6932 = vmatpush3.bf16.msra.mxu0 %v7635_v14  ;;  %v7683_v14 = vld [vmem:[%s9768_s1 + $0x508] sm:$0xff]  }
  0x7e   : > { %6954 = vmatpush3.bf16.msra.mxu1 %v7636_v15  ;;  %6933 = vmatprep.subr.bf16.mxu0 %v7637_v16  ;;  %v7684_v15 = vld [vmem:[%s9768_s1 + $0x588] sm:$0xff]   ;;  %v7685_v16 = vld [vmem:[%s9768_s1 + $0x550] sm:$0xff]  }
  0x7f   : > { %6955 = vmatprep.subr.bf16.mxu1 %v7638_v17  ;;  %v7686_v17 = vld [vmem:[%s9768_s1 + $0x5d0] sm:$0xff]  }
  0x81   : > { %6934 = vmatpush3.bf16.msra.mxu0 %v7639_v18  ;;  %v7687_v18 = vld [vmem:[%s9768_s1 + $0x510] sm:$0xff]  }
  0x82   : > { %6956 = vmatpush3.bf16.msra.mxu1 %v7640_v19  ;;  %6935 = vmatprep.subr.bf16.mxu0 %v7641_v20  ;;  %v7688_v19 = vld [vmem:[%s9768_s1 + $0x590] sm:$0xff]   ;;  %v7689_v20 = vld [vmem:[%s9768_s1 + $0x558] sm:$0xff]  }
  0x83   : > { %6957 = vmatprep.subr.bf16.mxu1 %v7642_v21  ;;  %v7690_v21 = vld [vmem:[%s9768_s1 + $0x5d8] sm:$0xff]  }
  0x85   : > { %6936 = vmatpush3.bf16.msra.mxu0 %v7643_v22  ;;  %v7691_v22 = vld [vmem:[%s9768_s1 + $0x518] sm:$0xff]  }
  0x86   : > { %6958 = vmatpush3.bf16.msra.mxu1 %v7644_v23  ;;  %6965 = vmatprep.subr.bf16.mxu0 %v7645_v32  ;;  %v7692_v23 = vld [vmem:[%s9768_s1 + $0x598] sm:$0xff]   ;;  %v7701_v32 = vld [vmem:[%s9768_s1 + $0x570] sm:$0xff]  }
  0x87   : > { %6987 = vmatprep.subr.bf16.mxu1 %v7646_v33  ;;  %v7702_v33 = vld [vmem:[%s9768_s1 + $0x5f0] sm:$0xff]  }
  0x88   : > { %5036 = vmatmul.mubr.bf16.vlgmr.msra.gmra.mrb[12].mxu0 %v6221_v27  ;;  %v7696_v27 = vld [vmem:[%s9768_s1 + $0x5a0] sm:$0xff]  }
  0x89   : > { %5077 = vmatmul.mubr.bf16.vlgmr.msra.gmra.mrb[12].mxu1 %v6223_v30  ;;  %6966 = vmatpush3.bf16.msra.mxu0 %v7647_v34  ;;  %v7699_v30 = vld [vmem:[%s9768_s1 + $0x528] sm:$0xff]   ;;  %v7703_v34 = vld [vmem:[%s9768_s1 + $0x530] sm:$0xff]  }
  0x8a   : > { %6988 = vmatpush3.bf16.msra.mxu1 %v7648_v35  ;;  %6967 = vmatprep.subr.bf16.mxu0 %v7649_v36  ;;  %v7704_v35 = vld [vmem:[%s9768_s1 + $0x5b0] sm:$0xff]   ;;  %v7705_v36 = vld [vmem:[%s9768_s1 + $0x578] sm:$0xff]  }
  0x8b   : > { %6989 = vmatprep.subr.bf16.mxu1 %v7650_v37  ;;  %5117 = vmatprep.mubr.bf16.mxu0 %v6226_v3  ;;  %v7706_v37 = vld [vmem:[%s9768_s1 + $0x5f8] sm:$0xff]   ;;  %v7728_v3 = vld [vmem:[%s9768_s1 + $0x6a0] sm:$0xff]  }
  0x8c   : > { %5158 = vmatprep.mubr.bf16.mxu1 %v6228_v7  ;;  %v7732_v7 = vld [vmem:[%s9768_s1 + $0x6a8] sm:$0xff]  }
  0x8d   : > { %6968 = vmatpush3.bf16.msra.mxu0 %v7651_v38  ;;  %v7707_v38 = vld [vmem:[%s9768_s1 + $0x538] sm:$0xff]  }
  0x8e   : > { %6990 = vmatpush3.bf16.msra.mxu1 %v7652_v39  ;;  %6969 = vmatprep.subr.bf16.mxu0 %v7653_v40  ;;  %v7708_v39 = vld [vmem:[%s9768_s1 + $0x5b8] sm:$0xff]   ;;  %v287_v40 = vld [vmem:[%s8191_s6 + $0x50] sm:$0xff] }
  0x8f   : > { %6991 = vmatprep.subr.bf16.mxu1 %v7654_v41  ;;  %v319_v41 = vld [vmem:[%s8191_s6 + $0x150] sm:$0xff] }
  0x91   : > { %6970 = vmatpush3.bf16.msra.mxu0 %v7655_v42  ;;  %v288_v42 = vld [vmem:[%s8191_s6 + $0x58] sm:$0xff] }
  0x92   : > { %6992 = vmatpush3.bf16.msra.mxu1 %v7656_v43  ;;  %6971 = vmatprep.subr.bf16.mxu0 %v7657_v44  ;;  %v320_v43 = vld [vmem:[%s8191_s6 + $0x158] sm:$0xff]  ;;  %v6229_v44 = vcombine.low %v287_v40, %v319_v41 }
  0x93   : > { %6993 = vmatprep.subr.bf16.mxu1 %v7658_v45  ;;  %v6230_v45 = vcombine.high %v287_v40, %v319_v41  ;;  %v7756_v41 = vld [vmem:[%s9768_s1 + $0x798] sm:$0xff]  }
  0x95   : > { %6972 = vmatpush3.bf16.msra.mxu0 %v7659_v46  ;;  %v6231_v46 = vcombine.low %v288_v42, %v320_v43 }
  0x96   : > { %6994 = vmatpush3.bf16.msra.mxu1 %v7660_v47  ;;  %6973 = vmatprep.subr.bf16.mxu0 %v7661_v48  ;;  %v6232_v47 = vcombine.high %v288_v42, %v320_v43  ;;  %v7709_v48 = vld [vmem:[%s9768_s1 + $0x640] sm:$0xff]  }
  0x97   : > { %6995 = vmatprep.subr.bf16.mxu1 %v7662_v49  ;;  %v7710_v49 = vld [vmem:[%s9768_s1 + $0x6c0] sm:$0xff]  }
  0x98   : > { %v7757_v43 = vld [vmem:[%s9768_s1 + $0x760] sm:$0xff]  }
  0x99   : > { %6974 = vmatpush3.bf16.msra.mxu0 %v7663_v50  ;;  %v7711_v50 = vld [vmem:[%s9768_s1 + $0x600] sm:$0xff]  }
  0x9a   : > { %6996 = vmatpush3.bf16.msra.mxu1 %v7664_v51  ;;  %6975 = vmatprep.subr.bf16.mxu0 %v7665_v52  ;;  %v7712_v51 = vld [vmem:[%s9768_s1 + $0x680] sm:$0xff]   ;;  %v7713_v52 = vld [vmem:[%s9768_s1 + $0x648] sm:$0xff]  }
  0x9b   : > { %6997 = vmatprep.subr.bf16.mxu1 %v7666_v53  ;;  %v7714_v53 = vld [vmem:[%s9768_s1 + $0x6c8] sm:$0xff]  }
  0x9d   : > { %6976 = vmatpush3.bf16.msra.mxu0 %v7667_v54  ;;  %v7715_v54 = vld [vmem:[%s9768_s1 + $0x608] sm:$0xff]  }
  0x9e   : > { %6998 = vmatpush3.bf16.msra.mxu1 %v7668_v55  ;;  %6977 = vmatprep.subr.bf16.mxu0 %v7669_v56  ;;  %v7716_v55 = vld [vmem:[%s9768_s1 + $0x688] sm:$0xff]   ;;  %v7717_v56 = vld [vmem:[%s9768_s1 + $0x650] sm:$0xff]  }
  0x9f   : > { %6999 = vmatprep.subr.bf16.mxu1 %v7670_v57  ;;  %v7718_v57 = vld [vmem:[%s9768_s1 + $0x6d0] sm:$0xff]  }
  0xa1   : > { %6978 = vmatpush3.bf16.msra.mxu0 %v7671_v58  ;;  %v7719_v58 = vld [vmem:[%s9768_s1 + $0x610] sm:$0xff]  }
  0xa2   : > { %7000 = vmatpush3.bf16.msra.mxu1 %v7672_v59  ;;  %6979 = vmatprep.subr.bf16.mxu0 %v7673_v60  ;;  %v7720_v59 = vld [vmem:[%s9768_s1 + $0x690] sm:$0xff]   ;;  %v7721_v60 = vld [vmem:[%s9768_s1 + $0x658] sm:$0xff]  }
  0xa3   : > { %7001 = vmatprep.subr.bf16.mxu1 %v7674_v61  ;;  %v7722_v61 = vld [vmem:[%s9768_s1 + $0x6d8] sm:$0xff]  }
  0xa5   : > { %6980 = vmatpush3.bf16.msra.mxu0 %v7675_v62  ;;  %v7723_v62 = vld [vmem:[%s9768_s1 + $0x618] sm:$0xff]  }
  0xa6   : > { %7002 = vmatpush3.bf16.msra.mxu1 %v7676_v63  ;;  %7009 = vmatprep.subr.bf16.mxu0 %v7677_v8  ;;  %v7724_v63 = vld [vmem:[%s9768_s1 + $0x698] sm:$0xff]   ;;  %v7733_v8 = vld [vmem:[%s9768_s1 + $0x670] sm:$0xff]  }
  0xa7   : > { %7031 = vmatprep.subr.bf16.mxu1 %v7678_v9  ;;  %v7734_v9 = vld [vmem:[%s9768_s1 + $0x6f0] sm:$0xff]  }
  0xa8   : > { %5118 = vmatmul.mubr.bf16.vlgmr.msra.gmra.mrb[16].mxu0 %v6225_v2  ;;  %v7727_v2 = vld [vmem:[%s9768_s1 + $0x620] sm:$0xff]  }
  0xa9   : > { %5159 = vmatmul.mubr.bf16.vlgmr.msra.gmra.mrb[16].mxu1 %v6227_v6  ;;  %7010 = vmatpush3.bf16.msra.mxu0 %v7679_v10  ;;  %v7731_v6 = vld [vmem:[%s9768_s1 + $0x628] sm:$0xff]   ;;  %v7735_v10 = vld [vmem:[%s9768_s1 + $0x630] sm:$0xff]  }
  0xaa   : > { %7032 = vmatpush3.bf16.msra.mxu1 %v7680_v11  ;;  %7011 = vmatprep.subr.bf16.mxu0 %v7681_v12  ;;  %v7736_v11 = vld [vmem:[%s9768_s1 + $0x6b0] sm:$0xff]   ;;  %v7737_v12 = vld [vmem:[%s9768_s1 + $0x678] sm:$0xff]  }
  0xab   : > { %7033 = vmatprep.subr.bf16.mxu1 %v7682_v13  ;;  %5199 = vmatprep.mubr.bf16.mxu0 %v6230_v45  ;;  %v7738_v13 = vld [vmem:[%s9768_s1 + $0x6f8] sm:$0xff]  }
  0xac   : > { %5240 = vmatprep.mubr.bf16.mxu1 %v6232_v47 }
  0xad   : > { %7012 = vmatpush3.bf16.msra.mxu0 %v7683_v14  ;;  %v7739_v14 = vld [vmem:[%s9768_s1 + $0x638] sm:$0xff]  }
  0xae   : > { %7034 = vmatpush3.bf16.msra.mxu1 %v7684_v15  ;;  %7013 = vmatprep.subr.bf16.mxu0 %v7685_v16  ;;  %v7740_v15 = vld [vmem:[%s9768_s1 + $0x6b8] sm:$0xff]   ;;  %v289_v16 = vld [vmem:[%s8191_s6 + $0x60] sm:$0xff] }
  0xaf   : > { %7035 = vmatprep.subr.bf16.mxu1 %v7686_v17  ;;  %v321_v17 = vld [vmem:[%s8191_s6 + $0x160] sm:$0xff] }
  0xb1   : > { %7014 = vmatpush3.bf16.msra.mxu0 %v7687_v18  ;;  %v290_v18 = vld [vmem:[%s8191_s6 + $0x68] sm:$0xff] }
  0xb2   : > { %7036 = vmatpush3.bf16.msra.mxu1 %v7688_v19  ;;  %7015 = vmatprep.subr.bf16.mxu0 %v7689_v20  ;;  %v6233_v19 = vcombine.low %v289_v16, %v321_v17  ;;  %v6234_v20 = vcombine.high %v289_v16, %v321_v17  ;;  %v7775_v16 = vld [vmem:[%s9768_s1 + $0x800] sm:$0xff]  }
  0xb3   : > { %7037 = vmatprep.subr.bf16.mxu1 %v7690_v21  ;;  %v322_v21 = vld [vmem:[%s8191_s6 + $0x168] sm:$0xff]  ;;  %v7776_v17 = vld [vmem:[%s9768_s1 + $0x880] sm:$0xff]  }
  0xb5   : > { %7016 = vmatpush3.bf16.msra.mxu0 %v7691_v22  ;;  %v6235_v22 = vcombine.low %v290_v18, %v322_v21 }
  0xb6   : > { %7038 = vmatpush3.bf16.msra.mxu1 %v7692_v23  ;;  %7017 = vmatprep.subr.bf16.mxu0 %v7693_v24  ;;  %v6236_v23 = vcombine.high %v290_v18, %v322_v21  ;;  %v7741_v24 = vld [vmem:[%s9768_s1 + $0x740] sm:$0xff]   ;;  %v7777_v18 = vld [vmem:[%s9768_s1 + $0x848] sm:$0xff]  }
  0xb7   : > { %7039 = vmatprep.subr.bf16.mxu1 %v7694_v25  ;;  %v7742_v25 = vld [vmem:[%s9768_s1 + $0x7c0] sm:$0xff]   ;;  %v7780_v21 = vld [vmem:[%s9768_s1 + $0x888] sm:$0xff]  }
  0xb9   : > { %7018 = vmatpush3.bf16.msra.mxu0 %v7695_v26  ;;  %v7743_v26 = vld [vmem:[%s9768_s1 + $0x700] sm:$0xff]  }
  0xba   : > { %7040 = vmatpush3.bf16.msra.mxu1 %v7696_v27  ;;  %7019 = vmatprep.subr.bf16.mxu0 %v7697_v28  ;;  %v7744_v27 = vld [vmem:[%s9768_s1 + $0x780] sm:$0xff]   ;;  %v7745_v28 = vld [vmem:[%s9768_s1 + $0x748] sm:$0xff]  }
  0xbb   : > { %7041 = vmatprep.subr.bf16.mxu1 %v7698_v29  ;;  %v7746_v29 = vld [vmem:[%s9768_s1 + $0x7c8] sm:$0xff]  }
  0xbd   : > { %7020 = vmatpush3.bf16.msra.mxu0 %v7699_v30  ;;  %v7747_v30 = vld [vmem:[%s9768_s1 + $0x708] sm:$0xff]  }
  0xbe   : > { %7042 = vmatpush3.bf16.msra.mxu1 %v7700_v31  ;;  %7021 = vmatprep.subr.bf16.mxu0 %v7701_v32  ;;  %v7748_v31 = vld [vmem:[%s9768_s1 + $0x788] sm:$0xff]   ;;  %v7749_v32 = vld [vmem:[%s9768_s1 + $0x750] sm:$0xff]  }
  0xbf   : > { %7043 = vmatprep.subr.bf16.mxu1 %v7702_v33  ;;  %v7750_v33 = vld [vmem:[%s9768_s1 + $0x7d0] sm:$0xff]  }
  0xc1   : > { %7022 = vmatpush3.bf16.msra.mxu0 %v7703_v34  ;;  %v7751_v34 = vld [vmem:[%s9768_s1 + $0x710] sm:$0xff]  }
  0xc2   : > { %7044 = vmatpush3.bf16.msra.mxu1 %v7704_v35  ;;  %7023 = vmatprep.subr.bf16.mxu0 %v7705_v36  ;;  %v7752_v35 = vld [vmem:[%s9768_s1 + $0x790] sm:$0xff]   ;;  %v7753_v36 = vld [vmem:[%s9768_s1 + $0x758] sm:$0xff]  }
  0xc3   : > { %7045 = vmatprep.subr.bf16.mxu1 %v7706_v37  ;;  %v7754_v37 = vld [vmem:[%s9768_s1 + $0x7d8] sm:$0xff]  }
  0xc5   : > { %7024 = vmatpush3.bf16.msra.mxu0 %v7707_v38 }
  0xc6   : > { %7046 = vmatpush3.bf16.msra.mxu1 %v7708_v39  ;;  %7053 = vmatprep.subr.bf16.mxu0 %v7709_v48  ;;  %v7755_v39 = vld [vmem:[%s9768_s1 + $0x718] sm:$0xff]  }
  0xc7   : > { %7075 = vmatprep.subr.bf16.mxu1 %v7710_v49  ;;  %v7759_v49 = vld [vmem:[%s9768_s1 + $0x720] sm:$0xff]  }
  0xc8   : > { %5200 = vmatmul.mubr.bf16.vlgmr.msra.gmra.mrb[20].mxu0 %v6229_v44 }
  0xc9   : > { %5241 = vmatmul.mubr.bf16.vlgmr.msra.gmra.mrb[20].mxu1 %v6231_v46  ;;  %7054 = vmatpush3.bf16.msra.mxu0 %v7711_v50  ;;  %v7758_v46 = vld [vmem:[%s9768_s1 + $0x7e0] sm:$0xff]  }
  0xca   : > { %7076 = vmatpush3.bf16.msra.mxu1 %v7712_v51  ;;  %7055 = vmatprep.subr.bf16.mxu0 %v7713_v52  ;;  %v7760_v51 = vld [vmem:[%s9768_s1 + $0x7a0] sm:$0xff]  }
  0xcb   : > { %7077 = vmatprep.subr.bf16.mxu1 %v7714_v53  ;;  %5281 = vmatprep.mubr.bf16.mxu0 %v6234_v20  ;;  %v7779_v20 = vld [vmem:[%s9768_s1 + $0x808] sm:$0xff]  }
  0xcc   : > { %5322 = vmatprep.mubr.bf16.mxu1 %v6236_v23  ;;  %v7782_v23 = vld [vmem:[%s9768_s1 + $0x8d0] sm:$0xff]  }
  0xcd   : > { %7056 = vmatpush3.bf16.msra.mxu0 %v7715_v54  ;;  %v7761_v54 = vld [vmem:[%s9768_s1 + $0x768] sm:$0xff]  }
  0xce   : > { %7078 = vmatpush3.bf16.msra.mxu1 %v7716_v55  ;;  %7057 = vmatprep.subr.bf16.mxu0 %v7717_v56 }
  0xcf   : > { %7079 = vmatprep.subr.bf16.mxu1 %v7718_v57  ;;  %v7762_v57 = vld [vmem:[%s9768_s1 + $0x7e8] sm:$0xff]  }
  0xd1   : > { %7058 = vmatpush3.bf16.msra.mxu0 %v7719_v58 }
  0xd2   : > { %7080 = vmatpush3.bf16.msra.mxu1 %v7720_v59  ;;  %7059 = vmatprep.subr.bf16.mxu0 %v7721_v60  ;;  %v7763_v59 = vld [vmem:[%s9768_s1 + $0x728] sm:$0xff]  }
  0xd3   : > { %7081 = vmatprep.subr.bf16.mxu1 %v7722_v61  ;;  %v7764_v60 = vld [vmem:[%s9768_s1 + $0x7a8] sm:$0xff]  }
  0xd5   : > { %7060 = vmatpush3.bf16.msra.mxu0 %v7723_v62  ;;  %v7765_v62 = vld [vmem:[%s9768_s1 + $0x770] sm:$0xff]  }
  0xd6   : > { %7082 = vmatpush3.bf16.msra.mxu1 %v7724_v63  ;;  %7061 = vmatprep.subr.bf16.mxu0 %v7725_v0  ;;  %v7766_v63 = vld [vmem:[%s9768_s1 + $0x7f0] sm:$0xff]  }
  0xd7   : > { %7083 = vmatprep.subr.bf16.mxu1 %v7726_v1  ;;  %v7767_v0 = vld [vmem:[%s9768_s1 + $0x730] sm:$0xff]  }
  0xd8   : > { %v7768_v1 = vld [vmem:[%s9768_s1 + $0x7b0] sm:$0xff]  }
  0xd9   : > { %7062 = vmatpush3.bf16.msra.mxu0 %v7727_v2  ;;  %v7769_v2 = vld [vmem:[%s9768_s1 + $0x778] sm:$0xff]  }
  0xda   : > { %7084 = vmatpush3.bf16.msra.mxu1 %v7728_v3  ;;  %7063 = vmatprep.subr.bf16.mxu0 %v7729_v4  ;;  %v7770_v3 = vld [vmem:[%s9768_s1 + $0x7f8] sm:$0xff]  }
  0xdb   : > { %7085 = vmatprep.subr.bf16.mxu1 %v7730_v5  ;;  %v7771_v4 = vld [vmem:[%s9768_s1 + $0x738] sm:$0xff]  }
  0xdc   : > { %v7772_v5 = vld [vmem:[%s9768_s1 + $0x7b8] sm:$0xff]  }
  0xdd   : > { %7064 = vmatpush3.bf16.msra.mxu0 %v7731_v6  ;;  %v291_v6 = vld [vmem:[%s8191_s6 + $0x70] sm:$0xff] }
  0xde   : > { %7086 = vmatpush3.bf16.msra.mxu1 %v7732_v7  ;;  %7065 = vmatprep.subr.bf16.mxu0 %v7733_v8  ;;  %v323_v7 = vld [vmem:[%s8191_s6 + $0x170] sm:$0xff] }
  0xdf   : > { %7087 = vmatprep.subr.bf16.mxu1 %v7734_v9  ;;  %v6237_v8 = vcombine.low %v291_v6, %v323_v7  ;;  %v6238_v9 = vcombine.high %v291_v6, %v323_v7  ;;  %v7805_v6 = vld [vmem:[%s9768_s1 + $0x940] sm:$0xff]  }
  0xe0   : > { %v7806_v7 = vld [vmem:[%s9768_s1 + $0x9c0] sm:$0xff]  }
  0xe1   : > { %7066 = vmatpush3.bf16.msra.mxu0 %v7735_v10  ;;  %v292_v10 = vld [vmem:[%s8191_s6 + $0x78] sm:$0xff] }
  0xe2   : > { %7088 = vmatpush3.bf16.msra.mxu1 %v7736_v11  ;;  %7067 = vmatprep.subr.bf16.mxu0 %v7737_v12  ;;  %v324_v11 = vld [vmem:[%s8191_s6 + $0x178] sm:$0xff] }
  0xe3   : > { %7089 = vmatprep.subr.bf16.mxu1 %v7738_v13  ;;  %v6239_v12 = vcombine.low %v292_v10, %v324_v11  ;;  %v6240_v13 = vcombine.high %v292_v10, %v324_v11  ;;  %v7809_v10 = vld [vmem:[%s9768_s1 + $0x948] sm:$0xff]  }
  0xe4   : > { %v7810_v11 = vld [vmem:[%s9768_s1 + $0x9c8] sm:$0xff]  }
  0xe5   : > { %7068 = vmatpush3.bf16.msra.mxu0 %v7739_v14  ;;  %v7773_v14 = vld [vmem:[%s9768_s1 + $0x840] sm:$0xff]  }
  0xe6   : > { %7090 = vmatpush3.bf16.msra.mxu1 %v7740_v15  ;;  %7097 = vmatprep.subr.bf16.mxu0 %v7741_v24  ;;  %v7774_v15 = vld [vmem:[%s9768_s1 + $0x8c0] sm:$0xff]   ;;  %v7783_v24 = vld [vmem:[%s9768_s1 + $0x810] sm:$0xff]  }
  0xe7   : > { %7119 = vmatprep.subr.bf16.mxu1 %v7742_v25  ;;  %v7784_v25 = vld [vmem:[%s9768_s1 + $0x890] sm:$0xff]  }
  0xe8   : > { %5282 = vmatmul.mubr.bf16.vlgmr.msra.gmra.mrb[24].mxu0 %v6233_v19  ;;  %v7778_v19 = vld [vmem:[%s9768_s1 + $0x8c8] sm:$0xff]  }
  0xe9   : > { %5323 = vmatmul.mubr.bf16.vlgmr.msra.gmra.mrb[24].mxu1 %v6235_v22  ;;  %7098 = vmatpush3.bf16.msra.mxu0 %v7743_v26  ;;  %v7781_v22 = vld [vmem:[%s9768_s1 + $0x850] sm:$0xff]   ;;  %v7785_v26 = vld [vmem:[%s9768_s1 + $0x858] sm:$0xff]  }
  0xea   : > { %7120 = vmatpush3.bf16.msra.mxu1 %v7744_v27  ;;  %7099 = vmatprep.subr.bf16.mxu0 %v7745_v28  ;;  %v7786_v27 = vld [vmem:[%s9768_s1 + $0x8d8] sm:$0xff]  }
  0xeb   : > { %7121 = vmatprep.subr.bf16.mxu1 %v7746_v29  ;;  %5363 = vmatprep.mubr.bf16.mxu0 %v6238_v9  ;;  %v7787_v29 = vld [vmem:[%s9768_s1 + $0x818] sm:$0xff]   ;;  %v7808_v9 = vld [vmem:[%s9768_s1 + $0x980] sm:$0xff]  }
  0xec   : > { %5404 = vmatprep.mubr.bf16.mxu1 %v6240_v13  ;;  %v7812_v13 = vld [vmem:[%s9768_s1 + $0x988] sm:$0xff]  }
  0xed   : > { %7100 = vmatpush3.bf16.msra.mxu0 %v7747_v30 }
  0xee   : > { %7122 = vmatpush3.bf16.msra.mxu1 %v7748_v31  ;;  %7101 = vmatprep.subr.bf16.mxu0 %v7749_v32  ;;  %v7788_v31 = vld [vmem:[%s9768_s1 + $0x898] sm:$0xff]  }
  0xef   : > { %7123 = vmatprep.subr.bf16.mxu1 %v7750_v33  ;;  %v7789_v33 = vld [vmem:[%s9768_s1 + $0x860] sm:$0xff]  }
  0xf1   : > { %7102 = vmatpush3.bf16.msra.mxu0 %v7751_v34 }
  0xf2   : > { %7124 = vmatpush3.bf16.msra.mxu1 %v7752_v35  ;;  %7103 = vmatprep.subr.bf16.mxu0 %v7753_v36  ;;  %v7790_v36 = vld [vmem:[%s9768_s1 + $0x8e0] sm:$0xff]  }
  0xf3   : > { %7125 = vmatprep.subr.bf16.mxu1 %v7754_v37 }
  0xf5   : > { %7104 = vmatpush3.bf16.msra.mxu0 %v7755_v39  ;;  %v7791_v39 = vld [vmem:[%s9768_s1 + $0x820] sm:$0xff]  }
  0xf6   : > { %7126 = vmatpush3.bf16.msra.mxu1 %v7756_v41  ;;  %7105 = vmatprep.subr.bf16.mxu0 %v7757_v43 }
  0xf7   : > { %7127 = vmatprep.subr.bf16.mxu1 %v7758_v46 }
  0xf9   : > { %7106 = vmatpush3.bf16.msra.mxu0 %v7759_v49 }
  0xfa   : > { %7128 = vmatpush3.bf16.msra.mxu1 %v7760_v51  ;;  %7107 = vmatprep.subr.bf16.mxu0 %v7761_v54  ;;  %v7797_v54 = vld [vmem:[%s9768_s1 + $0x870] sm:$0xff]  }
  0xfb   : > { %v6805_v38 = vpop.f32.mrb[0].mxu0  ;;  %7129 = vmatprep.subr.bf16.mxu1 %v7762_v57  ;;  %v7800_v57 = vld [vmem:[%s9768_s1 + $0x8b0] sm:$0xff]  }
  0xfc   : > { %v6827_v40 = vpop.f32.mrb[0].mxu1  ;;  %v6806_v42 = vpop.f32.mrb[1].mxu0 }
  0xfd   : > { %v6807_v44 = vadd.f32 %v6806_v42, %v6805_v38  ;;  %v6828_v45 = vpop.f32.mrb[1].mxu1  ;;  %v6808_v48 = vpop.f32.mrb[2].mxu0  ;;  %7108 = vmatpush3.bf16.msra.mxu0 %v7763_v59  ;;  %v7792_v42 = vld [vmem:[%s9768_s1 + $0x8a0] sm:$0xff]   ;;  %v7802_v59 = vld [vmem:[%s9768_s1 + $0x8f8] sm:$0xff]  }
  0xfe   : > { %v6829_v47 = vadd.f32 %v6828_v45, %v6827_v40  ;;  %v6830_v50 = vpop.f32.mrb[2].mxu1  ;;  %v6809_v53 = vpop.f32.mrb[3].mxu0  ;;  %7130 = vmatpush3.bf16.msra.mxu1 %v7764_v60  ;;  %7109 = vmatprep.subr.bf16.mxu0 %v7765_v62  ;;  %v7793_v45 = vld [vmem:[%s9768_s1 + $0x868] sm:$0xff]   ;;  %v7803_v60 = vld [vmem:[%s9768_s1 + $0x838] sm:$0xff]   ;;  %v293_v62 = vld [vmem:[%s8191_s6 + $0x80] sm:$0xff] }
  0xff   : > { %v6810_v55 = vadd.f32 %v6809_v53, %v6808_v48  ;;  %v6831_v56 = vpop.f32.mrb[3].mxu1  ;;  %7131 = vmatprep.subr.bf16.mxu1 %v7766_v63  ;;  %v7794_v48 = vld [vmem:[%s9768_s1 + $0x8e8] sm:$0xff]   ;;  %v325_v63 = vld [vmem:[%s8191_s6 + $0x180] sm:$0xff] }
 0x100   : > { %v8863_v52 = vadd.f32 %v6829_v47, %v6807_v44  ;;  %v6832_v58 = vadd.f32 %v6831_v56, %v6830_v50  ;;  %v7795_v50 = vld [vmem:[%s9768_s1 + $0x828] sm:$0xff]   ;;  %v7799_v56 = vld [vmem:[%s9768_s1 + $0x830] sm:$0xff]  }
 0x101   : > { %7110 = vmatpush3.bf16.msra.mxu0 %v7767_v0  ;;  %v294_v0 = vld [vmem:[%s8191_s6 + $0x88] sm:$0xff] }
 0x102   : > { %v8877_v61 = vadd.f32 %v6832_v58, %v6810_v55  ;;  %7132 = vmatpush3.bf16.msra.mxu1 %v7768_v1  ;;  %7111 = vmatprep.subr.bf16.mxu0 %v7769_v2  ;;  %v7798_v55 = vld [vmem:[%s9768_s1 + $0x8f0] sm:$0xff]   ;;  %v7801_v58 = vld [vmem:[%s9768_s1 + $0x878] sm:$0xff]   ;;  %v326_v1 = vld [vmem:[%s8191_s6 + $0x188] sm:$0xff]  ;;  %v6241_v2 = vcombine.low %v293_v62, %v325_v63 }
 0x103   : > { %7133 = vmatprep.subr.bf16.mxu1 %v7770_v3  ;;  %v6242_v3 = vcombine.high %v293_v62, %v325_v63  ;;  %v7837_v62 = vld [vmem:[%s9768_s1 + $0xa40] sm:$0xff]  }
 0x104   : > { %v7838_v63 = vld [vmem:[%s9768_s1 + $0xac0] sm:$0xff]  }
 0x105   : > { %7112 = vmatpush3.bf16.msra.mxu0 %v7771_v4  ;;  %v6243_v4 = vcombine.low %v294_v0, %v326_v1 }
 0x106   : > { %7134 = vmatpush3.bf16.msra.mxu1 %v7772_v5  ;;  %7141 = vmatprep.subr.bf16.mxu0 %v7773_v14  ;;  %v6244_v5 = vcombine.high %v294_v0, %v326_v1  ;;  %v7813_v14 = vld [vmem:[%s9768_s1 + $0x950] sm:$0xff]   ;;  %v7839_v0 = vld [vmem:[%s9768_s1 + $0xa00] sm:$0xff]  }
 0x107   : > { %7163 = vmatprep.subr.bf16.mxu1 %v7774_v15  ;;  %v7814_v15 = vld [vmem:[%s9768_s1 + $0x9d0] sm:$0xff]   ;;  %v7840_v1 = vld [vmem:[%s9768_s1 + $0xa80] sm:$0xff]  }
 0x108   : > { %5364 = vmatmul.mubr.bf16.vlgmr.msra.gmra.mrb[28].mxu0 %v6237_v8  ;;  %v7807_v8 = vld [vmem:[%s9768_s1 + $0x900] sm:$0xff]  }
 0x109   : > { %5405 = vmatmul.mubr.bf16.vlgmr.msra.gmra.mrb[28].mxu1 %v6239_v12  ;;  %7142 = vmatpush3.bf16.msra.mxu0 %v7775_v16  ;;  %v7811_v12 = vld [vmem:[%s9768_s1 + $0x908] sm:$0xff]   ;;  %v7815_v16 = vld [vmem:[%s9768_s1 + $0x910] sm:$0xff]  }
 0x10a   : > { %7164 = vmatpush3.bf16.msra.mxu1 %v7776_v17  ;;  %7143 = vmatprep.subr.bf16.mxu0 %v7777_v18  ;;  %v7816_v17 = vld [vmem:[%s9768_s1 + $0x990] sm:$0xff]   ;;  %v7817_v18 = vld [vmem:[%s9768_s1 + $0x958] sm:$0xff]  }
 0x10b   : > { %7165 = vmatprep.subr.bf16.mxu1 %v7778_v19  ;;  %5445 = vmatprep.mubr.bf16.mxu0 %v6242_v3  ;;  %v7818_v19 = vld [vmem:[%s9768_s1 + $0x9d8] sm:$0xff]   ;;  %v7842_v3 = vld [vmem:[%s9768_s1 + $0xac8] sm:$0xff]  }
 0x10c   : > { %5486 = vmatprep.mubr.bf16.mxu1 %v6244_v5  ;;  %v7844_v5 = vld [vmem:[%s9768_s1 + $0xa88] sm:$0xff]  }
 0x10d   : > { %7144 = vmatpush3.bf16.msra.mxu0 %v7779_v20  ;;  %v7819_v20 = vld [vmem:[%s9768_s1 + $0x918] sm:$0xff]  }
 0x10e   : > { %7166 = vmatpush3.bf16.msra.mxu1 %v7780_v21  ;;  %7145 = vmatprep.subr.bf16.mxu0 %v7781_v22  ;;  %v7820_v22 = vld [vmem:[%s9768_s1 + $0x998] sm:$0xff]  }
 0x10f   : > { %7167 = vmatprep.subr.bf16.mxu1 %v7782_v23 }
 0x111   : > { %7146 = vmatpush3.bf16.msra.mxu0 %v7783_v24  ;;  %v7821_v24 = vld [vmem:[%s9768_s1 + $0x960] sm:$0xff]  }
 0x112   : > { %7168 = vmatpush3.bf16.msra.mxu1 %v7784_v25  ;;  %7147 = vmatprep.subr.bf16.mxu0 %v7785_v26  ;;  %v7822_v26 = vld [vmem:[%s9768_s1 + $0x9e0] sm:$0xff]  }
 0x113   : > { %7169 = vmatprep.subr.bf16.mxu1 %v7786_v27 }
 0x115   : > { %7148 = vmatpush3.bf16.msra.mxu0 %v7787_v29  ;;  %v7823_v29 = vld [vmem:[%s9768_s1 + $0x920] sm:$0xff]  }
 0x116   : > { %7170 = vmatpush3.bf16.msra.mxu1 %v7788_v31  ;;  %7149 = vmatprep.subr.bf16.mxu0 %v7789_v33 }
 0x117   : > { %7171 = vmatprep.subr.bf16.mxu1 %v7790_v36 }
 0x119   : > { %7150 = vmatpush3.bf16.msra.mxu0 %v7791_v39 }
 0x11a   : > { %7172 = vmatpush3.bf16.msra.mxu1 %v7792_v42  ;;  %7151 = vmatprep.subr.bf16.mxu0 %v7793_v45  ;;  %v7829_v45 = vld [vmem:[%s9768_s1 + $0x970] sm:$0xff]  }
 0x11b   : > { %v6849_v28 = vpop.f32.mrb[4].mxu0  ;;  %7173 = vmatprep.subr.bf16.mxu1 %v7794_v48  ;;  %v7831_v48 = vld [vmem:[%s9768_s1 + $0x930] sm:$0xff]  }
 0x11c   : > { %v6871_v30 = vpop.f32.mrb[4].mxu1  ;;  %v6850_v32 = vpop.f32.mrb[5].mxu0 }
 0x11d   : > { %v6851_v34 = vadd.f32 %v6850_v32, %v6849_v28  ;;  %v6872_v35 = vpop.f32.mrb[5].mxu1  ;;  %v6852_v38 = vpop.f32.mrb[6].mxu0  ;;  %7152 = vmatpush3.bf16.msra.mxu0 %v7795_v50  ;;  %v7824_v32 = vld [vmem:[%s9768_s1 + $0x9a0] sm:$0xff]   ;;  %v7833_v50 = vld [vmem:[%s9768_s1 + $0x978] sm:$0xff]  }
 0x11e   : > { %v6873_v37 = vadd.f32 %v6872_v35, %v6871_v30  ;;  %v6874_v41 = vpop.f32.mrb[6].mxu1  ;;  %v6853_v43 = vpop.f32.mrb[7].mxu0  ;;  %7153 = vmatprep.subr.bf16.mxu0 %v7797_v54  ;;  %v7825_v35 = vld [vmem:[%s9768_s1 + $0x968] sm:$0xff]   ;;  %v295_v54 = vld [vmem:[%s8191_s6 + $0x90] sm:$0xff] }
 0x11f   : > { %v4874_v40 = vadd.f32 %v6851_v34, %v8863_v52  ;;  %v6854_v46 = vadd.f32 %v6853_v43, %v6852_v38  ;;  %v6875_v47 = vpop.f32.mrb[7].mxu1  ;;  %v7796_v52 = vld [vmem:[%s9768_s1 + $0x8a8] sm:$0xff]  }
 0x120   : > { %v6876_v49 = vadd.f32 %v6875_v47, %v6874_v41  ;;  %7174 = vmatpush3.bf16.msra.mxu1 %v7796_v52  ;;  %v7826_v38 = vld [vmem:[%s9768_s1 + $0x9e8] sm:$0xff]   ;;  %v7830_v47 = vld [vmem:[%s9768_s1 + $0x9f0] sm:$0xff]   ;;  %v7835_v52 = vld [vmem:[%s9768_s1 + $0x938] sm:$0xff]  }
 0x121   : > { %v8968_v44 = vadd.f32 %v6873_v37, %v4874_v40  ;;  %v4877_v51 = vadd.f32 %v6854_v46, %v8877_v61  ;;  %7175 = vmatprep.subr.bf16.mxu1 %v7798_v55  ;;  %7154 = vmatpush3.bf16.msra.mxu0 %v7799_v56  ;;  %v7804_v61 = vld [vmem:[%s9768_s1 + $0x8b8] sm:$0xff]   ;;  %v7827_v41 = vld [vmem:[%s9768_s1 + $0x928] sm:$0xff]   ;;  %v327_v55 = vld [vmem:[%s8191_s6 + $0x190] sm:$0xff] }
 0x122   : > { %7155 = vmatprep.subr.bf16.mxu0 %v7801_v58  ;;  %v7828_v43 = vld [vmem:[%s9768_s1 + $0x9a8] sm:$0xff]   ;;  %v296_v56 = vld [vmem:[%s8191_s6 + $0x98] sm:$0xff]  ;;  %v6246_v58 = vcombine.high %v295_v54, %v327_v55 }
 0x123   : > { %v8983_v53 = vadd.f32 %v6876_v49, %v4877_v51  ;;  %v7832_v49 = vld [vmem:[%s9768_s1 + $0x9b0] sm:$0xff]   ;;  %v7834_v51 = vld [vmem:[%s9768_s1 + $0x9f8] sm:$0xff]  }
 0x124   : > { %7176 = vmatpush3.bf16.msra.mxu1 %v7800_v57  ;;  %v6245_v57 = vcombine.low %v295_v54, %v327_v55  ;;  %v7869_v54 = vld [vmem:[%s9768_s1 + $0xb40] sm:$0xff]  }
 0x125   : > { %7177 = vmatprep.subr.bf16.mxu1 %v7802_v59  ;;  %7156 = vmatpush3.bf16.msra.mxu0 %v7803_v60  ;;  %v328_v59 = vld [vmem:[%s8191_s6 + $0x198] sm:$0xff]  ;;  %v7870_v55 = vld [vmem:[%s9768_s1 + $0xbc0] sm:$0xff]  }
 0x126   : > { %7185 = vmatprep.subr.bf16.mxu0 %v7805_v6  ;;  %v6247_v60 = vcombine.low %v296_v56, %v328_v59  ;;  %v7845_v6 = vld [vmem:[%s9768_s1 + $0xa50] sm:$0xff]  }
 0x128   : > { %7178 = vmatpush3.bf16.msra.mxu1 %v7804_v61  ;;  %5446 = vmatmul.mubr.bf16.vlgmr.msra.gmra.mrb[32].mxu0 %v6241_v2  ;;  %v6248_v61 = vcombine.high %v296_v56, %v328_v59  ;;  %v7841_v2 = vld [vmem:[%s9768_s1 + $0xa48] sm:$0xff]   ;;  %v7871_v56 = vld [vmem:[%s9768_s1 + $0xb00] sm:$0xff]  }
 0x129   : > { %7207 = vmatprep.subr.bf16.mxu1 %v7806_v7  ;;  %7186 = vmatpush3.bf16.msra.mxu0 %v7807_v8  ;;  %v7846_v7 = vld [vmem:[%s9768_s1 + $0xad0] sm:$0xff]   ;;  %v7874_v59 = vld [vmem:[%s9768_s1 + $0xbc8] sm:$0xff]  }
 0x12a   : > { %7187 = vmatprep.subr.bf16.mxu0 %v7809_v10  ;;  %5527 = vmatprep.mubr.bf16.mxu0 %v6246_v58  ;;  %v7847_v8 = vld [vmem:[%s9768_s1 + $0xa10] sm:$0xff]   ;;  %v7849_v10 = vld [vmem:[%s9768_s1 + $0xa58] sm:$0xff]   ;;  %v7873_v58 = vld [vmem:[%s9768_s1 + $0xb48] sm:$0xff]  }
 0x12b   : > { %5487 = vmatmul.mubr.bf16.vlgmr.msra.gmra.mrb[32].mxu1 %v6243_v4  ;;  %v7843_v4 = vld [vmem:[%s9768_s1 + $0xa08] sm:$0xff]  }
 0x12c   : > { %7208 = vmatpush3.bf16.msra.mxu1 %v7808_v9  ;;  %5568 = vmatprep.mubr.bf16.mxu1 %v6248_v61  ;;  %v7848_v9 = vld [vmem:[%s9768_s1 + $0xa90] sm:$0xff]   ;;  %v7876_v61 = vld [vmem:[%s9768_s1 + $0xb88] sm:$0xff]  }
 0x12d   : > { %7209 = vmatprep.subr.bf16.mxu1 %v7810_v11  ;;  %7188 = vmatpush3.bf16.msra.mxu0 %v7811_v12  ;;  %v7850_v11 = vld [vmem:[%s9768_s1 + $0xad8] sm:$0xff]  }
 0x12e   : > { %7189 = vmatprep.subr.bf16.mxu0 %v7813_v14 }
 0x130   : > { %7210 = vmatpush3.bf16.msra.mxu1 %v7812_v13  ;;  %v7851_v13 = vld [vmem:[%s9768_s1 + $0xa18] sm:$0xff]  }
 0x131   : > { %7211 = vmatprep.subr.bf16.mxu1 %v7814_v15  ;;  %7190 = vmatpush3.bf16.msra.mxu0 %v7815_v16  ;;  %v7852_v15 = vld [vmem:[%s9768_s1 + $0xa98] sm:$0xff]  }
 0x132   : > { %7191 = vmatprep.subr.bf16.mxu0 %v7817_v18 }
 0x134   : > { %7212 = vmatpush3.bf16.msra.mxu1 %v7816_v17  ;;  %v7853_v17 = vld [vmem:[%s9768_s1 + $0xa60] sm:$0xff]  }
 0x135   : > { %7213 = vmatprep.subr.bf16.mxu1 %v7818_v19  ;;  %7192 = vmatpush3.bf16.msra.mxu0 %v7819_v20  ;;  %v7854_v20 = vld [vmem:[%s9768_s1 + $0xae0] sm:$0xff]  }
 0x136   : > { %7193 = vmatprep.subr.bf16.mxu0 %v7821_v24 }
 0x138   : > { %7214 = vmatpush3.bf16.msra.mxu1 %v7820_v22 }
 0x139   : > { %7215 = vmatprep.subr.bf16.mxu1 %v7822_v26  ;;  %7194 = vmatpush3.bf16.msra.mxu0 %v7823_v29  ;;  %v7856_v26 = vld [vmem:[%s9768_s1 + $0xaa0] sm:$0xff]   ;;  %v7857_v29 = vld [vmem:[%s9768_s1 + $0xa68] sm:$0xff]  }
 0x13a   : > { %7195 = vmatprep.subr.bf16.mxu0 %v7825_v35 }
 0x13b   : > { %v6893_v21 = vpop.f32.mrb[8].mxu0 }
 0x13c   : > { %v6915_v23 = vpop.f32.mrb[8].mxu1  ;;  %v6894_v25 = vpop.f32.mrb[9].mxu0  ;;  %7216 = vmatpush3.bf16.msra.mxu1 %v7824_v32  ;;  %v7858_v32 = vld [vmem:[%s9768_s1 + $0xae8] sm:$0xff]  }
 0x13d   : > { %v6895_v27 = vadd.f32 %v6894_v25, %v6893_v21  ;;  %v6916_v28 = vpop.f32.mrb[9].mxu1  ;;  %v6896_v31 = vpop.f32.mrb[10].mxu0  ;;  %7217 = vmatprep.subr.bf16.mxu1 %v7826_v38  ;;  %7196 = vmatpush3.bf16.msra.mxu0 %v7827_v41  ;;  %v7861_v38 = vld [vmem:[%s9768_s1 + $0xa70] sm:$0xff]  }
 0x13e   : > { %v6917_v30 = vadd.f32 %v6916_v28, %v6915_v23  ;;  %v6918_v34 = vpop.f32.mrb[10].mxu1  ;;  %v6897_v36 = vpop.f32.mrb[11].mxu0  ;;  %7197 = vmatprep.subr.bf16.mxu0 %v7829_v45  ;;  %v7855_v23 = vld [vmem:[%s9768_s1 + $0xa20] sm:$0xff]   ;;  %v7864_v41 = vld [vmem:[%s9768_s1 + $0xab0] sm:$0xff]   ;;  %v7868_v45 = vld [vmem:[%s9768_s1 + $0xab8] sm:$0xff]  }
 0x13f   : > { %v4956_v33 = vadd.f32 %v6895_v27, %v8968_v44  ;;  %v6898_v39 = vadd.f32 %v6897_v36, %v6896_v31  ;;  %v6919_v40 = vpop.f32.mrb[11].mxu1  ;;  %v7860_v36 = vld [vmem:[%s9768_s1 + $0xaa8] sm:$0xff]  }
 0x140   : > { %v6920_v42 = vadd.f32 %v6919_v40, %v6918_v34  ;;  %7218 = vmatpush3.bf16.msra.mxu1 %v7828_v43  ;;  %v7859_v34 = vld [vmem:[%s9768_s1 + $0xa28] sm:$0xff]   ;;  %v7863_v40 = vld [vmem:[%s9768_s1 + $0xa30] sm:$0xff]   ;;  %v7866_v43 = vld [vmem:[%s9768_s1 + $0xaf8] sm:$0xff]  }
 0x141   : > { %v9077_v37 = vadd.f32 %v6917_v30, %v4956_v33  ;;  %v4959_v44 = vadd.f32 %v6898_v39, %v8983_v53  ;;  %7219 = vmatprep.subr.bf16.mxu1 %v7830_v47  ;;  %7198 = vmatpush3.bf16.msra.mxu0 %v7831_v48  ;;  %v7836_v53 = vld [vmem:[%s9768_s1 + $0x9b8] sm:$0xff]   ;;  %v7862_v39 = vld [vmem:[%s9768_s1 + $0xaf0] sm:$0xff]   ;;  %v329_v47 = vld [vmem:[%s8191_s6 + $0x1a0] sm:$0xff] }
 0x142   : > { %7199 = vmatprep.subr.bf16.mxu0 %v7833_v50  ;;  %v298_v50 = vld [vmem:[%s8191_s6 + $0xa8] sm:$0xff] }
 0x143   : > { %v9092_v46 = vadd.f32 %v6920_v42, %v4959_v44  ;;  %v7865_v42 = vld [vmem:[%s9768_s1 + $0xa78] sm:$0xff]  }
 0x144   : > { %7220 = vmatpush3.bf16.msra.mxu1 %v7832_v49  ;;  %v7867_v44 = vld [vmem:[%s9768_s1 + $0xa38] sm:$0xff]  }
 0x145   : > { %7221 = vmatprep.subr.bf16.mxu1 %v7834_v51  ;;  %7200 = vmatpush3.bf16.msra.mxu0 %v7835_v52  ;;  %v330_v51 = vld [vmem:[%s8191_s6 + $0x1a8] sm:$0xff] }
 0x146   : > { %7229 = vmatprep.subr.bf16.mxu0 %v7837_v62  ;;  %v6251_v52 = vcombine.low %v298_v50, %v330_v51  ;;  %v7877_v62 = vld [vmem:[%s9768_s1 + $0xb50] sm:$0xff]  }
 0x148   : > { %7222 = vmatpush3.bf16.msra.mxu1 %v7836_v53  ;;  %5528 = vmatmul.mubr.bf16.vlgmr.msra.gmra.mrb[36].mxu0 %v6245_v57  ;;  %v6252_v53 = vcombine.high %v298_v50, %v330_v51  ;;  %v7872_v57 = vld [vmem:[%s9768_s1 + $0xb80] sm:$0xff]   ;;  %v7905_v50 = vld [vmem:[%s9768_s1 + $0xc48] sm:$0xff]  }
 0x149   : > { %7251 = vmatprep.subr.bf16.mxu1 %v7838_v63  ;;  %7230 = vmatpush3.bf16.msra.mxu0 %v7839_v0  ;;  %v7878_v63 = vld [vmem:[%s9768_s1 + $0xbd0] sm:$0xff]   ;;  %v7906_v51 = vld [vmem:[%s9768_s1 + $0xcc8] sm:$0xff]  }
 0x14a   : > { %7231 = vmatprep.subr.bf16.mxu0 %v7841_v2  ;;  %v7879_v0 = vld [vmem:[%s9768_s1 + $0xb10] sm:$0xff]   ;;  %v7881_v2 = vld [vmem:[%s9768_s1 + $0xb58] sm:$0xff]  }
 0x14b   : > { %5569 = vmatmul.mubr.bf16.vlgmr.msra.gmra.mrb[36].mxu1 %v6247_v60  ;;  %v7875_v60 = vld [vmem:[%s9768_s1 + $0xb08] sm:$0xff]  }
 0x14c   : > { %7252 = vmatpush3.bf16.msra.mxu1 %v7840_v1  ;;  %5650 = vmatprep.mubr.bf16.mxu1 %v6252_v53  ;;  %v7880_v1 = vld [vmem:[%s9768_s1 + $0xb90] sm:$0xff]   ;;  %v7908_v53 = vld [vmem:[%s9768_s1 + $0xc88] sm:$0xff]  }
 0x14d   : > { %7253 = vmatprep.subr.bf16.mxu1 %v7842_v3  ;;  %7232 = vmatpush3.bf16.msra.mxu0 %v7843_v4  ;;  %v7882_v3 = vld [vmem:[%s9768_s1 + $0xbd8] sm:$0xff]  }
 0x14e   : > { %7233 = vmatprep.subr.bf16.mxu0 %v7845_v6 }
 0x150   : > { %7254 = vmatpush3.bf16.msra.mxu1 %v7844_v5  ;;  %v7883_v5 = vld [vmem:[%s9768_s1 + $0xb18] sm:$0xff]  }
 0x151   : > { %7255 = vmatprep.subr.bf16.mxu1 %v7846_v7  ;;  %7234 = vmatpush3.bf16.msra.mxu0 %v7847_v8  ;;  %v7884_v7 = vld [vmem:[%s9768_s1 + $0xb98] sm:$0xff]  }
 0x152   : > { %7235 = vmatprep.subr.bf16.mxu0 %v7849_v10 }
 0x154   : > { %7256 = vmatpush3.bf16.msra.mxu1 %v7848_v9  ;;  %v7885_v9 = vld [vmem:[%s9768_s1 + $0xb60] sm:$0xff]  }
 0x155   : > { %7257 = vmatprep.subr.bf16.mxu1 %v7850_v11  ;;  %7236 = vmatpush3.bf16.msra.mxu0 %v7851_v13 }
 0x156   : > { %7237 = vmatprep.subr.bf16.mxu0 %v7853_v17 }
 0x158   : > { %7258 = vmatpush3.bf16.msra.mxu1 %v7852_v15  ;;  %v7887_v15 = vld [vmem:[%s9768_s1 + $0xb20] sm:$0xff]  }
 0x159   : > { %7259 = vmatprep.subr.bf16.mxu1 %v7854_v20  ;;  %7238 = vmatpush3.bf16.msra.mxu0 %v7855_v23 }
 0x15a   : > { %7239 = vmatprep.subr.bf16.mxu0 %v7857_v29 }
 0x15b   : > { %v6937_v12 = vpop.f32.mrb[12].mxu0 }
 0x15c   : > { %v6959_v14 = vpop.f32.mrb[12].mxu1  ;;  %v6938_v16 = vpop.f32.mrb[13].mxu0  ;;  %7260 = vmatpush3.bf16.msra.mxu1 %v7856_v26  ;;  %v7891_v26 = vld [vmem:[%s9768_s1 + $0xb28] sm:$0xff]  }
 0x15d   : > { %v6939_v18 = vadd.f32 %v6938_v16, %v6937_v12  ;;  %v6960_v19 = vpop.f32.mrb[13].mxu1  ;;  %v6940_v22 = vpop.f32.mrb[14].mxu0  ;;  %7261 = vmatprep.subr.bf16.mxu1 %v7858_v32  ;;  %7240 = vmatpush3.bf16.msra.mxu0 %v7859_v34  ;;  %v7886_v12 = vld [vmem:[%s9768_s1 + $0xbe0] sm:$0xff]   ;;  %v7895_v32 = vld [vmem:[%s9768_s1 + $0xb30] sm:$0xff]   ;;  %v7897_v34 = vld [vmem:[%s9768_s1 + $0xb78] sm:$0xff]  }
 0x15e   : > { %v6961_v21 = vadd.f32 %v6960_v19, %v6959_v14  ;;  %v6962_v25 = vpop.f32.mrb[14].mxu1  ;;  %v6941_v27 = vpop.f32.mrb[15].mxu0  ;;  %7241 = vmatprep.subr.bf16.mxu0 %v7861_v38  ;;  %v299_v38 = vld [vmem:[%s8191_s6 + $0xb0] sm:$0xff] }
 0x15f   : > { %v5038_v24 = vadd.f32 %v6939_v18, %v9077_v37  ;;  %v6942_v30 = vadd.f32 %v6941_v27, %v6940_v22  ;;  %v6963_v31 = vpop.f32.mrb[15].mxu1  ;;  %v7888_v18 = vld [vmem:[%s9768_s1 + $0xba0] sm:$0xff]  }
 0x160   : > { %v6964_v33 = vadd.f32 %v6963_v31, %v6962_v25  ;;  %7262 = vmatpush3.bf16.msra.mxu1 %v7860_v36  ;;  %v7894_v31 = vld [vmem:[%s9768_s1 + $0xbf0] sm:$0xff]   ;;  %v7899_v36 = vld [vmem:[%s9768_s1 + $0xb38] sm:$0xff]  }
 0x161   : > { %v9180_v28 = vadd.f32 %v6961_v21, %v5038_v24  ;;  %v5041_v35 = vadd.f32 %v6942_v30, %v9092_v46  ;;  %7263 = vmatprep.subr.bf16.mxu1 %v7862_v39  ;;  %7242 = vmatpush3.bf16.msra.mxu0 %v7863_v40  ;;  %v297_v46 = vld [vmem:[%s8191_s6 + $0xa0] sm:$0xff]  ;;  %v7889_v21 = vld [vmem:[%s9768_s1 + $0xb68] sm:$0xff]   ;;  %v7893_v30 = vld [vmem:[%s9768_s1 + $0xb70] sm:$0xff]  }
 0x162   : > { %7243 = vmatprep.subr.bf16.mxu0 %v7865_v42  ;;  %v6249_v48 = vcombine.low %v297_v46, %v329_v47  ;;  %v6250_v49 = vcombine.high %v297_v46, %v329_v47  ;;  %v7890_v24 = vld [vmem:[%s9768_s1 + $0xbe8] sm:$0xff]   ;;  %v331_v39 = vld [vmem:[%s8191_s6 + $0x1b0] sm:$0xff]  ;;  %v300_v40 = vld [vmem:[%s8191_s6 + $0xb8] sm:$0xff] }
 0x163   : > { %v9195_v37 = vadd.f32 %v6964_v33, %v5041_v35  ;;  %v7896_v33 = vld [vmem:[%s9768_s1 + $0xbb0] sm:$0xff]   ;;  %v7898_v35 = vld [vmem:[%s9768_s1 + $0xbf8] sm:$0xff]   ;;  %v6253_v42 = vcombine.low %v299_v38, %v331_v39  ;;  %v7901_v46 = vld [vmem:[%s9768_s1 + $0xc40] sm:$0xff]  }
 0x164   : > { %7264 = vmatpush3.bf16.msra.mxu1 %v7864_v41  ;;  %5609 = vmatprep.mubr.bf16.mxu0 %v6250_v49  ;;  %v332_v41 = vld [vmem:[%s8191_s6 + $0x1b8] sm:$0xff]  ;;  %v7902_v47 = vld [vmem:[%s9768_s1 + $0xcc0] sm:$0xff]  }
 0x165   : > { %7265 = vmatprep.subr.bf16.mxu1 %v7866_v43  ;;  %7244 = vmatpush3.bf16.msra.mxu0 %v7867_v44  ;;  %v6254_v43 = vcombine.high %v299_v38, %v331_v39  ;;  %v6255_v44 = vcombine.low %v300_v40, %v332_v41  ;;  %v7904_v49 = vld [vmem:[%s9768_s1 + $0xc80] sm:$0xff]  }
 0x166   : > { %7273 = vmatprep.subr.bf16.mxu0 %v7869_v54  ;;  %v7909_v54 = vld [vmem:[%s9768_s1 + $0xc50] sm:$0xff]   ;;  %v7933_v38 = vld [vmem:[%s9768_s1 + $0xd40] sm:$0xff]  }
 0x167   : > { %v7934_v39 = vld [vmem:[%s9768_s1 + $0xdc0] sm:$0xff]  }
 0x168   : > { %7266 = vmatpush3.bf16.msra.mxu1 %v7868_v45  ;;  %5610 = vmatmul.mubr.bf16.vlgmr.msra.gmra.mrb[40].mxu0 %v6249_v48  ;;  %v6256_v45 = vcombine.high %v300_v40, %v332_v41  ;;  %v7903_v48 = vld [vmem:[%s9768_s1 + $0xc00] sm:$0xff]  }
 0x169   : > { %7295 = vmatprep.subr.bf16.mxu1 %v7870_v55  ;;  %7274 = vmatpush3.bf16.msra.mxu0 %v7871_v56  ;;  %v7910_v55 = vld [vmem:[%s9768_s1 + $0xcd0] sm:$0xff]   ;;  %v7935_v40 = vld [vmem:[%s9768_s1 + $0xd00] sm:$0xff]  }
 0x16a   : > { %7275 = vmatprep.subr.bf16.mxu0 %v7873_v58  ;;  %5691 = vmatprep.mubr.bf16.mxu0 %v6254_v43  ;;  %v7911_v56 = vld [vmem:[%s9768_s1 + $0xc10] sm:$0xff]   ;;  %v7913_v58 = vld [vmem:[%s9768_s1 + $0xc58] sm:$0xff]   ;;  %v7936_v41 = vld [vmem:[%s9768_s1 + $0xd80] sm:$0xff]  }
 0x16b   : > { %5651 = vmatmul.mubr.bf16.vlgmr.msra.gmra.mrb[40].mxu1 %v6251_v52  ;;  %v7907_v52 = vld [vmem:[%s9768_s1 + $0xc08] sm:$0xff]  }
 0x16c   : > { %7296 = vmatpush3.bf16.msra.mxu1 %v7872_v57  ;;  %5732 = vmatprep.mubr.bf16.mxu1 %v6256_v45  ;;  %v7912_v57 = vld [vmem:[%s9768_s1 + $0xc90] sm:$0xff]   ;;  %v7938_v43 = vld [vmem:[%s9768_s1 + $0xdc8] sm:$0xff]  }
 0x16d   : > { %7297 = vmatprep.subr.bf16.mxu1 %v7874_v59  ;;  %7276 = vmatpush3.bf16.msra.mxu0 %v7875_v60  ;;  %v7914_v59 = vld [vmem:[%s9768_s1 + $0xcd8] sm:$0xff]   ;;  %v7940_v45 = vld [vmem:[%s9768_s1 + $0xd88] sm:$0xff]  }
 0x16e   : > { %7277 = vmatprep.subr.bf16.mxu0 %v7877_v62  ;;  %v7915_v60 = vld [vmem:[%s9768_s1 + $0xc18] sm:$0xff]  }
 0x16f   : > { %v7916_v62 = vld [vmem:[%s9768_s1 + $0xc98] sm:$0xff]  }
 0x170   : > { %7298 = vmatpush3.bf16.msra.mxu1 %v7876_v61 }
 0x171   : > { %7299 = vmatprep.subr.bf16.mxu1 %v7878_v63  ;;  %7278 = vmatpush3.bf16.msra.mxu0 %v7879_v0  ;;  %v7917_v0 = vld [vmem:[%s9768_s1 + $0xc60] sm:$0xff]  }
 0x172   : > { %7279 = vmatprep.subr.bf16.mxu0 %v7881_v2  ;;  %v7918_v2 = vld [vmem:[%s9768_s1 + $0xce0] sm:$0xff]  }
 0x174   : > { %7300 = vmatpush3.bf16.msra.mxu1 %v7880_v1 }
 0x175   : > { %7301 = vmatprep.subr.bf16.mxu1 %v7882_v3  ;;  %7280 = vmatpush3.bf16.msra.mxu0 %v7883_v5  ;;  %v7919_v5 = vld [vmem:[%s9768_s1 + $0xc20] sm:$0xff]  }
 0x176   : > { %7281 = vmatprep.subr.bf16.mxu0 %v7885_v9 }
 0x178   : > { %7302 = vmatpush3.bf16.msra.mxu1 %v7884_v7 }
 0x179   : > { %7303 = vmatprep.subr.bf16.mxu1 %v7886_v12  ;;  %7282 = vmatpush3.bf16.msra.mxu0 %v7887_v15 }
 0x17a   : > { %7283 = vmatprep.subr.bf16.mxu0 %v7889_v21  ;;  %v7925_v21 = vld [vmem:[%s9768_s1 + $0xc70] sm:$0xff]  }
 0x17b   : > { %v6981_v4 = vpop.f32.mrb[16].mxu0 }
 0x17c   : > { %v7003_v6 = vpop.f32.mrb[16].mxu1  ;;  %v6982_v8 = vpop.f32.mrb[17].mxu0  ;;  %7304 = vmatpush3.bf16.msra.mxu1 %v7888_v18 }
 0x17d   : > { %v6983_v10 = vadd.f32 %v6982_v8, %v6981_v4  ;;  %v7004_v11 = vpop.f32.mrb[17].mxu1  ;;  %v6984_v14 = vpop.f32.mrb[18].mxu0  ;;  %7305 = vmatprep.subr.bf16.mxu1 %v7890_v24  ;;  %7284 = vmatpush3.bf16.msra.mxu0 %v7891_v26  ;;  %v7920_v8 = vld [vmem:[%s9768_s1 + $0xca0] sm:$0xff]   ;;  %v7927_v24 = vld [vmem:[%s9768_s1 + $0xc30] sm:$0xff]   ;;  %v7929_v26 = vld [vmem:[%s9768_s1 + $0xc78] sm:$0xff]  }
 0x17e   : > { %v7005_v13 = vadd.f32 %v7004_v11, %v7003_v6  ;;  %v7006_v17 = vpop.f32.mrb[18].mxu1  ;;  %v6985_v19 = vpop.f32.mrb[19].mxu0  ;;  %7285 = vmatprep.subr.bf16.mxu0 %v7893_v30  ;;  %v7921_v11 = vld [vmem:[%s9768_s1 + $0xc68] sm:$0xff]   ;;  %v301_v30 = vld [vmem:[%s8191_s6 + $0xc0] sm:$0xff] }
 0x17f   : > { %v5120_v16 = vadd.f32 %v6983_v10, %v9180_v28  ;;  %v6986_v22 = vadd.f32 %v6985_v19, %v6984_v14  ;;  %v7007_v23 = vpop.f32.mrb[19].mxu1  ;;  %v7892_v28 = vld [vmem:[%s9768_s1 + $0xba8] sm:$0xff]  }
 0x180   : > { %v7008_v25 = vadd.f32 %v7007_v23, %v7006_v17  ;;  %7306 = vmatpush3.bf16.msra.mxu1 %v7892_v28  ;;  %v7922_v14 = vld [vmem:[%s9768_s1 + $0xce8] sm:$0xff]   ;;  %v7926_v23 = vld [vmem:[%s9768_s1 + $0xcf0] sm:$0xff]   ;;  %v7931_v28 = vld [vmem:[%s9768_s1 + $0xc38] sm:$0xff]  }
 0x181   : > { %v9286_v20 = vadd.f32 %v7005_v13, %v5120_v16  ;;  %v5123_v27 = vadd.f32 %v6986_v22, %v9195_v37  ;;  %7307 = vmatprep.subr.bf16.mxu1 %v7894_v31  ;;  %7286 = vmatpush3.bf16.msra.mxu0 %v7895_v32  ;;  %v7900_v37 = vld [vmem:[%s9768_s1 + $0xbb8] sm:$0xff]   ;;  %v7923_v17 = vld [vmem:[%s9768_s1 + $0xc28] sm:$0xff]   ;;  %v333_v31 = vld [vmem:[%s8191_s6 + $0x1c0] sm:$0xff] }
 0x182   : > { %7287 = vmatprep.subr.bf16.mxu0 %v7897_v34  ;;  %v7924_v19 = vld [vmem:[%s9768_s1 + $0xca8] sm:$0xff]   ;;  %v6258_v34 = vcombine.high %v301_v30, %v333_v31 }
 0x183   : > { %v9301_v29 = vadd.f32 %v7008_v25, %v5123_v27  ;;  %v7928_v25 = vld [vmem:[%s9768_s1 + $0xcb0] sm:$0xff]   ;;  %v7930_v27 = vld [vmem:[%s9768_s1 + $0xcf8] sm:$0xff]   ;;  %v302_v32 = vld [vmem:[%s8191_s6 + $0xc8] sm:$0xff] }
 0x184   : > { %7308 = vmatpush3.bf16.msra.mxu1 %v7896_v33  ;;  %v6257_v33 = vcombine.low %v301_v30, %v333_v31  ;;  %v7965_v30 = vld [vmem:[%s9768_s1 + $0xe40] sm:$0xff]  }
 0x185   : > { %7309 = vmatprep.subr.bf16.mxu1 %v7898_v35  ;;  %7288 = vmatpush3.bf16.msra.mxu0 %v7899_v36  ;;  %v334_v35 = vld [vmem:[%s8191_s6 + $0x1c8] sm:$0xff]  ;;  %v7966_v31 = vld [vmem:[%s9768_s1 + $0xec0] sm:$0xff]  }
 0x186   : > { %7317 = vmatprep.subr.bf16.mxu0 %v7901_v46  ;;  %v6259_v36 = vcombine.low %v302_v32, %v334_v35  ;;  %v7941_v46 = vld [vmem:[%s9768_s1 + $0xd50] sm:$0xff]  }
 0x188   : > { %7310 = vmatpush3.bf16.msra.mxu1 %v7900_v37  ;;  %5692 = vmatmul.mubr.bf16.vlgmr.msra.gmra.mrb[44].mxu0 %v6253_v42  ;;  %v6260_v37 = vcombine.high %v302_v32, %v334_v35  ;;  %v7937_v42 = vld [vmem:[%s9768_s1 + $0xd48] sm:$0xff]   ;;  %v7967_v32 = vld [vmem:[%s9768_s1 + $0xe00] sm:$0xff]  }
 0x189   : > { %7339 = vmatprep.subr.bf16.mxu1 %v7902_v47  ;;  %7318 = vmatpush3.bf16.msra.mxu0 %v7903_v48  ;;  %v7942_v47 = vld [vmem:[%s9768_s1 + $0xdd0] sm:$0xff]   ;;  %v7970_v35 = vld [vmem:[%s9768_s1 + $0xec8] sm:$0xff]  }
 0x18a   : > { %7319 = vmatprep.subr.bf16.mxu0 %v7905_v50  ;;  %5773 = vmatprep.mubr.bf16.mxu0 %v6258_v34  ;;  %v7943_v48 = vld [vmem:[%s9768_s1 + $0xd10] sm:$0xff]   ;;  %v7945_v50 = vld [vmem:[%s9768_s1 + $0xd58] sm:$0xff]   ;;  %v7969_v34 = vld [vmem:[%s9768_s1 + $0xe48] sm:$0xff]  }
 0x18b   : > { %5733 = vmatmul.mubr.bf16.vlgmr.msra.gmra.mrb[44].mxu1 %v6255_v44  ;;  %v7939_v44 = vld [vmem:[%s9768_s1 + $0xd08] sm:$0xff]  }
 0x18c   : > { %7340 = vmatpush3.bf16.msra.mxu1 %v7904_v49  ;;  %5814 = vmatprep.mubr.bf16.mxu1 %v6260_v37  ;;  %v7944_v49 = vld [vmem:[%s9768_s1 + $0xd90] sm:$0xff]   ;;  %v7972_v37 = vld [vmem:[%s9768_s1 + $0xe88] sm:$0xff]  }
 0x18d   : > { %7341 = vmatprep.subr.bf16.mxu1 %v7906_v51  ;;  %7320 = vmatpush3.bf16.msra.mxu0 %v7907_v52  ;;  %v7946_v51 = vld [vmem:[%s9768_s1 + $0xdd8] sm:$0xff]  }
 0x18e   : > { %7321 = vmatprep.subr.bf16.mxu0 %v7909_v54 }
 0x190   : > { %7342 = vmatpush3.bf16.msra.mxu1 %v7908_v53  ;;  %v7947_v53 = vld [vmem:[%s9768_s1 + $0xd18] sm:$0xff]  }
 0x191   : > { %7343 = vmatprep.subr.bf16.mxu1 %v7910_v55  ;;  %7322 = vmatpush3.bf16.msra.mxu0 %v7911_v56  ;;  %v7948_v55 = vld [vmem:[%s9768_s1 + $0xd98] sm:$0xff]  }
 0x192   : > { %7323 = vmatprep.subr.bf16.mxu0 %v7913_v58 }
 0x194   : > { %7344 = vmatpush3.bf16.msra.mxu1 %v7912_v57  ;;  %v7949_v57 = vld [vmem:[%s9768_s1 + $0xd60] sm:$0xff]  }
 0x195   : > { %7345 = vmatprep.subr.bf16.mxu1 %v7914_v59  ;;  %7324 = vmatpush3.bf16.msra.mxu0 %v7915_v60  ;;  %v7950_v60 = vld [vmem:[%s9768_s1 + $0xde0] sm:$0xff]  }
 0x196   : > { %7325 = vmatprep.subr.bf16.mxu0 %v7917_v0 }
 0x198   : > { %7346 = vmatpush3.bf16.msra.mxu1 %v7916_v62 }
 0x199   : > { %7347 = vmatprep.subr.bf16.mxu1 %v7918_v2  ;;  %7326 = vmatpush3.bf16.msra.mxu0 %v7919_v5  ;;  %v7952_v2 = vld [vmem:[%s9768_s1 + $0xda0] sm:$0xff]   ;;  %v7953_v5 = vld [vmem:[%s9768_s1 + $0xd68] sm:$0xff]  }
 0x19a   : > { %7327 = vmatprep.subr.bf16.mxu0 %v7921_v11 }
 0x19b   : > { %v7025_v61 = vpop.f32.mrb[20].mxu0 }
 0x19c   : > { %v7047_v63 = vpop.f32.mrb[20].mxu1  ;;  %v7026_v1 = vpop.f32.mrb[21].mxu0  ;;  %7348 = vmatpush3.bf16.msra.mxu1 %v7920_v8  ;;  %v7954_v8 = vld [vmem:[%s9768_s1 + $0xde8] sm:$0xff]  }
 0x19d   : > { %v7027_v3 = vadd.f32 %v7026_v1, %v7025_v61  ;;  %v7048_v4 = vpop.f32.mrb[21].mxu1  ;;  %v7028_v7 = vpop.f32.mrb[22].mxu0  ;;  %7349 = vmatprep.subr.bf16.mxu1 %v7922_v14  ;;  %7328 = vmatpush3.bf16.msra.mxu0 %v7923_v17  ;;  %v7957_v14 = vld [vmem:[%s9768_s1 + $0xd70] sm:$0xff]  }
 0x19e   : > { %v7049_v6 = vadd.f32 %v7048_v4, %v7047_v63  ;;  %v7050_v10 = vpop.f32.mrb[22].mxu1  ;;  %v7029_v12 = vpop.f32.mrb[23].mxu0  ;;  %7329 = vmatprep.subr.bf16.mxu0 %v7925_v21  ;;  %v7951_v63 = vld [vmem:[%s9768_s1 + $0xd20] sm:$0xff]   ;;  %v7960_v17 = vld [vmem:[%s9768_s1 + $0xdb0] sm:$0xff]   ;;  %v7964_v21 = vld [vmem:[%s9768_s1 + $0xdb8] sm:$0xff]  }
 0x19f   : > { %v5202_v9 = vadd.f32 %v7027_v3, %v9286_v20  ;;  %v7030_v15 = vadd.f32 %v7029_v12, %v7028_v7  ;;  %v7051_v16 = vpop.f32.mrb[23].mxu1  ;;  %v7956_v12 = vld [vmem:[%s9768_s1 + $0xda8] sm:$0xff]  }
 0x1a0   : > { %v7052_v18 = vadd.f32 %v7051_v16, %v7050_v10  ;;  %7350 = vmatpush3.bf16.msra.mxu1 %v7924_v19  ;;  %v7955_v10 = vld [vmem:[%s9768_s1 + $0xd28] sm:$0xff]   ;;  %v7959_v16 = vld [vmem:[%s9768_s1 + $0xd30] sm:$0xff]   ;;  %v7962_v19 = vld [vmem:[%s9768_s1 + $0xdf8] sm:$0xff]  }
 0x1a1   : > { %v9395_v13 = vadd.f32 %v7049_v6, %v5202_v9  ;;  %v5205_v20 = vadd.f32 %v7030_v15, %v9301_v29  ;;  %7351 = vmatprep.subr.bf16.mxu1 %v7926_v23  ;;  %7330 = vmatpush3.bf16.msra.mxu0 %v7927_v24  ;;  %v7932_v29 = vld [vmem:[%s9768_s1 + $0xcb8] sm:$0xff]   ;;  %v7958_v15 = vld [vmem:[%s9768_s1 + $0xdf0] sm:$0xff]  }
 0x1a2   : > { %7331 = vmatprep.subr.bf16.mxu0 %v7929_v26  ;;  %v335_v23 = vld [vmem:[%s8191_s6 + $0x1d0] sm:$0xff]  ;;  %v304_v26 = vld [vmem:[%s8191_s6 + $0xd8] sm:$0xff] }
 0x1a3   : > { %v9410_v22 = vadd.f32 %v7052_v18, %v5205_v20  ;;  %v7961_v18 = vld [vmem:[%s9768_s1 + $0xd78] sm:$0xff]  }
 0x1a4   : > { %7352 = vmatpush3.bf16.msra.mxu1 %v7928_v25  ;;  %v7963_v20 = vld [vmem:[%s9768_s1 + $0xd38] sm:$0xff]  }
 0x1a5   : > { %7353 = vmatprep.subr.bf16.mxu1 %v7930_v27  ;;  %7332 = vmatpush3.bf16.msra.mxu0 %v7931_v28  ;;  %v336_v27 = vld [vmem:[%s8191_s6 + $0x1d8] sm:$0xff] }
 0x1a6   : > { %7361 = vmatprep.subr.bf16.mxu0 %v7933_v38  ;;  %v6263_v28 = vcombine.low %v304_v26, %v336_v27  ;;  %v7973_v38 = vld [vmem:[%s9768_s1 + $0xe50] sm:$0xff]  }
 0x1a8   : > { %7354 = vmatpush3.bf16.msra.mxu1 %v7932_v29  ;;  %5774 = vmatmul.mubr.bf16.vlgmr.msra.gmra.mrb[48].mxu0 %v6257_v33  ;;  %v6264_v29 = vcombine.high %v304_v26, %v336_v27  ;;  %v7968_v33 = vld [vmem:[%s9768_s1 + $0xe80] sm:$0xff]   ;;  %v8001_v26 = vld [vmem:[%s9768_s1 + $0xf48] sm:$0xff]  }
 0x1a9   : > { %7383 = vmatprep.subr.bf16.mxu1 %v7934_v39  ;;  %7362 = vmatpush3.bf16.msra.mxu0 %v7935_v40  ;;  %v7974_v39 = vld [vmem:[%s9768_s1 + $0xed0] sm:$0xff]   ;;  %v8002_v27 = vld [vmem:[%s9768_s1 + $0xfc8] sm:$0xff]  }
 0x1aa   : > { %7363 = vmatprep.subr.bf16.mxu0 %v7937_v42  ;;  %v7975_v40 = vld [vmem:[%s9768_s1 + $0xe10] sm:$0xff]   ;;  %v7977_v42 = vld [vmem:[%s9768_s1 + $0xe58] sm:$0xff]  }
 0x1ab   : > { %5815 = vmatmul.mubr.bf16.vlgmr.msra.gmra.mrb[48].mxu1 %v6259_v36  ;;  %v7971_v36 = vld [vmem:[%s9768_s1 + $0xe08] sm:$0xff]  }
 0x1ac   : > { %7384 = vmatpush3.bf16.msra.mxu1 %v7936_v41  ;;  %5896 = vmatprep.mubr.bf16.mxu1 %v6264_v29  ;;  %v7976_v41 = vld [vmem:[%s9768_s1 + $0xe90] sm:$0xff]   ;;  %v8004_v29 = vld [vmem:[%s9768_s1 + $0xf88] sm:$0xff]  }
 0x1ad   : > { %7385 = vmatprep.subr.bf16.mxu1 %v7938_v43  ;;  %7364 = vmatpush3.bf16.msra.mxu0 %v7939_v44  ;;  %v7978_v43 = vld [vmem:[%s9768_s1 + $0xed8] sm:$0xff]  }
 0x1ae   : > { %7365 = vmatprep.subr.bf16.mxu0 %v7941_v46 }
 0x1b0   : > { %7386 = vmatpush3.bf16.msra.mxu1 %v7940_v45  ;;  %v7979_v45 = vld [vmem:[%s9768_s1 + $0xe18] sm:$0xff]  }
 0x1b1   : > { %7387 = vmatprep.subr.bf16.mxu1 %v7942_v47  ;;  %7366 = vmatpush3.bf16.msra.mxu0 %v7943_v48  ;;  %v7980_v47 = vld [vmem:[%s9768_s1 + $0xe98] sm:$0xff]  }
 0x1b2   : > { %7367 = vmatprep.subr.bf16.mxu0 %v7945_v50 }
 0x1b4   : > { %7388 = vmatpush3.bf16.msra.mxu1 %v7944_v49  ;;  %v7981_v49 = vld [vmem:[%s9768_s1 + $0xe60] sm:$0xff]  }
 0x1b5   : > { %7389 = vmatprep.subr.bf16.mxu1 %v7946_v51  ;;  %7368 = vmatpush3.bf16.msra.mxu0 %v7947_v53 }
 0x1b6   : > { %7369 = vmatprep.subr.bf16.mxu0 %v7949_v57 }
 0x1b8   : > { %7390 = vmatpush3.bf16.msra.mxu1 %v7948_v55  ;;  %v7983_v55 = vld [vmem:[%s9768_s1 + $0xe20] sm:$0xff]  }
 0x1b9   : > { %7391 = vmatprep.subr.bf16.mxu1 %v7950_v60  ;;  %7370 = vmatpush3.bf16.msra.mxu0 %v7951_v63 }
 0x1ba   : > { %7371 = vmatprep.subr.bf16.mxu0 %v7953_v5 }
 0x1bb   : > { %v7069_v52 = vpop.f32.mrb[24].mxu0 }
 0x1bc   : > { %v7091_v54 = vpop.f32.mrb[24].mxu1  ;;  %v7070_v56 = vpop.f32.mrb[25].mxu0  ;;  %7392 = vmatpush3.bf16.msra.mxu1 %v7952_v2  ;;  %v7987_v2 = vld [vmem:[%s9768_s1 + $0xe28] sm:$0xff]  }
 0x1bd   : > { %v7071_v58 = vadd.f32 %v7070_v56, %v7069_v52  ;;  %v7092_v59 = vpop.f32.mrb[25].mxu1  ;;  %v7072_v62 = vpop.f32.mrb[26].mxu0  ;;  %7393 = vmatprep.subr.bf16.mxu1 %v7954_v8  ;;  %7372 = vmatpush3.bf16.msra.mxu0 %v7955_v10  ;;  %v7982_v52 = vld [vmem:[%s9768_s1 + $0xee0] sm:$0xff]   ;;  %v7991_v8 = vld [vmem:[%s9768_s1 + $0xe30] sm:$0xff]   ;;  %v7993_v10 = vld [vmem:[%s9768_s1 + $0xe78] sm:$0xff]  }
 0x1be   : > { %v7093_v61 = vadd.f32 %v7092_v59, %v7091_v54  ;;  %v7094_v1 = vpop.f32.mrb[26].mxu1  ;;  %v7073_v3 = vpop.f32.mrb[27].mxu0  ;;  %7373 = vmatprep.subr.bf16.mxu0 %v7957_v14  ;;  %v305_v14 = vld [vmem:[%s8191_s6 + $0xe0] sm:$0xff] }
 0x1bf   : > { %v5284_v0 = vadd.f32 %v7071_v58, %v9395_v13  ;;  %v7074_v6 = vadd.f32 %v7073_v3, %v7072_v62  ;;  %v7095_v7 = vpop.f32.mrb[27].mxu1  ;;  %v7984_v58 = vld [vmem:[%s9768_s1 + $0xea0] sm:$0xff]  }
 0x1c0   : > { %v7096_v9 = vadd.f32 %v7095_v7, %v7094_v1  ;;  %7394 = vmatpush3.bf16.msra.mxu1 %v7956_v12  ;;  %v7990_v7 = vld [vmem:[%s9768_s1 + $0xef0] sm:$0xff]   ;;  %v7995_v12 = vld [vmem:[%s9768_s1 + $0xe38] sm:$0xff]  }
 0x1c1   : > { %v9498_v4 = vadd.f32 %v7093_v61, %v5284_v0  ;;  %v5287_v11 = vadd.f32 %v7074_v6, %v9410_v22  ;;  %7395 = vmatprep.subr.bf16.mxu1 %v7958_v15  ;;  %7374 = vmatpush3.bf16.msra.mxu0 %v7959_v16  ;;  %v303_v22 = vld [vmem:[%s8191_s6 + $0xd0] sm:$0xff]  ;;  %v7985_v61 = vld [vmem:[%s9768_s1 + $0xe68] sm:$0xff]   ;;  %v337_v15 = vld [vmem:[%s8191_s6 + $0x1e0] sm:$0xff] }
 0x1c2   : > { %7375 = vmatprep.subr.bf16.mxu0 %v7961_v18  ;;  %v6261_v24 = vcombine.low %v303_v22, %v335_v23  ;;  %v6262_v25 = vcombine.high %v303_v22, %v335_v23  ;;  %v7986_v0 = vld [vmem:[%s9768_s1 + $0xee8] sm:$0xff]   ;;  %v7989_v6 = vld [vmem:[%s9768_s1 + $0xe70] sm:$0xff]   ;;  %v6265_v18 = vcombine.low %v305_v14, %v337_v15  ;;  %v7997_v22 = vld [vmem:[%s9768_s1 + $0xf40] sm:$0xff]  }
 0x1c3   : > { %v9513_v13 = vadd.f32 %v7096_v9, %v5287_v11  ;;  %v7992_v9 = vld [vmem:[%s9768_s1 + $0xeb0] sm:$0xff]   ;;  %v7994_v11 = vld [vmem:[%s9768_s1 + $0xef8] sm:$0xff]   ;;  %v306_v16 = vld [vmem:[%s8191_s6 + $0xe8] sm:$0xff] }
 0x1c4   : > { %7396 = vmatpush3.bf16.msra.mxu1 %v7960_v17  ;;  %5855 = vmatprep.mubr.bf16.mxu0 %v6262_v25  ;;  %v338_v17 = vld [vmem:[%s8191_s6 + $0x1e8] sm:$0xff]  ;;  %v7998_v23 = vld [vmem:[%s9768_s1 + $0xfc0] sm:$0xff]  }
 0x1c5   : > { %7397 = vmatprep.subr.bf16.mxu1 %v7962_v19  ;;  %7376 = vmatpush3.bf16.msra.mxu0 %v7963_v20  ;;  %v6266_v19 = vcombine.high %v305_v14, %v337_v15  ;;  %v6267_v20 = vcombine.low %v306_v16, %v338_v17  ;;  %v8000_v25 = vld [vmem:[%s9768_s1 + $0xf80] sm:$0xff]  }
 0x1c6   : > { %7405 = vmatprep.subr.bf16.mxu0 %v7965_v30  ;;  %v8005_v30 = vld [vmem:[%s9768_s1 + $0xf50] sm:$0xff]  }
 0x1c8   : > { %7398 = vmatpush3.bf16.msra.mxu1 %v7964_v21  ;;  %5856 = vmatmul.mubr.bf16.vlgmr.msra.gmra.mrb[52].mxu0 %v6261_v24  ;;  %v6268_v21 = vcombine.high %v306_v16, %v338_v17  ;;  %v7999_v24 = vld [vmem:[%s9768_s1 + $0xf00] sm:$0xff]  }
 0x1c9   : > { %7427 = vmatprep.subr.bf16.mxu1 %v7966_v31  ;;  %7406 = vmatpush3.bf16.msra.mxu0 %v7967_v32  ;;  %v8006_v31 = vld [vmem:[%s9768_s1 + $0xfd0] sm:$0xff]  }
 0x1ca   : > { %7407 = vmatprep.subr.bf16.mxu0 %v7969_v34  ;;  %5937 = vmatprep.mubr.bf16.mxu0 %v6266_v19  ;;  %v8007_v32 = vld [vmem:[%s9768_s1 + $0xf10] sm:$0xff]   ;;  %v8009_v34 = vld [vmem:[%s9768_s1 + $0xf58] sm:$0xff]  }
 0x1cb   : > { %5897 = vmatmul.mubr.bf16.vlgmr.msra.gmra.mrb[52].mxu1 %v6263_v28  ;;  %v8003_v28 = vld [vmem:[%s9768_s1 + $0xf08] sm:$0xff]  }
 0x1cc   : > { %7428 = vmatpush3.bf16.msra.mxu1 %v7968_v33  ;;  %5978 = vmatprep.mubr.bf16.mxu1 %v6268_v21  ;;  %v8008_v33 = vld [vmem:[%s9768_s1 + $0xf90] sm:$0xff]  }
 0x1cd   : > { %7429 = vmatprep.subr.bf16.mxu1 %v7970_v35  ;;  %7408 = vmatpush3.bf16.msra.mxu0 %v7971_v36  ;;  %v8010_v35 = vld [vmem:[%s9768_s1 + $0xfd8] sm:$0xff]  }
 0x1ce   : > { %7409 = vmatprep.subr.bf16.mxu0 %v7973_v38  ;;  %v8011_v36 = vld [vmem:[%s9768_s1 + $0xf18] sm:$0xff]  }
 0x1cf   : > { %v8012_v38 = vld [vmem:[%s9768_s1 + $0xf98] sm:$0xff]  }
 0x1d0   : > { %7430 = vmatpush3.bf16.msra.mxu1 %v7972_v37 }
 0x1d1   : > { %7431 = vmatprep.subr.bf16.mxu1 %v7974_v39  ;;  %7410 = vmatpush3.bf16.msra.mxu0 %v7975_v40  ;;  %v8013_v40 = vld [vmem:[%s9768_s1 + $0xf60] sm:$0xff]  }
 0x1d2   : > { %7411 = vmatprep.subr.bf16.mxu0 %v7977_v42  ;;  %v8014_v42 = vld [vmem:[%s9768_s1 + $0xfe0] sm:$0xff]  }
 0x1d4   : > { %7432 = vmatpush3.bf16.msra.mxu1 %v7976_v41 }
 0x1d5   : > { %7433 = vmatprep.subr.bf16.mxu1 %v7978_v43  ;;  %7412 = vmatpush3.bf16.msra.mxu0 %v7979_v45  ;;  %v8015_v45 = vld [vmem:[%s9768_s1 + $0xf20] sm:$0xff]  }
 0x1d6   : > { %7413 = vmatprep.subr.bf16.mxu0 %v7981_v49 }
 0x1d8   : > { %7434 = vmatpush3.bf16.msra.mxu1 %v7980_v47 }
 0x1d9   : > { %7435 = vmatprep.subr.bf16.mxu1 %v7982_v52  ;;  %7414 = vmatpush3.bf16.msra.mxu0 %v7983_v55 }
 0x1da   : > { %7415 = vmatprep.subr.bf16.mxu0 %v7985_v61  ;;  %v8021_v61 = vld [vmem:[%s9768_s1 + $0xf70] sm:$0xff]  }
 0x1db   : > { %v7113_v44 = vpop.f32.mrb[28].mxu0 }
 0x1dc   : > { %v7135_v46 = vpop.f32.mrb[28].mxu1  ;;  %v7114_v48 = vpop.f32.mrb[29].mxu0  ;;  %7436 = vmatpush3.bf16.msra.mxu1 %v7984_v58 }
 0x1dd   : > { %v7115_v50 = vadd.f32 %v7114_v48, %v7113_v44  ;;  %v7136_v51 = vpop.f32.mrb[29].mxu1  ;;  %v7116_v54 = vpop.f32.mrb[30].mxu0  ;;  %7437 = vmatprep.subr.bf16.mxu1 %v7986_v0  ;;  %7416 = vmatpush3.bf16.msra.mxu0 %v7987_v2  ;;  %v8016_v48 = vld [vmem:[%s9768_s1 + $0xfa0] sm:$0xff]   ;;  %v8023_v0 = vld [vmem:[%s9768_s1 + $0xf30] sm:$0xff]   ;;  %v8025_v2 = vld [vmem:[%s9768_s1 + $0xf78] sm:$0xff]  }
 0x1de   : > { %v7137_v53 = vadd.f32 %v7136_v51, %v7135_v46  ;;  %v7138_v57 = vpop.f32.mrb[30].mxu1  ;;  %v7117_v59 = vpop.f32.mrb[31].mxu0  ;;  %7417 = vmatprep.subr.bf16.mxu0 %v7989_v6  ;;  %v8017_v51 = vld [vmem:[%s9768_s1 + $0xf68] sm:$0xff]   ;;  %v307_v6 = vld [vmem:[%s8191_s6 + $0xf0] sm:$0xff] }
 0x1df   : > { %v5366_v56 = vadd.f32 %v7115_v50, %v9498_v4  ;;  %v7118_v62 = vadd.f32 %v7117_v59, %v7116_v54  ;;  %v7139_v63 = vpop.f32.mrb[31].mxu1  ;;  %v7988_v4 = vld [vmem:[%s9768_s1 + $0xea8] sm:$0xff]  }
 0x1e0   : > { %v7140_v1 = vadd.f32 %v7139_v63, %v7138_v57  ;;  %7438 = vmatpush3.bf16.msra.mxu1 %v7988_v4  ;;  %v8018_v54 = vld [vmem:[%s9768_s1 + $0xfe8] sm:$0xff]   ;;  %v8022_v63 = vld [vmem:[%s9768_s1 + $0xff0] sm:$0xff]   ;;  %v8027_v4 = vld [vmem:[%s9768_s1 + $0xf38] sm:$0xff]  }
 0x1e1   : > { %v9604_v60 = vadd.f32 %v7137_v53, %v5366_v56  ;;  %v5369_v3 = vadd.f32 %v7118_v62, %v9513_v13  ;;  %7439 = vmatprep.subr.bf16.mxu1 %v7990_v7  ;;  %7418 = vmatpush3.bf16.msra.mxu0 %v7991_v8  ;;  %v7996_v13 = vld [vmem:[%s9768_s1 + $0xeb8] sm:$0xff]   ;;  %v8019_v57 = vld [vmem:[%s9768_s1 + $0xf28] sm:$0xff]   ;;  %v339_v7 = vld [vmem:[%s8191_s6 + $0x1f0] sm:$0xff] }
 0x1e2   : > { %7419 = vmatprep.subr.bf16.mxu0 %v7993_v10  ;;  %v8020_v59 = vld [vmem:[%s9768_s1 + $0xfa8] sm:$0xff]   ;;  %v308_v8 = vld [vmem:[%s8191_s6 + $0xf8] sm:$0xff]  ;;  %v6270_v10 = vcombine.high %v307_v6, %v339_v7 }
 0x1e3   : > { %v9619_v5 = vadd.f32 %v7140_v1, %v5369_v3  ;;  %v8024_v1 = vld [vmem:[%s9768_s1 + $0xfb0] sm:$0xff]   ;;  %v8026_v3 = vld [vmem:[%s9768_s1 + $0xff8] sm:$0xff]  }
 0x1e4   : > { %7440 = vmatpush3.bf16.msra.mxu1 %v7992_v9  ;;  %v6269_v9 = vcombine.low %v307_v6, %v339_v7 }
 0x1e5   : > { %7441 = vmatprep.subr.bf16.mxu1 %v7994_v11  ;;  %7420 = vmatpush3.bf16.msra.mxu0 %v7995_v12  ;;  %v340_v11 = vld [vmem:[%s8191_s6 + $0x1f8] sm:$0xff]  ;;  %s6788_s6 = sshll.u32 %s9776_s12, 4 }
 0x1e6   : > { %7449 = vmatprep.subr.bf16.mxu0 %v7997_v22  ;;  %v6271_v12 = vcombine.low %v308_v8, %v340_v11  ;;  %s260_s7 = scalar_lea.vmem %s9770_s3, %s6788_s6 }
 0x1e8   : > { %7442 = vmatpush3.bf16.msra.mxu1 %v7996_v13  ;;  %5938 = vmatmul.mubr.bf16.vlgmr.msra.gmra.mrb[56].mxu0 %v6265_v18  ;;  %v6272_v13 = vcombine.high %v308_v8, %v340_v11 }
 0x1e9   : > { %7471 = vmatprep.subr.bf16.mxu1 %v7998_v23  ;;  %7450 = vmatpush3.bf16.msra.mxu0 %v7999_v24 }
 0x1ea   : > { %7451 = vmatprep.subr.bf16.mxu0 %v8001_v26  ;;  %6019 = vmatprep.mubr.bf16.mxu0 %v6270_v10 }
 0x1eb   : > { %5979 = vmatmul.mubr.bf16.vlgmr.msra.gmra.mrb[56].mxu1 %v6267_v20 }
 0x1ec   : > { %7472 = vmatpush3.bf16.msra.mxu1 %v8000_v25  ;;  %6060 = vmatprep.mubr.bf16.mxu1 %v6272_v13 }
 0x1ed   : > { %7473 = vmatprep.subr.bf16.mxu1 %v8002_v27  ;;  %7452 = vmatpush3.bf16.msra.mxu0 %v8003_v28 }
 0x1ee   : > { %7453 = vmatprep.subr.bf16.mxu0 %v8005_v30 }
 0x1f0   : > { %7474 = vmatpush3.bf16.msra.mxu1 %v8004_v29 }
 0x1f1   : > { %7475 = vmatprep.subr.bf16.mxu1 %v8006_v31  ;;  %7454 = vmatpush3.bf16.msra.mxu0 %v8007_v32 }
 0x1f2   : > { %7455 = vmatprep.subr.bf16.mxu0 %v8009_v34 }
 0x1f4   : > { %7476 = vmatpush3.bf16.msra.mxu1 %v8008_v33 }
 0x1f5   : > { %7477 = vmatprep.subr.bf16.mxu1 %v8010_v35  ;;  %7456 = vmatpush3.bf16.msra.mxu0 %v8011_v36 }
 0x1f6   : > { %7457 = vmatprep.subr.bf16.mxu0 %v8013_v40 }
 0x1f8   : > { %7478 = vmatpush3.bf16.msra.mxu1 %v8012_v38 }
 0x1f9   : > { %7479 = vmatprep.subr.bf16.mxu1 %v8014_v42  ;;  %7458 = vmatpush3.bf16.msra.mxu0 %v8015_v45 }
 0x1fa   : > { %7459 = vmatprep.subr.bf16.mxu0 %v8017_v51 }
 0x1fb   : > { %v7157_v37 = vpop.f32.mrb[32].mxu0 }
 0x1fc   : > { %v7158_v41 = vpop.f32.mrb[33].mxu0  ;;  %7480 = vmatpush3.bf16.msra.mxu1 %v8016_v48 }
 0x1fd   : > { %v7159_v43 = vadd.f32 %v7158_v41, %v7157_v37  ;;  %v7160_v47 = vpop.f32.mrb[34].mxu0  ;;  %7481 = vmatprep.subr.bf16.mxu1 %v8018_v54  ;;  %7460 = vmatpush3.bf16.msra.mxu0 %v8019_v57 }
 0x1fe   : > { %v7179_v39 = vpop.f32.mrb[32].mxu1  ;;  %v7161_v52 = vpop.f32.mrb[35].mxu0  ;;  %7461 = vmatprep.subr.bf16.mxu0 %v8021_v61 }
 0x1ff   : > { %v7180_v44 = vpop.f32.mrb[33].mxu1  ;;  %v5448_v49 = vadd.f32 %v7159_v43, %v9604_v60  ;;  %v7162_v55 = vadd.f32 %v7161_v52, %v7160_v47 }
 0x200   : > { %v7181_v46 = vadd.f32 %v7180_v44, %v7179_v39  ;;  %v7182_v50 = vpop.f32.mrb[34].mxu1  ;;  %7482 = vmatpush3.bf16.msra.mxu1 %v8020_v59 }
 0x201   : > { %v7183_v56 = vpop.f32.mrb[35].mxu1  ;;  %v5451_v60 = vadd.f32 %v7162_v55, %v9619_v5  ;;  %7483 = vmatprep.subr.bf16.mxu1 %v8022_v63  ;;  %7462 = vmatpush3.bf16.msra.mxu0 %v8023_v0  ;;  %v8028_v5 = vld [vmem:[%s9768_s1 + $0xfb8] sm:$0xff]  }
 0x202   : > { %v5489_v53 = vadd.f32 %v7181_v46, %v5448_v49  ;;  %v7184_v58 = vadd.f32 %v7183_v56, %v7182_v50  ;;  %7463 = vmatprep.subr.bf16.mxu0 %v8025_v2 }
 0x204   : > { %v5492_v62 = vadd.f32 %v7184_v58, %v5451_v60  ;;  %7484 = vmatpush3.bf16.msra.mxu1 %v8024_v1 }
 0x205   : > { %7485 = vmatprep.subr.bf16.mxu1 %v8026_v3  ;;  %7464 = vmatpush3.bf16.msra.mxu0 %v8027_v4 }
 0x208   : > { %7486 = vmatpush3.bf16.msra.mxu1 %v8028_v5  ;;  %6020 = vmatmul.mubr.bf16.vlgmr.msra.gmra.mrb[60].mxu0 %v6269_v9 }
 0x20b   : > { %6061 = vmatmul.mubr.bf16.vlgmr.msra.gmra.mrb[60].mxu1 %v6271_v12 }
 0x21b   : > { %v7201_v14 = vpop.f32.mrb[36].mxu0 }
 0x21c   : > { %v7202_v16 = vpop.f32.mrb[37].mxu0 }
 0x21d   : > { %v7203_v17 = vadd.f32 %v7202_v16, %v7201_v14  ;;  %v7204_v19 = vpop.f32.mrb[38].mxu0 }
 0x21e   : > { %v7223_v15 = vpop.f32.mrb[36].mxu1  ;;  %v7205_v22 = vpop.f32.mrb[39].mxu0 }
 0x21f   : > { %v7224_v18 = vpop.f32.mrb[37].mxu1  ;;  %v5530_v23 = vadd.f32 %v7203_v17, %v5489_v53  ;;  %v7206_v24 = vadd.f32 %v7205_v22, %v7204_v19 }
 0x220   : > { %v7225_v20 = vadd.f32 %v7224_v18, %v7223_v15  ;;  %v7226_v21 = vpop.f32.mrb[38].mxu1 }
 0x221   : > { %v7227_v25 = vpop.f32.mrb[39].mxu1  ;;  %v5533_v28 = vadd.f32 %v7206_v24, %v5492_v62 }
 0x222   : > { %v7228_v26 = vadd.f32 %v7227_v25, %v7226_v21  ;;  %v5571_v27 = vadd.f32 %v7225_v20, %v5530_v23 }
 0x224   : > { %v5574_v29 = vadd.f32 %v7228_v26, %v5533_v28 }
 0x23b   : > { %v7245_v30 = vpop.f32.mrb[40].mxu0 }
 0x23c   : > { %v7246_v32 = vpop.f32.mrb[41].mxu0 }
 0x23d   : > { %v7247_v33 = vadd.f32 %v7246_v32, %v7245_v30  ;;  %v7248_v35 = vpop.f32.mrb[42].mxu0 }
 0x23e   : > { %v7267_v31 = vpop.f32.mrb[40].mxu1  ;;  %v7249_v38 = vpop.f32.mrb[43].mxu0 }
 0x23f   : > { %v7268_v34 = vpop.f32.mrb[41].mxu1  ;;  %v5612_v39 = vadd.f32 %v7247_v33, %v5571_v27  ;;  %v7250_v40 = vadd.f32 %v7249_v38, %v7248_v35 }
 0x240   : > { %v7269_v36 = vadd.f32 %v7268_v34, %v7267_v31  ;;  %v7270_v37 = vpop.f32.mrb[42].mxu1 }
 0x241   : > { %v7271_v41 = vpop.f32.mrb[43].mxu1  ;;  %v5615_v44 = vadd.f32 %v7250_v40, %v5574_v29 }
 0x242   : > { %v7272_v42 = vadd.f32 %v7271_v41, %v7270_v37  ;;  %v5653_v43 = vadd.f32 %v7269_v36, %v5612_v39 }
 0x244   : > { %v5656_v45 = vadd.f32 %v7272_v42, %v5615_v44 }
 0x25b   : > { %v7289_v46 = vpop.f32.mrb[44].mxu0 }
 0x25c   : > { %v7290_v48 = vpop.f32.mrb[45].mxu0 }
 0x25d   : > { %v7291_v50 = vadd.f32 %v7290_v48, %v7289_v46  ;;  %v7292_v52 = vpop.f32.mrb[46].mxu0 }
 0x25e   : > { %v7311_v47 = vpop.f32.mrb[44].mxu1  ;;  %v7293_v54 = vpop.f32.mrb[47].mxu0 }
 0x25f   : > { %v7312_v49 = vpop.f32.mrb[45].mxu1  ;;  %v5694_v56 = vadd.f32 %v7291_v50, %v5653_v43  ;;  %v7294_v57 = vadd.f32 %v7293_v54, %v7292_v52 }
 0x260   : > { %v7313_v51 = vadd.f32 %v7312_v49, %v7311_v47  ;;  %v7314_v53 = vpop.f32.mrb[46].mxu1 }
 0x261   : > { %v7315_v55 = vpop.f32.mrb[47].mxu1  ;;  %v5697_v60 = vadd.f32 %v7294_v57, %v5656_v45 }
 0x262   : > { %v7316_v58 = vadd.f32 %v7315_v55, %v7314_v53  ;;  %v5735_v59 = vadd.f32 %v7313_v51, %v5694_v56 }
 0x264   : > { %v5738_v61 = vadd.f32 %v7316_v58, %v5697_v60  ;;  %v6208_v58 = vld [vmem:[%s9769_s2] ss:$0 sm:$0xff] }
 0x27b   : > { %v7333_v62 = vpop.f32.mrb[48].mxu0 }
 0x27c   : > { %v7334_v0 = vpop.f32.mrb[49].mxu0 }
 0x27d   : > { %v7335_v1 = vadd.f32 %v7334_v0, %v7333_v62  ;;  %v7336_v3 = vpop.f32.mrb[50].mxu0 }
 0x27e   : > { %v7355_v63 = vpop.f32.mrb[48].mxu1  ;;  %v7337_v6 = vpop.f32.mrb[51].mxu0 }
 0x27f   : > { %v7356_v2 = vpop.f32.mrb[49].mxu1  ;;  %v5776_v7 = vadd.f32 %v7335_v1, %v5735_v59  ;;  %v7338_v8 = vadd.f32 %v7337_v6, %v7336_v3 }
 0x280   : > { %v7357_v4 = vadd.f32 %v7356_v2, %v7355_v63  ;;  %v7358_v5 = vpop.f32.mrb[50].mxu1 }
 0x281   : > { %v7359_v9 = vpop.f32.mrb[51].mxu1  ;;  %v5779_v12 = vadd.f32 %v7338_v8, %v5738_v61 }
 0x282   : > { %v7360_v10 = vadd.f32 %v7359_v9, %v7358_v5  ;;  %v5817_v11 = vadd.f32 %v7357_v4, %v5776_v7 }
 0x284   : > { %v5820_v13 = vadd.f32 %v7360_v10, %v5779_v12 }
 0x29b   : > { %v7377_v14 = vpop.f32.mrb[52].mxu0 }
 0x29c   : > { %v7378_v16 = vpop.f32.mrb[53].mxu0 }
 0x29d   : > { %v7379_v17 = vadd.f32 %v7378_v16, %v7377_v14  ;;  %v7380_v19 = vpop.f32.mrb[54].mxu0 }
 0x29e   : > { %v7399_v15 = vpop.f32.mrb[52].mxu1  ;;  %v7381_v22 = vpop.f32.mrb[55].mxu0 }
 0x29f   : > { %v7400_v18 = vpop.f32.mrb[53].mxu1  ;;  %v5858_v23 = vadd.f32 %v7379_v17, %v5817_v11  ;;  %v7382_v24 = vadd.f32 %v7381_v22, %v7380_v19 }
 0x2a0   : > { %v7401_v20 = vadd.f32 %v7400_v18, %v7399_v15  ;;  %v7402_v21 = vpop.f32.mrb[54].mxu1 }
 0x2a1   : > { %v7403_v25 = vpop.f32.mrb[55].mxu1  ;;  %v5861_v28 = vadd.f32 %v7382_v24, %v5820_v13 }
 0x2a2   : > { %v7404_v26 = vadd.f32 %v7403_v25, %v7402_v21  ;;  %v5899_v27 = vadd.f32 %v7401_v20, %v5858_v23 }
 0x2a4   : > { %v5902_v29 = vadd.f32 %v7404_v26, %v5861_v28 }
 0x2bb   : > { %v7421_v30 = vpop.f32.mrb[56].mxu0 }
 0x2bc   : > { %v7422_v32 = vpop.f32.mrb[57].mxu0 }
 0x2bd   : > { %v7423_v34 = vadd.f32 %v7422_v32, %v7421_v30  ;;  %v7424_v36 = vpop.f32.mrb[58].mxu0 }
 0x2be   : > { %v7443_v31 = vpop.f32.mrb[56].mxu1  ;;  %v7425_v38 = vpop.f32.mrb[59].mxu0 }
 0x2bf   : > { %v7444_v33 = vpop.f32.mrb[57].mxu1  ;;  %v5940_v40 = vadd.f32 %v7423_v34, %v5899_v27  ;;  %v7426_v41 = vadd.f32 %v7425_v38, %v7424_v36 }
 0x2c0   : > { %v7445_v35 = vadd.f32 %v7444_v33, %v7443_v31  ;;  %v7446_v37 = vpop.f32.mrb[58].mxu1 }
 0x2c1   : > { %v7447_v39 = vpop.f32.mrb[59].mxu1  ;;  %v5943_v44 = vadd.f32 %v7426_v41, %v5902_v29 }
 0x2c2   : > { %v7448_v42 = vadd.f32 %v7447_v39, %v7446_v37  ;;  %v5981_v43 = vadd.f32 %v7445_v35, %v5940_v40 }
 0x2c4   : > { %v5984_v45 = vadd.f32 %v7448_v42, %v5943_v44 }
 0x2db   : > { %v7465_v46 = vpop.f32.mrb[60].mxu0 }
 0x2dc   : > { %v7466_v48 = vpop.f32.mrb[61].mxu0 }
 0x2dd   : > { %v7467_v49 = vadd.f32 %v7466_v48, %v7465_v46  ;;  %v7468_v51 = vpop.f32.mrb[62].mxu0 }
 0x2de   : > { %v7487_v47 = vpop.f32.mrb[60].mxu1  ;;  %v7469_v54 = vpop.f32.mrb[63].mxu0 }
 0x2df   : > { %v7488_v50 = vpop.f32.mrb[61].mxu1  ;;  %v6022_v55 = vadd.f32 %v7467_v49, %v5981_v43  ;;  %v7470_v56 = vadd.f32 %v7469_v54, %v7468_v51 }
 0x2e0   : > { %v7489_v52 = vadd.f32 %v7488_v50, %v7487_v47  ;;  %v7490_v53 = vpop.f32.mrb[62].mxu1 }
 0x2e1   : > { %v7491_v57 = vpop.f32.mrb[63].mxu1  ;;  %v6025_v61 = vadd.f32 %v7470_v56, %v5984_v45 }
 0x2e2   : > { %v7492_v59 = vadd.f32 %v7491_v57, %v7490_v53  ;;  %v6063_v60 = vadd.f32 %v7489_v52, %v6022_v55 }
 0x2e4   : > { %v6069_v62 = vadd.f32 %v6208_v58, %v6063_v60  ;;  %v6066_v63 = vadd.f32 %v7492_v59, %v6025_v61 }
 0x2e6   : > { %6078 = vst [vmem:[%s260_s7] sm:$0xff] %v6069_v62  ;;  %v6070_v0 = vadd.f32 %v6208_v58, %v6066_v63 }
 0x2e8   : > { %6079 = vst [vmem:[%s260_s7 + $0x8] sm:$0xff] %v6070_v0 }
 0x2e9 PF: > { %s13_s14 = sadd.s32 1, %s8051_s14   ;;  %s9771_s12 = smov %s8047_s13 }
 0x2ea   : > { %p10_p5 = scmp.ge.s32.totalorder %s13_s14, 4   ;;  %s9772_s13 = smov %s9774_s15 }
 0x2ec   :  { %12 = sbr.rel (!%p10_p5) target bundleno = 2 (0x2), region = 76 }

</bundles_post_ra>
